<compile_context>
chip_gen: v7x
topology: tpu7x:2x2x1
jax: 0.10.0
libtpu: 0.0.40
codegen_flags: <defaults>
</compile_context>

<pallas_src>
import jax
import jax.numpy as jnp
from jax import lax
from jax.experimental import pallas as pl
from jax.experimental.pallas import tpu as pltpu

EPS = 1e-5  # PyTorch BatchNorm default eps

# (in_channels, out_channels, down_sample) for the 6 RSBU_CW blocks
_RSBU_CFG = [(10, 10, True), (10, 10, False),
             (10, 20, True), (20, 20, False),
             (20, 40, True), (40, 40, False)]

_PACK_W = 40   # lane width of the packed parameter slabs (max channel count)


# ------------------------------ static plan -----------------------------------

def _build_plan(B, L):
    # Demo plan assumes every stride-4 / stride-2 stage divides cleanly.
    assert L % 128 == 0, "L must be a multiple of 128 for this plan"
    l1 = L // 4           # after Conv1d(1, 5, k=5, s=4, p=2)
    l2 = l1 // 4          # after Conv1d(5, 10, k=5, s=4, p=2)

    # ---- packed 1xC parameter rows (one row per vector, sliced statically) ----
    vec_idx = {}
    def add_vec(name, c):
        vec_idx[name] = (len(vec_idx), c)
    add_vec('c1a_b', 5); add_vec('c1b_b', 10)
    for i, (ci, co, _dn) in enumerate(_RSBU_CFG):
        for nm, c in (('g1', ci), ('be1', ci), ('cb1', co), ('g2', co), ('be2', co),
                      ('cb2', co), ('fb1', co), ('fg', co), ('fbe', co), ('fb2', co)):
            add_vec(f'b{i}_{nm}', c)
    add_vec('bn_g', 40); add_vec('bn_b', 40)
    add_vec('lin_b', 20); add_vec('out_w', 20); add_vec('out_b', 1)

    # ---- packed weight matrices (row offsets kept 8-aligned) -------------------
    mat_idx = {}
    mat_rows = [0]
    def add_mat(name, r, c):
        mat_idx[name] = (mat_rows[0], r, c)
        mat_rows[0] += -(-r // 8) * 8
    add_mat('c1a_w', 5, 5)          # folded (K*Cin, Cout)
    add_mat('c1b_w', 25, 10)
    for i, (ci, co, _dn) in enumerate(_RSBU_CFG):
        add_mat(f'b{i}_w1', 3 * ci, co)
        add_mat(f'b{i}_w2', 3 * co, co)
        add_mat(f'b{i}_fw1', co, co)
        add_mat(f'b{i}_fw2', co, co)
    add_mat('lin_w', 40, 20)

    # ---- VMEM staging buffers (halo rows zeroed ONCE at kernel start) ----------
    scratch = []          # list of (shape, halo row ranges)
    buf_idx = {}
    def add_buf(name, shape, halos):
        buf_idx[name] = len(scratch)
        scratch.append((shape, halos))
    # conv1b staging: interior rows 2 .. l1+1, halo rows {0, 1}
    add_buf('c1b', (B, l1 + 2, 5), ((0, 2),))

    blk_meta = []
    cur = l2
    for i, (ci, co, dn) in enumerate(_RSBU_CFG):
        stride = 2 if dn else 1
        lo = (cur + 2 - 3) // stride + 1
        add_buf(f'b{i}_c1', (B, cur + 2, ci), ((0, 1), (cur + 1, cur + 2)))
        add_buf(f'b{i}_c2', (B, lo + 2, co), ((0, 1), (lo + 1, lo + 2)))
        if dn:
            add_buf(f'b{i}_res', (B, cur, ci), ())   # raw input for decimation
        blk_meta.append((ci, co, dn, cur, lo))
        cur = lo

    return dict(B=B, L=L, l1=l1, l2=l2,
                vec_idx=vec_idx, n_vec=len(vec_idx),
                mat_idx=mat_idx, mat_rows=mat_rows[0],
                scratch=scratch, buf_idx=buf_idx, blk_meta=blk_meta)


# ------------------------------ fused kernel ----------------------------------

def _make_kernel(plan):
    B, l1, l2 = plan['B'], plan['l1'], plan['l2']
    vec_idx, mat_idx = plan['vec_idx'], plan['mat_idx']
    buf_idx, scratch, blk_meta = plan['buf_idx'], plan['scratch'], plan['blk_meta']

    def kernel(x_ref, vec_ref, mat_ref, o_ref, *bufs):
        # ---- static-slice accessors into the packed parameter slabs ----
        def vec(name):
            row, c = vec_idx[name]
            return vec_ref[row:row + 1, 0:c]                    # (1, C)

        def mat(name):
            off, r, c = mat_idx[name]
            return mat_ref[off:off + r, 0:c]                    # (R, C)

        def buf(name):
            return bufs[buf_idx[name]]

        # ---- one-time halo zeroing (only the 1-2 boundary rows per buffer) ----
        for idx, (shape, halos) in enumerate(scratch):
            _, _, C = shape
            for (r0, r1) in halos:
                bufs[idx][:, r0:r1, :] = jnp.zeros((B, r1 - r0, C), jnp.float32)

        # ---- in-kernel helpers ----
        def bn_nlc(x, gname, bname):
            # BatchNorm1d on (B, Lx, C): training-mode batch stats, two-pass.
            _, Lx, C = x.shape
            inv_n = 1.0 / float(B * Lx)
            mean = jnp.sum(x, axis=(0, 1), keepdims=True) * inv_n
            d = x - mean
            var = jnp.sum(d * d, axis=(0, 1), keepdims=True) * inv_n
            scale = lax.rsqrt(var + EPS) * vec(gname).reshape(1, 1, C)
            return d * scale + vec(bname).reshape(1, 1, C)

        def bn_rows(x, gname, bname):
            # BatchNorm1d on (B, F): training-mode batch stats, two-pass.
            inv_n = 1.0 / float(B)
            mean = jnp.sum(x, axis=0, keepdims=True) * inv_n
            d = x - mean
            var = jnp.sum(d * d, axis=0, keepdims=True) * inv_n
            return d * (lax.rsqrt(var + EPS) * vec(gname)) + vec(bname)

        def sigmoid(z):
            return 0.5 * (jnp.tanh(0.5 * z) + 1.0)              # EUP path

        def conv_from_stage(stage, x, wname, bname, *, stride, l_out):
            # Conv1d(k=3, pad=1) on channels-last x via ONE folded matmul.
            # stage: (B, L_in + 2, Cin) ref whose halo rows are already zero.
            _, L_in, Cin = x.shape
            stage[:, 1:1 + L_in, :] = x                         # interior only
            taps = []
            for k in range(3):
                if stride == 1:
                    taps.append(stage[:, k:k + l_out, :])
                else:
                    taps.append(stage[:, pl.ds(k, l_out, stride=stride), :])
            t = jnp.concatenate(taps, axis=-1).reshape(B * l_out, 3 * Cin)
            w = mat(wname)                                      # (3*Cin, Cout)
            cout = w.shape[1]
            y = jnp.dot(t, w, preferred_element_type=jnp.float32) + vec(bname)
            return y.reshape(B, l_out, cout)

        # ---------------- stem ----------------
        # Conv1d(1, 5, k=5, s=4, p=2): x_ref is (B, l1+1, 4) = [zero halo row] +
        # input reshaped (B, l1, 4); the 5 taps are two contiguous slices.
        t_lo = x_ref[:, 0:l1, 2:4]          # x[4l-2], x[4l-1]
        t_hi = x_ref[:, 1:l1 + 1, 0:3]      # x[4l], x[4l+1], x[4l+2]
        tap = jnp.concatenate([t_lo, t_hi], axis=-1).reshape(B * l1, 5)
        h = jnp.dot(tap, mat('c1a_w'), preferred_element_type=jnp.float32) + vec('c1a_b')
        h = h.reshape(B, l1, 5)

        # Conv1d(5, 10, k=5, s=4, p=2): staged strided taps, one folded matmul.
        c1b = buf('c1b')
        c1b[:, 2:2 + l1, :] = h                                 # interior rows only
        taps = [c1b[:, pl.ds(k, l2, stride=4), :] for k in range(5)]
        tap = jnp.concatenate(taps, axis=-1).reshape(B * l2, 25)
        h = jnp.dot(tap, mat('c1b_w'), preferred_element_type=jnp.float32) + vec('c1b_b')
        h = h.reshape(B, l2, 10)

        # ---------------- 6 RSBU_CW blocks ----------------
        for i, (ci, co, down, L_in, l_out) in enumerate(blk_meta):
            # residual path: AvgPool1d(k=1, s=2) == decimation (separate buffer)
            if down:
                rbuf = buf(f'b{i}_res')
                rbuf[...] = h
                res = rbuf[:, pl.ds(0, l_out, stride=2), :]
            else:
                res = h

            # BRC: BN -> ReLU -> Conv(stride) -> BN -> ReLU -> Conv(stride=1)
            t = jnp.maximum(bn_nlc(h, f'b{i}_g1', f'b{i}_be1'), 0.0)
            t = conv_from_stage(buf(f'b{i}_c1'), t, f'b{i}_w1', f'b{i}_cb1',
                                stride=2 if down else 1, l_out=l_out)
            t = jnp.maximum(bn_nlc(t, f'b{i}_g2', f'b{i}_be2'), 0.0)
            t = conv_from_stage(buf(f'b{i}_c2'), t, f'b{i}_w2', f'b{i}_cb2',
                                stride=1, l_out=l_out)

            # channel-wise soft thresholding:  t - clip(t, -thr, thr)
            gap = jnp.mean(jnp.abs(t), axis=1)                  # (B, co)
            z = jnp.dot(gap, mat(f'b{i}_fw1'),
                        preferred_element_type=jnp.float32) + vec(f'b{i}_fb1')
            z = jnp.maximum(bn_rows(z, f'b{i}_fg', f'b{i}_fbe'), 0.0)
            z = jnp.dot(z, mat(f'b{i}_fw2'),
                        preferred_element_type=jnp.float32) + vec(f'b{i}_fb2')
            thr = (gap * sigmoid(z)).reshape(B, 1, co)
            t = t - jnp.clip(t, -thr, thr)

            if ci != co:   # torch.cat((input, zeros_like(input)), dim=channel)
                res = jnp.concatenate([res, jnp.zeros_like(res)], axis=-1)
            h = t + res

        # ---------------- head: BN(40) -> ReLU -> GAP -> Linear(40,20) -> Linear(20,1)
        h = jnp.maximum(bn_nlc(h, 'bn_g', 'bn_b'), 0.0)
        gap = jnp.mean(h, axis=1)                               # (B, 40)
        z = jnp.dot(gap, mat('lin_w'), preferred_element_type=jnp.float32) + vec('lin_b')
        # final 20 -> 1 projection as multiply + lane reduce (avoids N=1 matmul)
        o_ref[...] = jnp.sum(z * vec('out_w'), axis=-1, keepdims=True) + vec('out_b')

    return kernel


# ------------------------------ params & wrapper -------------------------------

def init_params(key):
    keys = iter(jax.random.split(key, 128))

    def normal(shape, scale=0.1):
        return scale * jax.random.normal(next(keys), shape, dtype=jnp.float32)

    def conv_w(cout, cin, k):
        # PyTorch layout (Cout, Cin, K) -> kernel-ready folded (K*Cin, Cout)
        w = normal((cout, cin, k))
        return jnp.transpose(w, (2, 1, 0)).reshape(k * cin, cout)

    p = {
        'c1a_w': conv_w(5, 1, 5),   'c1a_b': normal((5,)),
        'c1b_w': conv_w(10, 5, 5),  'c1b_b': normal((10,)),
        'bn_g': jnp.ones((40,), jnp.float32), 'bn_b': jnp.zeros((40,), jnp.float32),
        'lin_w': normal((40, 20)),  'lin_b': normal((20,)),    # Linear(40,20) as (in,out)
        'out_w': normal((20,)),     'out_b': normal((1,)),     # Linear(20,1) as a row
    }
    for i, (ci, co, _dn) in enumerate(_RSBU_CFG):
        p[f'b{i}_g1'] = jnp.ones((ci,), jnp.float32)
        p[f'b{i}_be1'] = jnp.zeros((ci,), jnp.float32)
        p[f'b{i}_w1'] = conv_w(co, ci, 3)
        p[f'b{i}_cb1'] = normal((co,))
        p[f'b{i}_g2'] = jnp.ones((co,), jnp.float32)
        p[f'b{i}_be2'] = jnp.zeros((co,), jnp.float32)
        p[f'b{i}_w2'] = conv_w(co, co, 3)
        p[f'b{i}_cb2'] = normal((co,))
        p[f'b{i}_fw1'] = normal((co, co))
        p[f'b{i}_fb1'] = normal((co,))
        p[f'b{i}_fg'] = jnp.ones((co,), jnp.float32)
        p[f'b{i}_fbe'] = jnp.zeros((co,), jnp.float32)
        p[f'b{i}_fw2'] = normal((co, co))
        p[f'b{i}_fb2'] = normal((co,))
    return p


def _pack_params(params, plan):
    """Pack ~95 tiny parameter arrays into two VMEM slabs (3 input DMAs total)."""
    vec = jnp.zeros((plan['n_vec'], _PACK_W), jnp.float32)
    for name, (row, c) in plan['vec_idx'].items():
        vec = vec.at[row, :c].set(params[name].reshape(c).astype(jnp.float32))
    mat = jnp.zeros((plan['mat_rows'], _PACK_W), jnp.float32)
    for name, (off, r, c) in plan['mat_idx'].items():
        mat = mat.at[off:off + r, :c].set(params[name].astype(jnp.float32))
    return vec, mat


def drsnet_forward(params, x):
    B, _, L = x.shape
    plan = _build_plan(B, L)
    kernel = _make_kernel(plan)
    vecpack, matpack = _pack_params(params, plan)

    # Layout plumbing (done outside the kernel): (B,1,L) -> (B, L/4, 4) with a
    # single leading zero halo row -> first stride-4 conv taps are plain slices.
    x4 = x.astype(jnp.float32).reshape(B, plan['l1'], 4)
    x4p = jnp.concatenate([jnp.zeros((B, 1, 4), jnp.float32), x4], axis=1)

    vmem = pltpu.MemorySpace.VMEM
    return pl.pallas_call(
        kernel,
        out_shape=jax.ShapeDtypeStruct((B, 1), jnp.float32),
        in_specs=[pl.BlockSpec(memory_space=vmem)] * 3,
        out_specs=pl.BlockSpec(memory_space=vmem),
        scratch_shapes=[pltpu.VMEM(shape, jnp.float32) for shape, _ in plan['scratch']],
    )(x4p, vecpack, matpack)


if __name__ == "__main__":
    key = jax.random.PRNGKey(0)
    pkey, xkey = jax.random.split(key)
    params = init_params(pkey)
    # (batch=2, channels=1, length=512): every stride-4 / stride-2 stage divides cleanly.
    x = jax.random.normal(xkey, (2, 1, 512), dtype=jnp.float32)
    fwd = jax.jit(drsnet_forward)
    y = jax.block_until_ready(fwd(params, x))
    assert y.shape == (2, 1), y.shape
    assert bool(jnp.all(jnp.isfinite(y)))
    print("KERNEL_OK")
</pallas_src>

<mosaic_0001>
module attributes {stable_mosaic.version = 11 : i64} {
  func.func @kernel(%arg0: memref<2x129x4xf32, #tpu.memory_space<vmem>>, %arg1: memref<67x40xf32, #tpu.memory_space<vmem>>, %arg2: memref<1176x40xf32, #tpu.memory_space<vmem>>, %arg3: memref<2x1xf32, #tpu.memory_space<vmem>>, %arg4: memref<2x130x5xf32, #tpu.memory_space<vmem>>, %arg5: memref<2x34x10xf32, #tpu.memory_space<vmem>>, %arg6: memref<2x18x10xf32, #tpu.memory_space<vmem>>, %arg7: memref<2x32x10xf32, #tpu.memory_space<vmem>>, %arg8: memref<2x18x10xf32, #tpu.memory_space<vmem>>, %arg9: memref<2x18x10xf32, #tpu.memory_space<vmem>>, %arg10: memref<2x18x10xf32, #tpu.memory_space<vmem>>, %arg11: memref<2x10x20xf32, #tpu.memory_space<vmem>>, %arg12: memref<2x16x10xf32, #tpu.memory_space<vmem>>, %arg13: memref<2x10x20xf32, #tpu.memory_space<vmem>>, %arg14: memref<2x10x20xf32, #tpu.memory_space<vmem>>, %arg15: memref<2x10x20xf32, #tpu.memory_space<vmem>>, %arg16: memref<2x6x40xf32, #tpu.memory_space<vmem>>, %arg17: memref<2x8x20xf32, #tpu.memory_space<vmem>>, %arg18: memref<2x6x40xf32, #tpu.memory_space<vmem>>, %arg19: memref<2x6x40xf32, #tpu.memory_space<vmem>>) attributes {dimension_semantics = [], scalar_prefetch = 0 : i64, scratch_operands = 16 : i64, tpu.core_type = #tpu.core_type<tc>} {
    %cst = arith.constant 0.000000e+00 : f32
    %0 = vector.broadcast %cst : f32 to vector<2x2x5xf32>
    %c0 = arith.constant 0 : index
    %c0_0 = arith.constant 0 : index
    %c0_1 = arith.constant 0 : index
    %1 = vector.load %arg4[%c0, %c0_0, %c0_1] : memref<2x130x5xf32, #tpu.memory_space<vmem>>, vector<2x2x5xf32>
    tpu.vector_store %arg4[%c0, %c0_0, %c0_1], %0 {strides = array<i32>} : memref<2x130x5xf32, #tpu.memory_space<vmem>>, vector<2x2x5xf32>,
    %cst_2 = arith.constant 0.000000e+00 : f32
    %2 = vector.broadcast %cst_2 : f32 to vector<2x1x10xf32>
    %c0_3 = arith.constant 0 : index
    %c0_4 = arith.constant 0 : index
    %c0_5 = arith.constant 0 : index
    %3 = vector.load %arg5[%c0_3, %c0_4, %c0_5] : memref<2x34x10xf32, #tpu.memory_space<vmem>>, vector<2x1x10xf32>
    tpu.vector_store %arg5[%c0_3, %c0_4, %c0_5], %2 {strides = array<i32>} : memref<2x34x10xf32, #tpu.memory_space<vmem>>, vector<2x1x10xf32>,
    %cst_6 = arith.constant 0.000000e+00 : f32
    %4 = vector.broadcast %cst_6 : f32 to vector<2x1x10xf32>
    %c0_7 = arith.constant 0 : index
    %c33 = arith.constant 33 : index
    %c0_8 = arith.constant 0 : index
    %5 = vector.load %arg5[%c0_7, %c33, %c0_8] : memref<2x34x10xf32, #tpu.memory_space<vmem>>, vector<2x1x10xf32>
    tpu.vector_store %arg5[%c0_7, %c33, %c0_8], %4 {strides = array<i32>} : memref<2x34x10xf32, #tpu.memory_space<vmem>>, vector<2x1x10xf32>,
    %cst_9 = arith.constant 0.000000e+00 : f32
    %6 = vector.broadcast %cst_9 : f32 to vector<2x1x10xf32>
    %c0_10 = arith.constant 0 : index
    %c0_11 = arith.constant 0 : index
    %c0_12 = arith.constant 0 : index
    %7 = vector.load %arg6[%c0_10, %c0_11, %c0_12] : memref<2x18x10xf32, #tpu.memory_space<vmem>>, vector<2x1x10xf32>
    tpu.vector_store %arg6[%c0_10, %c0_11, %c0_12], %6 {strides = array<i32>} : memref<2x18x10xf32, #tpu.memory_space<vmem>>, vector<2x1x10xf32>,
    %cst_13 = arith.constant 0.000000e+00 : f32
    %8 = vector.broadcast %cst_13 : f32 to vector<2x1x10xf32>
    %c0_14 = arith.constant 0 : index
    %c17 = arith.constant 17 : index
    %c0_15 = arith.constant 0 : index
    %9 = vector.load %arg6[%c0_14, %c17, %c0_15] : memref<2x18x10xf32, #tpu.memory_space<vmem>>, vector<2x1x10xf32>
    tpu.vector_store %arg6[%c0_14, %c17, %c0_15], %8 {strides = array<i32>} : memref<2x18x10xf32, #tpu.memory_space<vmem>>, vector<2x1x10xf32>,
    %cst_16 = arith.constant 0.000000e+00 : f32
    %10 = vector.broadcast %cst_16 : f32 to vector<2x1x10xf32>
    %c0_17 = arith.constant 0 : index
    %c0_18 = arith.constant 0 : index
    %c0_19 = arith.constant 0 : index
    %11 = vector.load %arg8[%c0_17, %c0_18, %c0_19] : memref<2x18x10xf32, #tpu.memory_space<vmem>>, vector<2x1x10xf32>
    tpu.vector_store %arg8[%c0_17, %c0_18, %c0_19], %10 {strides = array<i32>} : memref<2x18x10xf32, #tpu.memory_space<vmem>>, vector<2x1x10xf32>,
    %cst_20 = arith.constant 0.000000e+00 : f32
    %12 = vector.broadcast %cst_20 : f32 to vector<2x1x10xf32>
    %c0_21 = arith.constant 0 : index
    %c17_22 = arith.constant 17 : index
    %c0_23 = arith.constant 0 : index
    %13 = vector.load %arg8[%c0_21, %c17_22, %c0_23] : memref<2x18x10xf32, #tpu.memory_space<vmem>>, vector<2x1x10xf32>
    tpu.vector_store %arg8[%c0_21, %c17_22, %c0_23], %12 {strides = array<i32>} : memref<2x18x10xf32, #tpu.memory_space<vmem>>, vector<2x1x10xf32>,
    %cst_24 = arith.constant 0.000000e+00 : f32
    %14 = vector.broadcast %cst_24 : f32 to vector<2x1x10xf32>
    %c0_25 = arith.constant 0 : index
    %c0_26 = arith.constant 0 : index
    %c0_27 = arith.constant 0 : index
    %15 = vector.load %arg9[%c0_25, %c0_26, %c0_27] : memref<2x18x10xf32, #tpu.memory_space<vmem>>, vector<2x1x10xf32>
    tpu.vector_store %arg9[%c0_25, %c0_26, %c0_27], %14 {strides = array<i32>} : memref<2x18x10xf32, #tpu.memory_space<vmem>>, vector<2x1x10xf32>,
    %cst_28 = arith.constant 0.000000e+00 : f32
    %16 = vector.broadcast %cst_28 : f32 to vector<2x1x10xf32>
    %c0_29 = arith.constant 0 : index
    %c17_30 = arith.constant 17 : index
    %c0_31 = arith.constant 0 : index
    %17 = vector.load %arg9[%c0_29, %c17_30, %c0_31] : memref<2x18x10xf32, #tpu.memory_space<vmem>>, vector<2x1x10xf32>
    tpu.vector_store %arg9[%c0_29, %c17_30, %c0_31], %16 {strides = array<i32>} : memref<2x18x10xf32, #tpu.memory_space<vmem>>, vector<2x1x10xf32>,
    %cst_32 = arith.constant 0.000000e+00 : f32
    %18 = vector.broadcast %cst_32 : f32 to vector<2x1x10xf32>
    %c0_33 = arith.constant 0 : index
    %c0_34 = arith.constant 0 : index
    %c0_35 = arith.constant 0 : index
    %19 = vector.load %arg10[%c0_33, %c0_34, %c0_35] : memref<2x18x10xf32, #tpu.memory_space<vmem>>, vector<2x1x10xf32>
    tpu.vector_store %arg10[%c0_33, %c0_34, %c0_35], %18 {strides = array<i32>} : memref<2x18x10xf32, #tpu.memory_space<vmem>>, vector<2x1x10xf32>,
    %cst_36 = arith.constant 0.000000e+00 : f32
    %20 = vector.broadcast %cst_36 : f32 to vector<2x1x10xf32>
    %c0_37 = arith.constant 0 : index
    %c17_38 = arith.constant 17 : index
    %c0_39 = arith.constant 0 : index
    %21 = vector.load %arg10[%c0_37, %c17_38, %c0_39] : memref<2x18x10xf32, #tpu.memory_space<vmem>>, vector<2x1x10xf32>
    tpu.vector_store %arg10[%c0_37, %c17_38, %c0_39], %20 {strides = array<i32>} : memref<2x18x10xf32, #tpu.memory_space<vmem>>, vector<2x1x10xf32>,
    %cst_40 = arith.constant 0.000000e+00 : f32
    %22 = vector.broadcast %cst_40 : f32 to vector<2x1x20xf32>
    %c0_41 = arith.constant 0 : index
    %c0_42 = arith.constant 0 : index
    %c0_43 = arith.constant 0 : index
    %23 = vector.load %arg11[%c0_41, %c0_42, %c0_43] : memref<2x10x20xf32, #tpu.memory_space<vmem>>, vector<2x1x20xf32>
    tpu.vector_store %arg11[%c0_41, %c0_42, %c0_43], %22 {strides = array<i32>} : memref<2x10x20xf32, #tpu.memory_space<vmem>>, vector<2x1x20xf32>,
    %cst_44 = arith.constant 0.000000e+00 : f32
    %24 = vector.broadcast %cst_44 : f32 to vector<2x1x20xf32>
    %c0_45 = arith.constant 0 : index
    %c9 = arith.constant 9 : index
    %c0_46 = arith.constant 0 : index
    %25 = vector.load %arg11[%c0_45, %c9, %c0_46] : memref<2x10x20xf32, #tpu.memory_space<vmem>>, vector<2x1x20xf32>
    tpu.vector_store %arg11[%c0_45, %c9, %c0_46], %24 {strides = array<i32>} : memref<2x10x20xf32, #tpu.memory_space<vmem>>, vector<2x1x20xf32>,
    %cst_47 = arith.constant 0.000000e+00 : f32
    %26 = vector.broadcast %cst_47 : f32 to vector<2x1x20xf32>
    %c0_48 = arith.constant 0 : index
    %c0_49 = arith.constant 0 : index
    %c0_50 = arith.constant 0 : index
    %27 = vector.load %arg13[%c0_48, %c0_49, %c0_50] : memref<2x10x20xf32, #tpu.memory_space<vmem>>, vector<2x1x20xf32>
    tpu.vector_store %arg13[%c0_48, %c0_49, %c0_50], %26 {strides = array<i32>} : memref<2x10x20xf32, #tpu.memory_space<vmem>>, vector<2x1x20xf32>,
    %cst_51 = arith.constant 0.000000e+00 : f32
    %28 = vector.broadcast %cst_51 : f32 to vector<2x1x20xf32>
    %c0_52 = arith.constant 0 : index
    %c9_53 = arith.constant 9 : index
    %c0_54 = arith.constant 0 : index
    %29 = vector.load %arg13[%c0_52, %c9_53, %c0_54] : memref<2x10x20xf32, #tpu.memory_space<vmem>>, vector<2x1x20xf32>
    tpu.vector_store %arg13[%c0_52, %c9_53, %c0_54], %28 {strides = array<i32>} : memref<2x10x20xf32, #tpu.memory_space<vmem>>, vector<2x1x20xf32>,
    %cst_55 = arith.constant 0.000000e+00 : f32
    %30 = vector.broadcast %cst_55 : f32 to vector<2x1x20xf32>
    %c0_56 = arith.constant 0 : index
    %c0_57 = arith.constant 0 : index
    %c0_58 = arith.constant 0 : index
    %31 = vector.load %arg14[%c0_56, %c0_57, %c0_58] : memref<2x10x20xf32, #tpu.memory_space<vmem>>, vector<2x1x20xf32>
    tpu.vector_store %arg14[%c0_56, %c0_57, %c0_58], %30 {strides = array<i32>} : memref<2x10x20xf32, #tpu.memory_space<vmem>>, vector<2x1x20xf32>,
    %cst_59 = arith.constant 0.000000e+00 : f32
    %32 = vector.broadcast %cst_59 : f32 to vector<2x1x20xf32>
    %c0_60 = arith.constant 0 : index
    %c9_61 = arith.constant 9 : index
    %c0_62 = arith.constant 0 : index
    %33 = vector.load %arg14[%c0_60, %c9_61, %c0_62] : memref<2x10x20xf32, #tpu.memory_space<vmem>>, vector<2x1x20xf32>
    tpu.vector_store %arg14[%c0_60, %c9_61, %c0_62], %32 {strides = array<i32>} : memref<2x10x20xf32, #tpu.memory_space<vmem>>, vector<2x1x20xf32>,
    %cst_63 = arith.constant 0.000000e+00 : f32
    %34 = vector.broadcast %cst_63 : f32 to vector<2x1x20xf32>
    %c0_64 = arith.constant 0 : index
    %c0_65 = arith.constant 0 : index
    %c0_66 = arith.constant 0 : index
    %35 = vector.load %arg15[%c0_64, %c0_65, %c0_66] : memref<2x10x20xf32, #tpu.memory_space<vmem>>, vector<2x1x20xf32>
    tpu.vector_store %arg15[%c0_64, %c0_65, %c0_66], %34 {strides = array<i32>} : memref<2x10x20xf32, #tpu.memory_space<vmem>>, vector<2x1x20xf32>,
    %cst_67 = arith.constant 0.000000e+00 : f32
    %36 = vector.broadcast %cst_67 : f32 to vector<2x1x20xf32>
    %c0_68 = arith.constant 0 : index
    %c9_69 = arith.constant 9 : index
    %c0_70 = arith.constant 0 : index
    %37 = vector.load %arg15[%c0_68, %c9_69, %c0_70] : memref<2x10x20xf32, #tpu.memory_space<vmem>>, vector<2x1x20xf32>
    tpu.vector_store %arg15[%c0_68, %c9_69, %c0_70], %36 {strides = array<i32>} : memref<2x10x20xf32, #tpu.memory_space<vmem>>, vector<2x1x20xf32>,
    %cst_71 = arith.constant 0.000000e+00 : f32
    %38 = vector.broadcast %cst_71 : f32 to vector<2x1x40xf32>
    %c0_72 = arith.constant 0 : index
    %c0_73 = arith.constant 0 : index
    %c0_74 = arith.constant 0 : index
    %39 = vector.load %arg16[%c0_72, %c0_73, %c0_74] : memref<2x6x40xf32, #tpu.memory_space<vmem>>, vector<2x1x40xf32>
    tpu.vector_store %arg16[%c0_72, %c0_73, %c0_74], %38 {strides = array<i32>} : memref<2x6x40xf32, #tpu.memory_space<vmem>>, vector<2x1x40xf32>,
    %cst_75 = arith.constant 0.000000e+00 : f32
    %40 = vector.broadcast %cst_75 : f32 to vector<2x1x40xf32>
    %c0_76 = arith.constant 0 : index
    %c5 = arith.constant 5 : index
    %c0_77 = arith.constant 0 : index
    %41 = vector.load %arg16[%c0_76, %c5, %c0_77] : memref<2x6x40xf32, #tpu.memory_space<vmem>>, vector<2x1x40xf32>
    tpu.vector_store %arg16[%c0_76, %c5, %c0_77], %40 {strides = array<i32>} : memref<2x6x40xf32, #tpu.memory_space<vmem>>, vector<2x1x40xf32>,
    %cst_78 = arith.constant 0.000000e+00 : f32
    %42 = vector.broadcast %cst_78 : f32 to vector<2x1x40xf32>
    %c0_79 = arith.constant 0 : index
    %c0_80 = arith.constant 0 : index
    %c0_81 = arith.constant 0 : index
    %43 = vector.load %arg18[%c0_79, %c0_80, %c0_81] : memref<2x6x40xf32, #tpu.memory_space<vmem>>, vector<2x1x40xf32>
    tpu.vector_store %arg18[%c0_79, %c0_80, %c0_81], %42 {strides = array<i32>} : memref<2x6x40xf32, #tpu.memory_space<vmem>>, vector<2x1x40xf32>,
    %cst_82 = arith.constant 0.000000e+00 : f32
    %44 = vector.broadcast %cst_82 : f32 to vector<2x1x40xf32>
    %c0_83 = arith.constant 0 : index
    %c5_84 = arith.constant 5 : index
    %c0_85 = arith.constant 0 : index
    %45 = vector.load %arg18[%c0_83, %c5_84, %c0_85] : memref<2x6x40xf32, #tpu.memory_space<vmem>>, vector<2x1x40xf32>
    tpu.vector_store %arg18[%c0_83, %c5_84, %c0_85], %44 {strides = array<i32>} : memref<2x6x40xf32, #tpu.memory_space<vmem>>, vector<2x1x40xf32>,
    %cst_86 = arith.constant 0.000000e+00 : f32
    %46 = vector.broadcast %cst_86 : f32 to vector<2x1x40xf32>
    %c0_87 = arith.constant 0 : index
    %c0_88 = arith.constant 0 : index
    %c0_89 = arith.constant 0 : index
    %47 = vector.load %arg19[%c0_87, %c0_88, %c0_89] : memref<2x6x40xf32, #tpu.memory_space<vmem>>, vector<2x1x40xf32>
    tpu.vector_store %arg19[%c0_87, %c0_88, %c0_89], %46 {strides = array<i32>} : memref<2x6x40xf32, #tpu.memory_space<vmem>>, vector<2x1x40xf32>,
    %cst_90 = arith.constant 0.000000e+00 : f32
    %48 = vector.broadcast %cst_90 : f32 to vector<2x1x40xf32>
    %c0_91 = arith.constant 0 : index
    %c5_92 = arith.constant 5 : index
    %c0_93 = arith.constant 0 : index
    %49 = vector.load %arg19[%c0_91, %c5_92, %c0_93] : memref<2x6x40xf32, #tpu.memory_space<vmem>>, vector<2x1x40xf32>
    tpu.vector_store %arg19[%c0_91, %c5_92, %c0_93], %48 {strides = array<i32>} : memref<2x6x40xf32, #tpu.memory_space<vmem>>, vector<2x1x40xf32>,
    %c0_94 = arith.constant 0 : index
    %c0_95 = arith.constant 0 : index
    %c2 = arith.constant 2 : index
    %50 = vector.load %arg0[%c0_94, %c0_95, %c2] : memref<2x129x4xf32, #tpu.memory_space<vmem>>, vector<2x128x2xf32>
    %c0_96 = arith.constant 0 : index
    %c1 = arith.constant 1 : index
    %c0_97 = arith.constant 0 : index
    %51 = vector.load %arg0[%c0_96, %c1, %c0_97] : memref<2x129x4xf32, #tpu.memory_space<vmem>>, vector<2x128x3xf32>
    %52 = tpu.concatenate %50, %51 in 2 : vector<2x128x2xf32>, vector<2x128x3xf32> -> vector<2x128x5xf32>
    %53 = vector.shape_cast %52 : vector<2x128x5xf32> to vector<256x5xf32>
    %c0_98 = arith.constant 0 : index
    %c0_99 = arith.constant 0 : index
    %54 = vector.load %arg2[%c0_98, %c0_99] : memref<1176x40xf32, #tpu.memory_space<vmem>>, vector<5x5xf32>
    %cst_100 = arith.constant dense<0.000000e+00> : vector<256x5xf32>
    %55 = tpu.matmul %53, %54, %cst_100 {dimension_numbers = #tpu.dot_dimension_numbers<[1], [0], [0], [1], [0, 0, 1, 1], [], []>} : vector<256x5xf32>, vector<5x5xf32>, vector<256x5xf32> -> vector<256x5xf32>
    %c0_101 = arith.constant 0 : index
    %c0_102 = arith.constant 0 : index
    %56 = vector.load %arg1[%c0_101, %c0_102] : memref<67x40xf32, #tpu.memory_space<vmem>>, vector<1x5xf32>
    %57 = vector.broadcast %56 : vector<1x5xf32> to vector<256x5xf32>
    %58 = arith.addf %55, %57 : vector<256x5xf32>
    %59 = vector.shape_cast %58 : vector<256x5xf32> to vector<2x128x5xf32>
    %c0_103 = arith.constant 0 : index
    %c2_104 = arith.constant 2 : index
    %c0_105 = arith.constant 0 : index
    %60 = vector.load %arg4[%c0_103, %c2_104, %c0_105] : memref<2x130x5xf32, #tpu.memory_space<vmem>>, vector<2x128x5xf32>
    tpu.vector_store %arg4[%c0_103, %c2_104, %c0_105], %59 {strides = array<i32>} : memref<2x130x5xf32, #tpu.memory_space<vmem>>, vector<2x128x5xf32>,
    %c0_106 = arith.constant 0 : index
    %c0_107 = arith.constant 0 : index
    %c0_108 = arith.constant 0 : index
    %61 = tpu.strided_load %arg4[%c0_106, %c0_107, %c0_108] {strides = array<i32: 1, 4, 1>} : memref<2x130x5xf32, #tpu.memory_space<vmem>>, vector<2x32x5xf32>
    %c0_109 = arith.constant 0 : index
    %c1_110 = arith.constant 1 : index
    %c0_111 = arith.constant 0 : index
    %62 = tpu.strided_load %arg4[%c0_109, %c1_110, %c0_111] {strides = array<i32: 1, 4, 1>} : memref<2x130x5xf32, #tpu.memory_space<vmem>>, vector<2x32x5xf32>
    %c0_112 = arith.constant 0 : index
    %c2_113 = arith.constant 2 : index
    %c0_114 = arith.constant 0 : index
    %63 = tpu.strided_load %arg4[%c0_112, %c2_113, %c0_114] {strides = array<i32: 1, 4, 1>} : memref<2x130x5xf32, #tpu.memory_space<vmem>>, vector<2x32x5xf32>
    %c0_115 = arith.constant 0 : index
    %c3 = arith.constant 3 : index
    %c0_116 = arith.constant 0 : index
    %64 = tpu.strided_load %arg4[%c0_115, %c3, %c0_116] {strides = array<i32: 1, 4, 1>} : memref<2x130x5xf32, #tpu.memory_space<vmem>>, vector<2x32x5xf32>
    %c0_117 = arith.constant 0 : index
    %c4 = arith.constant 4 : index
    %c0_118 = arith.constant 0 : index
    %65 = tpu.strided_load %arg4[%c0_117, %c4, %c0_118] {strides = array<i32: 1, 4, 1>} : memref<2x130x5xf32, #tpu.memory_space<vmem>>, vector<2x32x5xf32>
    %66 = tpu.concatenate %61, %62, %63, %64, %65 in 2 : vector<2x32x5xf32>, vector<2x32x5xf32>, vector<2x32x5xf32>, vector<2x32x5xf32>, vector<2x32x5xf32> -> vector<2x32x25xf32>
    %67 = vector.shape_cast %66 : vector<2x32x25xf32> to vector<64x25xf32>
    %c8 = arith.constant 8 : index
    %c0_119 = arith.constant 0 : index
    %68 = vector.load %arg2[%c8, %c0_119] : memref<1176x40xf32, #tpu.memory_space<vmem>>, vector<25x10xf32>
    %cst_120 = arith.constant dense<0.000000e+00> : vector<64x10xf32>
    %69 = tpu.matmul %67, %68, %cst_120 {dimension_numbers = #tpu.dot_dimension_numbers<[1], [0], [0], [1], [0, 0, 1, 1], [], []>} : vector<64x25xf32>, vector<25x10xf32>, vector<64x10xf32> -> vector<64x10xf32>
    %c1_121 = arith.constant 1 : index
    %c0_122 = arith.constant 0 : index
    %70 = vector.load %arg1[%c1_121, %c0_122] : memref<67x40xf32, #tpu.memory_space<vmem>>, vector<1x10xf32>
    %71 = vector.broadcast %70 : vector<1x10xf32> to vector<64x10xf32>
    %72 = arith.addf %69, %71 : vector<64x10xf32>
    %73 = vector.shape_cast %72 : vector<64x10xf32> to vector<2x32x10xf32>
    %c0_123 = arith.constant 0 : index
    %c0_124 = arith.constant 0 : index
    %c0_125 = arith.constant 0 : index
    %74 = vector.load %arg7[%c0_123, %c0_124, %c0_125] : memref<2x32x10xf32, #tpu.memory_space<vmem>>, vector<2x32x10xf32>
    tpu.vector_store %arg7[%c0_123, %c0_124, %c0_125], %73 {strides = array<i32>} : memref<2x32x10xf32, #tpu.memory_space<vmem>>, vector<2x32x10xf32>,
    %c0_126 = arith.constant 0 : index
    %c0_127 = arith.constant 0 : index
    %c0_128 = arith.constant 0 : index
    %75 = tpu.strided_load %arg7[%c0_126, %c0_127, %c0_128] {strides = array<i32: 1, 2, 1>} : memref<2x32x10xf32, #tpu.memory_space<vmem>>, vector<2x16x10xf32>
    %cst_129 = arith.constant dense<0.000000e+00> : vector<10xf32>
    %76 = vector.multi_reduction <add>, %73, %cst_129 [0, 1] : vector<2x32x10xf32> to vector<10xf32>
    %77 = vector.shape_cast %76 : vector<10xf32> to vector<1x1x10xf32>
    %cst_130 = arith.constant 1.562500e-02 : f32
    %78 = vector.broadcast %cst_130 : f32 to vector<1x1x10xf32>
    %79 = arith.mulf %77, %78 : vector<1x1x10xf32>
    %80 = vector.broadcast %79 : vector<1x1x10xf32> to vector<2x32x10xf32>
    %81 = arith.subf %73, %80 : vector<2x32x10xf32>
    %82 = arith.mulf %81, %81 : vector<2x32x10xf32>
    %cst_131 = arith.constant dense<0.000000e+00> : vector<10xf32>
    %83 = vector.multi_reduction <add>, %82, %cst_131 [0, 1] : vector<2x32x10xf32> to vector<10xf32>
    %84 = vector.shape_cast %83 : vector<10xf32> to vector<1x1x10xf32>
    %cst_132 = arith.constant 1.562500e-02 : f32
    %85 = vector.broadcast %cst_132 : f32 to vector<1x1x10xf32>
    %86 = arith.mulf %84, %85 : vector<1x1x10xf32>
    %cst_133 = arith.constant 9.99999974E-6 : f32
    %87 = vector.broadcast %cst_133 : f32 to vector<1x1x10xf32>
    %88 = arith.addf %86, %87 : vector<1x1x10xf32>
    %89 = math.rsqrt %88 : vector<1x1x10xf32>
    %c2_134 = arith.constant 2 : index
    %c0_135 = arith.constant 0 : index
    %90 = vector.load %arg1[%c2_134, %c0_135] : memref<67x40xf32, #tpu.memory_space<vmem>>, vector<1x10xf32>
    %91 = vector.shape_cast %90 : vector<1x10xf32> to vector<1x1x10xf32>
    %92 = arith.mulf %89, %91 : vector<1x1x10xf32>
    %93 = vector.broadcast %92 : vector<1x1x10xf32> to vector<2x32x10xf32>
    %94 = arith.mulf %81, %93 : vector<2x32x10xf32>
    %c3_136 = arith.constant 3 : index
    %c0_137 = arith.constant 0 : index
    %95 = vector.load %arg1[%c3_136, %c0_137] : memref<67x40xf32, #tpu.memory_space<vmem>>, vector<1x10xf32>
    %96 = vector.shape_cast %95 : vector<1x10xf32> to vector<1x1x10xf32>
    %97 = vector.broadcast %96 : vector<1x1x10xf32> to vector<2x32x10xf32>
    %98 = arith.addf %94, %97 : vector<2x32x10xf32>
    %cst_138 = arith.constant 0.000000e+00 : f32
    %99 = vector.broadcast %cst_138 : f32 to vector<2x32x10xf32>
    %100 = arith.maximumf %98, %99 : vector<2x32x10xf32>
    %c0_139 = arith.constant 0 : index
    %c1_140 = arith.constant 1 : index
    %c0_141 = arith.constant 0 : index
    %101 = vector.load %arg5[%c0_139, %c1_140, %c0_141] : memref<2x34x10xf32, #tpu.memory_space<vmem>>, vector<2x32x10xf32>
    tpu.vector_store %arg5[%c0_139, %c1_140, %c0_141], %100 {strides = array<i32>} : memref<2x34x10xf32, #tpu.memory_space<vmem>>, vector<2x32x10xf32>,
    %c0_142 = arith.constant 0 : index
    %c0_143 = arith.constant 0 : index
    %c0_144 = arith.constant 0 : index
    %102 = tpu.strided_load %arg5[%c0_142, %c0_143, %c0_144] {strides = array<i32: 1, 2, 1>} : memref<2x34x10xf32, #tpu.memory_space<vmem>>, vector<2x16x10xf32>
    %c0_145 = arith.constant 0 : index
    %c1_146 = arith.constant 1 : index
    %c0_147 = arith.constant 0 : index
    %103 = tpu.strided_load %arg5[%c0_145, %c1_146, %c0_147] {strides = array<i32: 1, 2, 1>} : memref<2x34x10xf32, #tpu.memory_space<vmem>>, vector<2x16x10xf32>
    %c0_148 = arith.constant 0 : index
    %c2_149 = arith.constant 2 : index
    %c0_150 = arith.constant 0 : index
    %104 = tpu.strided_load %arg5[%c0_148, %c2_149, %c0_150] {strides = array<i32: 1, 2, 1>} : memref<2x34x10xf32, #tpu.memory_space<vmem>>, vector<2x16x10xf32>
    %105 = tpu.concatenate %102, %103, %104 in 2 : vector<2x16x10xf32>, vector<2x16x10xf32>, vector<2x16x10xf32> -> vector<2x16x30xf32>
    %106 = vector.shape_cast %105 : vector<2x16x30xf32> to vector<32x30xf32>
    %c40 = arith.constant 40 : index
    %c0_151 = arith.constant 0 : index
    %107 = vector.load %arg2[%c40, %c0_151] : memref<1176x40xf32, #tpu.memory_space<vmem>>, vector<30x10xf32>
    %cst_152 = arith.constant dense<0.000000e+00> : vector<32x10xf32>
    %108 = tpu.matmul %106, %107, %cst_152 {dimension_numbers = #tpu.dot_dimension_numbers<[1], [0], [0], [1], [0, 0, 1, 1], [], []>} : vector<32x30xf32>, vector<30x10xf32>, vector<32x10xf32> -> vector<32x10xf32>
    %c4_153 = arith.constant 4 : index
    %c0_154 = arith.constant 0 : index
    %109 = vector.load %arg1[%c4_153, %c0_154] : memref<67x40xf32, #tpu.memory_space<vmem>>, vector<1x10xf32>
    %110 = vector.broadcast %109 : vector<1x10xf32> to vector<32x10xf32>
    %111 = arith.addf %108, %110 : vector<32x10xf32>
    %112 = vector.shape_cast %111 : vector<32x10xf32> to vector<2x16x10xf32>
    %cst_155 = arith.constant dense<0.000000e+00> : vector<10xf32>
    %113 = vector.multi_reduction <add>, %112, %cst_155 [0, 1] : vector<2x16x10xf32> to vector<10xf32>
    %114 = vector.shape_cast %113 : vector<10xf32> to vector<1x1x10xf32>
    %cst_156 = arith.constant 3.125000e-02 : f32
    %115 = vector.broadcast %cst_156 : f32 to vector<1x1x10xf32>
    %116 = arith.mulf %114, %115 : vector<1x1x10xf32>
    %117 = vector.broadcast %116 : vector<1x1x10xf32> to vector<2x16x10xf32>
    %118 = arith.subf %112, %117 : vector<2x16x10xf32>
    %119 = arith.mulf %118, %118 : vector<2x16x10xf32>
    %cst_157 = arith.constant dense<0.000000e+00> : vector<10xf32>
    %120 = vector.multi_reduction <add>, %119, %cst_157 [0, 1] : vector<2x16x10xf32> to vector<10xf32>
    %121 = vector.shape_cast %120 : vector<10xf32> to vector<1x1x10xf32>
    %cst_158 = arith.constant 3.125000e-02 : f32
    %122 = vector.broadcast %cst_158 : f32 to vector<1x1x10xf32>
    %123 = arith.mulf %121, %122 : vector<1x1x10xf32>
    %cst_159 = arith.constant 9.99999974E-6 : f32
    %124 = vector.broadcast %cst_159 : f32 to vector<1x1x10xf32>
    %125 = arith.addf %123, %124 : vector<1x1x10xf32>
    %126 = math.rsqrt %125 : vector<1x1x10xf32>
    %c5_160 = arith.constant 5 : index
    %c0_161 = arith.constant 0 : index
    %127 = vector.load %arg1[%c5_160, %c0_161] : memref<67x40xf32, #tpu.memory_space<vmem>>, vector<1x10xf32>
    %128 = vector.shape_cast %127 : vector<1x10xf32> to vector<1x1x10xf32>
    %129 = arith.mulf %126, %128 : vector<1x1x10xf32>
    %130 = vector.broadcast %129 : vector<1x1x10xf32> to vector<2x16x10xf32>
    %131 = arith.mulf %118, %130 : vector<2x16x10xf32>
    %c6 = arith.constant 6 : index
    %c0_162 = arith.constant 0 : index
    %132 = vector.load %arg1[%c6, %c0_162] : memref<67x40xf32, #tpu.memory_space<vmem>>, vector<1x10xf32>
    %133 = vector.shape_cast %132 : vector<1x10xf32> to vector<1x1x10xf32>
    %134 = vector.broadcast %133 : vector<1x1x10xf32> to vector<2x16x10xf32>
    %135 = arith.addf %131, %134 : vector<2x16x10xf32>
    %cst_163 = arith.constant 0.000000e+00 : f32
    %136 = vector.broadcast %cst_163 : f32 to vector<2x16x10xf32>
    %137 = arith.maximumf %135, %136 : vector<2x16x10xf32>
    %c0_164 = arith.constant 0 : index
    %c1_165 = arith.constant 1 : index
    %c0_166 = arith.constant 0 : index
    %138 = vector.load %arg6[%c0_164, %c1_165, %c0_166] : memref<2x18x10xf32, #tpu.memory_space<vmem>>, vector<2x16x10xf32>
    tpu.vector_store %arg6[%c0_164, %c1_165, %c0_166], %137 {strides = array<i32>} : memref<2x18x10xf32, #tpu.memory_space<vmem>>, vector<2x16x10xf32>,
    %c0_167 = arith.constant 0 : index
    %c0_168 = arith.constant 0 : index
    %c0_169 = arith.constant 0 : index
    %139 = vector.load %arg6[%c0_167, %c0_168, %c0_169] : memref<2x18x10xf32, #tpu.memory_space<vmem>>, vector<2x16x10xf32>
    %c0_170 = arith.constant 0 : index
    %c1_171 = arith.constant 1 : index
    %c0_172 = arith.constant 0 : index
    %140 = vector.load %arg6[%c0_170, %c1_171, %c0_172] : memref<2x18x10xf32, #tpu.memory_space<vmem>>, vector<2x16x10xf32>
    %c0_173 = arith.constant 0 : index
    %c2_174 = arith.constant 2 : index
    %c0_175 = arith.constant 0 : index
    %141 = vector.load %arg6[%c0_173, %c2_174, %c0_175] : memref<2x18x10xf32, #tpu.memory_space<vmem>>, vector<2x16x10xf32>
    %142 = tpu.concatenate %139, %140, %141 in 2 : vector<2x16x10xf32>, vector<2x16x10xf32>, vector<2x16x10xf32> -> vector<2x16x30xf32>
    %143 = vector.shape_cast %142 : vector<2x16x30xf32> to vector<32x30xf32>
    %c72 = arith.constant 72 : index
    %c0_176 = arith.constant 0 : index
    %144 = vector.load %arg2[%c72, %c0_176] : memref<1176x40xf32, #tpu.memory_space<vmem>>, vector<30x10xf32>
    %cst_177 = arith.constant dense<0.000000e+00> : vector<32x10xf32>
    %145 = tpu.matmul %143, %144, %cst_177 {dimension_numbers = #tpu.dot_dimension_numbers<[1], [0], [0], [1], [0, 0, 1, 1], [], []>} : vector<32x30xf32>, vector<30x10xf32>, vector<32x10xf32> -> vector<32x10xf32>
    %c7 = arith.constant 7 : index
    %c0_178 = arith.constant 0 : index
    %146 = vector.load %arg1[%c7, %c0_178] : memref<67x40xf32, #tpu.memory_space<vmem>>, vector<1x10xf32>
    %147 = vector.broadcast %146 : vector<1x10xf32> to vector<32x10xf32>
    %148 = arith.addf %145, %147 : vector<32x10xf32>
    %149 = vector.shape_cast %148 : vector<32x10xf32> to vector<2x16x10xf32>
    %150 = math.absf %149 : vector<2x16x10xf32>
    %cst_179 = arith.constant dense<0.000000e+00> : vector<2x10xf32>
    %151 = vector.multi_reduction <add>, %150, %cst_179 [1] : vector<2x16x10xf32> to vector<2x10xf32>
    %cst_180 = arith.constant 1.600000e+01 : f32
    %152 = vector.broadcast %cst_180 : f32 to vector<2x10xf32>
    %153 = arith.divf %151, %152 : vector<2x10xf32>
    %c104 = arith.constant 104 : index
    %c0_181 = arith.constant 0 : index
    %154 = vector.load %arg2[%c104, %c0_181] : memref<1176x40xf32, #tpu.memory_space<vmem>>, vector<10x10xf32>
    %cst_182 = arith.constant dense<0.000000e+00> : vector<2x10xf32>
    %155 = tpu.matmul %153, %154, %cst_182 {dimension_numbers = #tpu.dot_dimension_numbers<[1], [0], [0], [1], [0, 0, 1, 1], [], []>} : vector<2x10xf32>, vector<10x10xf32>, vector<2x10xf32> -> vector<2x10xf32>
    %c8_183 = arith.constant 8 : index
    %c0_184 = arith.constant 0 : index
    %156 = vector.load %arg1[%c8_183, %c0_184] : memref<67x40xf32, #tpu.memory_space<vmem>>, vector<1x10xf32>
    %157 = vector.broadcast %156 : vector<1x10xf32> to vector<2x10xf32>
    %158 = arith.addf %155, %157 : vector<2x10xf32>
    %cst_185 = arith.constant dense<0.000000e+00> : vector<10xf32>
    %159 = vector.multi_reduction <add>, %158, %cst_185 [0] : vector<2x10xf32> to vector<10xf32>
    %160 = vector.shape_cast %159 : vector<10xf32> to vector<1x10xf32>
    %cst_186 = arith.constant 5.000000e-01 : f32
    %161 = vector.broadcast %cst_186 : f32 to vector<1x10xf32>
    %162 = arith.mulf %160, %161 : vector<1x10xf32>
    %163 = vector.broadcast %162 : vector<1x10xf32> to vector<2x10xf32>
    %164 = arith.subf %158, %163 : vector<2x10xf32>
    %165 = arith.mulf %164, %164 : vector<2x10xf32>
    %cst_187 = arith.constant dense<0.000000e+00> : vector<10xf32>
    %166 = vector.multi_reduction <add>, %165, %cst_187 [0] : vector<2x10xf32> to vector<10xf32>
    %167 = vector.shape_cast %166 : vector<10xf32> to vector<1x10xf32>
    %cst_188 = arith.constant 5.000000e-01 : f32
    %168 = vector.broadcast %cst_188 : f32 to vector<1x10xf32>
    %169 = arith.mulf %167, %168 : vector<1x10xf32>
    %cst_189 = arith.constant 9.99999974E-6 : f32
    %170 = vector.broadcast %cst_189 : f32 to vector<1x10xf32>
    %171 = arith.addf %169, %170 : vector<1x10xf32>
    %172 = math.rsqrt %171 : vector<1x10xf32>
    %c9_190 = arith.constant 9 : index
    %c0_191 = arith.constant 0 : index
    %173 = vector.load %arg1[%c9_190, %c0_191] : memref<67x40xf32, #tpu.memory_space<vmem>>, vector<1x10xf32>
    %174 = arith.mulf %172, %173 : vector<1x10xf32>
    %175 = vector.broadcast %174 : vector<1x10xf32> to vector<2x10xf32>
    %176 = arith.mulf %164, %175 : vector<2x10xf32>
    %c10 = arith.constant 10 : index
    %c0_192 = arith.constant 0 : index
    %177 = vector.load %arg1[%c10, %c0_192] : memref<67x40xf32, #tpu.memory_space<vmem>>, vector<1x10xf32>
    %178 = vector.broadcast %177 : vector<1x10xf32> to vector<2x10xf32>
    %179 = arith.addf %176, %178 : vector<2x10xf32>
    %cst_193 = arith.constant 0.000000e+00 : f32
    %180 = vector.broadcast %cst_193 : f32 to vector<2x10xf32>
    %181 = arith.maximumf %179, %180 : vector<2x10xf32>
    %c120 = arith.constant 120 : index
    %c0_194 = arith.constant 0 : index
    %182 = vector.load %arg2[%c120, %c0_194] : memref<1176x40xf32, #tpu.memory_space<vmem>>, vector<10x10xf32>
    %cst_195 = arith.constant dense<0.000000e+00> : vector<2x10xf32>
    %183 = tpu.matmul %181, %182, %cst_195 {dimension_numbers = #tpu.dot_dimension_numbers<[1], [0], [0], [1], [0, 0, 1, 1], [], []>} : vector<2x10xf32>, vector<10x10xf32>, vector<2x10xf32> -> vector<2x10xf32>
    %c11 = arith.constant 11 : index
    %c0_196 = arith.constant 0 : index
    %184 = vector.load %arg1[%c11, %c0_196] : memref<67x40xf32, #tpu.memory_space<vmem>>, vector<1x10xf32>
    %185 = vector.broadcast %184 : vector<1x10xf32> to vector<2x10xf32>
    %186 = arith.addf %183, %185 : vector<2x10xf32>
    %cst_197 = arith.constant 5.000000e-01 : f32
    %187 = vector.broadcast %cst_197 : f32 to vector<2x10xf32>
    %188 = arith.mulf %187, %186 : vector<2x10xf32>
    %189 = math.tanh %188 : vector<2x10xf32>
    %cst_198 = arith.constant 1.000000e+00 : f32
    %190 = vector.broadcast %cst_198 : f32 to vector<2x10xf32>
    %191 = arith.addf %189, %190 : vector<2x10xf32>
    %cst_199 = arith.constant 5.000000e-01 : f32
    %192 = vector.broadcast %cst_199 : f32 to vector<2x10xf32>
    %193 = arith.mulf %192, %191 : vector<2x10xf32>
    %194 = arith.mulf %153, %193 : vector<2x10xf32>
    %195 = vector.shape_cast %194 : vector<2x10xf32> to vector<2x1x10xf32>
    %cst_200 = arith.constant 0.000000e+00 : f32
    %196 = vector.broadcast %cst_200 : f32 to vector<2x1x10xf32>
    %197 = arith.subf %196, %195 : vector<2x1x10xf32>
    %198 = vector.broadcast %197 : vector<2x1x10xf32> to vector<2x16x10xf32>
    %199 = arith.maximumf %198, %149 : vector<2x16x10xf32>
    %200 = vector.broadcast %195 : vector<2x1x10xf32> to vector<2x16x10xf32>
    %201 = arith.minimumf %200, %199 : vector<2x16x10xf32>
    %202 = arith.subf %149, %201 : vector<2x16x10xf32>
    %203 = arith.addf %202, %75 : vector<2x16x10xf32>
    %cst_201 = arith.constant dense<0.000000e+00> : vector<10xf32>
    %204 = vector.multi_reduction <add>, %203, %cst_201 [0, 1] : vector<2x16x10xf32> to vector<10xf32>
    %205 = vector.shape_cast %204 : vector<10xf32> to vector<1x1x10xf32>
    %cst_202 = arith.constant 3.125000e-02 : f32
    %206 = vector.broadcast %cst_202 : f32 to vector<1x1x10xf32>
    %207 = arith.mulf %205, %206 : vector<1x1x10xf32>
    %208 = vector.broadcast %207 : vector<1x1x10xf32> to vector<2x16x10xf32>
    %209 = arith.subf %203, %208 : vector<2x16x10xf32>
    %210 = arith.mulf %209, %209 : vector<2x16x10xf32>
    %cst_203 = arith.constant dense<0.000000e+00> : vector<10xf32>
    %211 = vector.multi_reduction <add>, %210, %cst_203 [0, 1] : vector<2x16x10xf32> to vector<10xf32>
    %212 = vector.shape_cast %211 : vector<10xf32> to vector<1x1x10xf32>
    %cst_204 = arith.constant 3.125000e-02 : f32
    %213 = vector.broadcast %cst_204 : f32 to vector<1x1x10xf32>
    %214 = arith.mulf %212, %213 : vector<1x1x10xf32>
    %cst_205 = arith.constant 9.99999974E-6 : f32
    %215 = vector.broadcast %cst_205 : f32 to vector<1x1x10xf32>
    %216 = arith.addf %214, %215 : vector<1x1x10xf32>
    %217 = math.rsqrt %216 : vector<1x1x10xf32>
    %c12 = arith.constant 12 : index
    %c0_206 = arith.constant 0 : index
    %218 = vector.load %arg1[%c12, %c0_206] : memref<67x40xf32, #tpu.memory_space<vmem>>, vector<1x10xf32>
    %219 = vector.shape_cast %218 : vector<1x10xf32> to vector<1x1x10xf32>
    %220 = arith.mulf %217, %219 : vector<1x1x10xf32>
    %221 = vector.broadcast %220 : vector<1x1x10xf32> to vector<2x16x10xf32>
    %222 = arith.mulf %209, %221 : vector<2x16x10xf32>
    %c13 = arith.constant 13 : index
    %c0_207 = arith.constant 0 : index
    %223 = vector.load %arg1[%c13, %c0_207] : memref<67x40xf32, #tpu.memory_space<vmem>>, vector<1x10xf32>
    %224 = vector.shape_cast %223 : vector<1x10xf32> to vector<1x1x10xf32>
    %225 = vector.broadcast %224 : vector<1x1x10xf32> to vector<2x16x10xf32>
    %226 = arith.addf %222, %225 : vector<2x16x10xf32>
    %cst_208 = arith.constant 0.000000e+00 : f32
    %227 = vector.broadcast %cst_208 : f32 to vector<2x16x10xf32>
    %228 = arith.maximumf %226, %227 : vector<2x16x10xf32>
    %c0_209 = arith.constant 0 : index
    %c1_210 = arith.constant 1 : index
    %c0_211 = arith.constant 0 : index
    %229 = vector.load %arg8[%c0_209, %c1_210, %c0_211] : memref<2x18x10xf32, #tpu.memory_space<vmem>>, vector<2x16x10xf32>
    tpu.vector_store %arg8[%c0_209, %c1_210, %c0_211], %228 {strides = array<i32>} : memref<2x18x10xf32, #tpu.memory_space<vmem>>, vector<2x16x10xf32>,
    %c0_212 = arith.constant 0 : index
    %c0_213 = arith.constant 0 : index
    %c0_214 = arith.constant 0 : index
    %230 = vector.load %arg8[%c0_212, %c0_213, %c0_214] : memref<2x18x10xf32, #tpu.memory_space<vmem>>, vector<2x16x10xf32>
    %c0_215 = arith.constant 0 : index
    %c1_216 = arith.constant 1 : index
    %c0_217 = arith.constant 0 : index
    %231 = vector.load %arg8[%c0_215, %c1_216, %c0_217] : memref<2x18x10xf32, #tpu.memory_space<vmem>>, vector<2x16x10xf32>
    %c0_218 = arith.constant 0 : index
    %c2_219 = arith.constant 2 : index
    %c0_220 = arith.constant 0 : index
    %232 = vector.load %arg8[%c0_218, %c2_219, %c0_220] : memref<2x18x10xf32, #tpu.memory_space<vmem>>, vector<2x16x10xf32>
    %233 = tpu.concatenate %230, %231, %232 in 2 : vector<2x16x10xf32>, vector<2x16x10xf32>, vector<2x16x10xf32> -> vector<2x16x30xf32>
    %234 = vector.shape_cast %233 : vector<2x16x30xf32> to vector<32x30xf32>
    %c136 = arith.constant 136 : index
    %c0_221 = arith.constant 0 : index
    %235 = vector.load %arg2[%c136, %c0_221] : memref<1176x40xf32, #tpu.memory_space<vmem>>, vector<30x10xf32>
    %cst_222 = arith.constant dense<0.000000e+00> : vector<32x10xf32>
    %236 = tpu.matmul %234, %235, %cst_222 {dimension_numbers = #tpu.dot_dimension_numbers<[1], [0], [0], [1], [0, 0, 1, 1], [], []>} : vector<32x30xf32>, vector<30x10xf32>, vector<32x10xf32> -> vector<32x10xf32>
    %c14 = arith.constant 14 : index
    %c0_223 = arith.constant 0 : index
    %237 = vector.load %arg1[%c14, %c0_223] : memref<67x40xf32, #tpu.memory_space<vmem>>, vector<1x10xf32>
    %238 = vector.broadcast %237 : vector<1x10xf32> to vector<32x10xf32>
    %239 = arith.addf %236, %238 : vector<32x10xf32>
    %240 = vector.shape_cast %239 : vector<32x10xf32> to vector<2x16x10xf32>
    %cst_224 = arith.constant dense<0.000000e+00> : vector<10xf32>
    %241 = vector.multi_reduction <add>, %240, %cst_224 [0, 1] : vector<2x16x10xf32> to vector<10xf32>
    %242 = vector.shape_cast %241 : vector<10xf32> to vector<1x1x10xf32>
    %cst_225 = arith.constant 3.125000e-02 : f32
    %243 = vector.broadcast %cst_225 : f32 to vector<1x1x10xf32>
    %244 = arith.mulf %242, %243 : vector<1x1x10xf32>
    %245 = vector.broadcast %244 : vector<1x1x10xf32> to vector<2x16x10xf32>
    %246 = arith.subf %240, %245 : vector<2x16x10xf32>
    %247 = arith.mulf %246, %246 : vector<2x16x10xf32>
    %cst_226 = arith.constant dense<0.000000e+00> : vector<10xf32>
    %248 = vector.multi_reduction <add>, %247, %cst_226 [0, 1] : vector<2x16x10xf32> to vector<10xf32>
    %249 = vector.shape_cast %248 : vector<10xf32> to vector<1x1x10xf32>
    %cst_227 = arith.constant 3.125000e-02 : f32
    %250 = vector.broadcast %cst_227 : f32 to vector<1x1x10xf32>
    %251 = arith.mulf %249, %250 : vector<1x1x10xf32>
    %cst_228 = arith.constant 9.99999974E-6 : f32
    %252 = vector.broadcast %cst_228 : f32 to vector<1x1x10xf32>
    %253 = arith.addf %251, %252 : vector<1x1x10xf32>
    %254 = math.rsqrt %253 : vector<1x1x10xf32>
    %c15 = arith.constant 15 : index
    %c0_229 = arith.constant 0 : index
    %255 = vector.load %arg1[%c15, %c0_229] : memref<67x40xf32, #tpu.memory_space<vmem>>, vector<1x10xf32>
    %256 = vector.shape_cast %255 : vector<1x10xf32> to vector<1x1x10xf32>
    %257 = arith.mulf %254, %256 : vector<1x1x10xf32>
    %258 = vector.broadcast %257 : vector<1x1x10xf32> to vector<2x16x10xf32>
    %259 = arith.mulf %246, %258 : vector<2x16x10xf32>
    %c16 = arith.constant 16 : index
    %c0_230 = arith.constant 0 : index
    %260 = vector.load %arg1[%c16, %c0_230] : memref<67x40xf32, #tpu.memory_space<vmem>>, vector<1x10xf32>
    %261 = vector.shape_cast %260 : vector<1x10xf32> to vector<1x1x10xf32>
    %262 = vector.broadcast %261 : vector<1x1x10xf32> to vector<2x16x10xf32>
    %263 = arith.addf %259, %262 : vector<2x16x10xf32>
    %cst_231 = arith.constant 0.000000e+00 : f32
    %264 = vector.broadcast %cst_231 : f32 to vector<2x16x10xf32>
    %265 = arith.maximumf %263, %264 : vector<2x16x10xf32>
    %c0_232 = arith.constant 0 : index
    %c1_233 = arith.constant 1 : index
    %c0_234 = arith.constant 0 : index
    %266 = vector.load %arg9[%c0_232, %c1_233, %c0_234] : memref<2x18x10xf32, #tpu.memory_space<vmem>>, vector<2x16x10xf32>
    tpu.vector_store %arg9[%c0_232, %c1_233, %c0_234], %265 {strides = array<i32>} : memref<2x18x10xf32, #tpu.memory_space<vmem>>, vector<2x16x10xf32>,
    %c0_235 = arith.constant 0 : index
    %c0_236 = arith.constant 0 : index
    %c0_237 = arith.constant 0 : index
    %267 = vector.load %arg9[%c0_235, %c0_236, %c0_237] : memref<2x18x10xf32, #tpu.memory_space<vmem>>, vector<2x16x10xf32>
    %c0_238 = arith.constant 0 : index
    %c1_239 = arith.constant 1 : index
    %c0_240 = arith.constant 0 : index
    %268 = vector.load %arg9[%c0_238, %c1_239, %c0_240] : memref<2x18x10xf32, #tpu.memory_space<vmem>>, vector<2x16x10xf32>
    %c0_241 = arith.constant 0 : index
    %c2_242 = arith.constant 2 : index
    %c0_243 = arith.constant 0 : index
    %269 = vector.load %arg9[%c0_241, %c2_242, %c0_243] : memref<2x18x10xf32, #tpu.memory_space<vmem>>, vector<2x16x10xf32>
    %270 = tpu.concatenate %267, %268, %269 in 2 : vector<2x16x10xf32>, vector<2x16x10xf32>, vector<2x16x10xf32> -> vector<2x16x30xf32>
    %271 = vector.shape_cast %270 : vector<2x16x30xf32> to vector<32x30xf32>
    %c168 = arith.constant 168 : index
    %c0_244 = arith.constant 0 : index
    %272 = vector.load %arg2[%c168, %c0_244] : memref<1176x40xf32, #tpu.memory_space<vmem>>, vector<30x10xf32>
    %cst_245 = arith.constant dense<0.000000e+00> : vector<32x10xf32>
    %273 = tpu.matmul %271, %272, %cst_245 {dimension_numbers = #tpu.dot_dimension_numbers<[1], [0], [0], [1], [0, 0, 1, 1], [], []>} : vector<32x30xf32>, vector<30x10xf32>, vector<32x10xf32> -> vector<32x10xf32>
    %c17_246 = arith.constant 17 : index
    %c0_247 = arith.constant 0 : index
    %274 = vector.load %arg1[%c17_246, %c0_247] : memref<67x40xf32, #tpu.memory_space<vmem>>, vector<1x10xf32>
    %275 = vector.broadcast %274 : vector<1x10xf32> to vector<32x10xf32>
    %276 = arith.addf %273, %275 : vector<32x10xf32>
    %277 = vector.shape_cast %276 : vector<32x10xf32> to vector<2x16x10xf32>
    %278 = math.absf %277 : vector<2x16x10xf32>
    %cst_248 = arith.constant dense<0.000000e+00> : vector<2x10xf32>
    %279 = vector.multi_reduction <add>, %278, %cst_248 [1] : vector<2x16x10xf32> to vector<2x10xf32>
    %cst_249 = arith.constant 1.600000e+01 : f32
    %280 = vector.broadcast %cst_249 : f32 to vector<2x10xf32>
    %281 = arith.divf %279, %280 : vector<2x10xf32>
    %c200 = arith.constant 200 : index
    %c0_250 = arith.constant 0 : index
    %282 = vector.load %arg2[%c200, %c0_250] : memref<1176x40xf32, #tpu.memory_space<vmem>>, vector<10x10xf32>
    %cst_251 = arith.constant dense<0.000000e+00> : vector<2x10xf32>
    %283 = tpu.matmul %281, %282, %cst_251 {dimension_numbers = #tpu.dot_dimension_numbers<[1], [0], [0], [1], [0, 0, 1, 1], [], []>} : vector<2x10xf32>, vector<10x10xf32>, vector<2x10xf32> -> vector<2x10xf32>
    %c18 = arith.constant 18 : index
    %c0_252 = arith.constant 0 : index
    %284 = vector.load %arg1[%c18, %c0_252] : memref<67x40xf32, #tpu.memory_space<vmem>>, vector<1x10xf32>
    %285 = vector.broadcast %284 : vector<1x10xf32> to vector<2x10xf32>
    %286 = arith.addf %283, %285 : vector<2x10xf32>
    %cst_253 = arith.constant dense<0.000000e+00> : vector<10xf32>
    %287 = vector.multi_reduction <add>, %286, %cst_253 [0] : vector<2x10xf32> to vector<10xf32>
    %288 = vector.shape_cast %287 : vector<10xf32> to vector<1x10xf32>
    %cst_254 = arith.constant 5.000000e-01 : f32
    %289 = vector.broadcast %cst_254 : f32 to vector<1x10xf32>
    %290 = arith.mulf %288, %289 : vector<1x10xf32>
    %291 = vector.broadcast %290 : vector<1x10xf32> to vector<2x10xf32>
    %292 = arith.subf %286, %291 : vector<2x10xf32>
    %293 = arith.mulf %292, %292 : vector<2x10xf32>
    %cst_255 = arith.constant dense<0.000000e+00> : vector<10xf32>
    %294 = vector.multi_reduction <add>, %293, %cst_255 [0] : vector<2x10xf32> to vector<10xf32>
    %295 = vector.shape_cast %294 : vector<10xf32> to vector<1x10xf32>
    %cst_256 = arith.constant 5.000000e-01 : f32
    %296 = vector.broadcast %cst_256 : f32 to vector<1x10xf32>
    %297 = arith.mulf %295, %296 : vector<1x10xf32>
    %cst_257 = arith.constant 9.99999974E-6 : f32
    %298 = vector.broadcast %cst_257 : f32 to vector<1x10xf32>
    %299 = arith.addf %297, %298 : vector<1x10xf32>
    %300 = math.rsqrt %299 : vector<1x10xf32>
    %c19 = arith.constant 19 : index
    %c0_258 = arith.constant 0 : index
    %301 = vector.load %arg1[%c19, %c0_258] : memref<67x40xf32, #tpu.memory_space<vmem>>, vector<1x10xf32>
    %302 = arith.mulf %300, %301 : vector<1x10xf32>
    %303 = vector.broadcast %302 : vector<1x10xf32> to vector<2x10xf32>
    %304 = arith.mulf %292, %303 : vector<2x10xf32>
    %c20 = arith.constant 20 : index
    %c0_259 = arith.constant 0 : index
    %305 = vector.load %arg1[%c20, %c0_259] : memref<67x40xf32, #tpu.memory_space<vmem>>, vector<1x10xf32>
    %306 = vector.broadcast %305 : vector<1x10xf32> to vector<2x10xf32>
    %307 = arith.addf %304, %306 : vector<2x10xf32>
    %cst_260 = arith.constant 0.000000e+00 : f32
    %308 = vector.broadcast %cst_260 : f32 to vector<2x10xf32>
    %309 = arith.maximumf %307, %308 : vector<2x10xf32>
    %c216 = arith.constant 216 : index
    %c0_261 = arith.constant 0 : index
    %310 = vector.load %arg2[%c216, %c0_261] : memref<1176x40xf32, #tpu.memory_space<vmem>>, vector<10x10xf32>
    %cst_262 = arith.constant dense<0.000000e+00> : vector<2x10xf32>
    %311 = tpu.matmul %309, %310, %cst_262 {dimension_numbers = #tpu.dot_dimension_numbers<[1], [0], [0], [1], [0, 0, 1, 1], [], []>} : vector<2x10xf32>, vector<10x10xf32>, vector<2x10xf32> -> vector<2x10xf32>
    %c21 = arith.constant 21 : index
    %c0_263 = arith.constant 0 : index
    %312 = vector.load %arg1[%c21, %c0_263] : memref<67x40xf32, #tpu.memory_space<vmem>>, vector<1x10xf32>
    %313 = vector.broadcast %312 : vector<1x10xf32> to vector<2x10xf32>
    %314 = arith.addf %311, %313 : vector<2x10xf32>
    %cst_264 = arith.constant 5.000000e-01 : f32
    %315 = vector.broadcast %cst_264 : f32 to vector<2x10xf32>
    %316 = arith.mulf %315, %314 : vector<2x10xf32>
    %317 = math.tanh %316 : vector<2x10xf32>
    %cst_265 = arith.constant 1.000000e+00 : f32
    %318 = vector.broadcast %cst_265 : f32 to vector<2x10xf32>
    %319 = arith.addf %317, %318 : vector<2x10xf32>
    %cst_266 = arith.constant 5.000000e-01 : f32
    %320 = vector.broadcast %cst_266 : f32 to vector<2x10xf32>
    %321 = arith.mulf %320, %319 : vector<2x10xf32>
    %322 = arith.mulf %281, %321 : vector<2x10xf32>
    %323 = vector.shape_cast %322 : vector<2x10xf32> to vector<2x1x10xf32>
    %cst_267 = arith.constant 0.000000e+00 : f32
    %324 = vector.broadcast %cst_267 : f32 to vector<2x1x10xf32>
    %325 = arith.subf %324, %323 : vector<2x1x10xf32>
    %326 = vector.broadcast %325 : vector<2x1x10xf32> to vector<2x16x10xf32>
    %327 = arith.maximumf %326, %277 : vector<2x16x10xf32>
    %328 = vector.broadcast %323 : vector<2x1x10xf32> to vector<2x16x10xf32>
    %329 = arith.minimumf %328, %327 : vector<2x16x10xf32>
    %330 = arith.subf %277, %329 : vector<2x16x10xf32>
    %331 = arith.addf %330, %203 : vector<2x16x10xf32>
    %c0_268 = arith.constant 0 : index
    %c0_269 = arith.constant 0 : index
    %c0_270 = arith.constant 0 : index
    %332 = vector.load %arg12[%c0_268, %c0_269, %c0_270] : memref<2x16x10xf32, #tpu.memory_space<vmem>>, vector<2x16x10xf32>
    tpu.vector_store %arg12[%c0_268, %c0_269, %c0_270], %331 {strides = array<i32>} : memref<2x16x10xf32, #tpu.memory_space<vmem>>, vector<2x16x10xf32>,
    %c0_271 = arith.constant 0 : index
    %c0_272 = arith.constant 0 : index
    %c0_273 = arith.constant 0 : index
    %333 = tpu.strided_load %arg12[%c0_271, %c0_272, %c0_273] {strides = array<i32: 1, 2, 1>} : memref<2x16x10xf32, #tpu.memory_space<vmem>>, vector<2x8x10xf32>
    %cst_274 = arith.constant dense<0.000000e+00> : vector<10xf32>
    %334 = vector.multi_reduction <add>, %331, %cst_274 [0, 1] : vector<2x16x10xf32> to vector<10xf32>
    %335 = vector.shape_cast %334 : vector<10xf32> to vector<1x1x10xf32>
    %cst_275 = arith.constant 3.125000e-02 : f32
    %336 = vector.broadcast %cst_275 : f32 to vector<1x1x10xf32>
    %337 = arith.mulf %335, %336 : vector<1x1x10xf32>
    %338 = vector.broadcast %337 : vector<1x1x10xf32> to vector<2x16x10xf32>
    %339 = arith.subf %331, %338 : vector<2x16x10xf32>
    %340 = arith.mulf %339, %339 : vector<2x16x10xf32>
    %cst_276 = arith.constant dense<0.000000e+00> : vector<10xf32>
    %341 = vector.multi_reduction <add>, %340, %cst_276 [0, 1] : vector<2x16x10xf32> to vector<10xf32>
    %342 = vector.shape_cast %341 : vector<10xf32> to vector<1x1x10xf32>
    %cst_277 = arith.constant 3.125000e-02 : f32
    %343 = vector.broadcast %cst_277 : f32 to vector<1x1x10xf32>
    %344 = arith.mulf %342, %343 : vector<1x1x10xf32>
    %cst_278 = arith.constant 9.99999974E-6 : f32
    %345 = vector.broadcast %cst_278 : f32 to vector<1x1x10xf32>
    %346 = arith.addf %344, %345 : vector<1x1x10xf32>
    %347 = math.rsqrt %346 : vector<1x1x10xf32>
    %c22 = arith.constant 22 : index
    %c0_279 = arith.constant 0 : index
    %348 = vector.load %arg1[%c22, %c0_279] : memref<67x40xf32, #tpu.memory_space<vmem>>, vector<1x10xf32>
    %349 = vector.shape_cast %348 : vector<1x10xf32> to vector<1x1x10xf32>
    %350 = arith.mulf %347, %349 : vector<1x1x10xf32>
    %351 = vector.broadcast %350 : vector<1x1x10xf32> to vector<2x16x10xf32>
    %352 = arith.mulf %339, %351 : vector<2x16x10xf32>
    %c23 = arith.constant 23 : index
    %c0_280 = arith.constant 0 : index
    %353 = vector.load %arg1[%c23, %c0_280] : memref<67x40xf32, #tpu.memory_space<vmem>>, vector<1x10xf32>
    %354 = vector.shape_cast %353 : vector<1x10xf32> to vector<1x1x10xf32>
    %355 = vector.broadcast %354 : vector<1x1x10xf32> to vector<2x16x10xf32>
    %356 = arith.addf %352, %355 : vector<2x16x10xf32>
    %cst_281 = arith.constant 0.000000e+00 : f32
    %357 = vector.broadcast %cst_281 : f32 to vector<2x16x10xf32>
    %358 = arith.maximumf %356, %357 : vector<2x16x10xf32>
    %c0_282 = arith.constant 0 : index
    %c1_283 = arith.constant 1 : index
    %c0_284 = arith.constant 0 : index
    %359 = vector.load %arg10[%c0_282, %c1_283, %c0_284] : memref<2x18x10xf32, #tpu.memory_space<vmem>>, vector<2x16x10xf32>
    tpu.vector_store %arg10[%c0_282, %c1_283, %c0_284], %358 {strides = array<i32>} : memref<2x18x10xf32, #tpu.memory_space<vmem>>, vector<2x16x10xf32>,
    %c0_285 = arith.constant 0 : index
    %c0_286 = arith.constant 0 : index
    %c0_287 = arith.constant 0 : index
    %360 = tpu.strided_load %arg10[%c0_285, %c0_286, %c0_287] {strides = array<i32: 1, 2, 1>} : memref<2x18x10xf32, #tpu.memory_space<vmem>>, vector<2x8x10xf32>
    %c0_288 = arith.constant 0 : index
    %c1_289 = arith.constant 1 : index
    %c0_290 = arith.constant 0 : index
    %361 = tpu.strided_load %arg10[%c0_288, %c1_289, %c0_290] {strides = array<i32: 1, 2, 1>} : memref<2x18x10xf32, #tpu.memory_space<vmem>>, vector<2x8x10xf32>
    %c0_291 = arith.constant 0 : index
    %c2_292 = arith.constant 2 : index
    %c0_293 = arith.constant 0 : index
    %362 = tpu.strided_load %arg10[%c0_291, %c2_292, %c0_293] {strides = array<i32: 1, 2, 1>} : memref<2x18x10xf32, #tpu.memory_space<vmem>>, vector<2x8x10xf32>
    %363 = tpu.concatenate %360, %361, %362 in 2 : vector<2x8x10xf32>, vector<2x8x10xf32>, vector<2x8x10xf32> -> vector<2x8x30xf32>
    %364 = vector.shape_cast %363 : vector<2x8x30xf32> to vector<16x30xf32>
    %c232 = arith.constant 232 : index
    %c0_294 = arith.constant 0 : index
    %365 = vector.load %arg2[%c232, %c0_294] : memref<1176x40xf32, #tpu.memory_space<vmem>>, vector<30x20xf32>
    %cst_295 = arith.constant dense<0.000000e+00> : vector<16x20xf32>
    %366 = tpu.matmul %364, %365, %cst_295 {dimension_numbers = #tpu.dot_dimension_numbers<[1], [0], [0], [1], [0, 0, 1, 1], [], []>} : vector<16x30xf32>, vector<30x20xf32>, vector<16x20xf32> -> vector<16x20xf32>
    %c24 = arith.constant 24 : index
    %c0_296 = arith.constant 0 : index
    %367 = vector.load %arg1[%c24, %c0_296] : memref<67x40xf32, #tpu.memory_space<vmem>>, vector<1x20xf32>
    %368 = vector.broadcast %367 : vector<1x20xf32> to vector<16x20xf32>
    %369 = arith.addf %366, %368 : vector<16x20xf32>
    %370 = vector.shape_cast %369 : vector<16x20xf32> to vector<2x8x20xf32>
    %cst_297 = arith.constant dense<0.000000e+00> : vector<20xf32>
    %371 = vector.multi_reduction <add>, %370, %cst_297 [0, 1] : vector<2x8x20xf32> to vector<20xf32>
    %372 = vector.shape_cast %371 : vector<20xf32> to vector<1x1x20xf32>
    %cst_298 = arith.constant 6.250000e-02 : f32
    %373 = vector.broadcast %cst_298 : f32 to vector<1x1x20xf32>
    %374 = arith.mulf %372, %373 : vector<1x1x20xf32>
    %375 = vector.broadcast %374 : vector<1x1x20xf32> to vector<2x8x20xf32>
    %376 = arith.subf %370, %375 : vector<2x8x20xf32>
    %377 = arith.mulf %376, %376 : vector<2x8x20xf32>
    %cst_299 = arith.constant dense<0.000000e+00> : vector<20xf32>
    %378 = vector.multi_reduction <add>, %377, %cst_299 [0, 1] : vector<2x8x20xf32> to vector<20xf32>
    %379 = vector.shape_cast %378 : vector<20xf32> to vector<1x1x20xf32>
    %cst_300 = arith.constant 6.250000e-02 : f32
    %380 = vector.broadcast %cst_300 : f32 to vector<1x1x20xf32>
    %381 = arith.mulf %379, %380 : vector<1x1x20xf32>
    %cst_301 = arith.constant 9.99999974E-6 : f32
    %382 = vector.broadcast %cst_301 : f32 to vector<1x1x20xf32>
    %383 = arith.addf %381, %382 : vector<1x1x20xf32>
    %384 = math.rsqrt %383 : vector<1x1x20xf32>
    %c25 = arith.constant 25 : index
    %c0_302 = arith.constant 0 : index
    %385 = vector.load %arg1[%c25, %c0_302] : memref<67x40xf32, #tpu.memory_space<vmem>>, vector<1x20xf32>
    %386 = vector.shape_cast %385 : vector<1x20xf32> to vector<1x1x20xf32>
    %387 = arith.mulf %384, %386 : vector<1x1x20xf32>
    %388 = vector.broadcast %387 : vector<1x1x20xf32> to vector<2x8x20xf32>
    %389 = arith.mulf %376, %388 : vector<2x8x20xf32>
    %c26 = arith.constant 26 : index
    %c0_303 = arith.constant 0 : index
    %390 = vector.load %arg1[%c26, %c0_303] : memref<67x40xf32, #tpu.memory_space<vmem>>, vector<1x20xf32>
    %391 = vector.shape_cast %390 : vector<1x20xf32> to vector<1x1x20xf32>
    %392 = vector.broadcast %391 : vector<1x1x20xf32> to vector<2x8x20xf32>
    %393 = arith.addf %389, %392 : vector<2x8x20xf32>
    %cst_304 = arith.constant 0.000000e+00 : f32
    %394 = vector.broadcast %cst_304 : f32 to vector<2x8x20xf32>
    %395 = arith.maximumf %393, %394 : vector<2x8x20xf32>
    %c0_305 = arith.constant 0 : index
    %c1_306 = arith.constant 1 : index
    %c0_307 = arith.constant 0 : index
    %396 = vector.load %arg11[%c0_305, %c1_306, %c0_307] : memref<2x10x20xf32, #tpu.memory_space<vmem>>, vector<2x8x20xf32>
    tpu.vector_store %arg11[%c0_305, %c1_306, %c0_307], %395 {strides = array<i32>} : memref<2x10x20xf32, #tpu.memory_space<vmem>>, vector<2x8x20xf32>,
    %c0_308 = arith.constant 0 : index
    %c0_309 = arith.constant 0 : index
    %c0_310 = arith.constant 0 : index
    %397 = vector.load %arg11[%c0_308, %c0_309, %c0_310] : memref<2x10x20xf32, #tpu.memory_space<vmem>>, vector<2x8x20xf32>
    %c0_311 = arith.constant 0 : index
    %c1_312 = arith.constant 1 : index
    %c0_313 = arith.constant 0 : index
    %398 = vector.load %arg11[%c0_311, %c1_312, %c0_313] : memref<2x10x20xf32, #tpu.memory_space<vmem>>, vector<2x8x20xf32>
    %c0_314 = arith.constant 0 : index
    %c2_315 = arith.constant 2 : index
    %c0_316 = arith.constant 0 : index
    %399 = vector.load %arg11[%c0_314, %c2_315, %c0_316] : memref<2x10x20xf32, #tpu.memory_space<vmem>>, vector<2x8x20xf32>
    %400 = tpu.concatenate %397, %398, %399 in 2 : vector<2x8x20xf32>, vector<2x8x20xf32>, vector<2x8x20xf32> -> vector<2x8x60xf32>
    %401 = vector.shape_cast %400 : vector<2x8x60xf32> to vector<16x60xf32>
    %c264 = arith.constant 264 : index
    %c0_317 = arith.constant 0 : index
    %402 = vector.load %arg2[%c264, %c0_317] : memref<1176x40xf32, #tpu.memory_space<vmem>>, vector<60x20xf32>
    %cst_318 = arith.constant dense<0.000000e+00> : vector<16x20xf32>
    %403 = tpu.matmul %401, %402, %cst_318 {dimension_numbers = #tpu.dot_dimension_numbers<[1], [0], [0], [1], [0, 0, 1, 1], [], []>} : vector<16x60xf32>, vector<60x20xf32>, vector<16x20xf32> -> vector<16x20xf32>
    %c27 = arith.constant 27 : index
    %c0_319 = arith.constant 0 : index
    %404 = vector.load %arg1[%c27, %c0_319] : memref<67x40xf32, #tpu.memory_space<vmem>>, vector<1x20xf32>
    %405 = vector.broadcast %404 : vector<1x20xf32> to vector<16x20xf32>
    %406 = arith.addf %403, %405 : vector<16x20xf32>
    %407 = vector.shape_cast %406 : vector<16x20xf32> to vector<2x8x20xf32>
    %408 = math.absf %407 : vector<2x8x20xf32>
    %cst_320 = arith.constant dense<0.000000e+00> : vector<2x20xf32>
    %409 = vector.multi_reduction <add>, %408, %cst_320 [1] : vector<2x8x20xf32> to vector<2x20xf32>
    %cst_321 = arith.constant 8.000000e+00 : f32
    %410 = vector.broadcast %cst_321 : f32 to vector<2x20xf32>
    %411 = arith.divf %409, %410 : vector<2x20xf32>
    %c328 = arith.constant 328 : index
    %c0_322 = arith.constant 0 : index
    %412 = vector.load %arg2[%c328, %c0_322] : memref<1176x40xf32, #tpu.memory_space<vmem>>, vector<20x20xf32>
    %cst_323 = arith.constant dense<0.000000e+00> : vector<2x20xf32>
    %413 = tpu.matmul %411, %412, %cst_323 {dimension_numbers = #tpu.dot_dimension_numbers<[1], [0], [0], [1], [0, 0, 1, 1], [], []>} : vector<2x20xf32>, vector<20x20xf32>, vector<2x20xf32> -> vector<2x20xf32>
    %c28 = arith.constant 28 : index
    %c0_324 = arith.constant 0 : index
    %414 = vector.load %arg1[%c28, %c0_324] : memref<67x40xf32, #tpu.memory_space<vmem>>, vector<1x20xf32>
    %415 = vector.broadcast %414 : vector<1x20xf32> to vector<2x20xf32>
    %416 = arith.addf %413, %415 : vector<2x20xf32>
    %cst_325 = arith.constant dense<0.000000e+00> : vector<20xf32>
    %417 = vector.multi_reduction <add>, %416, %cst_325 [0] : vector<2x20xf32> to vector<20xf32>
    %418 = vector.shape_cast %417 : vector<20xf32> to vector<1x20xf32>
    %cst_326 = arith.constant 5.000000e-01 : f32
    %419 = vector.broadcast %cst_326 : f32 to vector<1x20xf32>
    %420 = arith.mulf %418, %419 : vector<1x20xf32>
    %421 = vector.broadcast %420 : vector<1x20xf32> to vector<2x20xf32>
    %422 = arith.subf %416, %421 : vector<2x20xf32>
    %423 = arith.mulf %422, %422 : vector<2x20xf32>
    %cst_327 = arith.constant dense<0.000000e+00> : vector<20xf32>
    %424 = vector.multi_reduction <add>, %423, %cst_327 [0] : vector<2x20xf32> to vector<20xf32>
    %425 = vector.shape_cast %424 : vector<20xf32> to vector<1x20xf32>
    %cst_328 = arith.constant 5.000000e-01 : f32
    %426 = vector.broadcast %cst_328 : f32 to vector<1x20xf32>
    %427 = arith.mulf %425, %426 : vector<1x20xf32>
    %cst_329 = arith.constant 9.99999974E-6 : f32
    %428 = vector.broadcast %cst_329 : f32 to vector<1x20xf32>
    %429 = arith.addf %427, %428 : vector<1x20xf32>
    %430 = math.rsqrt %429 : vector<1x20xf32>
    %c29 = arith.constant 29 : index
    %c0_330 = arith.constant 0 : index
    %431 = vector.load %arg1[%c29, %c0_330] : memref<67x40xf32, #tpu.memory_space<vmem>>, vector<1x20xf32>
    %432 = arith.mulf %430, %431 : vector<1x20xf32>
    %433 = vector.broadcast %432 : vector<1x20xf32> to vector<2x20xf32>
    %434 = arith.mulf %422, %433 : vector<2x20xf32>
    %c30 = arith.constant 30 : index
    %c0_331 = arith.constant 0 : index
    %435 = vector.load %arg1[%c30, %c0_331] : memref<67x40xf32, #tpu.memory_space<vmem>>, vector<1x20xf32>
    %436 = vector.broadcast %435 : vector<1x20xf32> to vector<2x20xf32>
    %437 = arith.addf %434, %436 : vector<2x20xf32>
    %cst_332 = arith.constant 0.000000e+00 : f32
    %438 = vector.broadcast %cst_332 : f32 to vector<2x20xf32>
    %439 = arith.maximumf %437, %438 : vector<2x20xf32>
    %c352 = arith.constant 352 : index
    %c0_333 = arith.constant 0 : index
    %440 = vector.load %arg2[%c352, %c0_333] : memref<1176x40xf32, #tpu.memory_space<vmem>>, vector<20x20xf32>
    %cst_334 = arith.constant dense<0.000000e+00> : vector<2x20xf32>
    %441 = tpu.matmul %439, %440, %cst_334 {dimension_numbers = #tpu.dot_dimension_numbers<[1], [0], [0], [1], [0, 0, 1, 1], [], []>} : vector<2x20xf32>, vector<20x20xf32>, vector<2x20xf32> -> vector<2x20xf32>
    %c31 = arith.constant 31 : index
    %c0_335 = arith.constant 0 : index
    %442 = vector.load %arg1[%c31, %c0_335] : memref<67x40xf32, #tpu.memory_space<vmem>>, vector<1x20xf32>
    %443 = vector.broadcast %442 : vector<1x20xf32> to vector<2x20xf32>
    %444 = arith.addf %441, %443 : vector<2x20xf32>
    %cst_336 = arith.constant 5.000000e-01 : f32
    %445 = vector.broadcast %cst_336 : f32 to vector<2x20xf32>
    %446 = arith.mulf %445, %444 : vector<2x20xf32>
    %447 = math.tanh %446 : vector<2x20xf32>
    %cst_337 = arith.constant 1.000000e+00 : f32
    %448 = vector.broadcast %cst_337 : f32 to vector<2x20xf32>
    %449 = arith.addf %447, %448 : vector<2x20xf32>
    %cst_338 = arith.constant 5.000000e-01 : f32
    %450 = vector.broadcast %cst_338 : f32 to vector<2x20xf32>
    %451 = arith.mulf %450, %449 : vector<2x20xf32>
    %452 = arith.mulf %411, %451 : vector<2x20xf32>
    %453 = vector.shape_cast %452 : vector<2x20xf32> to vector<2x1x20xf32>
    %cst_339 = arith.constant 0.000000e+00 : f32
    %454 = vector.broadcast %cst_339 : f32 to vector<2x1x20xf32>
    %455 = arith.subf %454, %453 : vector<2x1x20xf32>
    %456 = vector.broadcast %455 : vector<2x1x20xf32> to vector<2x8x20xf32>
    %457 = arith.maximumf %456, %407 : vector<2x8x20xf32>
    %458 = vector.broadcast %453 : vector<2x1x20xf32> to vector<2x8x20xf32>
    %459 = arith.minimumf %458, %457 : vector<2x8x20xf32>
    %460 = arith.subf %407, %459 : vector<2x8x20xf32>
    %cst_340 = arith.constant 0.000000e+00 : f32
    %461 = vector.broadcast %cst_340 : f32 to vector<2x8x10xf32>
    %462 = tpu.concatenate %333, %461 in 2 : vector<2x8x10xf32>, vector<2x8x10xf32> -> vector<2x8x20xf32>
    %463 = arith.addf %460, %462 : vector<2x8x20xf32>
    %cst_341 = arith.constant dense<0.000000e+00> : vector<20xf32>
    %464 = vector.multi_reduction <add>, %463, %cst_341 [0, 1] : vector<2x8x20xf32> to vector<20xf32>
    %465 = vector.shape_cast %464 : vector<20xf32> to vector<1x1x20xf32>
    %cst_342 = arith.constant 6.250000e-02 : f32
    %466 = vector.broadcast %cst_342 : f32 to vector<1x1x20xf32>
    %467 = arith.mulf %465, %466 : vector<1x1x20xf32>
    %468 = vector.broadcast %467 : vector<1x1x20xf32> to vector<2x8x20xf32>
    %469 = arith.subf %463, %468 : vector<2x8x20xf32>
    %470 = arith.mulf %469, %469 : vector<2x8x20xf32>
    %cst_343 = arith.constant dense<0.000000e+00> : vector<20xf32>
    %471 = vector.multi_reduction <add>, %470, %cst_343 [0, 1] : vector<2x8x20xf32> to vector<20xf32>
    %472 = vector.shape_cast %471 : vector<20xf32> to vector<1x1x20xf32>
    %cst_344 = arith.constant 6.250000e-02 : f32
    %473 = vector.broadcast %cst_344 : f32 to vector<1x1x20xf32>
    %474 = arith.mulf %472, %473 : vector<1x1x20xf32>
    %cst_345 = arith.constant 9.99999974E-6 : f32
    %475 = vector.broadcast %cst_345 : f32 to vector<1x1x20xf32>
    %476 = arith.addf %474, %475 : vector<1x1x20xf32>
    %477 = math.rsqrt %476 : vector<1x1x20xf32>
    %c32 = arith.constant 32 : index
    %c0_346 = arith.constant 0 : index
    %478 = vector.load %arg1[%c32, %c0_346] : memref<67x40xf32, #tpu.memory_space<vmem>>, vector<1x20xf32>
    %479 = vector.shape_cast %478 : vector<1x20xf32> to vector<1x1x20xf32>
    %480 = arith.mulf %477, %479 : vector<1x1x20xf32>
    %481 = vector.broadcast %480 : vector<1x1x20xf32> to vector<2x8x20xf32>
    %482 = arith.mulf %469, %481 : vector<2x8x20xf32>
    %c33_347 = arith.constant 33 : index
    %c0_348 = arith.constant 0 : index
    %483 = vector.load %arg1[%c33_347, %c0_348] : memref<67x40xf32, #tpu.memory_space<vmem>>, vector<1x20xf32>
    %484 = vector.shape_cast %483 : vector<1x20xf32> to vector<1x1x20xf32>
    %485 = vector.broadcast %484 : vector<1x1x20xf32> to vector<2x8x20xf32>
    %486 = arith.addf %482, %485 : vector<2x8x20xf32>
    %cst_349 = arith.constant 0.000000e+00 : f32
    %487 = vector.broadcast %cst_349 : f32 to vector<2x8x20xf32>
    %488 = arith.maximumf %486, %487 : vector<2x8x20xf32>
    %c0_350 = arith.constant 0 : index
    %c1_351 = arith.constant 1 : index
    %c0_352 = arith.constant 0 : index
    %489 = vector.load %arg13[%c0_350, %c1_351, %c0_352] : memref<2x10x20xf32, #tpu.memory_space<vmem>>, vector<2x8x20xf32>
    tpu.vector_store %arg13[%c0_350, %c1_351, %c0_352], %488 {strides = array<i32>} : memref<2x10x20xf32, #tpu.memory_space<vmem>>, vector<2x8x20xf32>,
    %c0_353 = arith.constant 0 : index
    %c0_354 = arith.constant 0 : index
    %c0_355 = arith.constant 0 : index
    %490 = vector.load %arg13[%c0_353, %c0_354, %c0_355] : memref<2x10x20xf32, #tpu.memory_space<vmem>>, vector<2x8x20xf32>
    %c0_356 = arith.constant 0 : index
    %c1_357 = arith.constant 1 : index
    %c0_358 = arith.constant 0 : index
    %491 = vector.load %arg13[%c0_356, %c1_357, %c0_358] : memref<2x10x20xf32, #tpu.memory_space<vmem>>, vector<2x8x20xf32>
    %c0_359 = arith.constant 0 : index
    %c2_360 = arith.constant 2 : index
    %c0_361 = arith.constant 0 : index
    %492 = vector.load %arg13[%c0_359, %c2_360, %c0_361] : memref<2x10x20xf32, #tpu.memory_space<vmem>>, vector<2x8x20xf32>
    %493 = tpu.concatenate %490, %491, %492 in 2 : vector<2x8x20xf32>, vector<2x8x20xf32>, vector<2x8x20xf32> -> vector<2x8x60xf32>
    %494 = vector.shape_cast %493 : vector<2x8x60xf32> to vector<16x60xf32>
    %c376 = arith.constant 376 : index
    %c0_362 = arith.constant 0 : index
    %495 = vector.load %arg2[%c376, %c0_362] : memref<1176x40xf32, #tpu.memory_space<vmem>>, vector<60x20xf32>
    %cst_363 = arith.constant dense<0.000000e+00> : vector<16x20xf32>
    %496 = tpu.matmul %494, %495, %cst_363 {dimension_numbers = #tpu.dot_dimension_numbers<[1], [0], [0], [1], [0, 0, 1, 1], [], []>} : vector<16x60xf32>, vector<60x20xf32>, vector<16x20xf32> -> vector<16x20xf32>
    %c34 = arith.constant 34 : index
    %c0_364 = arith.constant 0 : index
    %497 = vector.load %arg1[%c34, %c0_364] : memref<67x40xf32, #tpu.memory_space<vmem>>, vector<1x20xf32>
    %498 = vector.broadcast %497 : vector<1x20xf32> to vector<16x20xf32>
    %499 = arith.addf %496, %498 : vector<16x20xf32>
    %500 = vector.shape_cast %499 : vector<16x20xf32> to vector<2x8x20xf32>
    %cst_365 = arith.constant dense<0.000000e+00> : vector<20xf32>
    %501 = vector.multi_reduction <add>, %500, %cst_365 [0, 1] : vector<2x8x20xf32> to vector<20xf32>
    %502 = vector.shape_cast %501 : vector<20xf32> to vector<1x1x20xf32>
    %cst_366 = arith.constant 6.250000e-02 : f32
    %503 = vector.broadcast %cst_366 : f32 to vector<1x1x20xf32>
    %504 = arith.mulf %502, %503 : vector<1x1x20xf32>
    %505 = vector.broadcast %504 : vector<1x1x20xf32> to vector<2x8x20xf32>
    %506 = arith.subf %500, %505 : vector<2x8x20xf32>
    %507 = arith.mulf %506, %506 : vector<2x8x20xf32>
    %cst_367 = arith.constant dense<0.000000e+00> : vector<20xf32>
    %508 = vector.multi_reduction <add>, %507, %cst_367 [0, 1] : vector<2x8x20xf32> to vector<20xf32>
    %509 = vector.shape_cast %508 : vector<20xf32> to vector<1x1x20xf32>
    %cst_368 = arith.constant 6.250000e-02 : f32
    %510 = vector.broadcast %cst_368 : f32 to vector<1x1x20xf32>
    %511 = arith.mulf %509, %510 : vector<1x1x20xf32>
    %cst_369 = arith.constant 9.99999974E-6 : f32
    %512 = vector.broadcast %cst_369 : f32 to vector<1x1x20xf32>
    %513 = arith.addf %511, %512 : vector<1x1x20xf32>
    %514 = math.rsqrt %513 : vector<1x1x20xf32>
    %c35 = arith.constant 35 : index
    %c0_370 = arith.constant 0 : index
    %515 = vector.load %arg1[%c35, %c0_370] : memref<67x40xf32, #tpu.memory_space<vmem>>, vector<1x20xf32>
    %516 = vector.shape_cast %515 : vector<1x20xf32> to vector<1x1x20xf32>
    %517 = arith.mulf %514, %516 : vector<1x1x20xf32>
    %518 = vector.broadcast %517 : vector<1x1x20xf32> to vector<2x8x20xf32>
    %519 = arith.mulf %506, %518 : vector<2x8x20xf32>
    %c36 = arith.constant 36 : index
    %c0_371 = arith.constant 0 : index
    %520 = vector.load %arg1[%c36, %c0_371] : memref<67x40xf32, #tpu.memory_space<vmem>>, vector<1x20xf32>
    %521 = vector.shape_cast %520 : vector<1x20xf32> to vector<1x1x20xf32>
    %522 = vector.broadcast %521 : vector<1x1x20xf32> to vector<2x8x20xf32>
    %523 = arith.addf %519, %522 : vector<2x8x20xf32>
    %cst_372 = arith.constant 0.000000e+00 : f32
    %524 = vector.broadcast %cst_372 : f32 to vector<2x8x20xf32>
    %525 = arith.maximumf %523, %524 : vector<2x8x20xf32>
    %c0_373 = arith.constant 0 : index
    %c1_374 = arith.constant 1 : index
    %c0_375 = arith.constant 0 : index
    %526 = vector.load %arg14[%c0_373, %c1_374, %c0_375] : memref<2x10x20xf32, #tpu.memory_space<vmem>>, vector<2x8x20xf32>
    tpu.vector_store %arg14[%c0_373, %c1_374, %c0_375], %525 {strides = array<i32>} : memref<2x10x20xf32, #tpu.memory_space<vmem>>, vector<2x8x20xf32>,
    %c0_376 = arith.constant 0 : index
    %c0_377 = arith.constant 0 : index
    %c0_378 = arith.constant 0 : index
    %527 = vector.load %arg14[%c0_376, %c0_377, %c0_378] : memref<2x10x20xf32, #tpu.memory_space<vmem>>, vector<2x8x20xf32>
    %c0_379 = arith.constant 0 : index
    %c1_380 = arith.constant 1 : index
    %c0_381 = arith.constant 0 : index
    %528 = vector.load %arg14[%c0_379, %c1_380, %c0_381] : memref<2x10x20xf32, #tpu.memory_space<vmem>>, vector<2x8x20xf32>
    %c0_382 = arith.constant 0 : index
    %c2_383 = arith.constant 2 : index
    %c0_384 = arith.constant 0 : index
    %529 = vector.load %arg14[%c0_382, %c2_383, %c0_384] : memref<2x10x20xf32, #tpu.memory_space<vmem>>, vector<2x8x20xf32>
    %530 = tpu.concatenate %527, %528, %529 in 2 : vector<2x8x20xf32>, vector<2x8x20xf32>, vector<2x8x20xf32> -> vector<2x8x60xf32>
    %531 = vector.shape_cast %530 : vector<2x8x60xf32> to vector<16x60xf32>
    %c440 = arith.constant 440 : index
    %c0_385 = arith.constant 0 : index
    %532 = vector.load %arg2[%c440, %c0_385] : memref<1176x40xf32, #tpu.memory_space<vmem>>, vector<60x20xf32>
    %cst_386 = arith.constant dense<0.000000e+00> : vector<16x20xf32>
    %533 = tpu.matmul %531, %532, %cst_386 {dimension_numbers = #tpu.dot_dimension_numbers<[1], [0], [0], [1], [0, 0, 1, 1], [], []>} : vector<16x60xf32>, vector<60x20xf32>, vector<16x20xf32> -> vector<16x20xf32>
    %c37 = arith.constant 37 : index
    %c0_387 = arith.constant 0 : index
    %534 = vector.load %arg1[%c37, %c0_387] : memref<67x40xf32, #tpu.memory_space<vmem>>, vector<1x20xf32>
    %535 = vector.broadcast %534 : vector<1x20xf32> to vector<16x20xf32>
    %536 = arith.addf %533, %535 : vector<16x20xf32>
    %537 = vector.shape_cast %536 : vector<16x20xf32> to vector<2x8x20xf32>
    %538 = math.absf %537 : vector<2x8x20xf32>
    %cst_388 = arith.constant dense<0.000000e+00> : vector<2x20xf32>
    %539 = vector.multi_reduction <add>, %538, %cst_388 [1] : vector<2x8x20xf32> to vector<2x20xf32>
    %cst_389 = arith.constant 8.000000e+00 : f32
    %540 = vector.broadcast %cst_389 : f32 to vector<2x20xf32>
    %541 = arith.divf %539, %540 : vector<2x20xf32>
    %c504 = arith.constant 504 : index
    %c0_390 = arith.constant 0 : index
    %542 = vector.load %arg2[%c504, %c0_390] : memref<1176x40xf32, #tpu.memory_space<vmem>>, vector<20x20xf32>
    %cst_391 = arith.constant dense<0.000000e+00> : vector<2x20xf32>
    %543 = tpu.matmul %541, %542, %cst_391 {dimension_numbers = #tpu.dot_dimension_numbers<[1], [0], [0], [1], [0, 0, 1, 1], [], []>} : vector<2x20xf32>, vector<20x20xf32>, vector<2x20xf32> -> vector<2x20xf32>
    %c38 = arith.constant 38 : index
    %c0_392 = arith.constant 0 : index
    %544 = vector.load %arg1[%c38, %c0_392] : memref<67x40xf32, #tpu.memory_space<vmem>>, vector<1x20xf32>
    %545 = vector.broadcast %544 : vector<1x20xf32> to vector<2x20xf32>
    %546 = arith.addf %543, %545 : vector<2x20xf32>
    %cst_393 = arith.constant dense<0.000000e+00> : vector<20xf32>
    %547 = vector.multi_reduction <add>, %546, %cst_393 [0] : vector<2x20xf32> to vector<20xf32>
    %548 = vector.shape_cast %547 : vector<20xf32> to vector<1x20xf32>
    %cst_394 = arith.constant 5.000000e-01 : f32
    %549 = vector.broadcast %cst_394 : f32 to vector<1x20xf32>
    %550 = arith.mulf %548, %549 : vector<1x20xf32>
    %551 = vector.broadcast %550 : vector<1x20xf32> to vector<2x20xf32>
    %552 = arith.subf %546, %551 : vector<2x20xf32>
    %553 = arith.mulf %552, %552 : vector<2x20xf32>
    %cst_395 = arith.constant dense<0.000000e+00> : vector<20xf32>
    %554 = vector.multi_reduction <add>, %553, %cst_395 [0] : vector<2x20xf32> to vector<20xf32>
    %555 = vector.shape_cast %554 : vector<20xf32> to vector<1x20xf32>
    %cst_396 = arith.constant 5.000000e-01 : f32
    %556 = vector.broadcast %cst_396 : f32 to vector<1x20xf32>
    %557 = arith.mulf %555, %556 : vector<1x20xf32>
    %cst_397 = arith.constant 9.99999974E-6 : f32
    %558 = vector.broadcast %cst_397 : f32 to vector<1x20xf32>
    %559 = arith.addf %557, %558 : vector<1x20xf32>
    %560 = math.rsqrt %559 : vector<1x20xf32>
    %c39 = arith.constant 39 : index
    %c0_398 = arith.constant 0 : index
    %561 = vector.load %arg1[%c39, %c0_398] : memref<67x40xf32, #tpu.memory_space<vmem>>, vector<1x20xf32>
    %562 = arith.mulf %560, %561 : vector<1x20xf32>
    %563 = vector.broadcast %562 : vector<1x20xf32> to vector<2x20xf32>
    %564 = arith.mulf %552, %563 : vector<2x20xf32>
    %c40_399 = arith.constant 40 : index
    %c0_400 = arith.constant 0 : index
    %565 = vector.load %arg1[%c40_399, %c0_400] : memref<67x40xf32, #tpu.memory_space<vmem>>, vector<1x20xf32>
    %566 = vector.broadcast %565 : vector<1x20xf32> to vector<2x20xf32>
    %567 = arith.addf %564, %566 : vector<2x20xf32>
    %cst_401 = arith.constant 0.000000e+00 : f32
    %568 = vector.broadcast %cst_401 : f32 to vector<2x20xf32>
    %569 = arith.maximumf %567, %568 : vector<2x20xf32>
    %c528 = arith.constant 528 : index
    %c0_402 = arith.constant 0 : index
    %570 = vector.load %arg2[%c528, %c0_402] : memref<1176x40xf32, #tpu.memory_space<vmem>>, vector<20x20xf32>
    %cst_403 = arith.constant dense<0.000000e+00> : vector<2x20xf32>
    %571 = tpu.matmul %569, %570, %cst_403 {dimension_numbers = #tpu.dot_dimension_numbers<[1], [0], [0], [1], [0, 0, 1, 1], [], []>} : vector<2x20xf32>, vector<20x20xf32>, vector<2x20xf32> -> vector<2x20xf32>
    %c41 = arith.constant 41 : index
    %c0_404 = arith.constant 0 : index
    %572 = vector.load %arg1[%c41, %c0_404] : memref<67x40xf32, #tpu.memory_space<vmem>>, vector<1x20xf32>
    %573 = vector.broadcast %572 : vector<1x20xf32> to vector<2x20xf32>
    %574 = arith.addf %571, %573 : vector<2x20xf32>
    %cst_405 = arith.constant 5.000000e-01 : f32
    %575 = vector.broadcast %cst_405 : f32 to vector<2x20xf32>
    %576 = arith.mulf %575, %574 : vector<2x20xf32>
    %577 = math.tanh %576 : vector<2x20xf32>
    %cst_406 = arith.constant 1.000000e+00 : f32
    %578 = vector.broadcast %cst_406 : f32 to vector<2x20xf32>
    %579 = arith.addf %577, %578 : vector<2x20xf32>
    %cst_407 = arith.constant 5.000000e-01 : f32
    %580 = vector.broadcast %cst_407 : f32 to vector<2x20xf32>
    %581 = arith.mulf %580, %579 : vector<2x20xf32>
    %582 = arith.mulf %541, %581 : vector<2x20xf32>
    %583 = vector.shape_cast %582 : vector<2x20xf32> to vector<2x1x20xf32>
    %cst_408 = arith.constant 0.000000e+00 : f32
    %584 = vector.broadcast %cst_408 : f32 to vector<2x1x20xf32>
    %585 = arith.subf %584, %583 : vector<2x1x20xf32>
    %586 = vector.broadcast %585 : vector<2x1x20xf32> to vector<2x8x20xf32>
    %587 = arith.maximumf %586, %537 : vector<2x8x20xf32>
    %588 = vector.broadcast %583 : vector<2x1x20xf32> to vector<2x8x20xf32>
    %589 = arith.minimumf %588, %587 : vector<2x8x20xf32>
    %590 = arith.subf %537, %589 : vector<2x8x20xf32>
    %591 = arith.addf %590, %463 : vector<2x8x20xf32>
    %c0_409 = arith.constant 0 : index
    %c0_410 = arith.constant 0 : index
    %c0_411 = arith.constant 0 : index
    %592 = vector.load %arg17[%c0_409, %c0_410, %c0_411] : memref<2x8x20xf32, #tpu.memory_space<vmem>>, vector<2x8x20xf32>
    tpu.vector_store %arg17[%c0_409, %c0_410, %c0_411], %591 {strides = array<i32>} : memref<2x8x20xf32, #tpu.memory_space<vmem>>, vector<2x8x20xf32>,
    %c0_412 = arith.constant 0 : index
    %c0_413 = arith.constant 0 : index
    %c0_414 = arith.constant 0 : index
    %593 = tpu.strided_load %arg17[%c0_412, %c0_413, %c0_414] {strides = array<i32: 1, 2, 1>} : memref<2x8x20xf32, #tpu.memory_space<vmem>>, vector<2x4x20xf32>
    %cst_415 = arith.constant dense<0.000000e+00> : vector<20xf32>
    %594 = vector.multi_reduction <add>, %591, %cst_415 [0, 1] : vector<2x8x20xf32> to vector<20xf32>
    %595 = vector.shape_cast %594 : vector<20xf32> to vector<1x1x20xf32>
    %cst_416 = arith.constant 6.250000e-02 : f32
    %596 = vector.broadcast %cst_416 : f32 to vector<1x1x20xf32>
    %597 = arith.mulf %595, %596 : vector<1x1x20xf32>
    %598 = vector.broadcast %597 : vector<1x1x20xf32> to vector<2x8x20xf32>
    %599 = arith.subf %591, %598 : vector<2x8x20xf32>
    %600 = arith.mulf %599, %599 : vector<2x8x20xf32>
    %cst_417 = arith.constant dense<0.000000e+00> : vector<20xf32>
    %601 = vector.multi_reduction <add>, %600, %cst_417 [0, 1] : vector<2x8x20xf32> to vector<20xf32>
    %602 = vector.shape_cast %601 : vector<20xf32> to vector<1x1x20xf32>
    %cst_418 = arith.constant 6.250000e-02 : f32
    %603 = vector.broadcast %cst_418 : f32 to vector<1x1x20xf32>
    %604 = arith.mulf %602, %603 : vector<1x1x20xf32>
    %cst_419 = arith.constant 9.99999974E-6 : f32
    %605 = vector.broadcast %cst_419 : f32 to vector<1x1x20xf32>
    %606 = arith.addf %604, %605 : vector<1x1x20xf32>
    %607 = math.rsqrt %606 : vector<1x1x20xf32>
    %c42 = arith.constant 42 : index
    %c0_420 = arith.constant 0 : index
    %608 = vector.load %arg1[%c42, %c0_420] : memref<67x40xf32, #tpu.memory_space<vmem>>, vector<1x20xf32>
    %609 = vector.shape_cast %608 : vector<1x20xf32> to vector<1x1x20xf32>
    %610 = arith.mulf %607, %609 : vector<1x1x20xf32>
    %611 = vector.broadcast %610 : vector<1x1x20xf32> to vector<2x8x20xf32>
    %612 = arith.mulf %599, %611 : vector<2x8x20xf32>
    %c43 = arith.constant 43 : index
    %c0_421 = arith.constant 0 : index
    %613 = vector.load %arg1[%c43, %c0_421] : memref<67x40xf32, #tpu.memory_space<vmem>>, vector<1x20xf32>
    %614 = vector.shape_cast %613 : vector<1x20xf32> to vector<1x1x20xf32>
    %615 = vector.broadcast %614 : vector<1x1x20xf32> to vector<2x8x20xf32>
    %616 = arith.addf %612, %615 : vector<2x8x20xf32>
    %cst_422 = arith.constant 0.000000e+00 : f32
    %617 = vector.broadcast %cst_422 : f32 to vector<2x8x20xf32>
    %618 = arith.maximumf %616, %617 : vector<2x8x20xf32>
    %c0_423 = arith.constant 0 : index
    %c1_424 = arith.constant 1 : index
    %c0_425 = arith.constant 0 : index
    %619 = vector.load %arg15[%c0_423, %c1_424, %c0_425] : memref<2x10x20xf32, #tpu.memory_space<vmem>>, vector<2x8x20xf32>
    tpu.vector_store %arg15[%c0_423, %c1_424, %c0_425], %618 {strides = array<i32>} : memref<2x10x20xf32, #tpu.memory_space<vmem>>, vector<2x8x20xf32>,
    %c0_426 = arith.constant 0 : index
    %c0_427 = arith.constant 0 : index
    %c0_428 = arith.constant 0 : index
    %620 = tpu.strided_load %arg15[%c0_426, %c0_427, %c0_428] {strides = array<i32: 1, 2, 1>} : memref<2x10x20xf32, #tpu.memory_space<vmem>>, vector<2x4x20xf32>
    %c0_429 = arith.constant 0 : index
    %c1_430 = arith.constant 1 : index
    %c0_431 = arith.constant 0 : index
    %621 = tpu.strided_load %arg15[%c0_429, %c1_430, %c0_431] {strides = array<i32: 1, 2, 1>} : memref<2x10x20xf32, #tpu.memory_space<vmem>>, vector<2x4x20xf32>
    %c0_432 = arith.constant 0 : index
    %c2_433 = arith.constant 2 : index
    %c0_434 = arith.constant 0 : index
    %622 = tpu.strided_load %arg15[%c0_432, %c2_433, %c0_434] {strides = array<i32: 1, 2, 1>} : memref<2x10x20xf32, #tpu.memory_space<vmem>>, vector<2x4x20xf32>
    %623 = tpu.concatenate %620, %621, %622 in 2 : vector<2x4x20xf32>, vector<2x4x20xf32>, vector<2x4x20xf32> -> vector<2x4x60xf32>
    %624 = vector.shape_cast %623 : vector<2x4x60xf32> to vector<8x60xf32>
    %c552 = arith.constant 552 : index
    %c0_435 = arith.constant 0 : index
    %625 = vector.load %arg2[%c552, %c0_435] : memref<1176x40xf32, #tpu.memory_space<vmem>>, vector<60x40xf32>
    %cst_436 = arith.constant dense<0.000000e+00> : vector<8x40xf32>
    %626 = tpu.matmul %624, %625, %cst_436 {dimension_numbers = #tpu.dot_dimension_numbers<[1], [0], [0], [1], [0, 0, 1, 1], [], []>} : vector<8x60xf32>, vector<60x40xf32>, vector<8x40xf32> -> vector<8x40xf32>
    %c44 = arith.constant 44 : index
    %c0_437 = arith.constant 0 : index
    %627 = vector.load %arg1[%c44, %c0_437] : memref<67x40xf32, #tpu.memory_space<vmem>>, vector<1x40xf32>
    %628 = vector.broadcast %627 : vector<1x40xf32> to vector<8x40xf32>
    %629 = arith.addf %626, %628 : vector<8x40xf32>
    %630 = vector.shape_cast %629 : vector<8x40xf32> to vector<2x4x40xf32>
    %cst_438 = arith.constant dense<0.000000e+00> : vector<40xf32>
    %631 = vector.multi_reduction <add>, %630, %cst_438 [0, 1] : vector<2x4x40xf32> to vector<40xf32>
    %632 = vector.shape_cast %631 : vector<40xf32> to vector<1x1x40xf32>
    %cst_439 = arith.constant 1.250000e-01 : f32
    %633 = vector.broadcast %cst_439 : f32 to vector<1x1x40xf32>
    %634 = arith.mulf %632, %633 : vector<1x1x40xf32>
    %635 = vector.broadcast %634 : vector<1x1x40xf32> to vector<2x4x40xf32>
    %636 = arith.subf %630, %635 : vector<2x4x40xf32>
    %637 = arith.mulf %636, %636 : vector<2x4x40xf32>
    %cst_440 = arith.constant dense<0.000000e+00> : vector<40xf32>
    %638 = vector.multi_reduction <add>, %637, %cst_440 [0, 1] : vector<2x4x40xf32> to vector<40xf32>
    %639 = vector.shape_cast %638 : vector<40xf32> to vector<1x1x40xf32>
    %cst_441 = arith.constant 1.250000e-01 : f32
    %640 = vector.broadcast %cst_441 : f32 to vector<1x1x40xf32>
    %641 = arith.mulf %639, %640 : vector<1x1x40xf32>
    %cst_442 = arith.constant 9.99999974E-6 : f32
    %642 = vector.broadcast %cst_442 : f32 to vector<1x1x40xf32>
    %643 = arith.addf %641, %642 : vector<1x1x40xf32>
    %644 = math.rsqrt %643 : vector<1x1x40xf32>
    %c45 = arith.constant 45 : index
    %c0_443 = arith.constant 0 : index
    %645 = vector.load %arg1[%c45, %c0_443] : memref<67x40xf32, #tpu.memory_space<vmem>>, vector<1x40xf32>
    %646 = vector.shape_cast %645 : vector<1x40xf32> to vector<1x1x40xf32>
    %647 = arith.mulf %644, %646 : vector<1x1x40xf32>
    %648 = vector.broadcast %647 : vector<1x1x40xf32> to vector<2x4x40xf32>
    %649 = arith.mulf %636, %648 : vector<2x4x40xf32>
    %c46 = arith.constant 46 : index
    %c0_444 = arith.constant 0 : index
    %650 = vector.load %arg1[%c46, %c0_444] : memref<67x40xf32, #tpu.memory_space<vmem>>, vector<1x40xf32>
    %651 = vector.shape_cast %650 : vector<1x40xf32> to vector<1x1x40xf32>
    %652 = vector.broadcast %651 : vector<1x1x40xf32> to vector<2x4x40xf32>
    %653 = arith.addf %649, %652 : vector<2x4x40xf32>
    %cst_445 = arith.constant 0.000000e+00 : f32
    %654 = vector.broadcast %cst_445 : f32 to vector<2x4x40xf32>
    %655 = arith.maximumf %653, %654 : vector<2x4x40xf32>
    %c0_446 = arith.constant 0 : index
    %c1_447 = arith.constant 1 : index
    %c0_448 = arith.constant 0 : index
    %656 = vector.load %arg16[%c0_446, %c1_447, %c0_448] : memref<2x6x40xf32, #tpu.memory_space<vmem>>, vector<2x4x40xf32>
    tpu.vector_store %arg16[%c0_446, %c1_447, %c0_448], %655 {strides = array<i32>} : memref<2x6x40xf32, #tpu.memory_space<vmem>>, vector<2x4x40xf32>,
    %c0_449 = arith.constant 0 : index
    %c0_450 = arith.constant 0 : index
    %c0_451 = arith.constant 0 : index
    %657 = vector.load %arg16[%c0_449, %c0_450, %c0_451] : memref<2x6x40xf32, #tpu.memory_space<vmem>>, vector<2x4x40xf32>
    %c0_452 = arith.constant 0 : index
    %c1_453 = arith.constant 1 : index
    %c0_454 = arith.constant 0 : index
    %658 = vector.load %arg16[%c0_452, %c1_453, %c0_454] : memref<2x6x40xf32, #tpu.memory_space<vmem>>, vector<2x4x40xf32>
    %c0_455 = arith.constant 0 : index
    %c2_456 = arith.constant 2 : index
    %c0_457 = arith.constant 0 : index
    %659 = vector.load %arg16[%c0_455, %c2_456, %c0_457] : memref<2x6x40xf32, #tpu.memory_space<vmem>>, vector<2x4x40xf32>
    %660 = tpu.concatenate %657, %658, %659 in 2 : vector<2x4x40xf32>, vector<2x4x40xf32>, vector<2x4x40xf32> -> vector<2x4x120xf32>
    %661 = vector.shape_cast %660 : vector<2x4x120xf32> to vector<8x120xf32>
    %c616 = arith.constant 616 : index
    %c0_458 = arith.constant 0 : index
    %662 = vector.load %arg2[%c616, %c0_458] : memref<1176x40xf32, #tpu.memory_space<vmem>>, vector<120x40xf32>
    %cst_459 = arith.constant dense<0.000000e+00> : vector<8x40xf32>
    %663 = tpu.matmul %661, %662, %cst_459 {dimension_numbers = #tpu.dot_dimension_numbers<[1], [0], [0], [1], [0, 0, 1, 1], [], []>} : vector<8x120xf32>, vector<120x40xf32>, vector<8x40xf32> -> vector<8x40xf32>
    %c47 = arith.constant 47 : index
    %c0_460 = arith.constant 0 : index
    %664 = vector.load %arg1[%c47, %c0_460] : memref<67x40xf32, #tpu.memory_space<vmem>>, vector<1x40xf32>
    %665 = vector.broadcast %664 : vector<1x40xf32> to vector<8x40xf32>
    %666 = arith.addf %663, %665 : vector<8x40xf32>
    %667 = vector.shape_cast %666 : vector<8x40xf32> to vector<2x4x40xf32>
    %668 = math.absf %667 : vector<2x4x40xf32>
    %cst_461 = arith.constant dense<0.000000e+00> : vector<2x40xf32>
    %669 = vector.multi_reduction <add>, %668, %cst_461 [1] : vector<2x4x40xf32> to vector<2x40xf32>
    %cst_462 = arith.constant 4.000000e+00 : f32
    %670 = vector.broadcast %cst_462 : f32 to vector<2x40xf32>
    %671 = arith.divf %669, %670 : vector<2x40xf32>
    %c736 = arith.constant 736 : index
    %c0_463 = arith.constant 0 : index
    %672 = vector.load %arg2[%c736, %c0_463] : memref<1176x40xf32, #tpu.memory_space<vmem>>, vector<40x40xf32>
    %cst_464 = arith.constant dense<0.000000e+00> : vector<2x40xf32>
    %673 = tpu.matmul %671, %672, %cst_464 {dimension_numbers = #tpu.dot_dimension_numbers<[1], [0], [0], [1], [0, 0, 1, 1], [], []>} : vector<2x40xf32>, vector<40x40xf32>, vector<2x40xf32> -> vector<2x40xf32>
    %c48 = arith.constant 48 : index
    %c0_465 = arith.constant 0 : index
    %674 = vector.load %arg1[%c48, %c0_465] : memref<67x40xf32, #tpu.memory_space<vmem>>, vector<1x40xf32>
    %675 = vector.broadcast %674 : vector<1x40xf32> to vector<2x40xf32>
    %676 = arith.addf %673, %675 : vector<2x40xf32>
    %cst_466 = arith.constant dense<0.000000e+00> : vector<40xf32>
    %677 = vector.multi_reduction <add>, %676, %cst_466 [0] : vector<2x40xf32> to vector<40xf32>
    %678 = vector.shape_cast %677 : vector<40xf32> to vector<1x40xf32>
    %cst_467 = arith.constant 5.000000e-01 : f32
    %679 = vector.broadcast %cst_467 : f32 to vector<1x40xf32>
    %680 = arith.mulf %678, %679 : vector<1x40xf32>
    %681 = vector.broadcast %680 : vector<1x40xf32> to vector<2x40xf32>
    %682 = arith.subf %676, %681 : vector<2x40xf32>
    %683 = arith.mulf %682, %682 : vector<2x40xf32>
    %cst_468 = arith.constant dense<0.000000e+00> : vector<40xf32>
    %684 = vector.multi_reduction <add>, %683, %cst_468 [0] : vector<2x40xf32> to vector<40xf32>
    %685 = vector.shape_cast %684 : vector<40xf32> to vector<1x40xf32>
    %cst_469 = arith.constant 5.000000e-01 : f32
    %686 = vector.broadcast %cst_469 : f32 to vector<1x40xf32>
    %687 = arith.mulf %685, %686 : vector<1x40xf32>
    %cst_470 = arith.constant 9.99999974E-6 : f32
    %688 = vector.broadcast %cst_470 : f32 to vector<1x40xf32>
    %689 = arith.addf %687, %688 : vector<1x40xf32>
    %690 = math.rsqrt %689 : vector<1x40xf32>
    %c49 = arith.constant 49 : index
    %c0_471 = arith.constant 0 : index
    %691 = vector.load %arg1[%c49, %c0_471] : memref<67x40xf32, #tpu.memory_space<vmem>>, vector<1x40xf32>
    %692 = arith.mulf %690, %691 : vector<1x40xf32>
    %693 = vector.broadcast %692 : vector<1x40xf32> to vector<2x40xf32>
    %694 = arith.mulf %682, %693 : vector<2x40xf32>
    %c50 = arith.constant 50 : index
    %c0_472 = arith.constant 0 : index
    %695 = vector.load %arg1[%c50, %c0_472] : memref<67x40xf32, #tpu.memory_space<vmem>>, vector<1x40xf32>
    %696 = vector.broadcast %695 : vector<1x40xf32> to vector<2x40xf32>
    %697 = arith.addf %694, %696 : vector<2x40xf32>
    %cst_473 = arith.constant 0.000000e+00 : f32
    %698 = vector.broadcast %cst_473 : f32 to vector<2x40xf32>
    %699 = arith.maximumf %697, %698 : vector<2x40xf32>
    %c776 = arith.constant 776 : index
    %c0_474 = arith.constant 0 : index
    %700 = vector.load %arg2[%c776, %c0_474] : memref<1176x40xf32, #tpu.memory_space<vmem>>, vector<40x40xf32>
    %cst_475 = arith.constant dense<0.000000e+00> : vector<2x40xf32>
    %701 = tpu.matmul %699, %700, %cst_475 {dimension_numbers = #tpu.dot_dimension_numbers<[1], [0], [0], [1], [0, 0, 1, 1], [], []>} : vector<2x40xf32>, vector<40x40xf32>, vector<2x40xf32> -> vector<2x40xf32>
    %c51 = arith.constant 51 : index
    %c0_476 = arith.constant 0 : index
    %702 = vector.load %arg1[%c51, %c0_476] : memref<67x40xf32, #tpu.memory_space<vmem>>, vector<1x40xf32>
    %703 = vector.broadcast %702 : vector<1x40xf32> to vector<2x40xf32>
    %704 = arith.addf %701, %703 : vector<2x40xf32>
    %cst_477 = arith.constant 5.000000e-01 : f32
    %705 = vector.broadcast %cst_477 : f32 to vector<2x40xf32>
    %706 = arith.mulf %705, %704 : vector<2x40xf32>
    %707 = math.tanh %706 : vector<2x40xf32>
    %cst_478 = arith.constant 1.000000e+00 : f32
    %708 = vector.broadcast %cst_478 : f32 to vector<2x40xf32>
    %709 = arith.addf %707, %708 : vector<2x40xf32>
    %cst_479 = arith.constant 5.000000e-01 : f32
    %710 = vector.broadcast %cst_479 : f32 to vector<2x40xf32>
    %711 = arith.mulf %710, %709 : vector<2x40xf32>
    %712 = arith.mulf %671, %711 : vector<2x40xf32>
    %713 = vector.shape_cast %712 : vector<2x40xf32> to vector<2x1x40xf32>
    %cst_480 = arith.constant 0.000000e+00 : f32
    %714 = vector.broadcast %cst_480 : f32 to vector<2x1x40xf32>
    %715 = arith.subf %714, %713 : vector<2x1x40xf32>
    %716 = vector.broadcast %715 : vector<2x1x40xf32> to vector<2x4x40xf32>
    %717 = arith.maximumf %716, %667 : vector<2x4x40xf32>
    %718 = vector.broadcast %713 : vector<2x1x40xf32> to vector<2x4x40xf32>
    %719 = arith.minimumf %718, %717 : vector<2x4x40xf32>
    %720 = arith.subf %667, %719 : vector<2x4x40xf32>
    %cst_481 = arith.constant 0.000000e+00 : f32
    %721 = vector.broadcast %cst_481 : f32 to vector<2x4x20xf32>
    %722 = tpu.concatenate %593, %721 in 2 : vector<2x4x20xf32>, vector<2x4x20xf32> -> vector<2x4x40xf32>
    %723 = arith.addf %720, %722 : vector<2x4x40xf32>
    %cst_482 = arith.constant dense<0.000000e+00> : vector<40xf32>
    %724 = vector.multi_reduction <add>, %723, %cst_482 [0, 1] : vector<2x4x40xf32> to vector<40xf32>
    %725 = vector.shape_cast %724 : vector<40xf32> to vector<1x1x40xf32>
    %cst_483 = arith.constant 1.250000e-01 : f32
    %726 = vector.broadcast %cst_483 : f32 to vector<1x1x40xf32>
    %727 = arith.mulf %725, %726 : vector<1x1x40xf32>
    %728 = vector.broadcast %727 : vector<1x1x40xf32> to vector<2x4x40xf32>
    %729 = arith.subf %723, %728 : vector<2x4x40xf32>
    %730 = arith.mulf %729, %729 : vector<2x4x40xf32>
    %cst_484 = arith.constant dense<0.000000e+00> : vector<40xf32>
    %731 = vector.multi_reduction <add>, %730, %cst_484 [0, 1] : vector<2x4x40xf32> to vector<40xf32>
    %732 = vector.shape_cast %731 : vector<40xf32> to vector<1x1x40xf32>
    %cst_485 = arith.constant 1.250000e-01 : f32
    %733 = vector.broadcast %cst_485 : f32 to vector<1x1x40xf32>
    %734 = arith.mulf %732, %733 : vector<1x1x40xf32>
    %cst_486 = arith.constant 9.99999974E-6 : f32
    %735 = vector.broadcast %cst_486 : f32 to vector<1x1x40xf32>
    %736 = arith.addf %734, %735 : vector<1x1x40xf32>
    %737 = math.rsqrt %736 : vector<1x1x40xf32>
    %c52 = arith.constant 52 : index
    %c0_487 = arith.constant 0 : index
    %738 = vector.load %arg1[%c52, %c0_487] : memref<67x40xf32, #tpu.memory_space<vmem>>, vector<1x40xf32>
    %739 = vector.shape_cast %738 : vector<1x40xf32> to vector<1x1x40xf32>
    %740 = arith.mulf %737, %739 : vector<1x1x40xf32>
    %741 = vector.broadcast %740 : vector<1x1x40xf32> to vector<2x4x40xf32>
    %742 = arith.mulf %729, %741 : vector<2x4x40xf32>
    %c53 = arith.constant 53 : index
    %c0_488 = arith.constant 0 : index
    %743 = vector.load %arg1[%c53, %c0_488] : memref<67x40xf32, #tpu.memory_space<vmem>>, vector<1x40xf32>
    %744 = vector.shape_cast %743 : vector<1x40xf32> to vector<1x1x40xf32>
    %745 = vector.broadcast %744 : vector<1x1x40xf32> to vector<2x4x40xf32>
    %746 = arith.addf %742, %745 : vector<2x4x40xf32>
    %cst_489 = arith.constant 0.000000e+00 : f32
    %747 = vector.broadcast %cst_489 : f32 to vector<2x4x40xf32>
    %748 = arith.maximumf %746, %747 : vector<2x4x40xf32>
    %c0_490 = arith.constant 0 : index
    %c1_491 = arith.constant 1 : index
    %c0_492 = arith.constant 0 : index
    %749 = vector.load %arg18[%c0_490, %c1_491, %c0_492] : memref<2x6x40xf32, #tpu.memory_space<vmem>>, vector<2x4x40xf32>
    tpu.vector_store %arg18[%c0_490, %c1_491, %c0_492], %748 {strides = array<i32>} : memref<2x6x40xf32, #tpu.memory_space<vmem>>, vector<2x4x40xf32>,
    %c0_493 = arith.constant 0 : index
    %c0_494 = arith.constant 0 : index
    %c0_495 = arith.constant 0 : index
    %750 = vector.load %arg18[%c0_493, %c0_494, %c0_495] : memref<2x6x40xf32, #tpu.memory_space<vmem>>, vector<2x4x40xf32>
    %c0_496 = arith.constant 0 : index
    %c1_497 = arith.constant 1 : index
    %c0_498 = arith.constant 0 : index
    %751 = vector.load %arg18[%c0_496, %c1_497, %c0_498] : memref<2x6x40xf32, #tpu.memory_space<vmem>>, vector<2x4x40xf32>
    %c0_499 = arith.constant 0 : index
    %c2_500 = arith.constant 2 : index
    %c0_501 = arith.constant 0 : index
    %752 = vector.load %arg18[%c0_499, %c2_500, %c0_501] : memref<2x6x40xf32, #tpu.memory_space<vmem>>, vector<2x4x40xf32>
    %753 = tpu.concatenate %750, %751, %752 in 2 : vector<2x4x40xf32>, vector<2x4x40xf32>, vector<2x4x40xf32> -> vector<2x4x120xf32>
    %754 = vector.shape_cast %753 : vector<2x4x120xf32> to vector<8x120xf32>
    %c816 = arith.constant 816 : index
    %c0_502 = arith.constant 0 : index
    %755 = vector.load %arg2[%c816, %c0_502] : memref<1176x40xf32, #tpu.memory_space<vmem>>, vector<120x40xf32>
    %cst_503 = arith.constant dense<0.000000e+00> : vector<8x40xf32>
    %756 = tpu.matmul %754, %755, %cst_503 {dimension_numbers = #tpu.dot_dimension_numbers<[1], [0], [0], [1], [0, 0, 1, 1], [], []>} : vector<8x120xf32>, vector<120x40xf32>, vector<8x40xf32> -> vector<8x40xf32>
    %c54 = arith.constant 54 : index
    %c0_504 = arith.constant 0 : index
    %757 = vector.load %arg1[%c54, %c0_504] : memref<67x40xf32, #tpu.memory_space<vmem>>, vector<1x40xf32>
    %758 = vector.broadcast %757 : vector<1x40xf32> to vector<8x40xf32>
    %759 = arith.addf %756, %758 : vector<8x40xf32>
    %760 = vector.shape_cast %759 : vector<8x40xf32> to vector<2x4x40xf32>
    %cst_505 = arith.constant dense<0.000000e+00> : vector<40xf32>
    %761 = vector.multi_reduction <add>, %760, %cst_505 [0, 1] : vector<2x4x40xf32> to vector<40xf32>
    %762 = vector.shape_cast %761 : vector<40xf32> to vector<1x1x40xf32>
    %cst_506 = arith.constant 1.250000e-01 : f32
    %763 = vector.broadcast %cst_506 : f32 to vector<1x1x40xf32>
    %764 = arith.mulf %762, %763 : vector<1x1x40xf32>
    %765 = vector.broadcast %764 : vector<1x1x40xf32> to vector<2x4x40xf32>
    %766 = arith.subf %760, %765 : vector<2x4x40xf32>
    %767 = arith.mulf %766, %766 : vector<2x4x40xf32>
    %cst_507 = arith.constant dense<0.000000e+00> : vector<40xf32>
    %768 = vector.multi_reduction <add>, %767, %cst_507 [0, 1] : vector<2x4x40xf32> to vector<40xf32>
    %769 = vector.shape_cast %768 : vector<40xf32> to vector<1x1x40xf32>
    %cst_508 = arith.constant 1.250000e-01 : f32
    %770 = vector.broadcast %cst_508 : f32 to vector<1x1x40xf32>
    %771 = arith.mulf %769, %770 : vector<1x1x40xf32>
    %cst_509 = arith.constant 9.99999974E-6 : f32
    %772 = vector.broadcast %cst_509 : f32 to vector<1x1x40xf32>
    %773 = arith.addf %771, %772 : vector<1x1x40xf32>
    %774 = math.rsqrt %773 : vector<1x1x40xf32>
    %c55 = arith.constant 55 : index
    %c0_510 = arith.constant 0 : index
    %775 = vector.load %arg1[%c55, %c0_510] : memref<67x40xf32, #tpu.memory_space<vmem>>, vector<1x40xf32>
    %776 = vector.shape_cast %775 : vector<1x40xf32> to vector<1x1x40xf32>
    %777 = arith.mulf %774, %776 : vector<1x1x40xf32>
    %778 = vector.broadcast %777 : vector<1x1x40xf32> to vector<2x4x40xf32>
    %779 = arith.mulf %766, %778 : vector<2x4x40xf32>
    %c56 = arith.constant 56 : index
    %c0_511 = arith.constant 0 : index
    %780 = vector.load %arg1[%c56, %c0_511] : memref<67x40xf32, #tpu.memory_space<vmem>>, vector<1x40xf32>
    %781 = vector.shape_cast %780 : vector<1x40xf32> to vector<1x1x40xf32>
    %782 = vector.broadcast %781 : vector<1x1x40xf32> to vector<2x4x40xf32>
    %783 = arith.addf %779, %782 : vector<2x4x40xf32>
    %cst_512 = arith.constant 0.000000e+00 : f32
    %784 = vector.broadcast %cst_512 : f32 to vector<2x4x40xf32>
    %785 = arith.maximumf %783, %784 : vector<2x4x40xf32>
    %c0_513 = arith.constant 0 : index
    %c1_514 = arith.constant 1 : index
    %c0_515 = arith.constant 0 : index
    %786 = vector.load %arg19[%c0_513, %c1_514, %c0_515] : memref<2x6x40xf32, #tpu.memory_space<vmem>>, vector<2x4x40xf32>
    tpu.vector_store %arg19[%c0_513, %c1_514, %c0_515], %785 {strides = array<i32>} : memref<2x6x40xf32, #tpu.memory_space<vmem>>, vector<2x4x40xf32>,
    %c0_516 = arith.constant 0 : index
    %c0_517 = arith.constant 0 : index
    %c0_518 = arith.constant 0 : index
    %787 = vector.load %arg19[%c0_516, %c0_517, %c0_518] : memref<2x6x40xf32, #tpu.memory_space<vmem>>, vector<2x4x40xf32>
    %c0_519 = arith.constant 0 : index
    %c1_520 = arith.constant 1 : index
    %c0_521 = arith.constant 0 : index
    %788 = vector.load %arg19[%c0_519, %c1_520, %c0_521] : memref<2x6x40xf32, #tpu.memory_space<vmem>>, vector<2x4x40xf32>
    %c0_522 = arith.constant 0 : index
    %c2_523 = arith.constant 2 : index
    %c0_524 = arith.constant 0 : index
    %789 = vector.load %arg19[%c0_522, %c2_523, %c0_524] : memref<2x6x40xf32, #tpu.memory_space<vmem>>, vector<2x4x40xf32>
    %790 = tpu.concatenate %787, %788, %789 in 2 : vector<2x4x40xf32>, vector<2x4x40xf32>, vector<2x4x40xf32> -> vector<2x4x120xf32>
    %791 = vector.shape_cast %790 : vector<2x4x120xf32> to vector<8x120xf32>
    %c936 = arith.constant 936 : index
    %c0_525 = arith.constant 0 : index
    %792 = vector.load %arg2[%c936, %c0_525] : memref<1176x40xf32, #tpu.memory_space<vmem>>, vector<120x40xf32>
    %cst_526 = arith.constant dense<0.000000e+00> : vector<8x40xf32>
    %793 = tpu.matmul %791, %792, %cst_526 {dimension_numbers = #tpu.dot_dimension_numbers<[1], [0], [0], [1], [0, 0, 1, 1], [], []>} : vector<8x120xf32>, vector<120x40xf32>, vector<8x40xf32> -> vector<8x40xf32>
    %c57 = arith.constant 57 : index
    %c0_527 = arith.constant 0 : index
    %794 = vector.load %arg1[%c57, %c0_527] : memref<67x40xf32, #tpu.memory_space<vmem>>, vector<1x40xf32>
    %795 = vector.broadcast %794 : vector<1x40xf32> to vector<8x40xf32>
    %796 = arith.addf %793, %795 : vector<8x40xf32>
    %797 = vector.shape_cast %796 : vector<8x40xf32> to vector<2x4x40xf32>
    %798 = math.absf %797 : vector<2x4x40xf32>
    %cst_528 = arith.constant dense<0.000000e+00> : vector<2x40xf32>
    %799 = vector.multi_reduction <add>, %798, %cst_528 [1] : vector<2x4x40xf32> to vector<2x40xf32>
    %cst_529 = arith.constant 4.000000e+00 : f32
    %800 = vector.broadcast %cst_529 : f32 to vector<2x40xf32>
    %801 = arith.divf %799, %800 : vector<2x40xf32>
    %c1056 = arith.constant 1056 : index
    %c0_530 = arith.constant 0 : index
    %802 = vector.load %arg2[%c1056, %c0_530] : memref<1176x40xf32, #tpu.memory_space<vmem>>, vector<40x40xf32>
    %cst_531 = arith.constant dense<0.000000e+00> : vector<2x40xf32>
    %803 = tpu.matmul %801, %802, %cst_531 {dimension_numbers = #tpu.dot_dimension_numbers<[1], [0], [0], [1], [0, 0, 1, 1], [], []>} : vector<2x40xf32>, vector<40x40xf32>, vector<2x40xf32> -> vector<2x40xf32>
    %c58 = arith.constant 58 : index
    %c0_532 = arith.constant 0 : index
    %804 = vector.load %arg1[%c58, %c0_532] : memref<67x40xf32, #tpu.memory_space<vmem>>, vector<1x40xf32>
    %805 = vector.broadcast %804 : vector<1x40xf32> to vector<2x40xf32>
    %806 = arith.addf %803, %805 : vector<2x40xf32>
    %cst_533 = arith.constant dense<0.000000e+00> : vector<40xf32>
    %807 = vector.multi_reduction <add>, %806, %cst_533 [0] : vector<2x40xf32> to vector<40xf32>
    %808 = vector.shape_cast %807 : vector<40xf32> to vector<1x40xf32>
    %cst_534 = arith.constant 5.000000e-01 : f32
    %809 = vector.broadcast %cst_534 : f32 to vector<1x40xf32>
    %810 = arith.mulf %808, %809 : vector<1x40xf32>
    %811 = vector.broadcast %810 : vector<1x40xf32> to vector<2x40xf32>
    %812 = arith.subf %806, %811 : vector<2x40xf32>
    %813 = arith.mulf %812, %812 : vector<2x40xf32>
    %cst_535 = arith.constant dense<0.000000e+00> : vector<40xf32>
    %814 = vector.multi_reduction <add>, %813, %cst_535 [0] : vector<2x40xf32> to vector<40xf32>
    %815 = vector.shape_cast %814 : vector<40xf32> to vector<1x40xf32>
    %cst_536 = arith.constant 5.000000e-01 : f32
    %816 = vector.broadcast %cst_536 : f32 to vector<1x40xf32>
    %817 = arith.mulf %815, %816 : vector<1x40xf32>
    %cst_537 = arith.constant 9.99999974E-6 : f32
    %818 = vector.broadcast %cst_537 : f32 to vector<1x40xf32>
    %819 = arith.addf %817, %818 : vector<1x40xf32>
    %820 = math.rsqrt %819 : vector<1x40xf32>
    %c59 = arith.constant 59 : index
    %c0_538 = arith.constant 0 : index
    %821 = vector.load %arg1[%c59, %c0_538] : memref<67x40xf32, #tpu.memory_space<vmem>>, vector<1x40xf32>
    %822 = arith.mulf %820, %821 : vector<1x40xf32>
    %823 = vector.broadcast %822 : vector<1x40xf32> to vector<2x40xf32>
    %824 = arith.mulf %812, %823 : vector<2x40xf32>
    %c60 = arith.constant 60 : index
    %c0_539 = arith.constant 0 : index
    %825 = vector.load %arg1[%c60, %c0_539] : memref<67x40xf32, #tpu.memory_space<vmem>>, vector<1x40xf32>
    %826 = vector.broadcast %825 : vector<1x40xf32> to vector<2x40xf32>
    %827 = arith.addf %824, %826 : vector<2x40xf32>
    %cst_540 = arith.constant 0.000000e+00 : f32
    %828 = vector.broadcast %cst_540 : f32 to vector<2x40xf32>
    %829 = arith.maximumf %827, %828 : vector<2x40xf32>
    %c1096 = arith.constant 1096 : index
    %c0_541 = arith.constant 0 : index
    %830 = vector.load %arg2[%c1096, %c0_541] : memref<1176x40xf32, #tpu.memory_space<vmem>>, vector<40x40xf32>
    %cst_542 = arith.constant dense<0.000000e+00> : vector<2x40xf32>
    %831 = tpu.matmul %829, %830, %cst_542 {dimension_numbers = #tpu.dot_dimension_numbers<[1], [0], [0], [1], [0, 0, 1, 1], [], []>} : vector<2x40xf32>, vector<40x40xf32>, vector<2x40xf32> -> vector<2x40xf32>
    %c61 = arith.constant 61 : index
    %c0_543 = arith.constant 0 : index
    %832 = vector.load %arg1[%c61, %c0_543] : memref<67x40xf32, #tpu.memory_space<vmem>>, vector<1x40xf32>
    %833 = vector.broadcast %832 : vector<1x40xf32> to vector<2x40xf32>
    %834 = arith.addf %831, %833 : vector<2x40xf32>
    %cst_544 = arith.constant 5.000000e-01 : f32
    %835 = vector.broadcast %cst_544 : f32 to vector<2x40xf32>
    %836 = arith.mulf %835, %834 : vector<2x40xf32>
    %837 = math.tanh %836 : vector<2x40xf32>
    %cst_545 = arith.constant 1.000000e+00 : f32
    %838 = vector.broadcast %cst_545 : f32 to vector<2x40xf32>
    %839 = arith.addf %837, %838 : vector<2x40xf32>
    %cst_546 = arith.constant 5.000000e-01 : f32
    %840 = vector.broadcast %cst_546 : f32 to vector<2x40xf32>
    %841 = arith.mulf %840, %839 : vector<2x40xf32>
    %842 = arith.mulf %801, %841 : vector<2x40xf32>
    %843 = vector.shape_cast %842 : vector<2x40xf32> to vector<2x1x40xf32>
    %cst_547 = arith.constant 0.000000e+00 : f32
    %844 = vector.broadcast %cst_547 : f32 to vector<2x1x40xf32>
    %845 = arith.subf %844, %843 : vector<2x1x40xf32>
    %846 = vector.broadcast %845 : vector<2x1x40xf32> to vector<2x4x40xf32>
    %847 = arith.maximumf %846, %797 : vector<2x4x40xf32>
    %848 = vector.broadcast %843 : vector<2x1x40xf32> to vector<2x4x40xf32>
    %849 = arith.minimumf %848, %847 : vector<2x4x40xf32>
    %850 = arith.subf %797, %849 : vector<2x4x40xf32>
    %851 = arith.addf %850, %723 : vector<2x4x40xf32>
    %cst_548 = arith.constant dense<0.000000e+00> : vector<40xf32>
    %852 = vector.multi_reduction <add>, %851, %cst_548 [0, 1] : vector<2x4x40xf32> to vector<40xf32>
    %853 = vector.shape_cast %852 : vector<40xf32> to vector<1x1x40xf32>
    %cst_549 = arith.constant 1.250000e-01 : f32
    %854 = vector.broadcast %cst_549 : f32 to vector<1x1x40xf32>
    %855 = arith.mulf %853, %854 : vector<1x1x40xf32>
    %856 = vector.broadcast %855 : vector<1x1x40xf32> to vector<2x4x40xf32>
    %857 = arith.subf %851, %856 : vector<2x4x40xf32>
    %858 = arith.mulf %857, %857 : vector<2x4x40xf32>
    %cst_550 = arith.constant dense<0.000000e+00> : vector<40xf32>
    %859 = vector.multi_reduction <add>, %858, %cst_550 [0, 1] : vector<2x4x40xf32> to vector<40xf32>
    %860 = vector.shape_cast %859 : vector<40xf32> to vector<1x1x40xf32>
    %cst_551 = arith.constant 1.250000e-01 : f32
    %861 = vector.broadcast %cst_551 : f32 to vector<1x1x40xf32>
    %862 = arith.mulf %860, %861 : vector<1x1x40xf32>
    %cst_552 = arith.constant 9.99999974E-6 : f32
    %863 = vector.broadcast %cst_552 : f32 to vector<1x1x40xf32>
    %864 = arith.addf %862, %863 : vector<1x1x40xf32>
    %865 = math.rsqrt %864 : vector<1x1x40xf32>
    %c62 = arith.constant 62 : index
    %c0_553 = arith.constant 0 : index
    %866 = vector.load %arg1[%c62, %c0_553] : memref<67x40xf32, #tpu.memory_space<vmem>>, vector<1x40xf32>
    %867 = vector.shape_cast %866 : vector<1x40xf32> to vector<1x1x40xf32>
    %868 = arith.mulf %865, %867 : vector<1x1x40xf32>
    %869 = vector.broadcast %868 : vector<1x1x40xf32> to vector<2x4x40xf32>
    %870 = arith.mulf %857, %869 : vector<2x4x40xf32>
    %c63 = arith.constant 63 : index
    %c0_554 = arith.constant 0 : index
    %871 = vector.load %arg1[%c63, %c0_554] : memref<67x40xf32, #tpu.memory_space<vmem>>, vector<1x40xf32>
    %872 = vector.shape_cast %871 : vector<1x40xf32> to vector<1x1x40xf32>
    %873 = vector.broadcast %872 : vector<1x1x40xf32> to vector<2x4x40xf32>
    %874 = arith.addf %870, %873 : vector<2x4x40xf32>
    %cst_555 = arith.constant 0.000000e+00 : f32
    %875 = vector.broadcast %cst_555 : f32 to vector<2x4x40xf32>
    %876 = arith.maximumf %874, %875 : vector<2x4x40xf32>
    %cst_556 = arith.constant dense<0.000000e+00> : vector<2x40xf32>
    %877 = vector.multi_reduction <add>, %876, %cst_556 [1] : vector<2x4x40xf32> to vector<2x40xf32>
    %cst_557 = arith.constant 4.000000e+00 : f32
    %878 = vector.broadcast %cst_557 : f32 to vector<2x40xf32>
    %879 = arith.divf %877, %878 : vector<2x40xf32>
    %c1136 = arith.constant 1136 : index
    %c0_558 = arith.constant 0 : index
    %880 = vector.load %arg2[%c1136, %c0_558] : memref<1176x40xf32, #tpu.memory_space<vmem>>, vector<40x20xf32>
    %cst_559 = arith.constant dense<0.000000e+00> : vector<2x20xf32>
    %881 = tpu.matmul %879, %880, %cst_559 {dimension_numbers = #tpu.dot_dimension_numbers<[1], [0], [0], [1], [0, 0, 1, 1], [], []>} : vector<2x40xf32>, vector<40x20xf32>, vector<2x20xf32> -> vector<2x20xf32>
    %c64 = arith.constant 64 : index
    %c0_560 = arith.constant 0 : index
    %882 = vector.load %arg1[%c64, %c0_560] : memref<67x40xf32, #tpu.memory_space<vmem>>, vector<1x20xf32>
    %883 = vector.broadcast %882 : vector<1x20xf32> to vector<2x20xf32>
    %884 = arith.addf %881, %883 : vector<2x20xf32>
    %c65 = arith.constant 65 : index
    %c0_561 = arith.constant 0 : index
    %885 = vector.load %arg1[%c65, %c0_561] : memref<67x40xf32, #tpu.memory_space<vmem>>, vector<1x20xf32>
    %886 = vector.broadcast %885 : vector<1x20xf32> to vector<2x20xf32>
    %887 = arith.mulf %884, %886 : vector<2x20xf32>
    %cst_562 = arith.constant dense<0.000000e+00> : vector<2xf32>
    %888 = vector.multi_reduction <add>, %887, %cst_562 [1] : vector<2x20xf32> to vector<2xf32>
    %889 = vector.shape_cast %888 : vector<2xf32> to vector<2x1xf32>
    %c66 = arith.constant 66 : index
    %c0_563 = arith.constant 0 : index
    %890 = vector.load %arg1[%c66, %c0_563] : memref<67x40xf32, #tpu.memory_space<vmem>>, vector<1x1xf32>
    %891 = vector.broadcast %890 : vector<1x1xf32> to vector<2x1xf32>
    %892 = arith.addf %889, %891 : vector<2x1xf32>
    %c0_564 = arith.constant 0 : index
    %c0_565 = arith.constant 0 : index
    %893 = vector.load %arg3[%c0_564, %c0_565] : memref<2x1xf32, #tpu.memory_space<vmem>>, vector<2x1xf32>
    tpu.vector_store %arg3[%c0_564, %c0_565], %892 {strides = array<i32>} : memref<2x1xf32, #tpu.memory_space<vmem>>, vector<2x1xf32>,
    return
  }
}

</mosaic_0001>

<bundles_post_ra>
// kernel: drsnet_forward.1
= control target key start
LH: loop header
LB: loop body
LE: loop exit
PB: predicated region body
PF: predicated region fallthrough
CT: control target
= control target key end

     0   :  { %s6402_s16 = smov 126   ;;  %s6403_s21 = smov 2   ;;  %vm524_vm0 = vcmask 1044480   ;;  %vm388_vm1 = vcmask 15360   ;;  %vm427_vm2 = vcmask 39936   ;;  %vm14_vm3 = vcmask 33792   ;;  %s8317_s0 = inlined_call_operand.vmem [shape: f32[2,129,4], index: 0, kind: input, shape index: {}]   ;;  %s8318_s2 = inlined_call_operand.vmem [shape: f32[1176,40], index: 2, kind: input, shape index: {}]   ;;  %s8319_s1 = inlined_call_operand.vmem [shape: f32[67,40], index: 1, kind: input, shape index: {}]   ;;  %s8320_s3 = inlined_call_operand.vmem [shape: f32[2,1], index: 3, kind: output, shape index: {}]  }
   0x1   :  { %v69_v0 = vld [vmem:[%s8317_s0 + $0x8] sm:$0xff]  ;;  %v68_v1 = vld [vmem:[%s8317_s0] sm:$0xff]  ;;  %v102_v4 = vld [vmem:[%s8317_s0 + $0x11] sm:$0xff]  ;;  %s6406_s23 = smov 10   ;;  %vm1061_vm4 = vcmask 1040384   ;;  %s6407_s28 = smov 15  }
   0x2   :  { %166 = vrot.lane.b32.xlu1 %v69_v0, %s6402_s16  ;;  %164 = vrot.lane.b32.xlu0 %v68_v1, %s6402_s16  ;;  %v101_v2 = vld [vmem:[%s8317_s0 + $0x9] sm:$0xff]  ;;  %v100_v3 = vld [vmem:[%s8317_s0 + $0x1] sm:$0xff]  ;;  %vm6408_vm5 = vmmov 1   ;;  %s6409_s29 = smov 20   ;;  %vm1000_vm7 = vcmask 80896   ;;  %vm1009_vm8 = vcmask 121856  }
   0x3   :  { %v70_v5 = vld [vmem:[%s8317_s0 + $0x10] sm:$0xff]  ;;  %v103_v6 = vld [vmem:[%s8317_s0 + $0x19] sm:$0xff]  ;;  %v104_v8 = vld [vmem:[%s8317_s0 + $0x21] sm:$0xff]  ;;  %vm1018_vm9 = vcmask 162816   ;;  %vm1036_vm10 = vcmask 203776   ;;  %vm17_vm11 = vcmask 73728  }
   0x4   :  { %v71_v7 = vld [vmem:[%s8317_s0 + $0x18] sm:$0xff]  ;;  %v72_v9 = vld [vmem:[%s8317_s0 + $0x20] sm:$0xff]  ;;  %v105_v10 = vld [vmem:[%s8317_s0 + $0x29] sm:$0xff]  ;;  %vm1375_vm12 = vcmask 1045504   ;;  %vm1362_vm14 = vcmask 244736   ;;  %vm1728_vm15 = vcmask 1041408  }
   0x5   :  { %v73_v11 = vld [vmem:[%s8317_s0 + $0x28] sm:$0xff]  ;;  %v106_v12 = vld [vmem:[%s8317_s0 + $0x31] sm:$0xff]  ;;  %v421_v14 = vld [vmem:[%s8318_s2] sm:$0x1f]  ;;  %s6412_s20 = smov 40   ;;  %s6413_s6 = smov 80  }
   0x6   :  { %294 = vrot.lane.b32.xlu1 %v101_v2, %s6403_s21  ;;  %292 = vrot.lane.b32.xlu0 %v100_v3, %s6403_s21  ;;  %v74_v13 = vld [vmem:[%s8317_s0 + $0x30] sm:$0xff]  ;;  %v107_v15 = vld [vmem:[%s8317_s0 + $0x39] sm:$0xff]  ;;  %vm6097_vm6 = vmpackc.low %vm1061_vm4, %vm6408_vm5  ;;  %vm38_vm4 = vcmask 155648  }
   0x7   :  { %5651 = vmatprep.subr.msk.mxu0 %vm524_vm0, %v421_v14  ;;  %v75_v16 = vld [vmem:[%s8317_s0 + $0x38] sm:$0xff]  ;;  %v108_v17 = vld [vmem:[%s8317_s0 + $0x41] sm:$0xff]  ;;  %v109_v19 = vld [vmem:[%s8317_s0 + $0x49] sm:$0xff] }
   0x8   :  { %5652 = vmatpush3.msk.msra.mxu0 %vm524_vm0, %v421_v14  ;;  %v76_v18 = vld [vmem:[%s8317_s0 + $0x40] sm:$0xff]  ;;  %v77_v20 = vld [vmem:[%s8317_s0 + $0x48] sm:$0xff]  ;;  %v110_v21 = vld [vmem:[%s8317_s0 + $0x51] sm:$0xff] }
   0x9   :  { %v78_v22 = vld [vmem:[%s8317_s0 + $0x50] sm:$0xff]  ;;  %v111_v23 = vld [vmem:[%s8317_s0 + $0x59] sm:$0xff]  ;;  %v112_v25 = vld [vmem:[%s8317_s0 + $0x61] sm:$0xff] }
   0xa   :  { %296 = vrot.lane.b32.xlu1 %v102_v4, %s6403_s21  ;;  %168 = vrot.lane.b32.xlu0 %v70_v5, %s6402_s16  ;;  %v79_v24 = vld [vmem:[%s8317_s0 + $0x58] sm:$0xff]  ;;  %v80_v26 = vld [vmem:[%s8317_s0 + $0x60] sm:$0xff]  ;;  %vm7010_vm13 = vmpackc.low %vm1375_vm12, %vm6408_vm5  ;;  %vm4084_vm12 = vcmask 322560  }
   0xb   :  { %v113_v27 = vld [vmem:[%s8317_s0 + $0x69] sm:$0xff]  ;;  %v114_v29 = vld [vmem:[%s8317_s0 + $0x71] sm:$0xff]  ;;  %v115_v31 = vld [vmem:[%s8317_s0 + $0x79] sm:$0xff] }
   0xc   :  { %v81_v28 = vld [vmem:[%s8317_s0 + $0x68] sm:$0xff]  ;;  %v82_v30 = vld [vmem:[%s8317_s0 + $0x70] sm:$0xff]  ;;  %v83_v32 = vld [vmem:[%s8317_s0 + $0x78] sm:$0xff] }
   0xd   :  { %v116_v33 = vld [vmem:[%s8317_s0 + $0x89] sm:$0xff]  ;;  %v117_v35 = vld [vmem:[%s8317_s0 + $0x91] sm:$0xff]  ;;  %v118_v37 = vld [vmem:[%s8317_s0 + $0x99] sm:$0xff] }
   0xe   :  { %298 = vrot.lane.b32.xlu1 %v103_v6, %s6403_s21  ;;  %170 = vrot.lane.b32.xlu0 %v71_v7, %s6402_s16  ;;  %v84_v34 = vld [vmem:[%s8317_s0 + $0x88] sm:$0xff]  ;;  %v85_v36 = vld [vmem:[%s8317_s0 + $0x90] sm:$0xff]  ;;  %vm7112_vm0 = vmpackc.low %vm1728_vm15, %vm6408_vm5  ;;  %vm4360_vm15 = vcmask 320512  }
   0xf   :  { %v86_v38 = vld [vmem:[%s8317_s0 + $0x98] sm:$0xff]  ;;  %v119_v39 = vld [vmem:[%s8317_s0 + $0xa1] sm:$0xff]  ;;  %v120_v41 = vld [vmem:[%s8317_s0 + $0xa9] sm:$0xff] }
  0x10   :  { %v87_v40 = vld [vmem:[%s8317_s0 + $0xa0] sm:$0xff]  ;;  %v88_v42 = vld [vmem:[%s8317_s0 + $0xa8] sm:$0xff]  ;;  %v121_v43 = vld [vmem:[%s8317_s0 + $0xb1] sm:$0xff] }
  0x11   :  { %v89_v44 = vld [vmem:[%s8317_s0 + $0xb0] sm:$0xff]  ;;  %v122_v45 = vld [vmem:[%s8317_s0 + $0xb9] sm:$0xff]  ;;  %v123_v47 = vld [vmem:[%s8317_s0 + $0xc1] sm:$0xff] }
  0x12   :  { %300 = vrot.lane.b32.xlu1 %v104_v8, %s6403_s21  ;;  %172 = vrot.lane.b32.xlu0 %v72_v9, %s6402_s16  ;;  %v90_v46 = vld [vmem:[%s8317_s0 + $0xb8] sm:$0xff]  ;;  %v91_v48 = vld [vmem:[%s8317_s0 + $0xc0] sm:$0xff] }
  0x13   :  { %v124_v49 = vld [vmem:[%s8317_s0 + $0xc9] sm:$0xff]  ;;  %v125_v51 = vld [vmem:[%s8317_s0 + $0xd1] sm:$0xff]  ;;  %v126_v53 = vld [vmem:[%s8317_s0 + $0xd9] sm:$0xff] }
  0x14   :  { %v92_v50 = vld [vmem:[%s8317_s0 + $0xc8] sm:$0xff]  ;;  %v93_v52 = vld [vmem:[%s8317_s0 + $0xd0] sm:$0xff]  ;;  %v94_v54 = vld [vmem:[%s8317_s0 + $0xd8] sm:$0xff] }
  0x15   :  { %v127_v55 = vld [vmem:[%s8317_s0 + $0xe1] sm:$0xff]  ;;  %v128_v57 = vld [vmem:[%s8317_s0 + $0xe9] sm:$0xff]  ;;  %v129_v59 = vld [vmem:[%s8317_s0 + $0xf1] sm:$0xff] }
  0x16   :  { %302 = vrot.lane.b32.xlu1 %v105_v10, %s6403_s21  ;;  %174 = vrot.lane.b32.xlu0 %v73_v11, %s6402_s16  ;;  %v95_v56 = vld [vmem:[%s8317_s0 + $0xe0] sm:$0xff]  ;;  %v96_v58 = vld [vmem:[%s8317_s0 + $0xe8] sm:$0xff] }
  0x17   :  { %v97_v60 = vld [vmem:[%s8317_s0 + $0xf0] sm:$0xff]  ;;  %v130_v63 = vld [vmem:[%s8317_s0 + $0xf9] sm:$0xff]  ;;  %v131_v5 = vld [vmem:[%s8317_s0 + $0x101] sm:$0xff] }
  0x18   :  { %v98_v0 = vld [vmem:[%s8317_s0 + $0xf8] sm:$0xff]  ;;  %v99_v6 = vld [vmem:[%s8317_s0 + $0x100] sm:$0xff] }
  0x1a   :  { %304 = vrot.lane.b32.xlu1 %v106_v12, %s6403_s21  ;;  %176 = vrot.lane.b32.xlu0 %v74_v13, %s6402_s16 }
  0x1e   :  { %306 = vrot.lane.b32.xlu1 %v107_v15, %s6403_s21  ;;  %178 = vrot.lane.b32.xlu0 %v75_v16, %s6402_s16 }
  0x22   :  { %308 = vrot.lane.b32.xlu1 %v108_v17, %s6403_s21  ;;  %180 = vrot.lane.b32.xlu0 %v76_v18, %s6402_s16 }
  0x26   :  { %310 = vrot.lane.b32.xlu1 %v109_v19, %s6403_s21  ;;  %182 = vrot.lane.b32.xlu0 %v77_v20, %s6402_s16 }
  0x2a   :  { %312 = vrot.lane.b32.xlu1 %v110_v21, %s6403_s21  ;;  %184 = vrot.lane.b32.xlu0 %v78_v22, %s6402_s16 }
  0x2e   :  { %314 = vrot.lane.b32.xlu1 %v111_v23, %s6403_s21  ;;  %186 = vrot.lane.b32.xlu0 %v79_v24, %s6402_s16 }
  0x32   :  { %316 = vrot.lane.b32.xlu1 %v112_v25, %s6403_s21  ;;  %188 = vrot.lane.b32.xlu0 %v80_v26, %s6402_s16 }
  0x36   :  { %318 = vrot.lane.b32.xlu1 %v113_v27, %s6403_s21  ;;  %190 = vrot.lane.b32.xlu0 %v81_v28, %s6402_s16 }
  0x3a   :  { %320 = vrot.lane.b32.xlu1 %v114_v29, %s6403_s21  ;;  %192 = vrot.lane.b32.xlu0 %v82_v30, %s6402_s16 }
  0x3e   :  { %322 = vrot.lane.b32.xlu1 %v115_v31, %s6403_s21  ;;  %194 = vrot.lane.b32.xlu0 %v83_v32, %s6402_s16 }
  0x42   :  { %324 = vrot.lane.b32.xlu1 %v116_v33, %s6403_s21  ;;  %196 = vrot.lane.b32.xlu0 %v84_v34, %s6402_s16 }
  0x46   :  { %326 = vrot.lane.b32.xlu1 %v117_v35, %s6403_s21  ;;  %198 = vrot.lane.b32.xlu0 %v85_v36, %s6402_s16 }
  0x4a   :  { %328 = vrot.lane.b32.xlu1 %v118_v37, %s6403_s21  ;;  %200 = vrot.lane.b32.xlu0 %v86_v38, %s6402_s16 }
  0x4e   :  { %330 = vrot.lane.b32.xlu1 %v119_v39, %s6403_s21  ;;  %202 = vrot.lane.b32.xlu0 %v87_v40, %s6402_s16 }
  0x52   :  { %332 = vrot.lane.b32.xlu1 %v120_v41, %s6403_s21  ;;  %204 = vrot.lane.b32.xlu0 %v88_v42, %s6402_s16 }
  0x56   :  { %334 = vrot.lane.b32.xlu1 %v121_v43, %s6403_s21  ;;  %206 = vrot.lane.b32.xlu0 %v89_v44, %s6402_s16 }
  0x5a   :  { %336 = vrot.lane.b32.xlu1 %v122_v45, %s6403_s21  ;;  %208 = vrot.lane.b32.xlu0 %v90_v46, %s6402_s16 }
  0x5e   :  { %338 = vrot.lane.b32.xlu1 %v123_v47, %s6403_s21  ;;  %210 = vrot.lane.b32.xlu0 %v91_v48, %s6402_s16 }
  0x62   :  { %340 = vrot.lane.b32.xlu1 %v124_v49, %s6403_s21  ;;  %212 = vrot.lane.b32.xlu0 %v92_v50, %s6402_s16 }
  0x66   :  { %342 = vrot.lane.b32.xlu1 %v125_v51, %s6403_s21  ;;  %214 = vrot.lane.b32.xlu0 %v93_v52, %s6402_s16 }
  0x6a   :  { %344 = vrot.lane.b32.xlu1 %v126_v53, %s6403_s21  ;;  %216 = vrot.lane.b32.xlu0 %v94_v54, %s6402_s16 }
  0x6e   :  { %346 = vrot.lane.b32.xlu1 %v127_v55, %s6403_s21  ;;  %218 = vrot.lane.b32.xlu0 %v95_v56, %s6402_s16 }
  0x72   :  { %348 = vrot.lane.b32.xlu1 %v128_v57, %s6403_s21  ;;  %220 = vrot.lane.b32.xlu0 %v96_v58, %s6402_s16 }
  0x74   :  { %v167_v61 = vpop.permute.xlu1 %166  ;;  %v165_v62 = vpop.permute.xlu0 %164 }
  0x76   :  { %350 = vrot.lane.b32.xlu1 %v129_v59, %s6403_s21  ;;  %222 = vrot.lane.b32.xlu0 %v97_v60, %s6402_s16 }
  0x78   :  { %v295_v1 = vpop.permute.xlu1 %294  ;;  %v293_v2 = vpop.permute.xlu0 %292 }
  0x79   :  { %v390_v3 = vsel %vm388_vm1, %v167_v61, %v295_v1  ;;  %v389_v4 = vsel %vm388_vm1, %v165_v62, %v293_v2 }
  0x7a   :  { %352 = vrot.lane.b32.xlu1 %v130_v63, %s6403_s21  ;;  %224 = vrot.lane.b32.xlu0 %v98_v0, %s6402_s16 }
  0x7b   :  { %5653 = vmatprep.mubr.msk.f32.mxu0 %vm427_vm2, %v389_v4 }
  0x7c   :  { %5654 = vmatmul.mubr.msk.f32.vlgmr.msra.gmra.mrb[0].mxu0 %vm427_vm2, %v390_v3  ;;  %v297_v7 = vpop.permute.xlu1 %296  ;;  %v169_v8 = vpop.permute.xlu0 %168 }
  0x7d   :  { %v391_v9 = vsel %vm388_vm1, %v169_v8, %v297_v7 }
  0x7e   :  { %354 = vrot.lane.b32.xlu1 %v131_v5, %s6403_s21  ;;  %226 = vrot.lane.b32.xlu0 %v99_v6, %s6402_s16  ;;  %s6405_s21 = smov 5  }
  0x7f   :  { %5656 = vmatprep.mubr.msk.f32.mxu0 %vm427_vm2, %v391_v9 }
  0x80   :  { %v299_v10 = vpop.permute.xlu1 %298  ;;  %v171_v11 = vpop.permute.xlu0 %170 }
  0x81   :  { %v392_v12 = vsel %vm388_vm1, %v171_v11, %v299_v10 }
  0x82   :  { %5657 = vmatmul.mubr.msk.f32.gmra.mrb[2].mxu0 %vm427_vm2, %v392_v12 }
  0x84   :  { %v301_v13 = vpop.permute.xlu1 %300  ;;  %v173_v14 = vpop.permute.xlu0 %172 }
  0x85   :  { %v393_v15 = vsel %vm388_vm1, %v173_v14, %v301_v13 }
  0x86   :  { %5659 = vmatprep.mubr.msk.f32.mxu0 %vm427_vm2, %v393_v15  ;;  %v6404_v15 = vmov 0.0  }
  0x87   :  { %15 = vst.msk [vmem:[#allocation2] sm:$0x3] %vm14_vm3, %v6404_v15  ;;  %16 = vst.msk [vmem:[#allocation2 + $0x88] sm:$0x3] %vm14_vm3, %v6404_v15  ;;  %vm1802_vm3 = vcmask 74752  }
  0x88   :  { %v303_v16 = vpop.permute.xlu1 %302  ;;  %v175_v17 = vpop.permute.xlu0 %174  ;;  %18 = vst.msk [vmem:[#allocation3] sm:$0x1] %vm17_vm11, %v6404_v15  ;;  %19 = vst.msk [vmem:[#allocation3 + $0x28] sm:$0x1] %vm17_vm11, %v6404_v15 }
  0x89   :  { %v394_v18 = vsel %vm388_vm1, %v175_v17, %v303_v16  ;;  %22 = vst.msk [vmem:[#allocation4] sm:$0x1] %vm17_vm11, %v6404_v15  ;;  %23 = vst.msk [vmem:[#allocation4 + $0x18] sm:$0x1] %vm17_vm11, %v6404_v15 }
  0x8a   :  { %5660 = vmatmul.mubr.msk.f32.gmra.mrb[4].mxu0 %vm427_vm2, %v394_v18  ;;  %24 = vst.msk [vmem:[#allocation4 + $0x11] sm:$0x1] %vm17_vm11, %v6404_v15  ;;  %25 = vst.msk [vmem:[#allocation4 + $0x29] sm:$0x1] %vm17_vm11, %v6404_v15 }
  0x8b   :  { %26 = vst.msk [vmem:[#allocation6] sm:$0x1] %vm17_vm11, %v6404_v15  ;;  %27 = vst.msk [vmem:[#allocation6 + $0x18] sm:$0x1] %vm17_vm11, %v6404_v15 }
  0x8c   :  { %v305_v19 = vpop.permute.xlu1 %304  ;;  %v177_v20 = vpop.permute.xlu0 %176  ;;  %28 = vst.msk [vmem:[#allocation6 + $0x11] sm:$0x1] %vm17_vm11, %v6404_v15  ;;  %29 = vst.msk [vmem:[#allocation6 + $0x29] sm:$0x1] %vm17_vm11, %v6404_v15 }
  0x8d   :  { %v395_v21 = vsel %vm388_vm1, %v177_v20, %v305_v19  ;;  %30 = vst.msk [vmem:[#allocation7] sm:$0x1] %vm17_vm11, %v6404_v15  ;;  %31 = vst.msk [vmem:[#allocation7 + $0x18] sm:$0x1] %vm17_vm11, %v6404_v15 }
  0x8e   :  { %5662 = vmatprep.mubr.msk.f32.mxu0 %vm427_vm2, %v395_v21  ;;  %32 = vst.msk [vmem:[#allocation7 + $0x11] sm:$0x1] %vm17_vm11, %v6404_v15  ;;  %33 = vst.msk [vmem:[#allocation7 + $0x29] sm:$0x1] %vm17_vm11, %v6404_v15 }
  0x8f   :  { %34 = vst.msk [vmem:[#allocation8] sm:$0x1] %vm17_vm11, %v6404_v15  ;;  %35 = vst.msk [vmem:[#allocation8 + $0x18] sm:$0x1] %vm17_vm11, %v6404_v15  ;;  %vm3158_vm11 = vcmask 156672  }
  0x90   :  { %v307_v22 = vpop.permute.xlu1 %306  ;;  %v179_v23 = vpop.permute.xlu0 %178  ;;  %42 = vst.msk [vmem:[#allocation9 + $0x19] sm:$0x1] %vm38_vm4, %v6404_v15  ;;  %39 = vst.msk [vmem:[#allocation9] sm:$0x1] %vm38_vm4, %v6404_v15 }
  0x91   :  { %v396_v24 = vsel %vm388_vm1, %v179_v23, %v307_v22  ;;  %40 = vst.msk [vmem:[#allocation9 + $0x10] sm:$0x1] %vm38_vm4, %v6404_v15  ;;  %41 = vst.msk [vmem:[#allocation9 + $0x9] sm:$0x1] %vm38_vm4, %v6404_v15 }
  0x92   :  { %5663 = vmatmul.mubr.msk.f32.gmra.mrb[6].mxu0 %vm427_vm2, %v396_v24  ;;  %43 = vst.msk [vmem:[#allocation11] sm:$0x1] %vm38_vm4, %v6404_v15  ;;  %44 = vst.msk [vmem:[#allocation11 + $0x10] sm:$0x1] %vm38_vm4, %v6404_v15 }
  0x93   :  { %45 = vst.msk [vmem:[#allocation11 + $0x9] sm:$0x1] %vm38_vm4, %v6404_v15  ;;  %46 = vst.msk [vmem:[#allocation11 + $0x19] sm:$0x1] %vm38_vm4, %v6404_v15 }
  0x94   :  { %v309_v25 = vpop.permute.xlu1 %308  ;;  %v181_v26 = vpop.permute.xlu0 %180  ;;  %47 = vst.msk [vmem:[#allocation12] sm:$0x1] %vm38_vm4, %v6404_v15  ;;  %48 = vst.msk [vmem:[#allocation12 + $0x10] sm:$0x1] %vm38_vm4, %v6404_v15 }
  0x95   :  { %v397_v27 = vsel %vm388_vm1, %v181_v26, %v309_v25  ;;  %49 = vst.msk [vmem:[#allocation12 + $0x9] sm:$0x1] %vm38_vm4, %v6404_v15  ;;  %50 = vst.msk [vmem:[#allocation12 + $0x19] sm:$0x1] %vm38_vm4, %v6404_v15 }
  0x96   :  { %5665 = vmatprep.mubr.msk.f32.mxu0 %vm427_vm2, %v397_v27  ;;  %51 = vst.msk [vmem:[#allocation13] sm:$0x1] %vm38_vm4, %v6404_v15  ;;  %52 = vst.msk [vmem:[#allocation13 + $0x10] sm:$0x1] %vm38_vm4, %v6404_v15 }
  0x98   :  { %v311_v28 = vpop.permute.xlu1 %310  ;;  %v183_v29 = vpop.permute.xlu0 %182 }
  0x99   :  { %v398_v30 = vsel %vm388_vm1, %v183_v29, %v311_v28 }
  0x9a   :  { %5666 = vmatmul.mubr.msk.f32.gmra.mrb[8].mxu0 %vm427_vm2, %v398_v30 }
  0x9c   :  { %v313_v31 = vpop.permute.xlu1 %312  ;;  %v185_v32 = vpop.permute.xlu0 %184 }
  0x9d   :  { %v399_v33 = vsel %vm388_vm1, %v185_v32, %v313_v31 }
  0x9e   :  { %5668 = vmatprep.mubr.msk.f32.mxu0 %vm427_vm2, %v399_v33 }
  0xa0   :  { %v315_v34 = vpop.permute.xlu1 %314  ;;  %v187_v35 = vpop.permute.xlu0 %186 }
  0xa1   :  { %v400_v36 = vsel %vm388_vm1, %v187_v35, %v315_v34  ;;  %v6762_v34 = vld [vmem:[%s8319_s1] ss:$0 sm:$0xff] }
  0xa2   :  { %5669 = vmatmul.mubr.msk.f32.gmra.mrb[10].mxu0 %vm427_vm2, %v400_v36 }
  0xa4   :  { %v317_v37 = vpop.permute.xlu1 %316  ;;  %v189_v38 = vpop.permute.xlu0 %188 }
  0xa5   :  { %v401_v39 = vsel %vm388_vm1, %v189_v38, %v317_v37 }
  0xa6   :  { %5671 = vmatprep.mubr.msk.f32.mxu0 %vm427_vm2, %v401_v39 }
  0xa8   :  { %v319_v40 = vpop.permute.xlu1 %318  ;;  %v191_v41 = vpop.permute.xlu0 %190 }
  0xa9   :  { %v402_v42 = vsel %vm388_vm1, %v191_v41, %v319_v40 }
  0xaa   :  { %5672 = vmatmul.mubr.msk.f32.gmra.mrb[12].mxu0 %vm427_vm2, %v402_v42 }
  0xac   :  { %v321_v43 = vpop.permute.xlu1 %320  ;;  %v193_v44 = vpop.permute.xlu0 %192 }
  0xad   :  { %v403_v45 = vsel %vm388_vm1, %v193_v44, %v321_v43 }
  0xae   :  { %5674 = vmatprep.mubr.msk.f32.mxu0 %vm427_vm2, %v403_v45 }
  0xb0   :  { %v323_v46 = vpop.permute.xlu1 %322  ;;  %v195_v47 = vpop.permute.xlu0 %194 }
  0xb1   :  { %v404_v48 = vsel %vm388_vm1, %v195_v47, %v323_v46 }
  0xb2   :  { %5675 = vmatmul.mubr.msk.f32.gmra.mrb[14].mxu0 %vm427_vm2, %v404_v48 }
  0xb4   :  { %v325_v49 = vpop.permute.xlu1 %324  ;;  %v197_v50 = vpop.permute.xlu0 %196 }
  0xb5   :  { %v405_v51 = vsel %vm388_vm1, %v197_v50, %v325_v49  ;;  %v1027_v49 = vld [vmem:[%s8318_s2 + $0x8] sm:$0xff]  ;;  %v1028_v50 = vld [vmem:[%s8318_s2 + $0x10] sm:$0xff] }
  0xb6   :  { %5677 = vmatprep.mubr.msk.f32.mxu0 %vm427_vm2, %v405_v51 }
  0xb8   :  { %v327_v52 = vpop.permute.xlu1 %326  ;;  %v199_v53 = vpop.permute.xlu0 %198 }
  0xb9   :  { %v406_v54 = vsel %vm388_vm1, %v199_v53, %v327_v52  ;;  %v6092_v52 = vpack.c.bf16 %v1028_v50, %v1027_v49 }
  0xba   :  { %5678 = vmatmul.mubr.msk.f32.gmra.mrb[16].mxu0 %vm427_vm2, %v406_v54 }
  0xbb   :  { %6093 = vmatprep.subr.bf16.mxu1 %v6092_v52 }
  0xbc   :  { %v329_v55 = vpop.permute.xlu1 %328  ;;  %v201_v56 = vpop.permute.xlu0 %200  ;;  %6095 = vmatpush3.bf16.msra.mxu1 %v6092_v52 }
  0xbd   :  { %v407_v57 = vsel %vm388_vm1, %v201_v56, %v329_v55 }
  0xbe   :  { %5680 = vmatprep.mubr.msk.f32.mxu0 %vm427_vm2, %v407_v57  ;;  %v1029_v57 = vld [vmem:[%s8318_s2 + $0x18] sm:$0xff] }
  0xc0   :  { %v331_v58 = vpop.permute.xlu1 %330  ;;  %v203_v59 = vpop.permute.xlu0 %202 }
  0xc1   :  { %v408_v60 = vsel %vm388_vm1, %v203_v59, %v331_v58  ;;  %v1030_v58 = vld [vmem:[%s8318_s2 + $0x20] sm:$0x1] }
  0xc2   :  { %5681 = vmatmul.mubr.msk.f32.gmra.mrb[18].mxu0 %vm427_vm2, %v408_v60  ;;  %v6096_v59 = vpack.c.bf16 %v1030_v58, %v1029_v57 }
  0xc4   :  { %v333_v61 = vpop.permute.xlu1 %332  ;;  %v205_v62 = vpop.permute.xlu0 %204  ;;  %6098 = vmatprep.subr.msk.bf16.mxu1 %vm6097_vm6, %v6096_v59 }
  0xc5   :  { %v409_v63 = vsel %vm388_vm1, %v205_v62, %v333_v61  ;;  %6101 = vmatpush3.bf16.msk.msra.mxu1 %vm6097_vm6, %v6096_v59  ;;  %vm2974_vm6 = vcmask 1043456  }
  0xc6   :  { %5683 = vmatprep.mubr.msk.f32.mxu0 %vm427_vm2, %v409_v63 }
  0xc8   :  { %v335_v0 = vpop.permute.xlu1 %334  ;;  %v207_v1 = vpop.permute.xlu0 %206 }
  0xc9   :  { %v410_v2 = vsel %vm388_vm1, %v207_v1, %v335_v0 }
  0xca   :  { %5684 = vmatmul.mubr.msk.f32.gmra.mrb[20].mxu0 %vm427_vm2, %v410_v2 }
  0xcc   :  { %v337_v3 = vpop.permute.xlu1 %336  ;;  %v209_v4 = vpop.permute.xlu0 %208 }
  0xcd   :  { %v411_v5 = vsel %vm388_vm1, %v209_v4, %v337_v3 }
  0xce   :  { %5686 = vmatprep.mubr.msk.f32.mxu0 %vm427_vm2, %v411_v5 }
  0xd0   :  { %v339_v6 = vpop.permute.xlu1 %338  ;;  %v211_v7 = vpop.permute.xlu0 %210 }
  0xd1   :  { %v412_v8 = vsel %vm388_vm1, %v211_v7, %v339_v6 }
  0xd2   :  { %5687 = vmatmul.mubr.msk.f32.gmra.mrb[22].mxu0 %vm427_vm2, %v412_v8 }
  0xd4   :  { %v341_v9 = vpop.permute.xlu1 %340  ;;  %v213_v10 = vpop.permute.xlu0 %212 }
  0xd5   :  { %v413_v11 = vsel %vm388_vm1, %v213_v10, %v341_v9 }
  0xd6   :  { %5689 = vmatprep.mubr.msk.f32.mxu0 %vm427_vm2, %v413_v11 }
  0xd8   :  { %v343_v12 = vpop.permute.xlu1 %342  ;;  %v215_v13 = vpop.permute.xlu0 %214 }
  0xd9   :  { %v414_v14 = vsel %vm388_vm1, %v215_v13, %v343_v12 }
  0xda   :  { %5690 = vmatmul.mubr.msk.f32.gmra.mrb[24].mxu0 %vm427_vm2, %v414_v14 }
  0xdc   :  { %v345_v16 = vpop.permute.xlu1 %344  ;;  %v217_v17 = vpop.permute.xlu0 %216 }
  0xdd   :  { %v415_v18 = vsel %vm388_vm1, %v217_v17, %v345_v16 }
  0xde   :  { %5692 = vmatprep.mubr.msk.f32.mxu0 %vm427_vm2, %v415_v18 }
  0xe0   :  { %v347_v19 = vpop.permute.xlu1 %346  ;;  %v219_v20 = vpop.permute.xlu0 %218 }
  0xe1   :  { %v416_v21 = vsel %vm388_vm1, %v219_v20, %v347_v19 }
  0xe2   :  { %5693 = vmatmul.mubr.msk.f32.gmra.mrb[26].mxu0 %vm427_vm2, %v416_v21 }
  0xe4   :  { %v349_v22 = vpop.permute.xlu1 %348  ;;  %v221_v23 = vpop.permute.xlu0 %220 }
  0xe5   :  { %v417_v24 = vsel %vm388_vm1, %v221_v23, %v349_v22 }
  0xe6   :  { %5695 = vmatprep.mubr.msk.f32.mxu0 %vm427_vm2, %v417_v24 }
  0xe8   :  { %v351_v25 = vpop.permute.xlu1 %350  ;;  %v223_v26 = vpop.permute.xlu0 %222 }
  0xe9   :  { %v418_v27 = vsel %vm388_vm1, %v223_v26, %v351_v25 }
  0xea   :  { %5696 = vmatmul.mubr.msk.f32.gmra.mrb[28].mxu0 %vm427_vm2, %v418_v27 }
  0xec   :  { %v353_v28 = vpop.permute.xlu1 %352  ;;  %v225_v29 = vpop.permute.xlu0 %224 }
  0xed   :  { %v419_v30 = vsel %vm388_vm1, %v225_v29, %v353_v28 }
  0xee   :  { %5698 = vmatprep.mubr.msk.f32.mxu0 %vm427_vm2, %v419_v30 }
  0xf0   :  { %v355_v31 = vpop.permute.xlu1 %354  ;;  %v227_v32 = vpop.permute.xlu0 %226 }
  0xf1   :  { %v420_v33 = vsel %vm388_vm1, %v227_v32, %v355_v31  ;;  %vm6411_vm1 = vmmov 0  }
  0xf2   :  { %5699 = vmatmul.mubr.msk.f32.gmra.mrb[30].mxu0 %vm427_vm2, %v420_v33 }
 0x14f   :  { %v5655_v35 = vpop.f32.mrb[0].mxu0 }
 0x150   :  { %v600_v36 = vadd.f32 %v5655_v35, %v6762_v34  ;;  %v594_v37 = vpop.f32.mrb[1].mxu0 }
 0x151   :  { %v595_v38 = vadd.f32 %v6762_v34, %v594_v37 }
 0x152   :  { %754 = vst.msk [vmem:[#allocation2 + $0xa] sm:$0xff] %vm427_vm2, %v600_v36 }
 0x153   :  { %753 = vst.msk [vmem:[#allocation2 + $0x2] sm:$0xff] %vm427_vm2, %v595_v38 }
 0x155   :  { %v5658_v39 = vpop.f32.mrb[2].mxu0 }
 0x156   :  { %v610_v40 = vadd.f32 %v5658_v39, %v6762_v34  ;;  %v604_v41 = vpop.f32.mrb[3].mxu0 }
 0x157   :  { %v605_v42 = vadd.f32 %v6762_v34, %v604_v41 }
 0x158   :  { %756 = vst.msk [vmem:[#allocation2 + $0x1a] sm:$0xff] %vm427_vm2, %v610_v40 }
 0x159   :  { %755 = vst.msk [vmem:[#allocation2 + $0x12] sm:$0xff] %vm427_vm2, %v605_v42 }
 0x15d   :  { %v5661_v43 = vpop.f32.mrb[4].mxu0 }
 0x15e   :  { %v620_v44 = vadd.f32 %v5661_v43, %v6762_v34  ;;  %v614_v45 = vpop.f32.mrb[5].mxu0 }
 0x15f   :  { %v615_v46 = vadd.f32 %v6762_v34, %v614_v45 }
 0x160   :  { %758 = vst.msk [vmem:[#allocation2 + $0x2a] sm:$0xff] %vm427_vm2, %v620_v44  ;;  %v801_v47 = vld [vmem:[#allocation2 + $0x1] ss:$4 sm:$0xff]  ;;  %v817_v48 = vld [vmem:[#allocation2 + $0x2] ss:$4 sm:$0xff] }
 0x161   :  { %757 = vst.msk [vmem:[#allocation2 + $0x22] sm:$0xff] %vm427_vm2, %v615_v46  ;;  %872 = vrot.lane.b32.xlu0 %v801_v47, %s6405_s21  ;;  %v833_v56 = vld [vmem:[#allocation2 + $0x3] ss:$4 sm:$0xff]  ;;  %v849_v60 = vld [vmem:[#allocation2 + $0x4] ss:$4 sm:$0xff] }
 0x165   :  { %904 = vrot.lane.b32.xlu0 %v817_v48, %s6406_s23  ;;  %v5664_v51 = vpop.f32.mrb[6].mxu0 }
 0x166   :  { %v630_v53 = vadd.f32 %v5664_v51, %v6762_v34  ;;  %v624_v54 = vpop.f32.mrb[7].mxu0 }
 0x167   :  { %v625_v55 = vadd.f32 %v6762_v34, %v624_v54 }
 0x168   :  { %760 = vst.msk [vmem:[#allocation2 + $0x3a] sm:$0xff] %vm427_vm2, %v630_v53 }
 0x169   :  { %759 = vst.msk [vmem:[#allocation2 + $0x32] sm:$0xff] %vm427_vm2, %v625_v55  ;;  %936 = vrot.lane.b32.xlu0 %v833_v56, %s6407_s28 }
 0x16d   :  { %968 = vrot.lane.b32.xlu0 %v849_v60, %s6409_s29  ;;  %v5667_v61 = vpop.f32.mrb[8].mxu0 }
 0x16e   :  { %v640_v62 = vadd.f32 %v5667_v61, %v6762_v34  ;;  %v634_v63 = vpop.f32.mrb[9].mxu0 }
 0x16f   :  { %v635_v0 = vadd.f32 %v6762_v34, %v634_v63 }
 0x170   :  { %762 = vst.msk [vmem:[#allocation2 + $0x4a] sm:$0xff] %vm427_vm2, %v640_v62  ;;  %v851_v1 = vld [vmem:[#allocation2 + $0x24] ss:$4 sm:$0xff]  ;;  %v803_v2 = vld [vmem:[#allocation2 + $0x21] ss:$4 sm:$0xff] }
 0x171   :  { %761 = vst.msk [vmem:[#allocation2 + $0x42] sm:$0xff] %vm427_vm2, %v635_v0  ;;  %970 = vrot.lane.b32.xlu0 %v851_v1, %s6409_s29  ;;  %874 = vrot.lane.b32.xlu1 %v803_v2, %s6405_s21  ;;  %v819_v3 = vld [vmem:[#allocation2 + $0x22] ss:$4 sm:$0xff]  ;;  %v835_v8 = vld [vmem:[#allocation2 + $0x23] ss:$4 sm:$0xff] }
 0x175   :  { %906 = vrot.lane.b32.xlu1 %v819_v3, %s6406_s23  ;;  %v5670_v4 = vpop.f32.mrb[10].mxu0 }
 0x176   :  { %v650_v5 = vadd.f32 %v5670_v4, %v6762_v34  ;;  %v644_v6 = vpop.f32.mrb[11].mxu0 }
 0x177   :  { %v645_v7 = vadd.f32 %v6762_v34, %v644_v6 }
 0x178   :  { %764 = vst.msk [vmem:[#allocation2 + $0x5a] sm:$0xff] %vm427_vm2, %v650_v5 }
 0x179   :  { %763 = vst.msk [vmem:[#allocation2 + $0x52] sm:$0xff] %vm427_vm2, %v645_v7  ;;  %938 = vrot.lane.b32.xlu1 %v835_v8, %s6407_s28 }
 0x17d   :  { %v5673_v9 = vpop.f32.mrb[12].mxu0 }
 0x17e   :  { %v660_v10 = vadd.f32 %v5673_v9, %v6762_v34  ;;  %v654_v11 = vpop.f32.mrb[13].mxu0 }
 0x17f   :  { %v655_v12 = vadd.f32 %v6762_v34, %v654_v11 }
 0x180   :  { %766 = vst.msk [vmem:[#allocation2 + $0x6a] sm:$0xff] %vm427_vm2, %v660_v10  ;;  %v821_v13 = vld [vmem:[#allocation2 + $0x42] ss:$4 sm:$0xff]  ;;  %v805_v14 = vld [vmem:[#allocation2 + $0x41] ss:$4 sm:$0xff] }
 0x181   :  { %765 = vst.msk [vmem:[#allocation2 + $0x62] sm:$0xff] %vm427_vm2, %v655_v12  ;;  %908 = vrot.lane.b32.xlu0 %v821_v13, %s6406_s23  ;;  %876 = vrot.lane.b32.xlu1 %v805_v14, %s6405_s21  ;;  %v837_v16 = vld [vmem:[#allocation2 + $0x43] ss:$4 sm:$0xff]  ;;  %v853_v21 = vld [vmem:[#allocation2 + $0x44] ss:$4 sm:$0xff] }
 0x182   :  { %v785_v12 = vld [vmem:[#allocation2] ss:$4 sm:$0xff] }
 0x185   :  { %940 = vrot.lane.b32.xlu0 %v837_v16, %s6407_s28  ;;  %v5676_v17 = vpop.f32.mrb[14].mxu0 }
 0x186   :  { %v670_v18 = vadd.f32 %v5676_v17, %v6762_v34  ;;  %v664_v19 = vpop.f32.mrb[15].mxu0 }
 0x187   :  { %v665_v20 = vadd.f32 %v6762_v34, %v664_v19 }
 0x188   :  { %768 = vst.msk [vmem:[#allocation2 + $0x7a] sm:$0xff] %vm427_vm2, %v670_v18 }
 0x189   :  { %767 = vst.msk [vmem:[#allocation2 + $0x72] sm:$0xff] %vm427_vm2, %v665_v20  ;;  %972 = vrot.lane.b32.xlu0 %v853_v21, %s6409_s29 }
 0x18d   :  { %v5679_v22 = vpop.f32.mrb[16].mxu0 }
 0x18e   :  { %v680_v23 = vadd.f32 %v5679_v22, %v6762_v34  ;;  %v674_v24 = vpop.f32.mrb[17].mxu0  ;;  %v787_v22 = vld [vmem:[#allocation2 + $0x20] ss:$4 sm:$0xff] }
 0x18f   :  { %v675_v25 = vadd.f32 %v6762_v34, %v674_v24 }
 0x190   :  { %770 = vst.msk [vmem:[#allocation2 + $0x92] sm:$0xff] %vm427_vm2, %v680_v23  ;;  %v855_v26 = vld [vmem:[#allocation2 + $0x64] ss:$4 sm:$0xff]  ;;  %v807_v27 = vld [vmem:[#allocation2 + $0x61] ss:$4 sm:$0xff] }
 0x191   :  { %769 = vst.msk [vmem:[#allocation2 + $0x8a] sm:$0xff] %vm427_vm2, %v675_v25  ;;  %974 = vrot.lane.b32.xlu0 %v855_v26, %s6409_s29  ;;  %878 = vrot.lane.b32.xlu1 %v807_v27, %s6405_s21  ;;  %v823_v28 = vld [vmem:[#allocation2 + $0x62] ss:$4 sm:$0xff]  ;;  %v839_v33 = vld [vmem:[#allocation2 + $0x63] ss:$4 sm:$0xff] }
 0x195   :  { %910 = vrot.lane.b32.xlu1 %v823_v28, %s6406_s23  ;;  %v5682_v29 = vpop.f32.mrb[18].mxu0 }
 0x196   :  { %v690_v30 = vadd.f32 %v5682_v29, %v6762_v34  ;;  %v684_v31 = vpop.f32.mrb[19].mxu0 }
 0x197   :  { %v685_v32 = vadd.f32 %v6762_v34, %v684_v31  ;;  %v789_v31 = vld [vmem:[#allocation2 + $0x40] ss:$4 sm:$0xff] }
 0x198   :  { %772 = vst.msk [vmem:[#allocation2 + $0xa2] sm:$0xff] %vm427_vm2, %v690_v30 }
 0x199   :  { %771 = vst.msk [vmem:[#allocation2 + $0x9a] sm:$0xff] %vm427_vm2, %v685_v32  ;;  %942 = vrot.lane.b32.xlu1 %v839_v33, %s6407_s28 }
 0x19d   :  { %v5685_v35 = vpop.f32.mrb[20].mxu0 }
 0x19e   :  { %v700_v36 = vadd.f32 %v5685_v35, %v6762_v34  ;;  %v694_v37 = vpop.f32.mrb[21].mxu0 }
 0x19f   :  { %v695_v38 = vadd.f32 %v6762_v34, %v694_v37 }
 0x1a0   :  { %774 = vst.msk [vmem:[#allocation2 + $0xb2] sm:$0xff] %vm427_vm2, %v700_v36  ;;  %v825_v39 = vld [vmem:[#allocation2 + $0x8a] ss:$4 sm:$0xff]  ;;  %v809_v40 = vld [vmem:[#allocation2 + $0x89] ss:$4 sm:$0xff] }
 0x1a1   :  { %773 = vst.msk [vmem:[#allocation2 + $0xaa] sm:$0xff] %vm427_vm2, %v695_v38  ;;  %912 = vrot.lane.b32.xlu0 %v825_v39, %s6406_s23  ;;  %880 = vrot.lane.b32.xlu1 %v809_v40, %s6405_s21  ;;  %v841_v41 = vld [vmem:[#allocation2 + $0x8b] ss:$4 sm:$0xff]  ;;  %v857_v46 = vld [vmem:[#allocation2 + $0x8c] ss:$4 sm:$0xff] }
 0x1a5   :  { %944 = vrot.lane.b32.xlu0 %v841_v41, %s6407_s28  ;;  %v5688_v42 = vpop.f32.mrb[22].mxu0  ;;  %v791_v41 = vld [vmem:[#allocation2 + $0x60] ss:$4 sm:$0xff] }
 0x1a6   :  { %v710_v43 = vadd.f32 %v5688_v42, %v6762_v34  ;;  %v704_v44 = vpop.f32.mrb[23].mxu0 }
 0x1a7   :  { %v705_v45 = vadd.f32 %v6762_v34, %v704_v44 }
 0x1a8   :  { %776 = vst.msk [vmem:[#allocation2 + $0xc2] sm:$0xff] %vm427_vm2, %v710_v43 }
 0x1a9   :  { %775 = vst.msk [vmem:[#allocation2 + $0xba] sm:$0xff] %vm427_vm2, %v705_v45  ;;  %976 = vrot.lane.b32.xlu0 %v857_v46, %s6409_s29 }
 0x1ad   :  { %v5691_v47 = vpop.f32.mrb[24].mxu0 }
 0x1ae   :  { %v720_v48 = vadd.f32 %v5691_v47, %v6762_v34  ;;  %v714_v49 = vpop.f32.mrb[25].mxu0 }
 0x1af   :  { %v715_v50 = vadd.f32 %v6762_v34, %v714_v49 }
 0x1b0   :  { %778 = vst.msk [vmem:[#allocation2 + $0xd2] sm:$0xff] %vm427_vm2, %v720_v48  ;;  %v859_v51 = vld [vmem:[#allocation2 + $0xac] ss:$4 sm:$0xff]  ;;  %v811_v52 = vld [vmem:[#allocation2 + $0xa9] ss:$4 sm:$0xff] }
 0x1b1   :  { %777 = vst.msk [vmem:[#allocation2 + $0xca] sm:$0xff] %vm427_vm2, %v715_v50  ;;  %978 = vrot.lane.b32.xlu0 %v859_v51, %s6409_s29  ;;  %882 = vrot.lane.b32.xlu1 %v811_v52, %s6405_s21  ;;  %v827_v53 = vld [vmem:[#allocation2 + $0xaa] ss:$4 sm:$0xff]  ;;  %v843_v58 = vld [vmem:[#allocation2 + $0xab] ss:$4 sm:$0xff] }
 0x1b2   :  { %v793_v50 = vld [vmem:[#allocation2 + $0x88] ss:$4 sm:$0xff] }
 0x1b5   :  { %914 = vrot.lane.b32.xlu1 %v827_v53, %s6406_s23  ;;  %v5694_v54 = vpop.f32.mrb[26].mxu0 }
 0x1b6   :  { %v730_v55 = vadd.f32 %v5694_v54, %v6762_v34  ;;  %v724_v56 = vpop.f32.mrb[27].mxu0 }
 0x1b7   :  { %v725_v57 = vadd.f32 %v6762_v34, %v724_v56 }
 0x1b8   :  { %780 = vst.msk [vmem:[#allocation2 + $0xe2] sm:$0xff] %vm427_vm2, %v730_v55 }
 0x1b9   :  { %779 = vst.msk [vmem:[#allocation2 + $0xda] sm:$0xff] %vm427_vm2, %v725_v57  ;;  %946 = vrot.lane.b32.xlu1 %v843_v58, %s6407_s28 }
 0x1bd   :  { %v5697_v59 = vpop.f32.mrb[28].mxu0 }
 0x1be   :  { %v740_v60 = vadd.f32 %v5697_v59, %v6762_v34  ;;  %v734_v61 = vpop.f32.mrb[29].mxu0  ;;  %v795_v59 = vld [vmem:[#allocation2 + $0xa8] ss:$4 sm:$0xff] }
 0x1bf   :  { %v735_v62 = vadd.f32 %v6762_v34, %v734_v61 }
 0x1c0   :  { %782 = vst.msk [vmem:[#allocation2 + $0xf2] sm:$0xff] %vm427_vm2, %v740_v60  ;;  %v829_v63 = vld [vmem:[#allocation2 + $0xca] ss:$4 sm:$0xff]  ;;  %v813_v0 = vld [vmem:[#allocation2 + $0xc9] ss:$4 sm:$0xff] }
 0x1c1   :  { %781 = vst.msk [vmem:[#allocation2 + $0xea] sm:$0xff] %vm427_vm2, %v735_v62  ;;  %916 = vrot.lane.b32.xlu0 %v829_v63, %s6406_s23  ;;  %884 = vrot.lane.b32.xlu1 %v813_v0, %s6405_s21  ;;  %v845_v1 = vld [vmem:[#allocation2 + $0xcb] ss:$4 sm:$0xff]  ;;  %v861_v6 = vld [vmem:[#allocation2 + $0xcc] ss:$4 sm:$0xff] }
 0x1c5   :  { %948 = vrot.lane.b32.xlu0 %v845_v1, %s6407_s28  ;;  %v5700_v2 = vpop.f32.mrb[30].mxu0 }
 0x1c6   :  { %v750_v3 = vadd.f32 %v5700_v2, %v6762_v34  ;;  %v744_v4 = vpop.f32.mrb[31].mxu0 }
 0x1c7   :  { %v745_v5 = vadd.f32 %v6762_v34, %v744_v4  ;;  %v797_v4 = vld [vmem:[#allocation2 + $0xc8] ss:$4 sm:$0xff] }
 0x1c8   :  { %784 = vst.msk [vmem:[#allocation2 + $0x102] sm:$0xff] %vm427_vm2, %v750_v3 }
 0x1c9   :  { %783 = vst.msk [vmem:[#allocation2 + $0xfa] sm:$0xff] %vm427_vm2, %v745_v5  ;;  %980 = vrot.lane.b32.xlu0 %v861_v6, %s6409_s29 }
 0x1d0   :  { %v815_v7 = vld [vmem:[#allocation2 + $0xe9] ss:$4 sm:$0xff]  ;;  %v831_v9 = vld [vmem:[#allocation2 + $0xea] ss:$4 sm:$0xff]  ;;  %v847_v11 = vld [vmem:[#allocation2 + $0xeb] ss:$4 sm:$0xff] }
 0x1d1   :  { %886 = vrot.lane.b32.xlu1 %v815_v7, %s6405_s21  ;;  %v863_v13 = vld [vmem:[#allocation2 + $0xec] ss:$4 sm:$0xff] }
 0x1d3   :  { %v873_v8 = vpop.permute.xlu0 %872 }
 0x1d4   :  { %v992_v14 = vsel %vm427_vm2, %v785_v12, %v873_v8 }
 0x1d5   :  { %918 = vrot.lane.b32.xlu1 %v831_v9, %s6406_s23 }
 0x1d7   :  { %v905_v10 = vpop.permute.xlu0 %904 }
 0x1d8   :  { %v1001_v16 = vsel %vm1000_vm7, %v992_v14, %v905_v10 }
 0x1d9   :  { %950 = vrot.lane.b32.xlu1 %v847_v11, %s6407_s28 }
 0x1db   :  { %v937_v34 = vpop.permute.xlu0 %936 }
 0x1dc   :  { %v1010_v17 = vsel %vm1009_vm8, %v1001_v16, %v937_v34 }
 0x1dd   :  { %982 = vrot.lane.b32.xlu1 %v863_v13, %s6409_s29  ;;  %v799_v13 = vld [vmem:[#allocation2 + $0xe8] ss:$4 sm:$0xff] }
 0x1df   :  { %v969_v18 = vpop.permute.xlu0 %968 }
 0x1e0   :  { %v1019_v19 = vsel %vm1018_vm9, %v1010_v17, %v969_v18 }
 0x1e1   :  { %5709 = vmatprep.mubr.msk.f32.mxu1 %vm1036_vm10, %v1019_v19 }
 0x1e3   :  { %v875_v20 = vpop.permute.xlu1 %874  ;;  %v971_v26 = vpop.permute.xlu0 %970 }
 0x1e4   :  { %v993_v23 = vsel %vm427_vm2, %v787_v22, %v875_v20  ;;  %v5309_v20 = vld [vmem:[%s8319_s1 + $0x1] ss:$0 sm:$0xff] }
 0x1e7   :  { %v907_v21 = vpop.permute.xlu1 %906 }
 0x1e8   :  { %v1002_v24 = vsel %vm1000_vm7, %v993_v23, %v907_v21 }
 0x1eb   :  { %v939_v25 = vpop.permute.xlu1 %938 }
 0x1ec   :  { %v1011_v27 = vsel %vm1009_vm8, %v1002_v24, %v939_v25 }
 0x1ed   :  { %v1020_v28 = vsel %vm1018_vm9, %v1011_v27, %v971_v26 }
 0x1ee   :  { %5710 = vmatmul.mubr.msk.f32.vlgmr.msra.gmra.mrb[0].mxu1 %vm1036_vm10, %v1020_v28 }
 0x1f3   :  { %v909_v29 = vpop.permute.xlu0 %908  ;;  %v877_v30 = vpop.permute.xlu1 %876 }
 0x1f4   :  { %v994_v32 = vsel %vm427_vm2, %v789_v31, %v877_v30 }
 0x1f5   :  { %v1003_v35 = vsel %vm1000_vm7, %v994_v32, %v909_v29 }
 0x1f7   :  { %v941_v33 = vpop.permute.xlu0 %940 }
 0x1f8   :  { %v1012_v36 = vsel %vm1009_vm8, %v1003_v35, %v941_v33 }
 0x1fb   :  { %v973_v37 = vpop.permute.xlu0 %972 }
 0x1fc   :  { %v1021_v38 = vsel %vm1018_vm9, %v1012_v36, %v973_v37 }
 0x1fd   :  { %5712 = vmatprep.mubr.msk.f32.mxu1 %vm1036_vm10, %v1021_v38 }
 0x203   :  { %v879_v39 = vpop.permute.xlu1 %878  ;;  %v975_v45 = vpop.permute.xlu0 %974 }
 0x204   :  { %v995_v42 = vsel %vm427_vm2, %v791_v41, %v879_v39 }
 0x207   :  { %v911_v40 = vpop.permute.xlu1 %910 }
 0x208   :  { %v1004_v43 = vsel %vm1000_vm7, %v995_v42, %v911_v40 }
 0x20b   :  { %v943_v44 = vpop.permute.xlu1 %942 }
 0x20c   :  { %v1013_v46 = vsel %vm1009_vm8, %v1004_v43, %v943_v44  ;;  %v1353_v44 = vld [vmem:[%s8318_s2 + $0x28] sm:$0xff] }
 0x20d   :  { %v1022_v47 = vsel %vm1018_vm9, %v1013_v46, %v975_v45  ;;  %v1354_v45 = vld [vmem:[%s8318_s2 + $0x30] sm:$0xff] }
 0x20e   :  { %5713 = vmatmul.mubr.msk.f32.gmra.mrb[2].mxu1 %vm1036_vm10, %v1022_v47  ;;  %v6102_v47 = vpack.c.bf16 %v1354_v45, %v1353_v44 }
 0x210   :  { %6103 = vmatprep.subr.bf16.mxu1 %v6102_v47 }
 0x211   :  { %6105 = vmatpush3.bf16.msra.mxu1 %v6102_v47 }
 0x213   :  { %v913_v48 = vpop.permute.xlu0 %912  ;;  %v881_v49 = vpop.permute.xlu1 %880 }
 0x214   :  { %v996_v51 = vsel %vm427_vm2, %v793_v50, %v881_v49 }
 0x215   :  { %v1005_v53 = vsel %vm1000_vm7, %v996_v51, %v913_v48 }
 0x217   :  { %v945_v52 = vpop.permute.xlu0 %944 }
 0x218   :  { %v1014_v54 = vsel %vm1009_vm8, %v1005_v53, %v945_v52 }
 0x21b   :  { %v977_v55 = vpop.permute.xlu0 %976 }
 0x21c   :  { %v1023_v56 = vsel %vm1018_vm9, %v1014_v54, %v977_v55 }
 0x21d   :  { %5715 = vmatprep.mubr.msk.f32.mxu1 %vm1036_vm10, %v1023_v56 }
 0x223   :  { %v883_v57 = vpop.permute.xlu1 %882  ;;  %v979_v63 = vpop.permute.xlu0 %978 }
 0x224   :  { %v997_v60 = vsel %vm427_vm2, %v795_v59, %v883_v57 }
 0x227   :  { %v915_v58 = vpop.permute.xlu1 %914 }
 0x228   :  { %v1006_v61 = vsel %vm1000_vm7, %v997_v60, %v915_v58 }
 0x22b   :  { %v947_v62 = vpop.permute.xlu1 %946 }
 0x22c   :  { %v1015_v0 = vsel %vm1009_vm8, %v1006_v61, %v947_v62 }
 0x22d   :  { %v1024_v1 = vsel %vm1018_vm9, %v1015_v0, %v979_v63 }
 0x22e   :  { %5716 = vmatmul.mubr.msk.f32.gmra.mrb[4].mxu1 %vm1036_vm10, %v1024_v1 }
 0x233   :  { %v917_v2 = vpop.permute.xlu0 %916  ;;  %v885_v3 = vpop.permute.xlu1 %884 }
 0x234   :  { %v998_v5 = vsel %vm427_vm2, %v797_v4, %v885_v3 }
 0x235   :  { %v1007_v7 = vsel %vm1000_vm7, %v998_v5, %v917_v2 }
 0x237   :  { %v949_v6 = vpop.permute.xlu0 %948 }
 0x238   :  { %v1016_v8 = vsel %vm1009_vm8, %v1007_v7, %v949_v6 }
 0x23b   :  { %v981_v9 = vpop.permute.xlu0 %980 }
 0x23c   :  { %v1025_v10 = vsel %vm1018_vm9, %v1016_v8, %v981_v9 }
 0x23d   :  { %5718 = vmatprep.mubr.msk.f32.mxu1 %vm1036_vm10, %v1025_v10 }
 0x243   :  { %v887_v11 = vpop.permute.xlu1 %886 }
 0x244   :  { %v999_v14 = vsel %vm427_vm2, %v799_v13, %v887_v11  ;;  %vm1724_vm2 = vcmask 1041409  }
 0x247   :  { %v919_v34 = vpop.permute.xlu1 %918 }
 0x248   :  { %v1008_v16 = vsel %vm1000_vm7, %v999_v14, %v919_v34 }
 0x24b   :  { %v951_v12 = vpop.permute.xlu1 %950 }
 0x24c   :  { %v1017_v17 = vsel %vm1009_vm8, %v1008_v16, %v951_v12  ;;  %vm7492_vm8 = vmpackc.low %vm2974_vm6, %vm6408_vm5  ;;  %vm2951_vm5 = vcmask 326656  }
 0x24f   :  { %v983_v18 = vpop.permute.xlu1 %982 }
 0x250   :  { %v1026_v19 = vsel %vm1018_vm9, %v1017_v17, %v983_v18 }
 0x251   :  { %5719 = vmatmul.mubr.msk.f32.gmra.mrb[6].mxu1 %vm1036_vm10, %v1026_v19  ;;  %vm2967_vm10 = vcmask 490496  }
 0x2c1   :  { %v5711_v21 = vpop.f32.mrb[0].mxu1 }
 0x2c2   :  { %v6916_v22 = vadd.f32 %v5711_v21, %v5309_v20  ;;  %v1131_v23 = vpop.f32.mrb[1].mxu1 }
 0x2c3   :  { %v6918_v24 = vadd.f32 %v5309_v20, %v1131_v23 }
 0x2c4   :  { %1171 = vst.msk [vmem:[#allocation5 + $0x8] sm:$0xff] %vm1000_vm7, %v6916_v22  ;;  %v1186_v29 = vsel %vm1000_vm7, %v6916_v22, 0.0 }
 0x2c5   :  { %1170 = vst.msk [vmem:[#allocation5] sm:$0xff] %vm1000_vm7, %v6918_v24  ;;  %v1185_v30 = vsel %vm1000_vm7, %v6918_v24, 0.0 }
 0x2c6   :  { %v1187_v32 = vadd.f32 %v1186_v29, %v1185_v30 }
 0x2e1   :  { %v5714_v25 = vpop.f32.mrb[2].mxu1 }
 0x2e2   :  { %v6924_v26 = vadd.f32 %v5714_v25, %v5309_v20  ;;  %v1141_v27 = vpop.f32.mrb[3].mxu1 }
 0x2e3   :  { %v1142_v28 = vadd.f32 %v5309_v20, %v1141_v27 }
 0x2e4   :  { %1173 = vst.msk [vmem:[#allocation5 + $0x18] sm:$0xff] %vm1000_vm7, %v6924_v26  ;;  %v1190_v38 = vsel %vm1000_vm7, %v6924_v26, 0.0 }
 0x2e5   :  { %1172 = vst.msk [vmem:[#allocation5 + $0x10] sm:$0xff] %vm1000_vm7, %v1142_v28  ;;  %v1188_v31 = vsel %vm1000_vm7, %v1142_v28, 0.0 }
 0x2e6   :  { %v1189_v33 = vadd.f32 %v1188_v31, %v1187_v32 }
 0x2e8   :  { %v1191_v40 = vadd.f32 %v1190_v38, %v1189_v33 }
 0x301   :  { %v5717_v35 = vpop.f32.mrb[4].mxu1 }
 0x302   :  { %v1157_v36 = vadd.f32 %v5717_v35, %v5309_v20  ;;  %v1151_v37 = vpop.f32.mrb[5].mxu1 }
 0x303   :  { %v1152_v39 = vadd.f32 %v5309_v20, %v1151_v37 }
 0x304   :  { %1175 = vst.msk [vmem:[#allocation5 + $0x28] sm:$0xff] %vm1000_vm7, %v1157_v36  ;;  %v1194_v43 = vsel %vm1000_vm7, %v1157_v36, 0.0 }
 0x305   :  { %1174 = vst.msk [vmem:[#allocation5 + $0x20] sm:$0xff] %vm1000_vm7, %v1152_v39  ;;  %v1192_v41 = vsel %vm1000_vm7, %v1152_v39, 0.0 }
 0x306   :  { %v1193_v42 = vadd.f32 %v1192_v41, %v1191_v40  ;;  %v1247_v41 = vld [vmem:[%s8319_s1 + $0x2] sm:$0x1] }
 0x308   :  { %v1195_v46 = vadd.f32 %v1194_v43, %v1193_v42 }
 0x324   :  { %v5720_v48 = vpop.f32.mrb[6].mxu1 }
 0x325   :  { %v1167_v49 = vadd.f32 %v5720_v48, %v5309_v20  ;;  %v1161_v50 = vpop.f32.mrb[7].mxu1 }
 0x326   :  { %v1162_v51 = vadd.f32 %v5309_v20, %v1161_v50 }
 0x327   :  { %1177 = vst.msk [vmem:[#allocation5 + $0x38] sm:$0xff] %vm1000_vm7, %v1167_v49  ;;  %v1198_v54 = vsel %vm1000_vm7, %v1167_v49, 0.0 }
 0x328   :  { %1176 = vst.msk [vmem:[#allocation5 + $0x30] sm:$0xff] %vm1000_vm7, %v1162_v51  ;;  %v1196_v52 = vsel %vm1000_vm7, %v1162_v51, 0.0 }
 0x329   :  { %v1197_v53 = vadd.f32 %v1196_v52, %v1195_v46  ;;  %v5319_v46 = vld [vmem:[%s8319_s1 + $0x3] ss:$0 sm:$0xff] }
 0x32b   :  { %v1199_v55 = vadd.f32 %v1198_v54, %v1197_v53 }
 0x32d   :  { %v1200_v56 = vrot.slane %v1199_v55, 4 }
 0x32f   :  { %v1201_v57 = vadd.f32 %v1200_v56, %v1199_v55 }
 0x331   :  { %v1202_v58 = vrot.slane %v1201_v57, 2 }
 0x333   :  { %v1203_v59 = vadd.f32 %v1202_v58, %v1201_v57 }
 0x335   :  { %v1204_v60 = vrot.slane %v1203_v59, 1 }
 0x337   :  { %v1205_v61 = vadd.f32 %v1204_v60, %v1203_v59 }
 0x339   :  { %v1206_v62 = vmul.f32 0.015625, %v1205_v61 }
 0x33b   :  { %v1207_v63 = vsub.f32 %v6918_v24, %v1206_v62  ;;  %v1208_v0 = vsub.f32 %v6916_v22, %v1206_v62  ;;  %v1209_v1 = vsub.f32 %v1142_v28, %v1206_v62  ;;  %v1210_v2 = vsub.f32 %v6924_v26, %v1206_v62 }
 0x33c   :  { %v1211_v3 = vsub.f32 %v1152_v39, %v1206_v62  ;;  %v1212_v4 = vsub.f32 %v1157_v36, %v1206_v62  ;;  %v1213_v5 = vsub.f32 %v1162_v51, %v1206_v62  ;;  %v1214_v6 = vsub.f32 %v1167_v49, %v1206_v62 }
 0x33d   :  { %v1215_v7 = vmul.f32 %v1207_v63, %v1207_v63  ;;  %v1216_v8 = vmul.f32 %v1208_v0, %v1208_v0  ;;  %v1217_v9 = vmul.f32 %v1209_v1, %v1209_v1  ;;  %v1218_v10 = vmul.f32 %v1210_v2, %v1210_v2 }
 0x33e   :  { %v1219_v13 = vmul.f32 %v1211_v3, %v1211_v3  ;;  %v1220_v17 = vmul.f32 %v1212_v4, %v1212_v4  ;;  %v1221_v20 = vmul.f32 %v1213_v5, %v1213_v5  ;;  %v1222_v23 = vmul.f32 %v1214_v6, %v1214_v6 }
 0x33f   :  { %v1223_v11 = vsel %vm1000_vm7, %v1215_v7, 0.0  ;;  %v1224_v34 = vsel %vm1000_vm7, %v1216_v8, 0.0  ;;  %v1226_v14 = vsel %vm1000_vm7, %v1217_v9, 0.0  ;;  %v1228_v18 = vsel %vm1000_vm7, %v1218_v10, 0.0  ;;  %v1355_v7 = vld [vmem:[%s8318_s2 + $0x38] sm:$0xff] }
 0x340   :  { %v1225_v12 = vadd.f32 %v1224_v34, %v1223_v11  ;;  %v1230_v21 = vsel %vm1000_vm7, %v1219_v13, 0.0  ;;  %v1232_v24 = vsel %vm1000_vm7, %v1220_v17, 0.0  ;;  %v1234_v26 = vsel %vm1000_vm7, %v1221_v20, 0.0 }
 0x341   :  { %v1236_v28 = vsel %vm1000_vm7, %v1222_v23, 0.0  ;;  %v1249_v39 = vlaneseq }
 0x342   :  { %v1227_v16 = vadd.f32 %v1226_v14, %v1225_v12 }
 0x343   :  { %v1250_v40 = vshrl.u32 %v1249_v39, 7 }
 0x344   :  { %v1229_v19 = vadd.f32 %v1228_v18, %v1227_v16 }
 0x345   :  { %v6996_v42 = vsub.s32 0, %v1250_v40  ;;  %v1581_v40 = vld [vmem:[%s8318_s2 + $0x48] sm:$0xff] }
 0x346   :  { %v1231_v22 = vadd.f32 %v1230_v21, %v1229_v19 }
 0x348   :  { %v1233_v25 = vadd.f32 %v1232_v24, %v1231_v22 }
 0x34a   :  { %v1235_v27 = vadd.f32 %v1234_v26, %v1233_v25 }
 0x34c   :  { %v1237_v29 = vadd.f32 %v1236_v28, %v1235_v27 }
 0x34e   :  { %v1238_v30 = vrot.slane %v1237_v29, 4 }
 0x350   :  { %v1239_v31 = vadd.f32 %v1238_v30, %v1237_v29 }
 0x352   :  { %v1240_v32 = vrot.slane %v1239_v31, 2 }
 0x354   :  { %v1241_v33 = vadd.f32 %v1240_v32, %v1239_v31 }
 0x356   :  { %v1242_v35 = vrot.slane %v1241_v33, 1 }
 0x358   :  { %v1243_v36 = vadd.f32 %v1242_v35, %v1241_v33 }
 0x35a   :  { %v1244_v37 = vmul.f32 0.015625, %v1243_v36 }
 0x35c   :  { %v1245_v38 = vadd.f32 1e-05, %v1244_v37 }
 0x35e   :  { %6352 = vrsqrt.f32 %v1245_v38 }
 0x368   :  { %v6353_v43 = vpop.eup %6352 }
 0x369   :  { %v1248_v44 = vmul.f32 %v6353_v43, %v1247_v41  ;;  %v1582_v41 = vld [vmem:[%s8318_s2 + $0x50] sm:$0xff] }
 0x36a   :  { %v6112_v43 = vpack.c.bf16 %v1582_v41, %v1581_v40 }
 0x36b   :  { %v1252_v45 = vrot.slane %v1248_v44, %v6996_v42  ;;  %v5320_v44 = vld [vmem:[%s8319_s1 + $0x4] ss:$0 sm:$0xff] }
 0x36d   :  { %v1253_v47 = vmul.f32 %v1252_v45, %v1207_v63  ;;  %v1254_v48 = vmul.f32 %v1252_v45, %v1208_v0  ;;  %v1255_v49 = vmul.f32 %v1252_v45, %v1209_v1  ;;  %v1256_v50 = vmul.f32 %v1252_v45, %v1210_v2  ;;  %v1356_v63 = vld [vmem:[%s8318_s2 + $0x40] sm:$0x3f] }
 0x36e   :  { %v1257_v51 = vmul.f32 %v1252_v45, %v1211_v3  ;;  %v1258_v52 = vmul.f32 %v1252_v45, %v1212_v4  ;;  %v1259_v53 = vmul.f32 %v1252_v45, %v1213_v5  ;;  %v1260_v54 = vmul.f32 %v1252_v45, %v1214_v6 }
 0x36f   :  { %v1266_v55 = vadd.f32 %v5319_v46, %v1253_v47  ;;  %v1267_v56 = vadd.f32 %v5319_v46, %v1254_v48  ;;  %v1268_v57 = vadd.f32 %v5319_v46, %v1255_v49  ;;  %v1269_v58 = vadd.f32 %v5319_v46, %v1256_v50 }
 0x370   :  { %v1270_v59 = vadd.f32 %v5319_v46, %v1257_v51  ;;  %v1271_v60 = vadd.f32 %v5319_v46, %v1258_v52  ;;  %v1272_v61 = vadd.f32 %v5319_v46, %v1259_v53  ;;  %v1273_v62 = vadd.f32 %v5319_v46, %v1260_v54 }
 0x371   :  { %v1274_v0 = vmax.f32 %v1266_v55, 0.0  ;;  %v1275_v1 = vmax.f32 %v1267_v56, 0.0  ;;  %v1276_v2 = vmax.f32 %v1268_v57, 0.0  ;;  %v1277_v3 = vmax.f32 %v1269_v58, 0.0 }
 0x372   :  { %v1278_v5 = vmax.f32 %v1270_v59, 0.0  ;;  %v1279_v6 = vmax.f32 %v1271_v60, 0.0  ;;  %v1280_v8 = vmax.f32 %v1272_v61, 0.0  ;;  %v1281_v9 = vmax.f32 %v1273_v62, 0.0 }
 0x373   :  { %1282 = vst.msk [vmem:[#allocation3 + $0x1] sm:$0xff] %vm1000_vm7, %v1274_v0  ;;  %1283 = vst.msk [vmem:[#allocation3 + $0x9] sm:$0xff] %vm1000_vm7, %v1275_v1  ;;  %v6106_v10 = vpack.c.bf16 %v1356_v63, %v1355_v7 }
 0x374   :  { %1284 = vst.msk [vmem:[#allocation3 + $0x11] sm:$0xff] %vm1000_vm7, %v1276_v2  ;;  %1285 = vst.msk [vmem:[#allocation3 + $0x19] sm:$0xff] %vm1000_vm7, %v1277_v3 }
 0x375   :  { %1286 = vst.msk [vmem:[#allocation3 + $0x29] sm:$0xff] %vm1000_vm7, %v1278_v5  ;;  %1287 = vst.msk [vmem:[#allocation3 + $0x31] sm:$0xff] %vm1000_vm7, %v1279_v6  ;;  %6108 = vmatprep.subr.msk.bf16.mxu1 %vm7010_vm13, %v6106_v10 }
 0x376   :  { %1288 = vst.msk [vmem:[#allocation3 + $0x39] sm:$0xff] %vm1000_vm7, %v1280_v8  ;;  %1289 = vst.msk [vmem:[#allocation3 + $0x41] sm:$0xff] %vm1000_vm7, %v1281_v9  ;;  %6111 = vmatpush3.bf16.msk.msra.mxu1 %vm7010_vm13, %v6106_v10 }
 0x377   :  { %6113 = vmatprep.subr.bf16.mxu1 %v6112_v43 }
 0x37a   :  { %v1298_v34 = vld [vmem:[#allocation3 + $0x1] ss:$2 sm:$0xff]  ;;  %v1306_v13 = vld [vmem:[#allocation3 + $0x2] ss:$2 sm:$0xff] }
 0x37b   :  { %v1300_v11 = vld [vmem:[#allocation3 + $0x11] ss:$2 sm:$0xff]  ;;  %1317 = vrot.lane.b32.xlu0 %v1298_v34, %s6406_s23  ;;  %v1308_v12 = vld [vmem:[#allocation3 + $0x12] ss:$2 sm:$0xff] }
 0x37c   :  { %1319 = vrot.lane.b32.xlu1 %v1300_v11, %s6406_s23  ;;  %v1302_v16 = vld [vmem:[#allocation3 + $0x29] ss:$2 sm:$0xff]  ;;  %v1310_v18 = vld [vmem:[#allocation3 + $0x2a] ss:$2 sm:$0xff] }
 0x37d   :  { %v1304_v14 = vld [vmem:[#allocation3 + $0x39] ss:$2 sm:$0xff]  ;;  %v1312_v17 = vld [vmem:[#allocation3 + $0x3a] ss:$2 sm:$0xff] }
 0x37e   :  { %v1292_v21 = vld [vmem:[#allocation3 + $0x10] ss:$2 sm:$0xff]  ;;  %v1290_v22 = vld [vmem:[#allocation3] ss:$2 sm:$0xff] }
 0x37f   :  { %1333 = vrot.lane.b32.xlu0 %v1306_v13, %s6409_s29  ;;  %v1296_v31 = vld [vmem:[#allocation3 + $0x38] ss:$2 sm:$0xff]  ;;  %v1294_v32 = vld [vmem:[#allocation3 + $0x28] ss:$2 sm:$0xff] }
 0x380   :  { %1335 = vrot.lane.b32.xlu1 %v1308_v12, %s6409_s29 }
 0x383   :  { %1321 = vrot.lane.b32.xlu0 %v1302_v16, %s6406_s23 }
 0x384   :  { %1323 = vrot.lane.b32.xlu1 %v1304_v14, %s6406_s23 }
 0x387   :  { %1337 = vrot.lane.b32.xlu0 %v1310_v18, %s6409_s29 }
 0x388   :  { %1339 = vrot.lane.b32.xlu1 %v1312_v17, %s6409_s29 }
 0x3ed   :  { %v1318_v20 = vpop.permute.xlu0 %1317 }
 0x3ee   :  { %v1320_v19 = vpop.permute.xlu1 %1319  ;;  %v1345_v24 = vsel %vm1000_vm7, %v1290_v22, %v1318_v20 }
 0x3ef   :  { %v1346_v23 = vsel %vm1000_vm7, %v1292_v21, %v1320_v19 }
 0x3f1   :  { %v1334_v26 = vpop.permute.xlu0 %1333 }
 0x3f2   :  { %v1336_v25 = vpop.permute.xlu1 %1335  ;;  %v1349_v28 = vsel %vm1018_vm9, %v1345_v24, %v1334_v26 }
 0x3f3   :  { %v1350_v27 = vsel %vm1018_vm9, %v1346_v23, %v1336_v25  ;;  %5729 = vmatprep.mubr.msk.f32.mxu1 %vm1362_vm14, %v1349_v28 }
 0x3f4   :  { %5730 = vmatmul.mubr.msk.f32.vlgmr.msra.gmra.mrb[8].mxu1 %vm1362_vm14, %v1350_v27  ;;  %v1502_v27 = vld [vmem:[%s8319_s1 + $0x5] sm:$0x1] }
 0x3f5   :  { %v1322_v30 = vpop.permute.xlu0 %1321  ;;  %6115 = vmatpush3.bf16.msra.mxu1 %v6112_v43 }
 0x3f6   :  { %v1324_v29 = vpop.permute.xlu1 %1323  ;;  %v1347_v35 = vsel %vm1000_vm7, %v1294_v32, %v1322_v30 }
 0x3f7   :  { %v1348_v33 = vsel %vm1000_vm7, %v1296_v31, %v1324_v29  ;;  %v5326_v31 = vld [vmem:[%s8319_s1 + $0x6] ss:$0 sm:$0xff] }
 0x3f9   :  { %v1338_v37 = vpop.permute.xlu0 %1337 }
 0x3fa   :  { %v1340_v36 = vpop.permute.xlu1 %1339  ;;  %v1351_v39 = vsel %vm1018_vm9, %v1347_v35, %v1338_v37  ;;  %v1583_v37 = vld [vmem:[%s8318_s2 + $0x58] sm:$0xff] }
 0x3fb   :  { %v1352_v38 = vsel %vm1018_vm9, %v1348_v33, %v1340_v36  ;;  %5732 = vmatprep.mubr.msk.f32.mxu1 %vm1362_vm14, %v1351_v39 }
 0x3fc   :  { %5733 = vmatmul.mubr.msk.f32.gmra.mrb[10].mxu1 %vm1362_vm14, %v1352_v38  ;;  %v1584_v38 = vld [vmem:[%s8318_s2 + $0x60] sm:$0x3f] }
 0x4c7   :  { %v5731_v45 = vpop.f32.mrb[8].mxu1 }
 0x4c8   :  { %v1451_v46 = vadd.f32 %v5731_v45, %v5320_v44  ;;  %v1445_v47 = vpop.f32.mrb[9].mxu1 }
 0x4c9   :  { %v1446_v48 = vadd.f32 %v5320_v44, %v1445_v47 }
 0x4ca   :  { %v1465_v49 = vsel %vm1000_vm7, %v1451_v46, 0.0 }
 0x4cb   :  { %v1464_v50 = vsel %vm1000_vm7, %v1446_v48, 0.0 }
 0x4cc   :  { %v1466_v51 = vadd.f32 %v1465_v49, %v1464_v50 }
 0x4cf   :  { %v5734_v52 = vpop.f32.mrb[10].mxu1 }
 0x4d0   :  { %v1455_v53 = vpop.f32.mrb[11].mxu1  ;;  %v1461_v54 = vadd.f32 %v5734_v52, %v5320_v44 }
 0x4d1   :  { %v1456_v55 = vadd.f32 %v5320_v44, %v1455_v53  ;;  %v6116_v44 = vpack.c.bf16 %v1584_v38, %v1583_v37 }
 0x4d2   :  { %v1469_v58 = vsel %vm1000_vm7, %v1461_v54, 0.0 }
 0x4d3   :  { %v1467_v56 = vsel %vm1000_vm7, %v1456_v55, 0.0  ;;  %6118 = vmatprep.subr.msk.bf16.mxu1 %vm7010_vm13, %v6116_v44 }
 0x4d4   :  { %v1468_v57 = vadd.f32 %v1467_v56, %v1466_v51  ;;  %6121 = vmatpush3.bf16.msk.msra.mxu1 %vm7010_vm13, %v6116_v44 }
 0x4d6   :  { %v1470_v59 = vadd.f32 %v1469_v58, %v1468_v57 }
 0x4d8   :  { %v1471_v60 = vrot.slane %v1470_v59, 4 }
 0x4da   :  { %v1472_v61 = vadd.f32 %v1471_v60, %v1470_v59 }
 0x4dc   :  { %v1473_v62 = vrot.slane %v1472_v61, 2 }
 0x4de   :  { %v1474_v7 = vadd.f32 %v1473_v62, %v1472_v61 }
 0x4e0   :  { %v1475_v63 = vrot.slane %v1474_v7, 1 }
 0x4e2   :  { %v1476_v0 = vadd.f32 %v1475_v63, %v1474_v7 }
 0x4e4   :  { %v1477_v1 = vmul.f32 0.03125, %v1476_v0 }
 0x4e6   :  { %v1478_v2 = vsub.f32 %v1446_v48, %v1477_v1  ;;  %v1479_v3 = vsub.f32 %v1451_v46, %v1477_v1  ;;  %v1480_v5 = vsub.f32 %v1456_v55, %v1477_v1  ;;  %v1481_v6 = vsub.f32 %v1461_v54, %v1477_v1 }
 0x4e8   :  { %v1482_v8 = vmul.f32 %v1478_v2, %v1478_v2  ;;  %v1483_v9 = vmul.f32 %v1479_v3, %v1479_v3  ;;  %v1484_v10 = vmul.f32 %v1480_v5, %v1480_v5  ;;  %v1485_v11 = vmul.f32 %v1481_v6, %v1481_v6 }
 0x4ea   :  { %v1486_v34 = vsel %vm1000_vm7, %v1482_v8, 0.0  ;;  %v1487_v12 = vsel %vm1000_vm7, %v1483_v9, 0.0  ;;  %v1489_v14 = vsel %vm1000_vm7, %v1484_v10, 0.0  ;;  %v1491_v17 = vsel %vm1000_vm7, %v1485_v11, 0.0 }
 0x4eb   :  { %v1488_v13 = vadd.f32 %v1487_v12, %v1486_v34 }
 0x4ed   :  { %v1490_v16 = vadd.f32 %v1489_v14, %v1488_v13  ;;  %v1715_v13 = vld [vmem:[%s8318_s2 + $0x68] sm:$0xff]  ;;  %v1716_v14 = vld [vmem:[%s8318_s2 + $0x70] sm:$0x3] }
 0x4ef   :  { %v1492_v18 = vadd.f32 %v1491_v17, %v1490_v16  ;;  %v6410_v16 = vmov 0.0|0.0   ;;  %v6123_v17 = vpack.c.bf16 %v1716_v14, %v1715_v13 }
 0x4f0   :  { %6122 = vmatprep.subr.bf16.mxu1 %v6410_v16 }
 0x4f1   :  { %v1493_v19 = vrot.slane %v1492_v18, 4 }
 0x4f3   :  { %v1494_v20 = vadd.f32 %v1493_v19, %v1492_v18  ;;  %v5327_v19 = vld [vmem:[%s8319_s1 + $0x7] ss:$0 sm:$0xff] }
 0x4f5   :  { %v1495_v21 = vrot.slane %v1494_v20, 2 }
 0x4f7   :  { %v1496_v22 = vadd.f32 %v1495_v21, %v1494_v20 }
 0x4f9   :  { %v1497_v23 = vrot.slane %v1496_v22, 1 }
 0x4fb   :  { %v1498_v24 = vadd.f32 %v1497_v23, %v1496_v22 }
 0x4fd   :  { %v1499_v25 = vmul.f32 0.03125, %v1498_v24 }
 0x4ff   :  { %v1500_v26 = vadd.f32 1e-05, %v1499_v25 }
 0x501   :  { %6354 = vrsqrt.f32 %v1500_v26 }
 0x50b   :  { %v6355_v28 = vpop.eup %6354 }
 0x50c   :  { %v1503_v29 = vmul.f32 %v6355_v28, %v1502_v27 }
 0x50e   :  { %v1507_v30 = vrot.slane %v1503_v29, %v6996_v42 }
 0x510   :  { %v1508_v32 = vmul.f32 %v1507_v30, %v1478_v2  ;;  %v1509_v33 = vmul.f32 %v1507_v30, %v1479_v3  ;;  %v1510_v35 = vmul.f32 %v1507_v30, %v1480_v5  ;;  %v1511_v36 = vmul.f32 %v1507_v30, %v1481_v6 }
 0x512   :  { %v1517_v39 = vadd.f32 %v5326_v31, %v1508_v32  ;;  %v1518_v40 = vadd.f32 %v5326_v31, %v1509_v33  ;;  %v1519_v41 = vadd.f32 %v5326_v31, %v1510_v35  ;;  %v1520_v43 = vadd.f32 %v5326_v31, %v1511_v36 }
 0x514   :  { %v1521_v45 = vmax.f32 %v1517_v39, 0.0  ;;  %v1522_v46 = vmax.f32 %v1518_v40, 0.0  ;;  %v1523_v47 = vmax.f32 %v1519_v41, 0.0  ;;  %v1524_v48 = vmax.f32 %v1520_v43, 0.0 }
 0x516   :  { %1525 = vst.msk [vmem:[#allocation4 + $0x1] sm:$0xff] %vm1000_vm7, %v1521_v45  ;;  %1526 = vst.msk [vmem:[#allocation4 + $0x9] sm:$0xff] %vm1000_vm7, %v1522_v46 }
 0x517   :  { %1527 = vst.msk [vmem:[#allocation4 + $0x19] sm:$0xff] %vm1000_vm7, %v1523_v47  ;;  %1528 = vst.msk [vmem:[#allocation4 + $0x21] sm:$0xff] %vm1000_vm7, %v1524_v48 }
 0x51d   :  { %v1534_v49 = vld [vmem:[#allocation4 + $0x9] sm:$0xff]  ;;  %v1533_v50 = vld [vmem:[#allocation4 + $0x1] sm:$0xff] }
 0x51e   :  { %1547 = vrot.lane.b32.xlu1 %v1534_v49, %s6406_s23  ;;  %1545 = vrot.lane.b32.xlu0 %v1533_v50, %s6406_s23  ;;  %v1538_v51 = vld [vmem:[#allocation4 + $0xa] sm:$0xff]  ;;  %v1537_v52 = vld [vmem:[#allocation4 + $0x2] sm:$0xff]  ;;  %v1535_v54 = vld [vmem:[#allocation4 + $0x19] sm:$0xff] }
 0x51f   :  { %v1536_v53 = vld [vmem:[#allocation4 + $0x21] sm:$0xff]  ;;  %v1531_v6 = vld [vmem:[#allocation4 + $0x18] sm:$0xff] }
 0x520   :  { %v1540_v55 = vld [vmem:[#allocation4 + $0x22] sm:$0xff]  ;;  %v1539_v56 = vld [vmem:[#allocation4 + $0x1a] sm:$0xff] }
 0x521   :  { %v1530_v59 = vld [vmem:[#allocation4 + $0x8] sm:$0xff]  ;;  %v1529_v60 = vld [vmem:[#allocation4] sm:$0xff] }
 0x522   :  { %1563 = vrot.lane.b32.xlu1 %v1538_v51, %s6409_s29  ;;  %1561 = vrot.lane.b32.xlu0 %v1537_v52, %s6409_s29  ;;  %v1532_v5 = vld [vmem:[#allocation4 + $0x20] sm:$0xff] }
 0x526   :  { %1551 = vrot.lane.b32.xlu1 %v1536_v53, %s6406_s23  ;;  %1549 = vrot.lane.b32.xlu0 %v1535_v54, %s6406_s23 }
 0x52a   :  { %1567 = vrot.lane.b32.xlu1 %v1540_v55, %s6409_s29  ;;  %1565 = vrot.lane.b32.xlu0 %v1539_v56, %s6409_s29  ;;  %v1837_v55 = vld [vmem:[%s8318_s2 + $0x78] sm:$0xff]  ;;  %v1838_v56 = vld [vmem:[%s8318_s2 + $0x80] sm:$0x3] }
 0x590   :  { %v1548_v57 = vpop.permute.xlu1 %1547  ;;  %v1546_v58 = vpop.permute.xlu0 %1545 }
 0x591   :  { %v1574_v61 = vsel %vm1000_vm7, %v1530_v59, %v1548_v57  ;;  %v1573_v62 = vsel %vm1000_vm7, %v1529_v60, %v1546_v58  ;;  %v6127_v57 = vpack.c.bf16 %v1838_v56, %v1837_v55  ;;  %v5333_v58 = vld [vmem:[%s8319_s1 + $0x8] ss:$0 sm:$0xff] }
 0x594   :  { %v1564_v7 = vpop.permute.xlu1 %1563  ;;  %v1562_v63 = vpop.permute.xlu0 %1561 }
 0x595   :  { %v1578_v0 = vsel %vm1018_vm9, %v1574_v61, %v1564_v7  ;;  %v1577_v1 = vsel %vm1018_vm9, %v1573_v62, %v1562_v63 }
 0x596   :  { %5743 = vmatprep.mubr.msk.f32.mxu1 %vm1362_vm14, %v1577_v1 }
 0x597   :  { %5744 = vmatmul.mubr.msk.f32.vlgmr.msra.gmra.mrb[12].mxu1 %vm1362_vm14, %v1578_v0 }
 0x598   :  { %v1552_v2 = vpop.permute.xlu1 %1551  ;;  %v1550_v3 = vpop.permute.xlu0 %1549  ;;  %6125 = vmatpush3.bf16.msk.msra.mxu1 %vm7112_vm0, %v6123_v17 }
 0x599   :  { %v1576_v8 = vsel %vm1000_vm7, %v1532_v5, %v1552_v2  ;;  %v1575_v9 = vsel %vm1000_vm7, %v1531_v6, %v1550_v3  ;;  %6126 = vmatprep.subr.bf16.mxu1 %v6410_v16 }
 0x59c   :  { %v1568_v10 = vpop.permute.xlu1 %1567  ;;  %v1566_v11 = vpop.permute.xlu0 %1565 }
 0x59d   :  { %v1580_v34 = vsel %vm1018_vm9, %v1576_v8, %v1568_v10  ;;  %v1579_v12 = vsel %vm1018_vm9, %v1575_v9, %v1566_v11 }
 0x59e   :  { %5746 = vmatprep.mubr.msk.f32.mxu1 %vm1362_vm14, %v1579_v12 }
 0x59f   :  { %5747 = vmatmul.mubr.msk.f32.gmra.mrb[14].mxu1 %vm1362_vm14, %v1580_v34 }
 0x5a0   :  { %5753 = vmatprep.mubr.msk.f32.mxu1 %vm6411_vm1, %v6404_v15 }
 0x66a   :  { %v5745_v20 = vpop.f32.mrb[12].mxu1 }
 0x66b   :  { %v7124_v21 = vadd.f32 %v5745_v20, %v5327_v19  ;;  %v1671_v22 = vpop.f32.mrb[13].mxu1  ;;  %v1823_v20 = vld [vmem:[%s8319_s1 + $0x9] sm:$0x1] }
 0x66c   :  { %v7126_v23 = vadd.f32 %v5327_v19, %v1671_v22 }
 0x66d   :  { %v1691_v24 = vand.u32 2147483647, %v7124_v21 }
 0x66e   :  { %v1690_v25 = vand.u32 2147483647, %v7126_v23 }
 0x66f   :  { %v1695_v26 = vsel %vm1000_vm7, %v1691_v24, 0.0 }
 0x670   :  { %v1694_v27 = vsel %vm1000_vm7, %v1690_v25, 0.0 }
 0x671   :  { %v1696_v28 = vadd.f32 %v1695_v26, %v1694_v27  ;;  %v5336_v26 = vld [vmem:[%s8319_s1 + $0xa] ss:$0 sm:$0xff] }
 0x672   :  { %v5748_v29 = vpop.f32.mrb[14].mxu1 }
 0x673   :  { %v1697_v30 = vrot.slane %v1696_v28, 4  ;;  %v7132_v31 = vadd.f32 %v5748_v29, %v5327_v19  ;;  %v1681_v32 = vpop.f32.mrb[15].mxu1 }
 0x674   :  { %v7134_v33 = vadd.f32 %v5327_v19, %v1681_v32  ;;  %v2082_v32 = vld [vmem:[%s8318_s2 + $0x90] sm:$0xff] }
 0x675   :  { %v1698_v35 = vadd.f32 %v1697_v30, %v1696_v28  ;;  %v1693_v36 = vand.u32 2147483647, %v7132_v31  ;;  %v2081_v30 = vld [vmem:[%s8318_s2 + $0x88] sm:$0xff] }
 0x676   :  { %v1692_v37 = vand.u32 2147483647, %v7134_v33 }
 0x677   :  { %v1699_v38 = vrot.slane %v1698_v35, 2  ;;  %v1704_v39 = vsel %vm1000_vm7, %v1693_v36, 0.0  ;;  %v5337_v36 = vld [vmem:[%s8319_s1 + $0xb] ss:$0 sm:$0xff] }
 0x678   :  { %v1703_v40 = vsel %vm1000_vm7, %v1692_v37, 0.0 }
 0x679   :  { %v1705_v41 = vadd.f32 %v1704_v39, %v1703_v40  ;;  %v1700_v43 = vadd.f32 %v1699_v38, %v1698_v35  ;;  %v6130_v35 = vpack.c.bf16 %v2082_v32, %v2081_v30 }
 0x67b   :  { %v1706_v44 = vrot.slane %v1705_v41, 4  ;;  %v1701_v46 = vrot.slane %v1700_v43, 1 }
 0x67d   :  { %v1707_v45 = vadd.f32 %v1706_v44, %v1705_v41  ;;  %v1702_v50 = vadd.f32 %v1701_v46, %v1700_v43 }
 0x67f   :  { %v1708_v47 = vrot.slane %v1707_v45, 2  ;;  %v1713_v52 = vmul.f32 0.0625, %v1702_v50 }
 0x681   :  { %v1709_v48 = vadd.f32 %v1708_v47, %v1707_v45 }
 0x683   :  { %v1710_v49 = vrot.slane %v1709_v48, 1 }
 0x685   :  { %v1711_v51 = vadd.f32 %v1710_v49, %v1709_v48 }
 0x687   :  { %v1714_v53 = vmul.f32 0.0625, %v1711_v51 }
 0x689   :  { %v1725_v54 = vsel %vm1724_vm2, %v1714_v53, %v1713_v52 }
 0x68a   :  { %5754 = vmatmul.mubr.msk.f32.vlgmr.msra.gmra.mrb[16].mxu1 %vm1000_vm7, %v1725_v54 }
 0x68b   :  { %5760 = vmatprep.mubr.msk.f32.mxu1 %vm6411_vm1, %v6404_v15  ;;  %6129 = vmatpush3.bf16.msk.msra.mxu1 %vm7112_vm0, %v6127_v57 }
 0x68c   :  { %6131 = vmatprep.subr.bf16.mxu1 %v6130_v35 }
 0x75d   :  { %v1798_v59 = vpop.f32.mrb[16].mxu1 }
 0x75e   :  { %v1799_v60 = vadd.f32 %v5333_v58, %v1798_v59  ;;  %v5755_v61 = vpop.f32.mrb[17].mxu1 }
 0x760   :  { %v1803_v62 = vsel %vm1802_vm3, %v1799_v60, 0.0 }
 0x761   :  { %v1804_v7 = vrot.slane %v1803_v62, 4 }
 0x763   :  { %v1805_v63 = vadd.f32 %v1804_v7, %v1803_v62 }
 0x765   :  { %v1806_v0 = vrot.slane %v1805_v63, 2 }
 0x767   :  { %v1807_v1 = vadd.f32 %v1806_v0, %v1805_v63  ;;  %v1178_v63 = vld [vmem:[#allocation5] ss:$2 sm:$0xff]  ;;  %v1180_v0 = vld [vmem:[#allocation5 + $0x10] ss:$2 sm:$0xff] }
 0x769   :  { %v1808_v2 = vrot.slane %v1807_v1, 1 }
 0x76b   :  { %v1809_v3 = vadd.f32 %v1808_v2, %v1807_v1 }
 0x76d   :  { %v1810_v5 = vmul.f32 0.5, %v1809_v3 }
 0x76f   :  { %v1811_v6 = vsub.f32 %v1799_v60, %v1810_v5 }
 0x771   :  { %v1812_v8 = vmul.f32 %v1811_v6, %v1811_v6 }
 0x773   :  { %v1813_v9 = vsel %vm1802_vm3, %v1812_v8, 0.0  ;;  %v1184_v8 = vld [vmem:[#allocation5 + $0x30] ss:$2 sm:$0xff] }
 0x774   :  { %v1814_v10 = vrot.slane %v1813_v9, 4 }
 0x776   :  { %v1815_v11 = vadd.f32 %v1814_v10, %v1813_v9 }
 0x778   :  { %v1816_v34 = vrot.slane %v1815_v11, 2 }
 0x77a   :  { %v1817_v12 = vadd.f32 %v1816_v34, %v1815_v11 }
 0x77c   :  { %v1818_v13 = vrot.slane %v1817_v12, 1 }
 0x77e   :  { %v1819_v14 = vadd.f32 %v1818_v13, %v1817_v12 }
 0x780   :  { %v1820_v17 = vmul.f32 0.5, %v1819_v14 }
 0x782   :  { %v1821_v19 = vadd.f32 1e-05, %v1820_v17 }
 0x784   :  { %6356 = vrsqrt.f32 %v1821_v19 }
 0x78e   :  { %v6357_v22 = vpop.eup %6356 }
 0x78f   :  { %v1824_v24 = vmul.f32 %v6357_v22, %v1823_v20 }
 0x791   :  { %v1828_v25 = vrot.slane %v1824_v24, %v6996_v42 }
 0x793   :  { %v1829_v27 = vmul.f32 %v1828_v25, %v1811_v6  ;;  %v1182_v6 = vld [vmem:[#allocation5 + $0x20] ss:$2 sm:$0xff] }
 0x795   :  { %v1835_v28 = vadd.f32 %v5336_v26, %v1829_v27 }
 0x797   :  { %v1836_v29 = vmax.f32 %v1835_v28, 0.0 }
 0x799   :  { %5761 = vmatmul.mubr.msk.f32.vlgmr.msra.gmra.mrb[18].mxu1 %vm1000_vm7, %v1836_v29 }
 0x79a   :  { %6133 = vmatpush3.bf16.msra.mxu1 %v6130_v35 }
 0x86c   :  { %v1916_v37 = vpop.f32.mrb[18].mxu1 }
 0x86d   :  { %v1917_v38 = vadd.f32 %v5337_v36, %v1916_v37  ;;  %v5762_v39 = vpop.f32.mrb[19].mxu1 }
 0x86f   :  { %v1920_v40 = vmul.f32 0.5, %v1917_v38 }
 0x871   :  { %6358 = vtanh.f32 %v1920_v40 }
 0x87b   :  { %v6359_v41 = vpop.eup %6358 }
 0x87c   :  { %v1922_v43 = vadd.f32 1.0, %v6359_v41 }
 0x87e   :  { %v1923_v44 = vmul.f32 0.5, %v1922_v43 }
 0x880   :  { %v1925_v45 = vrot.slane %v1923_v44, 1  ;;  %v1928_v46 = vmul.f32 %v1923_v44, %v1713_v52 }
 0x882   :  { %v1929_v47 = vmul.f32 %v1925_v45, %v1714_v53  ;;  %v1930_v48 = vsub.f32 0.0, %v1928_v46  ;;  %v1947_v56 = vrot.slane %v1928_v46, %v6996_v42 }
 0x884   :  { %v1931_v49 = vsub.f32 0.0, %v1929_v47  ;;  %v1935_v50 = vrot.slane %v1930_v48, %v6996_v42  ;;  %v1951_v57 = vrot.slane %v1929_v47, %v6996_v42 }
 0x886   :  { %v1939_v51 = vrot.slane %v1931_v49, %v6996_v42  ;;  %v1940_v54 = vmax.f32 %v1935_v50, %v7126_v23  ;;  %v1941_v55 = vmax.f32 %v1935_v50, %v7124_v21 }
 0x888   :  { %v1942_v58 = vmax.f32 %v1939_v51, %v7134_v33  ;;  %v1943_v59 = vmax.f32 %v1939_v51, %v7132_v31  ;;  %v1952_v52 = vmin.f32 %v1947_v56, %v1940_v54  ;;  %v1953_v53 = vmin.f32 %v1947_v56, %v1941_v55  ;;  %v2002_v54 = vld [vmem:[%s8319_s1 + $0xc] sm:$0x1] }
 0x88a   :  { %v1954_v60 = vmin.f32 %v1951_v57, %v1942_v58  ;;  %v1955_v61 = vmin.f32 %v1951_v57, %v1943_v59  ;;  %v1956_v62 = vsub.f32 %v7126_v23, %v1952_v52  ;;  %v1957_v7 = vsub.f32 %v7124_v21, %v1953_v53  ;;  %v5340_v58 = vld [vmem:[%s8319_s1 + $0xd] ss:$0 sm:$0xff] }
 0x88c   :  { %v1958_v1 = vsub.f32 %v7134_v33, %v1954_v60  ;;  %v1959_v2 = vsub.f32 %v7132_v31, %v1955_v61  ;;  %v7186_v3 = vadd.f32 %v1956_v62, %v1178_v63  ;;  %v7188_v5 = vadd.f32 %v1957_v7, %v1180_v0  ;;  %v2083_v61 = vld [vmem:[%s8318_s2 + $0x98] sm:$0xff]  ;;  %v2084_v62 = vld [vmem:[%s8318_s2 + $0xa0] sm:$0x3f] }
 0x88e   :  { %v7190_v9 = vadd.f32 %v1958_v1, %v1182_v6  ;;  %v7192_v10 = vadd.f32 %v1959_v2, %v1184_v8  ;;  %v1964_v23 = vsel %vm1000_vm7, %v7186_v3, 0.0  ;;  %v1965_v21 = vsel %vm1000_vm7, %v7188_v5, 0.0 }
 0x88f   :  { %v1966_v11 = vadd.f32 %v1965_v21, %v1964_v23  ;;  %v6134_v2 = vpack.c.bf16 %v2084_v62, %v2083_v61 }
 0x890   :  { %v1967_v31 = vsel %vm1000_vm7, %v7190_v9, 0.0  ;;  %v1969_v34 = vsel %vm1000_vm7, %v7192_v10, 0.0 }
 0x891   :  { %v1968_v33 = vadd.f32 %v1967_v31, %v1966_v11  ;;  %6136 = vmatprep.subr.msk.bf16.mxu1 %vm7010_vm13, %v6134_v2 }
 0x892   :  { %6139 = vmatpush3.bf16.msk.msra.mxu1 %vm7010_vm13, %v6134_v2 }
 0x893   :  { %v1970_v12 = vadd.f32 %v1969_v34, %v1968_v33 }
 0x895   :  { %v1971_v13 = vrot.slane %v1970_v12, 4 }
 0x897   :  { %v1972_v14 = vadd.f32 %v1971_v13, %v1970_v12 }
 0x899   :  { %v1973_v17 = vrot.slane %v1972_v14, 2 }
 0x89b   :  { %v1974_v19 = vadd.f32 %v1973_v17, %v1972_v14 }
 0x89d   :  { %v1975_v20 = vrot.slane %v1974_v19, 1 }
 0x89f   :  { %v1976_v22 = vadd.f32 %v1975_v20, %v1974_v19 }
 0x8a1   :  { %v1977_v24 = vmul.f32 0.03125, %v1976_v22 }
 0x8a3   :  { %v1978_v25 = vsub.f32 %v7186_v3, %v1977_v24  ;;  %v1979_v26 = vsub.f32 %v7188_v5, %v1977_v24  ;;  %v1980_v27 = vsub.f32 %v7190_v9, %v1977_v24  ;;  %v1981_v28 = vsub.f32 %v7192_v10, %v1977_v24 }
 0x8a5   :  { %v1982_v29 = vmul.f32 %v1978_v25, %v1978_v25  ;;  %v1983_v30 = vmul.f32 %v1979_v26, %v1979_v26  ;;  %v1984_v32 = vmul.f32 %v1980_v27, %v1980_v27  ;;  %v1985_v35 = vmul.f32 %v1981_v28, %v1981_v28 }
 0x8a7   :  { %v1986_v36 = vsel %vm1000_vm7, %v1982_v29, 0.0  ;;  %v1987_v37 = vsel %vm1000_vm7, %v1983_v30, 0.0  ;;  %v1989_v39 = vsel %vm1000_vm7, %v1984_v32, 0.0  ;;  %v1991_v41 = vsel %vm1000_vm7, %v1985_v35, 0.0 }
 0x8a8   :  { %v1988_v38 = vadd.f32 %v1987_v37, %v1986_v36 }
 0x8aa   :  { %v1990_v40 = vadd.f32 %v1989_v39, %v1988_v38 }
 0x8ac   :  { %v1992_v43 = vadd.f32 %v1991_v41, %v1990_v40 }
 0x8ae   :  { %v1993_v44 = vrot.slane %v1992_v43, 4 }
 0x8b0   :  { %v1994_v45 = vadd.f32 %v1993_v44, %v1992_v43 }
 0x8b2   :  { %v1995_v46 = vrot.slane %v1994_v45, 2 }
 0x8b4   :  { %v1996_v47 = vadd.f32 %v1995_v46, %v1994_v45  ;;  %v2307_v45 = vld [vmem:[%s8318_s2 + $0xa8] sm:$0xff]  ;;  %v2308_v46 = vld [vmem:[%s8318_s2 + $0xb0] sm:$0xff] }
 0x8b6   :  { %v1997_v48 = vrot.slane %v1996_v47, 1 }
 0x8b8   :  { %v1998_v49 = vadd.f32 %v1997_v48, %v1996_v47  ;;  %v6140_v47 = vpack.c.bf16 %v2308_v46, %v2307_v45  ;;  %v5341_v48 = vld [vmem:[%s8319_s1 + $0xe] ss:$0 sm:$0xff] }
 0x8ba   :  { %v1999_v50 = vmul.f32 0.03125, %v1998_v49  ;;  %6141 = vmatprep.subr.bf16.mxu1 %v6140_v47 }
 0x8bc   :  { %v2000_v51 = vadd.f32 1e-05, %v1999_v50 }
 0x8be   :  { %6360 = vrsqrt.f32 %v2000_v51 }
 0x8c8   :  { %v6361_v55 = vpop.eup %6360 }
 0x8c9   :  { %v2003_v56 = vmul.f32 %v6361_v55, %v2002_v54 }
 0x8cb   :  { %v2007_v57 = vrot.slane %v2003_v56, %v6996_v42 }
 0x8cd   :  { %v2008_v59 = vmul.f32 %v2007_v57, %v1978_v25  ;;  %v2009_v52 = vmul.f32 %v2007_v57, %v1979_v26  ;;  %v2010_v53 = vmul.f32 %v2007_v57, %v1980_v27  ;;  %v2011_v60 = vmul.f32 %v2007_v57, %v1981_v28 }
 0x8cf   :  { %v2017_v7 = vadd.f32 %v5340_v58, %v2008_v59  ;;  %v2018_v63 = vadd.f32 %v5340_v58, %v2009_v52  ;;  %v2019_v0 = vadd.f32 %v5340_v58, %v2010_v53  ;;  %v2020_v1 = vadd.f32 %v5340_v58, %v2011_v60 }
 0x8d1   :  { %v2021_v6 = vmax.f32 %v2017_v7, 0.0  ;;  %v2022_v8 = vmax.f32 %v2018_v63, 0.0  ;;  %v2023_v23 = vmax.f32 %v2019_v0, 0.0  ;;  %v2024_v21 = vmax.f32 %v2020_v1, 0.0 }
 0x8d3   :  { %2025 = vst.msk [vmem:[#allocation6 + $0x1] sm:$0xff] %vm1000_vm7, %v2021_v6  ;;  %2026 = vst.msk [vmem:[#allocation6 + $0x9] sm:$0xff] %vm1000_vm7, %v2022_v8 }
 0x8d4   :  { %2027 = vst.msk [vmem:[#allocation6 + $0x19] sm:$0xff] %vm1000_vm7, %v2023_v23  ;;  %2028 = vst.msk [vmem:[#allocation6 + $0x21] sm:$0xff] %vm1000_vm7, %v2024_v21 }
 0x8da   :  { %v2034_v11 = vld [vmem:[#allocation6 + $0x9] sm:$0xff]  ;;  %v2033_v31 = vld [vmem:[#allocation6 + $0x1] sm:$0xff] }
 0x8db   :  { %2047 = vrot.lane.b32.xlu1 %v2034_v11, %s6406_s23  ;;  %2045 = vrot.lane.b32.xlu0 %v2033_v31, %s6406_s23  ;;  %v2038_v33 = vld [vmem:[#allocation6 + $0xa] sm:$0xff]  ;;  %v2037_v34 = vld [vmem:[#allocation6 + $0x2] sm:$0xff]  ;;  %v2035_v13 = vld [vmem:[#allocation6 + $0x19] sm:$0xff] }
 0x8dc   :  { %v2036_v12 = vld [vmem:[#allocation6 + $0x21] sm:$0xff]  ;;  %v2031_v37 = vld [vmem:[#allocation6 + $0x18] sm:$0xff] }
 0x8dd   :  { %v2040_v14 = vld [vmem:[#allocation6 + $0x22] sm:$0xff]  ;;  %v2039_v17 = vld [vmem:[#allocation6 + $0x1a] sm:$0xff] }
 0x8de   :  { %v2030_v22 = vld [vmem:[#allocation6 + $0x8] sm:$0xff]  ;;  %v2029_v24 = vld [vmem:[#allocation6] sm:$0xff] }
 0x8df   :  { %2063 = vrot.lane.b32.xlu1 %v2038_v33, %s6409_s29  ;;  %2061 = vrot.lane.b32.xlu0 %v2037_v34, %s6409_s29  ;;  %v2032_v36 = vld [vmem:[#allocation6 + $0x20] sm:$0xff] }
 0x8e3   :  { %2051 = vrot.lane.b32.xlu1 %v2036_v12, %s6406_s23  ;;  %2049 = vrot.lane.b32.xlu0 %v2035_v13, %s6406_s23 }
 0x8e7   :  { %2067 = vrot.lane.b32.xlu1 %v2040_v14, %s6409_s29  ;;  %2065 = vrot.lane.b32.xlu0 %v2039_v17, %s6409_s29 }
 0x94d   :  { %v2048_v19 = vpop.permute.xlu1 %2047  ;;  %v2046_v20 = vpop.permute.xlu0 %2045 }
 0x94e   :  { %v2074_v25 = vsel %vm1000_vm7, %v2030_v22, %v2048_v19  ;;  %v2073_v26 = vsel %vm1000_vm7, %v2029_v24, %v2046_v20 }
 0x951   :  { %v2064_v27 = vpop.permute.xlu1 %2063  ;;  %v2062_v28 = vpop.permute.xlu0 %2061 }
 0x952   :  { %v2078_v29 = vsel %vm1018_vm9, %v2074_v25, %v2064_v27  ;;  %v2077_v30 = vsel %vm1018_vm9, %v2073_v26, %v2062_v28 }
 0x953   :  { %5771 = vmatprep.mubr.msk.f32.mxu1 %vm1362_vm14, %v2077_v30 }
 0x954   :  { %5772 = vmatmul.mubr.msk.f32.vlgmr.msra.gmra.mrb[20].mxu1 %vm1362_vm14, %v2078_v29 }
 0x955   :  { %v2052_v32 = vpop.permute.xlu1 %2051  ;;  %v2050_v35 = vpop.permute.xlu0 %2049  ;;  %6143 = vmatpush3.bf16.msra.mxu1 %v6140_v47 }
 0x956   :  { %v2076_v38 = vsel %vm1000_vm7, %v2032_v36, %v2052_v32  ;;  %v2075_v39 = vsel %vm1000_vm7, %v2031_v37, %v2050_v35 }
 0x959   :  { %v2068_v40 = vpop.permute.xlu1 %2067  ;;  %v2066_v41 = vpop.permute.xlu0 %2065 }
 0x95a   :  { %v2080_v43 = vsel %vm1018_vm9, %v2076_v38, %v2068_v40  ;;  %v2079_v44 = vsel %vm1018_vm9, %v2075_v39, %v2066_v41  ;;  %v2228_v38 = vld [vmem:[%s8319_s1 + $0xf] sm:$0x1] }
 0x95b   :  { %5774 = vmatprep.mubr.msk.f32.mxu1 %vm1362_vm14, %v2079_v44 }
 0x95c   :  { %5775 = vmatmul.mubr.msk.f32.gmra.mrb[22].mxu1 %vm1362_vm14, %v2080_v43  ;;  %v5347_v43 = vld [vmem:[%s8319_s1 + $0x10] ss:$0 sm:$0xff] }
 0xa27   :  { %v5773_v49 = vpop.f32.mrb[20].mxu1 }
 0xa28   :  { %v2177_v50 = vadd.f32 %v5773_v49, %v5341_v48  ;;  %v2171_v51 = vpop.f32.mrb[21].mxu1  ;;  %v2310_v49 = vld [vmem:[%s8318_s2 + $0xc0] sm:$0x3f] }
 0xa29   :  { %v2172_v54 = vadd.f32 %v5341_v48, %v2171_v51 }
 0xa2a   :  { %v2191_v55 = vsel %vm1000_vm7, %v2177_v50, 0.0 }
 0xa2b   :  { %v2190_v56 = vsel %vm1000_vm7, %v2172_v54, 0.0 }
 0xa2c   :  { %v2192_v57 = vadd.f32 %v2191_v55, %v2190_v56 }
 0xa2f   :  { %v5776_v58 = vpop.f32.mrb[22].mxu1 }
 0xa30   :  { %v2181_v59 = vpop.f32.mrb[23].mxu1  ;;  %v2187_v52 = vadd.f32 %v5776_v58, %v5341_v48 }
 0xa31   :  { %v2182_v53 = vadd.f32 %v5341_v48, %v2181_v59  ;;  %v2309_v48 = vld [vmem:[%s8318_s2 + $0xb8] sm:$0xff] }
 0xa32   :  { %v2195_v62 = vsel %vm1000_vm7, %v2187_v52, 0.0  ;;  %v6144_v56 = vpack.c.bf16 %v2310_v49, %v2309_v48 }
 0xa33   :  { %v2193_v60 = vsel %vm1000_vm7, %v2182_v53, 0.0 }
 0xa34   :  { %v2194_v61 = vadd.f32 %v2193_v60, %v2192_v57  ;;  %6146 = vmatprep.subr.msk.bf16.mxu1 %vm7010_vm13, %v6144_v56 }
 0xa35   :  { %6149 = vmatpush3.bf16.msk.msra.mxu1 %vm7010_vm13, %v6144_v56 }
 0xa36   :  { %v2196_v7 = vadd.f32 %v2195_v62, %v2194_v61  ;;  %6150 = vmatprep.subr.bf16.mxu1 %v6410_v16 }
 0xa38   :  { %v2197_v63 = vrot.slane %v2196_v7, 4 }
 0xa3a   :  { %v2198_v0 = vadd.f32 %v2197_v63, %v2196_v7 }
 0xa3c   :  { %v2199_v1 = vrot.slane %v2198_v0, 2 }
 0xa3e   :  { %v2200_v2 = vadd.f32 %v2199_v1, %v2198_v0 }
 0xa40   :  { %v2201_v6 = vrot.slane %v2200_v2, 1 }
 0xa42   :  { %v2202_v8 = vadd.f32 %v2201_v6, %v2200_v2 }
 0xa44   :  { %v2203_v23 = vmul.f32 0.03125, %v2202_v8 }
 0xa46   :  { %v2204_v21 = vsub.f32 %v2172_v54, %v2203_v23  ;;  %v2205_v11 = vsub.f32 %v2177_v50, %v2203_v23  ;;  %v2206_v31 = vsub.f32 %v2182_v53, %v2203_v23  ;;  %v2207_v33 = vsub.f32 %v2187_v52, %v2203_v23 }
 0xa48   :  { %v2208_v34 = vmul.f32 %v2204_v21, %v2204_v21  ;;  %v2209_v12 = vmul.f32 %v2205_v11, %v2205_v11  ;;  %v2210_v13 = vmul.f32 %v2206_v31, %v2206_v31  ;;  %v2211_v14 = vmul.f32 %v2207_v33, %v2207_v33 }
 0xa4a   :  { %v2212_v17 = vsel %vm1000_vm7, %v2208_v34, 0.0  ;;  %v2213_v19 = vsel %vm1000_vm7, %v2209_v12, 0.0  ;;  %v2215_v22 = vsel %vm1000_vm7, %v2210_v13, 0.0  ;;  %v2217_v25 = vsel %vm1000_vm7, %v2211_v14, 0.0 }
 0xa4b   :  { %v2214_v20 = vadd.f32 %v2213_v19, %v2212_v17 }
 0xa4d   :  { %v2216_v24 = vadd.f32 %v2215_v22, %v2214_v20 }
 0xa4f   :  { %v2218_v26 = vadd.f32 %v2217_v25, %v2216_v24 }
 0xa51   :  { %v2219_v27 = vrot.slane %v2218_v26, 4 }
 0xa53   :  { %v2220_v28 = vadd.f32 %v2219_v27, %v2218_v26 }
 0xa55   :  { %v2221_v29 = vrot.slane %v2220_v28, 2 }
 0xa57   :  { %v2222_v30 = vadd.f32 %v2221_v29, %v2220_v28  ;;  %v2440_v28 = vld [vmem:[%s8318_s2 + $0xc8] sm:$0xff]  ;;  %v2441_v29 = vld [vmem:[%s8318_s2 + $0xd0] sm:$0x3] }
 0xa59   :  { %v2223_v32 = vrot.slane %v2222_v30, 1 }
 0xa5b   :  { %v2224_v35 = vadd.f32 %v2223_v32, %v2222_v30  ;;  %v6151_v30 = vpack.c.bf16 %v2441_v29, %v2440_v28  ;;  %v5348_v32 = vld [vmem:[%s8319_s1 + $0x11] ss:$0 sm:$0xff] }
 0xa5d   :  { %v2225_v36 = vmul.f32 0.03125, %v2224_v35 }
 0xa5f   :  { %v2226_v37 = vadd.f32 1e-05, %v2225_v36 }
 0xa61   :  { %6362 = vrsqrt.f32 %v2226_v37 }
 0xa6b   :  { %v6363_v39 = vpop.eup %6362 }
 0xa6c   :  { %v2229_v40 = vmul.f32 %v6363_v39, %v2228_v38 }
 0xa6e   :  { %v2233_v41 = vrot.slane %v2229_v40, %v6996_v42 }
 0xa70   :  { %v2234_v44 = vmul.f32 %v2233_v41, %v2204_v21  ;;  %v2235_v45 = vmul.f32 %v2233_v41, %v2205_v11  ;;  %v2236_v46 = vmul.f32 %v2233_v41, %v2206_v31  ;;  %v2237_v47 = vmul.f32 %v2233_v41, %v2207_v33 }
 0xa72   :  { %v2243_v50 = vadd.f32 %v5347_v43, %v2234_v44  ;;  %v2244_v51 = vadd.f32 %v5347_v43, %v2235_v45  ;;  %v2245_v54 = vadd.f32 %v5347_v43, %v2236_v46  ;;  %v2246_v55 = vadd.f32 %v5347_v43, %v2237_v47 }
 0xa74   :  { %v2247_v57 = vmax.f32 %v2243_v50, 0.0  ;;  %v2248_v58 = vmax.f32 %v2244_v51, 0.0  ;;  %v2249_v59 = vmax.f32 %v2245_v54, 0.0  ;;  %v2250_v52 = vmax.f32 %v2246_v55, 0.0 }
 0xa76   :  { %2251 = vst.msk [vmem:[#allocation7 + $0x1] sm:$0xff] %vm1000_vm7, %v2247_v57  ;;  %2252 = vst.msk [vmem:[#allocation7 + $0x9] sm:$0xff] %vm1000_vm7, %v2248_v58 }
 0xa77   :  { %2253 = vst.msk [vmem:[#allocation7 + $0x19] sm:$0xff] %vm1000_vm7, %v2249_v59  ;;  %2254 = vst.msk [vmem:[#allocation7 + $0x21] sm:$0xff] %vm1000_vm7, %v2250_v52 }
 0xa7d   :  { %v2260_v53 = vld [vmem:[#allocation7 + $0x9] sm:$0xff]  ;;  %v2259_v60 = vld [vmem:[#allocation7 + $0x1] sm:$0xff] }
 0xa7e   :  { %2273 = vrot.lane.b32.xlu1 %v2260_v53, %s6406_s23  ;;  %2271 = vrot.lane.b32.xlu0 %v2259_v60, %s6406_s23  ;;  %v2264_v61 = vld [vmem:[#allocation7 + $0xa] sm:$0xff]  ;;  %v2263_v62 = vld [vmem:[#allocation7 + $0x2] sm:$0xff]  ;;  %v2261_v63 = vld [vmem:[#allocation7 + $0x19] sm:$0xff] }
 0xa7f   :  { %v2262_v7 = vld [vmem:[#allocation7 + $0x21] sm:$0xff]  ;;  %v2257_v19 = vld [vmem:[#allocation7 + $0x18] sm:$0xff] }
 0xa80   :  { %v2266_v0 = vld [vmem:[#allocation7 + $0x22] sm:$0xff]  ;;  %v2265_v1 = vld [vmem:[#allocation7 + $0x1a] sm:$0xff] }
 0xa81   :  { %v2256_v8 = vld [vmem:[#allocation7 + $0x8] sm:$0xff]  ;;  %v2255_v23 = vld [vmem:[#allocation7] sm:$0xff] }
 0xa82   :  { %2289 = vrot.lane.b32.xlu1 %v2264_v61, %s6409_s29  ;;  %2287 = vrot.lane.b32.xlu0 %v2263_v62, %s6409_s29  ;;  %v2258_v17 = vld [vmem:[#allocation7 + $0x20] sm:$0xff] }
 0xa86   :  { %2277 = vrot.lane.b32.xlu1 %v2262_v7, %s6406_s23  ;;  %2275 = vrot.lane.b32.xlu0 %v2261_v63, %s6406_s23 }
 0xa8a   :  { %2293 = vrot.lane.b32.xlu1 %v2266_v0, %s6409_s29  ;;  %2291 = vrot.lane.b32.xlu0 %v2265_v1, %s6409_s29 }
 0xaf0   :  { %v2274_v2 = vpop.permute.xlu1 %2273  ;;  %v2272_v6 = vpop.permute.xlu0 %2271 }
 0xaf1   :  { %v2300_v21 = vsel %vm1000_vm7, %v2256_v8, %v2274_v2  ;;  %v2299_v11 = vsel %vm1000_vm7, %v2255_v23, %v2272_v6  ;;  %v2559_v8 = vld [vmem:[%s8318_s2 + $0xd8] sm:$0xff]  ;;  %v2560_v23 = vld [vmem:[%s8318_s2 + $0xe0] sm:$0x3] }
 0xaf4   :  { %v2290_v31 = vpop.permute.xlu1 %2289  ;;  %v2288_v33 = vpop.permute.xlu0 %2287 }
 0xaf5   :  { %v2304_v34 = vsel %vm1018_vm9, %v2300_v21, %v2290_v31  ;;  %v2303_v12 = vsel %vm1018_vm9, %v2299_v11, %v2288_v33  ;;  %v6155_v21 = vpack.c.bf16 %v2560_v23, %v2559_v8  ;;  %v5354_v11 = vld [vmem:[%s8319_s1 + $0x12] ss:$0 sm:$0xff] }
 0xaf6   :  { %5785 = vmatprep.mubr.msk.f32.mxu1 %vm1362_vm14, %v2303_v12 }
 0xaf7   :  { %5786 = vmatmul.mubr.msk.f32.vlgmr.msra.gmra.mrb[24].mxu1 %vm1362_vm14, %v2304_v34 }
 0xaf8   :  { %v2278_v13 = vpop.permute.xlu1 %2277  ;;  %v2276_v14 = vpop.permute.xlu0 %2275  ;;  %6153 = vmatpush3.bf16.msk.msra.mxu1 %vm7112_vm0, %v6151_v30 }
 0xaf9   :  { %v2302_v20 = vsel %vm1000_vm7, %v2258_v17, %v2278_v13  ;;  %v2301_v22 = vsel %vm1000_vm7, %v2257_v19, %v2276_v14  ;;  %6154 = vmatprep.subr.bf16.mxu1 %v6410_v16 }
 0xafc   :  { %v2294_v24 = vpop.permute.xlu1 %2293  ;;  %v2292_v25 = vpop.permute.xlu0 %2291 }
 0xafd   :  { %v2306_v26 = vsel %vm1018_vm9, %v2302_v20, %v2294_v24  ;;  %v2305_v27 = vsel %vm1018_vm9, %v2301_v22, %v2292_v25 }
 0xafe   :  { %5788 = vmatprep.mubr.msk.f32.mxu1 %vm1362_vm14, %v2305_v27 }
 0xaff   :  { %5789 = vmatmul.mubr.msk.f32.gmra.mrb[26].mxu1 %vm1362_vm14, %v2306_v26 }
 0xb00   :  { %5795 = vmatprep.mubr.msk.f32.mxu1 %vm6411_vm1, %v6404_v15 }
 0xbca   :  { %v5787_v35 = vpop.f32.mrb[24].mxu1 }
 0xbcb   :  { %v7324_v36 = vadd.f32 %v5787_v35, %v5348_v32  ;;  %v2397_v37 = vpop.f32.mrb[25].mxu1 }
 0xbcc   :  { %v7326_v38 = vadd.f32 %v5348_v32, %v2397_v37 }
 0xbcd   :  { %v2417_v39 = vand.u32 2147483647, %v7324_v36 }
 0xbce   :  { %v2416_v40 = vand.u32 2147483647, %v7326_v38 }
 0xbcf   :  { %v2421_v41 = vsel %vm1000_vm7, %v2417_v39, 0.0 }
 0xbd0   :  { %v2420_v43 = vsel %vm1000_vm7, %v2416_v40, 0.0  ;;  %v2545_v40 = vld [vmem:[%s8319_s1 + $0x13] sm:$0x1] }
 0xbd1   :  { %v2422_v44 = vadd.f32 %v2421_v41, %v2420_v43 }
 0xbd2   :  { %v5790_v45 = vpop.f32.mrb[26].mxu1 }
 0xbd3   :  { %v2423_v46 = vrot.slane %v2422_v44, 4  ;;  %v7332_v47 = vadd.f32 %v5790_v45, %v5348_v32  ;;  %v2407_v48 = vpop.f32.mrb[27].mxu1  ;;  %v5357_v45 = vld [vmem:[%s8319_s1 + $0x14] ss:$0 sm:$0xff] }
 0xbd4   :  { %v7334_v49 = vadd.f32 %v5348_v32, %v2407_v48 }
 0xbd5   :  { %v2424_v50 = vadd.f32 %v2423_v46, %v2422_v44  ;;  %v2419_v51 = vand.u32 2147483647, %v7332_v47 }
 0xbd6   :  { %v2418_v54 = vand.u32 2147483647, %v7334_v49 }
 0xbd7   :  { %v2425_v55 = vrot.slane %v2424_v50, 2  ;;  %v2430_v56 = vsel %vm1000_vm7, %v2419_v51, 0.0  ;;  %v2789_v51 = vld [vmem:[%s8318_s2 + $0xe8] sm:$0xff] }
 0xbd8   :  { %v2429_v57 = vsel %vm1000_vm7, %v2418_v54, 0.0  ;;  %v2790_v54 = vld [vmem:[%s8318_s2 + $0xf0] sm:$0xff] }
 0xbd9   :  { %v2431_v58 = vadd.f32 %v2430_v56, %v2429_v57  ;;  %v2426_v59 = vadd.f32 %v2425_v55, %v2424_v50  ;;  %v2791_v55 = vld [vmem:[%s8318_s2 + $0xf8] sm:$0xff]  ;;  %v6158_v56 = vpack.c.bf16 %v2790_v54, %v2789_v51  ;;  %v2792_v57 = vld [vmem:[%s8318_s2 + $0x100] sm:$0x3f] }
 0xbdb   :  { %v2432_v52 = vrot.slane %v2431_v58, 4  ;;  %v2427_v60 = vrot.slane %v2426_v59, 1  ;;  %6159 = vmatprep.subr.bf16.mxu0 %v6158_v56 }
 0xbdc   :  { %6161 = vmatpush3.bf16.msra.mxu0 %v6158_v56 }
 0xbdd   :  { %v2433_v53 = vadd.f32 %v2432_v52, %v2431_v58  ;;  %v2428_v63 = vadd.f32 %v2427_v60, %v2426_v59  ;;  %v6162_v58 = vpack.c.bf16 %v2792_v57, %v2791_v55  ;;  %v5358_v59 = vld [vmem:[%s8319_s1 + $0x15] ss:$0 sm:$0xff] }
 0xbdf   :  { %v2434_v61 = vrot.slane %v2433_v53, 2  ;;  %v7340_v1 = vmul.f32 0.0625, %v2428_v63  ;;  %6164 = vmatprep.subr.msk.bf16.mxu0 %vm7010_vm13, %v6162_v58 }
 0xbe0   :  { %6167 = vmatpush3.bf16.msk.msra.mxu0 %vm7010_vm13, %v6162_v58  ;;  %vm4154_vm13 = vcmask 654336  }
 0xbe1   :  { %v2435_v62 = vadd.f32 %v2434_v61, %v2433_v53  ;;  %6186 = vmatprep.subr.bf16.mxu0 %v6410_v16 }
 0xbe3   :  { %v2436_v7 = vrot.slane %v2435_v62, 1 }
 0xbe5   :  { %v2437_v0 = vadd.f32 %v2436_v7, %v2435_v62 }
 0xbe7   :  { %v7342_v2 = vmul.f32 0.0625, %v2437_v0 }
 0xbe9   :  { %v2449_v6 = vsel %vm1724_vm2, %v7342_v2, %v7340_v1 }
 0xbea   :  { %5796 = vmatmul.mubr.msk.f32.vlgmr.msra.gmra.mrb[28].mxu1 %vm1000_vm7, %v2449_v6 }
 0xbeb   :  { %5802 = vmatprep.mubr.msk.f32.mxu1 %vm6411_vm1, %v6404_v15  ;;  %6157 = vmatpush3.bf16.msk.msra.mxu1 %vm7112_vm0, %v6155_v21 }
 0xcbd   :  { %v2521_v31 = vpop.f32.mrb[28].mxu1 }
 0xcbe   :  { %v2522_v33 = vadd.f32 %v5354_v11, %v2521_v31  ;;  %v5797_v34 = vpop.f32.mrb[29].mxu1 }
 0xcc0   :  { %v2525_v12 = vsel %vm1802_vm3, %v2522_v33, 0.0 }
 0xcc1   :  { %v2526_v13 = vrot.slane %v2525_v12, 4 }
 0xcc3   :  { %v2527_v14 = vadd.f32 %v2526_v13, %v2525_v12 }
 0xcc5   :  { %v2528_v17 = vrot.slane %v2527_v14, 2 }
 0xcc7   :  { %v2529_v19 = vadd.f32 %v2528_v17, %v2527_v14 }
 0xcc9   :  { %v2530_v20 = vrot.slane %v2529_v19, 1 }
 0xccb   :  { %v2531_v22 = vadd.f32 %v2530_v20, %v2529_v19 }
 0xccd   :  { %v2532_v24 = vmul.f32 0.5, %v2531_v22 }
 0xccf   :  { %v2533_v25 = vsub.f32 %v2522_v33, %v2532_v24 }
 0xcd1   :  { %v2534_v26 = vmul.f32 %v2533_v25, %v2533_v25 }
 0xcd3   :  { %v2535_v18 = vsel %vm1802_vm3, %v2534_v26, 0.0 }
 0xcd4   :  { %v2536_v27 = vrot.slane %v2535_v18, 4 }
 0xcd6   :  { %v2537_v28 = vadd.f32 %v2536_v27, %v2535_v18 }
 0xcd8   :  { %v2538_v29 = vrot.slane %v2537_v28, 2 }
 0xcda   :  { %v2539_v30 = vadd.f32 %v2538_v29, %v2537_v28 }
 0xcdc   :  { %v2540_v32 = vrot.slane %v2539_v30, 1 }
 0xcde   :  { %v2541_v35 = vadd.f32 %v2540_v32, %v2539_v30 }
 0xce0   :  { %v2542_v37 = vmul.f32 0.5, %v2541_v35 }
 0xce2   :  { %v2543_v39 = vadd.f32 1e-05, %v2542_v37 }
 0xce4   :  { %6364 = vrsqrt.f32 %v2543_v39 }
 0xcee   :  { %v6365_v41 = vpop.eup %6364 }
 0xcef   :  { %v2546_v43 = vmul.f32 %v6365_v41, %v2545_v40 }
 0xcf1   :  { %v2550_v44 = vrot.slane %v2546_v43, %v6996_v42 }
 0xcf3   :  { %v2551_v46 = vmul.f32 %v2550_v44, %v2533_v25 }
 0xcf5   :  { %v2557_v48 = vadd.f32 %v5357_v45, %v2551_v46 }
 0xcf7   :  { %v2558_v50 = vmax.f32 %v2557_v48, 0.0 }
 0xcf9   :  { %5803 = vmatmul.mubr.msk.f32.vlgmr.msra.gmra.mrb[30].mxu1 %vm1000_vm7, %v2558_v50 }
 0xdcc   :  { %v2638_v52 = vpop.f32.mrb[30].mxu1 }
 0xdcd   :  { %v2639_v53 = vadd.f32 %v5358_v59, %v2638_v52  ;;  %v5804_v60 = vpop.f32.mrb[31].mxu1 }
 0xdcf   :  { %v2642_v61 = vmul.f32 0.5, %v2639_v53 }
 0xdd1   :  { %6366 = vtanh.f32 %v2642_v61 }
 0xddb   :  { %v6367_v62 = vpop.eup %6366 }
 0xddc   :  { %v2644_v7 = vadd.f32 1.0, %v6367_v62 }
 0xdde   :  { %v2645_v63 = vmul.f32 0.5, %v2644_v7 }
 0xde0   :  { %v2647_v0 = vrot.slane %v2645_v63, 1  ;;  %v2650_v6 = vmul.f32 %v2645_v63, %v7340_v1 }
 0xde2   :  { %v2651_v4 = vmul.f32 %v2647_v0, %v7342_v2  ;;  %v2652_v8 = vsub.f32 0.0, %v2650_v6  ;;  %v2669_v34 = vrot.slane %v2650_v6, %v6996_v42  ;;  %v2731_v6 = vld [vmem:[%s8319_s1 + $0x16] sm:$0x1] }
 0xde4   :  { %v2653_v23 = vsub.f32 0.0, %v2651_v4  ;;  %v2657_v21 = vrot.slane %v2652_v8, %v6996_v42  ;;  %v2673_v12 = vrot.slane %v2651_v4, %v6996_v42 }
 0xde6   :  { %v2661_v11 = vrot.slane %v2653_v23, %v6996_v42  ;;  %v2662_v31 = vmax.f32 %v2657_v21, %v7326_v38  ;;  %v2663_v33 = vmax.f32 %v2657_v21, %v7324_v36  ;;  %v5361_v21 = vld [vmem:[%s8319_s1 + $0x17] ss:$0 sm:$0xff] }
 0xde8   :  { %v2664_v13 = vmax.f32 %v2661_v11, %v7334_v49  ;;  %v2665_v1 = vmax.f32 %v2661_v11, %v7332_v47  ;;  %v2674_v14 = vmin.f32 %v2669_v34, %v2662_v31  ;;  %v2675_v2 = vmin.f32 %v2669_v34, %v2663_v33 }
 0xdea   :  { %v2676_v17 = vmin.f32 %v2673_v12, %v2664_v13  ;;  %v2677_v19 = vmin.f32 %v2673_v12, %v2665_v1  ;;  %v2678_v20 = vsub.f32 %v7326_v38, %v2674_v14  ;;  %v2679_v22 = vsub.f32 %v7324_v36, %v2675_v2 }
 0xdec   :  { %v2680_v24 = vsub.f32 %v7334_v49, %v2676_v17  ;;  %v2681_v25 = vsub.f32 %v7332_v47, %v2677_v19  ;;  %v2682_v26 = vadd.f32 %v2678_v20, %v7186_v3  ;;  %v2683_v18 = vadd.f32 %v2679_v22, %v7188_v5 }
 0xdee   :  { %v2684_v27 = vadd.f32 %v2680_v24, %v7190_v9  ;;  %v2685_v28 = vadd.f32 %v2681_v25, %v7192_v10  ;;  %2686 = vst.msk [vmem:[#allocation10] sm:$0xff] %vm1000_vm7, %v2682_v26  ;;  %2687 = vst.msk [vmem:[#allocation10 + $0x8] sm:$0xff] %vm1000_vm7, %v2683_v18  ;;  %v2693_v38 = vsel %vm1000_vm7, %v2682_v26, 0.0  ;;  %v2694_v36 = vsel %vm1000_vm7, %v2683_v18, 0.0 }
 0xdef   :  { %v2695_v29 = vadd.f32 %v2694_v36, %v2693_v38 }
 0xdf0   :  { %2688 = vst.msk [vmem:[#allocation10 + $0x10] sm:$0xff] %vm1000_vm7, %v2684_v27  ;;  %2689 = vst.msk [vmem:[#allocation10 + $0x18] sm:$0xff] %vm1000_vm7, %v2685_v28  ;;  %v2696_v3 = vsel %vm1000_vm7, %v2684_v27, 0.0  ;;  %v2698_v9 = vsel %vm1000_vm7, %v2685_v28, 0.0 }
 0xdf1   :  { %v2697_v5 = vadd.f32 %v2696_v3, %v2695_v29 }
 0xdf3   :  { %v2699_v47 = vadd.f32 %v2698_v9, %v2697_v5 }
 0xdf5   :  { %v2700_v10 = vrot.slane %v2699_v47, 4 }
 0xdf7   :  { %v2701_v49 = vadd.f32 %v2700_v10, %v2699_v47  ;;  %v2954_v10 = vld [vmem:[%s8318_s2 + $0x108] sm:$0xff] }
 0xdf9   :  { %v2702_v30 = vrot.slane %v2701_v49, 2 }
 0xdfb   :  { %v2703_v32 = vadd.f32 %v2702_v30, %v2701_v49  ;;  %v2955_v49 = vld [vmem:[%s8318_s2 + $0x110] sm:$0xff]  ;;  %v2956_v30 = vld [vmem:[%s8318_s2 + $0x118] sm:$0xff] }
 0xdfd   :  { %v2704_v35 = vrot.slane %v2703_v32, 1 }
 0xdff   :  { %v2705_v37 = vadd.f32 %v2704_v35, %v2703_v32  ;;  %v6168_v32 = vpack.c.bf16 %v2955_v49, %v2954_v10  ;;  %v2957_v35 = vld [vmem:[%s8318_s2 + $0x120] sm:$0xff] }
 0xe01   :  { %v2706_v39 = vmul.f32 0.03125, %v2705_v37  ;;  %v6172_v37 = vpack.c.bf16 %v2957_v35, %v2956_v30  ;;  %6169 = vmatprep.subr.bf16.mxu1 %v6168_v32 }
 0xe02   :  { %6171 = vmatpush3.bf16.msra.mxu1 %v6168_v32 }
 0xe03   :  { %v2707_v40 = vsub.f32 %v2682_v26, %v2706_v39  ;;  %v2708_v41 = vsub.f32 %v2683_v18, %v2706_v39  ;;  %v2709_v43 = vsub.f32 %v2684_v27, %v2706_v39  ;;  %v2710_v44 = vsub.f32 %v2685_v28, %v2706_v39  ;;  %v2958_v39 = vld [vmem:[%s8318_s2 + $0x128] sm:$0xff]  ;;  %6173 = vmatprep.subr.bf16.mxu1 %v6172_v37 }
 0xe05   :  { %v2711_v45 = vmul.f32 %v2707_v40, %v2707_v40  ;;  %v2712_v46 = vmul.f32 %v2708_v41, %v2708_v41  ;;  %v2713_v48 = vmul.f32 %v2709_v43, %v2709_v43  ;;  %v2714_v50 = vmul.f32 %v2710_v44, %v2710_v44 }
 0xe06   :  { %6175 = vmatpush3.bf16.msra.mxu1 %v6172_v37 }
 0xe07   :  { %v2715_v51 = vsel %vm1000_vm7, %v2711_v45, 0.0  ;;  %v2716_v54 = vsel %vm1000_vm7, %v2712_v46, 0.0  ;;  %v2718_v56 = vsel %vm1000_vm7, %v2713_v48, 0.0  ;;  %v2720_v58 = vsel %vm1000_vm7, %v2714_v50, 0.0 }
 0xe08   :  { %v2717_v55 = vadd.f32 %v2716_v54, %v2715_v51 }
 0xe0a   :  { %v2719_v57 = vadd.f32 %v2718_v56, %v2717_v55 }
 0xe0c   :  { %v2721_v59 = vadd.f32 %v2720_v58, %v2719_v57 }
 0xe0e   :  { %v2722_v52 = vrot.slane %v2721_v59, 4 }
 0xe10   :  { %v2723_v53 = vadd.f32 %v2722_v52, %v2721_v59 }
 0xe12   :  { %v2724_v60 = vrot.slane %v2723_v53, 2 }
 0xe14   :  { %v2725_v61 = vadd.f32 %v2724_v60, %v2723_v53 }
 0xe16   :  { %v2726_v62 = vrot.slane %v2725_v61, 1 }
 0xe18   :  { %v2727_v7 = vadd.f32 %v2726_v62, %v2725_v61 }
 0xe1a   :  { %v2728_v63 = vmul.f32 0.03125, %v2727_v7 }
 0xe1c   :  { %v2729_v0 = vadd.f32 1e-05, %v2728_v63 }
 0xe1e   :  { %6368 = vrsqrt.f32 %v2729_v0 }
 0xe28   :  { %v6369_v4 = vpop.eup %6368 }
 0xe29   :  { %v2732_v8 = vmul.f32 %v6369_v4, %v2731_v6 }
 0xe2b   :  { %v2736_v23 = vrot.slane %v2732_v8, %v6996_v42 }
 0xe2d   :  { %v2737_v11 = vmul.f32 %v2736_v23, %v2707_v40  ;;  %v2738_v31 = vmul.f32 %v2736_v23, %v2708_v41  ;;  %v2739_v33 = vmul.f32 %v2736_v23, %v2709_v43  ;;  %v2740_v34 = vmul.f32 %v2736_v23, %v2710_v44  ;;  %v2959_v40 = vld [vmem:[%s8318_s2 + $0x130] sm:$0xff]  ;;  %v5362_v43 = vld [vmem:[%s8319_s1 + $0x18] ss:$0 sm:$0xff] }
 0xe2e   :  { %v6176_v41 = vpack.c.bf16 %v2959_v40, %v2958_v39  ;;  %v3072_v40 = vld [vmem:[%s8318_s2 + $0x148] sm:$0xff] }
 0xe2f   :  { %v2746_v12 = vadd.f32 %v5361_v21, %v2737_v11  ;;  %v2747_v13 = vadd.f32 %v5361_v21, %v2738_v31  ;;  %v2748_v1 = vadd.f32 %v5361_v21, %v2739_v33  ;;  %v2749_v14 = vadd.f32 %v5361_v21, %v2740_v34 }
 0xe30   :  { %6177 = vmatprep.subr.bf16.mxu1 %v6176_v41 }
 0xe31   :  { %v2750_v2 = vmax.f32 %v2746_v12, 0.0  ;;  %v2751_v17 = vmax.f32 %v2747_v13, 0.0  ;;  %v2752_v19 = vmax.f32 %v2748_v1, 0.0  ;;  %v2753_v20 = vmax.f32 %v2749_v14, 0.0  ;;  %6179 = vmatpush3.bf16.msra.mxu1 %v6176_v41  ;;  %v2908_v12 = vld [vmem:[%s8319_s1 + $0x19] sm:$0x1] }
 0xe32   :  { %v3073_v41 = vld [vmem:[%s8318_s2 + $0x150] sm:$0xff] }
 0xe33   :  { %2754 = vst.msk [vmem:[#allocation8 + $0x1] sm:$0xff] %vm1000_vm7, %v2750_v2  ;;  %2755 = vst.msk [vmem:[#allocation8 + $0x9] sm:$0xff] %vm1000_vm7, %v2751_v17  ;;  %v5366_v2 = vld [vmem:[%s8319_s1 + $0x1a] ss:$0 sm:$0xff] }
 0xe34   :  { %2756 = vst.msk [vmem:[#allocation8 + $0x19] sm:$0xff] %vm1000_vm7, %v2752_v19  ;;  %2757 = vst.msk [vmem:[#allocation8 + $0x21] sm:$0xff] %vm1000_vm7, %v2753_v20 }
 0xe3a   :  { %v2762_v24 = vld [vmem:[#allocation8 + $0x1] ss:$2 sm:$0xff]  ;;  %v2766_v26 = vld [vmem:[#allocation8 + $0x2] ss:$2 sm:$0xff] }
 0xe3b   :  { %v2764_v22 = vld [vmem:[#allocation8 + $0x19] ss:$2 sm:$0xff]  ;;  %2771 = vrot.lane.b32.xlu0 %v2762_v24, %s6406_s23  ;;  %v2768_v25 = vld [vmem:[#allocation8 + $0x1a] ss:$2 sm:$0xff]  ;;  %v2961_v24 = vld [vmem:[%s8318_s2 + $0x140] sm:$0xf] }
 0xe3c   :  { %2773 = vrot.lane.b32.xlu1 %v2764_v22, %s6406_s23  ;;  %v2760_v28 = vld [vmem:[#allocation8 + $0x18] ss:$2 sm:$0xff]  ;;  %v2960_v22 = vld [vmem:[%s8318_s2 + $0x138] sm:$0xff] }
 0xe3d   :  { %v2758_v38 = vld [vmem:[#allocation8] ss:$2 sm:$0xff] }
 0xe3f   :  { %2779 = vrot.lane.b32.xlu0 %v2766_v26, %s6409_s29 }
 0xe40   :  { %2781 = vrot.lane.b32.xlu1 %v2768_v25, %s6409_s29 }
 0xead   :  { %v2772_v27 = vpop.permute.xlu0 %2771 }
 0xeae   :  { %v2774_v18 = vpop.permute.xlu1 %2773  ;;  %v2785_v29 = vsel %vm1000_vm7, %v2758_v38, %v2772_v27 }
 0xeaf   :  { %v2786_v36 = vsel %vm1000_vm7, %v2760_v28, %v2774_v18  ;;  %v6180_v18 = vpack.c.bf16 %v2961_v24, %v2960_v22 }
 0xeb1   :  { %v2780_v5 = vpop.permute.xlu0 %2779  ;;  %6182 = vmatprep.subr.msk.bf16.mxu1 %vm7492_vm8, %v6180_v18 }
 0xeb2   :  { %v2782_v3 = vpop.permute.xlu1 %2781  ;;  %v2787_v47 = vsel %vm1018_vm9, %v2785_v29, %v2780_v5  ;;  %6185 = vmatpush3.bf16.msk.msra.mxu1 %vm7492_vm8, %v6180_v18 }
 0xeb3   :  { %v2788_v9 = vsel %vm1018_vm9, %v2786_v36, %v2782_v3  ;;  %5813 = vmatprep.mubr.msk.f32.mxu0 %vm1362_vm14, %v2787_v47 }
 0xeb4   :  { %5814 = vmatmul.mubr.msk.f32.vlgmr.msra.gmra.mrb[32].mxu0 %vm1362_vm14, %v2788_v9  ;;  %vm4180_vm14 = vcmask 982016  }
 0xeb5   :  { %5841 = vmatprep.mubr.msk.f32.mxu0 %vm6411_vm1, %v6404_v15 }
 0xf87   :  { %v5815_v44 = vpop.f32.mrb[32].mxu0 }
 0xf88   :  { %v2879_v45 = vadd.f32 %v5815_v44, %v5362_v43  ;;  %v2873_v46 = vpop.f32.mrb[33].mxu0  ;;  %v3074_v44 = vld [vmem:[%s8318_s2 + $0x158] sm:$0xf] }
 0xf89   :  { %v2874_v48 = vadd.f32 %v5362_v43, %v2873_v46  ;;  %v6187_v43 = vpack.c.bf16 %v3073_v41, %v3072_v40 }
 0xf8a   :  { %v2883_v50 = vsel %vm1018_vm9, %v2879_v45, 0.0 }
 0xf8b   :  { %v2882_v51 = vsel %vm1018_vm9, %v2874_v48, 0.0  ;;  %6188 = vmatpush3.bf16.msra.mxu0 %v6187_v43 }
 0xf8c   :  { %v2884_v54 = vadd.f32 %v2883_v50, %v2882_v51  ;;  %5839 = vmatprep.subr.mxu0 %v6404_v15 }
 0xf8e   :  { %v2885_v55 = vrot.slane %v2884_v54, 4 }
 0xf8f   :  { %5840 = vmatpush3.msk.msra.mxu0 %vm2974_vm6, %v3074_v44  ;;  %v3386_v44 = vld [vmem:[%s8318_s2 + $0x178] sm:$0xff] }
 0xf90   :  { %v2886_v56 = vadd.f32 %v2885_v55, %v2884_v54  ;;  %6189 = vmatprep.subr.bf16.mxu0 %v6410_v16 }
 0xf92   :  { %v2887_v57 = vrot.slane %v2886_v56, 2 }
 0xf94   :  { %v2888_v58 = vadd.f32 %v2887_v57, %v2886_v56 }
 0xf96   :  { %v2889_v59 = vrot.slane %v2888_v58, 1 }
 0xf98   :  { %v2890_v52 = vadd.f32 %v2889_v59, %v2888_v58 }
 0xf9a   :  { %v2891_v53 = vmul.f32 0.0625, %v2890_v52 }
 0xf9c   :  { %v2892_v60 = vsub.f32 %v2874_v48, %v2891_v53  ;;  %v2893_v61 = vsub.f32 %v2879_v45, %v2891_v53  ;;  %v5367_v45 = vld [vmem:[%s8319_s1 + $0x1b] ss:$0 sm:$0xff] }
 0xf9e   :  { %v2894_v62 = vmul.f32 %v2892_v60, %v2892_v60  ;;  %v2895_v7 = vmul.f32 %v2893_v61, %v2893_v61 }
 0xfa0   :  { %v2896_v63 = vsel %vm1018_vm9, %v2894_v62, 0.0  ;;  %v2897_v0 = vsel %vm1018_vm9, %v2895_v7, 0.0 }
 0xfa1   :  { %v2898_v6 = vadd.f32 %v2897_v0, %v2896_v63 }
 0xfa3   :  { %v2899_v4 = vrot.slane %v2898_v6, 4 }
 0xfa5   :  { %v2900_v8 = vadd.f32 %v2899_v4, %v2898_v6 }
 0xfa7   :  { %v2901_v23 = vrot.slane %v2900_v8, 2 }
 0xfa9   :  { %v2902_v21 = vadd.f32 %v2901_v23, %v2900_v8 }
 0xfab   :  { %v2903_v11 = vrot.slane %v2902_v21, 1 }
 0xfad   :  { %v2904_v31 = vadd.f32 %v2903_v11, %v2902_v21  ;;  %v3193_v11 = vld [vmem:[%s8318_s2 + $0x160] sm:$0xff] }
 0xfaf   :  { %v2905_v33 = vmul.f32 0.0625, %v2904_v31  ;;  %v3194_v31 = vld [vmem:[%s8318_s2 + $0x168] sm:$0xff] }
 0xfb1   :  { %v2906_v34 = vadd.f32 1e-05, %v2905_v33  ;;  %v6190_v33 = vpack.c.bf16 %v3194_v31, %v3193_v11 }
 0xfb3   :  { %6370 = vrsqrt.f32 %v2906_v34  ;;  %v3195_v34 = vld [vmem:[%s8318_s2 + $0x170] sm:$0xf] }
 0xfbd   :  { %v6371_v13 = vpop.eup %6370 }
 0xfbe   :  { %v2909_v1 = vmul.f32 %v6371_v13, %v2908_v12  ;;  %v5371_v12 = vld [vmem:[%s8319_s1 + $0x1c] ss:$0 sm:$0xff] }
 0xfc0   :  { %v2913_v14 = vrot.slane %v2909_v1, %v6996_v42 }
 0xfc2   :  { %v2914_v17 = vmul.f32 %v2913_v14, %v2892_v60  ;;  %v2915_v19 = vmul.f32 %v2913_v14, %v2893_v61 }
 0xfc4   :  { %v2921_v25 = vadd.f32 %v5366_v2, %v2914_v17  ;;  %v2922_v26 = vadd.f32 %v5366_v2, %v2915_v19 }
 0xfc6   :  { %v2923_v27 = vmax.f32 %v2921_v25, 0.0  ;;  %v2924_v28 = vmax.f32 %v2922_v26, 0.0 }
 0xfc8   :  { %2925 = vst.msk [vmem:[#allocation9 + $0x1] sm:$0xff] %vm1018_vm9, %v2923_v27  ;;  %2926 = vst.msk [vmem:[#allocation9 + $0x11] sm:$0xff] %vm1018_vm9, %v2924_v28 }
 0xfcf   :  { %v2930_v38 = vld [vmem:[#allocation9 + $0x11] sm:$0xff]  ;;  %v2929_v36 = vld [vmem:[#allocation9 + $0x1] sm:$0xff] }
 0xfd0   :  { %2937 = vrot.lane.b32.xlu1 %v2930_v38, %s6409_s29  ;;  %2935 = vrot.lane.b32.xlu0 %v2929_v36, %s6409_s29  ;;  %v2932_v29 = vld [vmem:[#allocation9 + $0x12] sm:$0xff]  ;;  %v2931_v3 = vld [vmem:[#allocation9 + $0x2] sm:$0xff] }
 0xfd1   :  { %v2928_v47 = vld [vmem:[#allocation9 + $0x10] sm:$0xff]  ;;  %v2927_v10 = vld [vmem:[#allocation9] sm:$0xff] }
 0xfd4   :  { %2945 = vrot.lane.b32.xlu1 %v2932_v29, %s6412_s20  ;;  %2943 = vrot.lane.b32.xlu0 %v2931_v3, %s6412_s20 }
0x1042   :  { %v2938_v5 = vpop.permute.xlu1 %2937  ;;  %v2936_v9 = vpop.permute.xlu0 %2935 }
0x1043   :  { %v2950_v49 = vsel %vm1018_vm9, %v2928_v47, %v2938_v5  ;;  %v2949_v30 = vsel %vm1018_vm9, %v2927_v10, %v2936_v9 }
0x1046   :  { %v2946_v32 = vpop.permute.xlu1 %2945  ;;  %v2944_v35 = vpop.permute.xlu0 %2943 }
0x1047   :  { %v2953_v37 = vsel %vm2951_vm5, %v2950_v49, %v2946_v32  ;;  %v2952_v39 = vsel %vm2951_vm5, %v2949_v30, %v2944_v35  ;;  %v3179_v30 = vld [vmem:[%s8319_s1 + $0x1d] sm:$0x1] }
0x1048   :  { %5832 = vmatprep.mubr.msk.f32.mxu1 %vm2967_vm10, %v2952_v39  ;;  %v5374_v39 = vld [vmem:[%s8319_s1 + $0x1e] ss:$0 sm:$0xff] }
0x1049   :  { %5833 = vmatmul.mubr.msk.f32.vlgmr.msra.gmra.mrb[32].mxu1 %vm2967_vm10, %v2953_v37 }
0x111c   :  { %v5834_v46 = vpop.f32.mrb[32].mxu1 }
0x111d   :  { %v7533_v48 = vadd.f32 %v5834_v46, %v5367_v45  ;;  %v3044_v50 = vpop.f32.mrb[33].mxu1  ;;  %v3388_v46 = vld [vmem:[%s8318_s2 + $0x188] sm:$0xff] }
0x111e   :  { %v7535_v51 = vadd.f32 %v5367_v45, %v3044_v50  ;;  %v3387_v45 = vld [vmem:[%s8318_s2 + $0x180] sm:$0xff] }
0x111f   :  { %v3054_v54 = vand.u32 2147483647, %v7533_v48  ;;  %v6192_v50 = vpack.c.bf16 %v3387_v45, %v3386_v44 }
0x1120   :  { %v3053_v55 = vand.u32 2147483647, %v7535_v51 }
0x1121   :  { %v3062_v56 = vsel %vm1018_vm9, %v3054_v54, 0.0  ;;  %v3389_v54 = vld [vmem:[%s8318_s2 + $0x190] sm:$0xff]  ;;  %6193 = vmatprep.subr.bf16.mxu1 %v6192_v50 }
0x1122   :  { %v3063_v57 = vrot.slane %v3062_v56, 4  ;;  %v3055_v58 = vsel %vm1018_vm9, %v3053_v55, 0.0  ;;  %v6196_v55 = vpack.c.bf16 %v3389_v54, %v3388_v46  ;;  %6195 = vmatpush3.bf16.msra.mxu1 %v6192_v50  ;;  %v3341_v50 = vld [vmem:[%s8319_s1 + $0x20] sm:$0x1] }
0x1123   :  { %v3056_v59 = vrot.slane %v3055_v58, 4 }
0x1124   :  { %v3064_v52 = vadd.f32 %v3063_v57, %v3062_v56  ;;  %v3390_v56 = vld [vmem:[%s8318_s2 + $0x198] sm:$0xff]  ;;  %v3391_v57 = vld [vmem:[%s8318_s2 + $0x1a0] sm:$0xff]  ;;  %6197 = vmatprep.subr.bf16.mxu1 %v6196_v55 }
0x1125   :  { %v3057_v53 = vadd.f32 %v3056_v59, %v3055_v58  ;;  %v6200_v58 = vpack.c.bf16 %v3391_v57, %v3390_v56  ;;  %v5375_v59 = vld [vmem:[%s8319_s1 + $0x1f] ss:$0 sm:$0xff]  ;;  %v5378_v57 = vld [vmem:[%s8319_s1 + $0x21] ss:$0 sm:$0xff] }
0x1126   :  { %v3065_v60 = vrot.slane %v3064_v52, 2  ;;  %6199 = vmatpush3.bf16.msra.mxu1 %v6196_v55 }
0x1127   :  { %v3058_v61 = vrot.slane %v3057_v53, 2  ;;  %6201 = vmatprep.subr.bf16.mxu1 %v6200_v58 }
0x1128   :  { %v3066_v62 = vadd.f32 %v3065_v60, %v3064_v52 }
0x1129   :  { %v3059_v7 = vadd.f32 %v3058_v61, %v3057_v53 }
0x112a   :  { %v3067_v63 = vrot.slane %v3066_v62, 1  ;;  %6203 = vmatpush3.bf16.msra.mxu1 %v6200_v58 }
0x112b   :  { %v3060_v0 = vrot.slane %v3059_v7, 1 }
0x112c   :  { %v3068_v6 = vadd.f32 %v3067_v63, %v3066_v62 }
0x112d   :  { %v3061_v4 = vadd.f32 %v3060_v0, %v3059_v7 }
0x112e   :  { %v7541_v8 = vmul.f32 0.125, %v3068_v6 }
0x112f   :  { %v7543_v23 = vmul.f32 0.125, %v3061_v4 }
0x1131   :  { %v3082_v21 = vsel %vm1724_vm2, %v7541_v8, %v7543_v23 }
0x1132   :  { %5842 = vmatmul.mubr.msk.f32.vlgmr.msra.gmra.mrb[34].mxu0 %vm1018_vm9, %v3082_v21 }
0x1133   :  { %5850 = vmatprep.mubr.msk.f32.mxu0 %vm6411_vm1, %v6404_v15  ;;  %6191 = vmatpush3.bf16.msra.mxu0 %v6190_v33 }
0x1134   :  { %5848 = vmatprep.subr.mxu0 %v6404_v15 }
0x1137   :  { %5849 = vmatpush3.msk.msra.mxu0 %vm2974_vm6, %v3195_v34 }
0x1205   :  { %v3154_v13 = vpop.f32.mrb[34].mxu0 }
0x1206   :  { %v3155_v1 = vadd.f32 %v5371_v12, %v3154_v13  ;;  %v5843_v14 = vpop.f32.mrb[35].mxu0  ;;  %v2690_v13 = vld [vmem:[#allocation10] ss:$2 sm:$0xff] }
0x1208   :  { %v3159_v2 = vsel %vm3158_vm11, %v3155_v1, 0.0 }
0x1209   :  { %v3160_v17 = vrot.slane %v3159_v2, 4 }
0x120b   :  { %v3161_v19 = vadd.f32 %v3160_v17, %v3159_v2  ;;  %v2692_v17 = vld [vmem:[#allocation10 + $0x10] ss:$2 sm:$0xff] }
0x120d   :  { %v3162_v22 = vrot.slane %v3161_v19, 2 }
0x120f   :  { %v3163_v24 = vadd.f32 %v3162_v22, %v3161_v19  ;;  %v3311_v19 = vsel %vm1000_vm7, %v2690_v13, 0.0 }
0x1211   :  { %v3164_v25 = vrot.slane %v3163_v24, 1 }
0x1213   :  { %v3165_v26 = vadd.f32 %v3164_v25, %v3163_v24  ;;  %v3312_v25 = vsel %vm1000_vm7, %v2692_v17, 0.0  ;;  %vm55_vm7 = vcmask 319488  }
0x1214   :  { %59 = vst.msk [vmem:[#allocation14 + $0xd] sm:$0x1] %vm55_vm7, %v6404_v15  ;;  %56 = vst.msk [vmem:[#allocation14] sm:$0x1] %vm55_vm7, %v6404_v15 }
0x1215   :  { %v3166_v18 = vmul.f32 0.5, %v3165_v26  ;;  %57 = vst.msk [vmem:[#allocation14 + $0x8] sm:$0x1] %vm55_vm7, %v6404_v15  ;;  %58 = vst.msk [vmem:[#allocation14 + $0x5] sm:$0x1] %vm55_vm7, %v6404_v15 }
0x1216   :  { %60 = vst.msk [vmem:[#allocation16] sm:$0x1] %vm55_vm7, %v6404_v15  ;;  %61 = vst.msk [vmem:[#allocation16 + $0x8] sm:$0x1] %vm55_vm7, %v6404_v15 }
0x1217   :  { %v3167_v27 = vsub.f32 %v3155_v1, %v3166_v18  ;;  %62 = vst.msk [vmem:[#allocation16 + $0x5] sm:$0x1] %vm55_vm7, %v6404_v15  ;;  %63 = vst.msk [vmem:[#allocation16 + $0xd] sm:$0x1] %vm55_vm7, %v6404_v15 }
0x1218   :  { %64 = vst.msk [vmem:[#allocation17] sm:$0x1] %vm55_vm7, %v6404_v15  ;;  %65 = vst.msk [vmem:[#allocation17 + $0x8] sm:$0x1] %vm55_vm7, %v6404_v15 }
0x1219   :  { %v3168_v28 = vmul.f32 %v3167_v27, %v3167_v27  ;;  %66 = vst.msk [vmem:[#allocation17 + $0x5] sm:$0x1] %vm55_vm7, %v6404_v15  ;;  %67 = vst.msk [vmem:[#allocation17 + $0xd] sm:$0x1] %vm55_vm7, %v6404_v15 }
0x121b   :  { %v3169_v38 = vsel %vm3158_vm11, %v3168_v28, 0.0 }
0x121c   :  { %v3170_v36 = vrot.slane %v3169_v38, 4 }
0x121e   :  { %v3171_v29 = vadd.f32 %v3170_v36, %v3169_v38 }
0x1220   :  { %v3172_v3 = vrot.slane %v3171_v29, 2 }
0x1222   :  { %v3173_v5 = vadd.f32 %v3172_v3, %v3171_v29 }
0x1224   :  { %v3174_v9 = vrot.slane %v3173_v5, 1 }
0x1226   :  { %v3175_v47 = vadd.f32 %v3174_v9, %v3173_v5 }
0x1228   :  { %v3176_v10 = vmul.f32 0.5, %v3175_v47 }
0x122a   :  { %v3177_v49 = vadd.f32 1e-05, %v3176_v10 }
0x122c   :  { %6372 = vrsqrt.f32 %v3177_v49 }
0x1236   :  { %v6373_v32 = vpop.eup %6372 }
0x1237   :  { %v3180_v35 = vmul.f32 %v6373_v32, %v3179_v30 }
0x1239   :  { %v3184_v37 = vrot.slane %v3180_v35, %v6996_v42 }
0x123b   :  { %v3185_v40 = vmul.f32 %v3184_v37, %v3167_v27 }
0x123d   :  { %v3191_v41 = vadd.f32 %v5374_v39, %v3185_v40 }
0x123f   :  { %v3192_v43 = vmax.f32 %v3191_v41, 0.0 }
0x1241   :  { %5851 = vmatmul.mubr.msk.f32.vlgmr.msra.gmra.mrb[36].mxu0 %vm1018_vm9, %v3192_v43 }
0x1314   :  { %v3273_v52 = vpop.f32.mrb[36].mxu0 }
0x1315   :  { %v3274_v53 = vadd.f32 %v5375_v59, %v3273_v52  ;;  %v5852_v60 = vpop.f32.mrb[37].mxu0  ;;  %v3392_v52 = vld [vmem:[%s8318_s2 + $0x1a8] sm:$0xff] }
0x1317   :  { %v3277_v61 = vmul.f32 0.5, %v3274_v53  ;;  %v3393_v53 = vld [vmem:[%s8318_s2 + $0x1b0] sm:$0xf] }
0x1319   :  { %6374 = vtanh.f32 %v3277_v61 }
0x1323   :  { %v6375_v62 = vpop.eup %6374 }
0x1324   :  { %v3279_v7 = vadd.f32 1.0, %v6375_v62  ;;  %v6204_v62 = vpack.c.bf16 %v3393_v53, %v3392_v52 }
0x1326   :  { %v3280_v63 = vmul.f32 0.5, %v3279_v7  ;;  %6206 = vmatprep.subr.msk.bf16.mxu1 %vm7492_vm8, %v6204_v62 }
0x1327   :  { %6209 = vmatpush3.bf16.msk.msra.mxu1 %vm7492_vm8, %v6204_v62 }
0x1328   :  { %v3282_v0 = vrot.slane %v3280_v63, 1  ;;  %v3285_v6 = vmul.f32 %v3280_v63, %v7543_v23  ;;  %6228 = vmatprep.subr.bf16.mxu1 %v6410_v16 }
0x132a   :  { %v3286_v4 = vmul.f32 %v3282_v0, %v7541_v8  ;;  %v3287_v21 = vsub.f32 0.0, %v3285_v6  ;;  %v3302_v12 = vrot.slane %v3285_v6, %v6996_v42 }
0x132c   :  { %v3288_v11 = vsub.f32 0.0, %v3286_v4  ;;  %v3292_v31 = vrot.slane %v3287_v21, %v6996_v42  ;;  %v3306_v14 = vrot.slane %v3286_v4, %v6996_v42 }
0x132e   :  { %v3296_v33 = vrot.slane %v3288_v11, %v6996_v42  ;;  %v3297_v34 = vmax.f32 %v3292_v31, %v7535_v51 }
0x1330   :  { %v3298_v1 = vmax.f32 %v3296_v33, %v7533_v48  ;;  %v3307_v2 = vmin.f32 %v3302_v12, %v3297_v34 }
0x1332   :  { %v3308_v23 = vmin.f32 %v3306_v14, %v3298_v1  ;;  %v3309_v8 = vsub.f32 %v7535_v51, %v3307_v2 }
0x1334   :  { %v3310_v22 = vsub.f32 %v7533_v48, %v3308_v23  ;;  %v7607_v24 = vadd.f32 %v3311_v19, %v3309_v8  ;;  %v3554_v23 = vld [vmem:[%s8318_s2 + $0x1b8] sm:$0xff]  ;;  %v3555_v8 = vld [vmem:[%s8318_s2 + $0x1c0] sm:$0xff]  ;;  %v3556_v19 = vld [vmem:[%s8318_s2 + $0x1c8] sm:$0xff] }
0x1336   :  { %v7610_v26 = vadd.f32 %v3312_v25, %v3310_v22  ;;  %v3315_v18 = vsel %vm1018_vm9, %v7607_v24, 0.0  ;;  %v6210_v22 = vpack.c.bf16 %v3555_v8, %v3554_v23  ;;  %v3557_v25 = vld [vmem:[%s8318_s2 + $0x1d0] sm:$0xff] }
0x1338   :  { %v3316_v27 = vsel %vm1018_vm9, %v7610_v26, 0.0  ;;  %6211 = vmatprep.subr.bf16.mxu0 %v6210_v22 }
0x1339   :  { %v3317_v28 = vadd.f32 %v3316_v27, %v3315_v18  ;;  %v6214_v18 = vpack.c.bf16 %v3557_v25, %v3556_v19  ;;  %v3558_v27 = vld [vmem:[%s8318_s2 + $0x1d8] sm:$0xff]  ;;  %6213 = vmatpush3.bf16.msra.mxu0 %v6210_v22 }
0x133b   :  { %v3318_v38 = vrot.slane %v3317_v28, 4  ;;  %6215 = vmatprep.subr.bf16.mxu0 %v6214_v18 }
0x133d   :  { %v3319_v36 = vadd.f32 %v3318_v38, %v3317_v28  ;;  %v3559_v28 = vld [vmem:[%s8318_s2 + $0x1e0] sm:$0xff]  ;;  %6217 = vmatpush3.bf16.msra.mxu0 %v6214_v18 }
0x133e   :  { %v6218_v38 = vpack.c.bf16 %v3559_v28, %v3558_v27 }
0x133f   :  { %v3320_v51 = vrot.slane %v3319_v36, 2 }
0x1340   :  { %6219 = vmatprep.subr.bf16.mxu0 %v6218_v38 }
0x1341   :  { %v3321_v29 = vadd.f32 %v3320_v51, %v3319_v36  ;;  %6221 = vmatpush3.bf16.msra.mxu0 %v6218_v38  ;;  %v5379_v36 = vld [vmem:[%s8319_s1 + $0x22] ss:$0 sm:$0xff] }
0x1343   :  { %v3322_v3 = vrot.slane %v3321_v29, 1 }
0x1345   :  { %v3323_v5 = vadd.f32 %v3322_v3, %v3321_v29 }
0x1347   :  { %v3324_v48 = vmul.f32 0.0625, %v3323_v5 }
0x1349   :  { %v3325_v9 = vsub.f32 %v7607_v24, %v3324_v48  ;;  %v3326_v47 = vsub.f32 %v7610_v26, %v3324_v48 }
0x134b   :  { %v3327_v10 = vmul.f32 %v3325_v9, %v3325_v9  ;;  %v3328_v49 = vmul.f32 %v3326_v47, %v3326_v47 }
0x134d   :  { %v3329_v30 = vsel %vm1018_vm9, %v3327_v10, 0.0  ;;  %v3330_v32 = vsel %vm1018_vm9, %v3328_v49, 0.0 }
0x134e   :  { %v3331_v35 = vadd.f32 %v3330_v32, %v3329_v30 }
0x1350   :  { %v3332_v37 = vrot.slane %v3331_v35, 4 }
0x1352   :  { %v3333_v39 = vadd.f32 %v3332_v37, %v3331_v35 }
0x1354   :  { %v3334_v40 = vrot.slane %v3333_v39, 2 }
0x1356   :  { %v3335_v41 = vadd.f32 %v3334_v40, %v3333_v39 }
0x1358   :  { %v3336_v43 = vrot.slane %v3335_v41, 1 }
0x135a   :  { %v3337_v44 = vadd.f32 %v3336_v43, %v3335_v41 }
0x135c   :  { %v3338_v45 = vmul.f32 0.0625, %v3337_v44 }
0x135e   :  { %v3339_v46 = vadd.f32 1e-05, %v3338_v45 }
0x1360   :  { %6376 = vrsqrt.f32 %v3339_v46 }
0x136a   :  { %v6377_v54 = vpop.eup %6376 }
0x136b   :  { %v3342_v55 = vmul.f32 %v6377_v54, %v3341_v50 }
0x136d   :  { %v3346_v56 = vrot.slane %v3342_v55, %v6996_v42 }
0x136f   :  { %v3347_v58 = vmul.f32 %v3346_v56, %v3325_v9  ;;  %v3348_v59 = vmul.f32 %v3346_v56, %v3326_v47 }
0x1371   :  { %v3354_v60 = vadd.f32 %v5378_v57, %v3347_v58  ;;  %v3355_v61 = vadd.f32 %v5378_v57, %v3348_v59 }
0x1373   :  { %v3356_v7 = vmax.f32 %v3354_v60, 0.0  ;;  %v3357_v63 = vmax.f32 %v3355_v61, 0.0  ;;  %v3509_v60 = vld [vmem:[%s8319_s1 + $0x23] sm:$0x1] }
0x1375   :  { %3358 = vst.msk [vmem:[#allocation11 + $0x1] sm:$0xff] %vm1018_vm9, %v3356_v7  ;;  %3359 = vst.msk [vmem:[#allocation11 + $0x11] sm:$0xff] %vm1018_vm9, %v3357_v63  ;;  %v5383_v63 = vld [vmem:[%s8319_s1 + $0x24] ss:$0 sm:$0xff] }
0x137c   :  { %v3363_v0 = vld [vmem:[#allocation11 + $0x11] sm:$0xff]  ;;  %v3362_v6 = vld [vmem:[#allocation11 + $0x1] sm:$0xff] }
0x137d   :  { %3370 = vrot.lane.b32.xlu1 %v3363_v0, %s6409_s29  ;;  %3368 = vrot.lane.b32.xlu0 %v3362_v6, %s6409_s29  ;;  %v3365_v4 = vld [vmem:[#allocation11 + $0x12] sm:$0xff]  ;;  %v3364_v21 = vld [vmem:[#allocation11 + $0x2] sm:$0xff] }
0x137e   :  { %v3361_v33 = vld [vmem:[#allocation11 + $0x10] sm:$0xff]  ;;  %v3360_v34 = vld [vmem:[#allocation11] sm:$0xff] }
0x1381   :  { %3378 = vrot.lane.b32.xlu1 %v3365_v4, %s6412_s20  ;;  %3376 = vrot.lane.b32.xlu0 %v3364_v21, %s6412_s20  ;;  %v3560_v4 = vld [vmem:[%s8318_s2 + $0x1e8] sm:$0xff]  ;;  %v3561_v21 = vld [vmem:[%s8318_s2 + $0x1f0] sm:$0xf] }
0x13ef   :  { %v3371_v11 = vpop.permute.xlu1 %3370  ;;  %v3369_v31 = vpop.permute.xlu0 %3368 }
0x13f0   :  { %v3383_v12 = vsel %vm1018_vm9, %v3361_v33, %v3371_v11  ;;  %v3382_v13 = vsel %vm1018_vm9, %v3360_v34, %v3369_v31  ;;  %v6222_v33 = vpack.c.bf16 %v3561_v21, %v3560_v4 }
0x13f2   :  { %6224 = vmatprep.subr.msk.bf16.mxu0 %vm7492_vm8, %v6222_v33 }
0x13f3   :  { %v3379_v1 = vpop.permute.xlu1 %3378  ;;  %v3377_v14 = vpop.permute.xlu0 %3376  ;;  %6227 = vmatpush3.bf16.msk.msra.mxu0 %vm7492_vm8, %v6222_v33 }
0x13f4   :  { %v3385_v2 = vsel %vm2951_vm5, %v3383_v12, %v3379_v1  ;;  %v3384_v17 = vsel %vm2951_vm5, %v3382_v13, %v3377_v14  ;;  %6231 = vmatprep.subr.bf16.mxu0 %v6410_v16 }
0x13f5   :  { %5869 = vmatprep.mubr.msk.f32.mxu1 %vm2967_vm10, %v3384_v17 }
0x13f6   :  { %5870 = vmatmul.mubr.msk.f32.vlgmr.msra.gmra.mrb[34].mxu1 %vm2967_vm10, %v3385_v2 }
0x13f7   :  { %5897 = vmatprep.mubr.msk.f32.mxu1 %vm6411_vm1, %v6404_v15 }
0x14c9   :  { %v5871_v51 = vpop.f32.mrb[34].mxu1 }
0x14ca   :  { %v3480_v29 = vadd.f32 %v5871_v51, %v5379_v36  ;;  %v3474_v3 = vpop.f32.mrb[35].mxu1  ;;  %v3670_v51 = vld [vmem:[%s8318_s2 + $0x200] sm:$0xff] }
0x14cb   :  { %v3475_v5 = vadd.f32 %v5379_v36, %v3474_v3  ;;  %v3669_v36 = vld [vmem:[%s8318_s2 + $0x1f8] sm:$0xff]  ;;  %v3671_v3 = vld [vmem:[%s8318_s2 + $0x208] sm:$0xf] }
0x14cc   :  { %v3484_v48 = vsel %vm1018_vm9, %v3480_v29, 0.0 }
0x14cd   :  { %v3483_v9 = vsel %vm1018_vm9, %v3475_v5, 0.0 }
0x14ce   :  { %v3485_v47 = vadd.f32 %v3484_v48, %v3483_v9 }
0x14d0   :  { %v3486_v10 = vrot.slane %v3485_v47, 4 }
0x14d2   :  { %v3487_v49 = vadd.f32 %v3486_v10, %v3485_v47 }
0x14d4   :  { %v3488_v30 = vrot.slane %v3487_v49, 2 }
0x14d6   :  { %v3489_v32 = vadd.f32 %v3488_v30, %v3487_v49 }
0x14d8   :  { %v3490_v35 = vrot.slane %v3489_v32, 1 }
0x14da   :  { %v3491_v37 = vadd.f32 %v3490_v35, %v3489_v32 }
0x14dc   :  { %v3492_v39 = vmul.f32 0.0625, %v3491_v37 }
0x14de   :  { %v3493_v40 = vsub.f32 %v3475_v5, %v3492_v39  ;;  %v3494_v41 = vsub.f32 %v3480_v29, %v3492_v39  ;;  %v6229_v29 = vpack.c.bf16 %v3670_v51, %v3669_v36  ;;  %v5384_v5 = vld [vmem:[%s8319_s1 + $0x25] ss:$0 sm:$0xff]  ;;  %v5391_v51 = vld [vmem:[%s8319_s1 + $0x28] ss:$0 sm:$0xff] }
0x14e0   :  { %v3495_v43 = vmul.f32 %v3493_v40, %v3493_v40  ;;  %v3496_v44 = vmul.f32 %v3494_v41, %v3494_v41  ;;  %6230 = vmatpush3.bf16.msra.mxu1 %v6229_v29 }
0x14e1   :  { %5895 = vmatprep.subr.mxu1 %v6404_v15 }
0x14e2   :  { %v3497_v45 = vsel %vm1018_vm9, %v3495_v43, 0.0  ;;  %v3498_v46 = vsel %vm1018_vm9, %v3496_v44, 0.0 }
0x14e3   :  { %v3499_v50 = vadd.f32 %v3498_v46, %v3497_v45 }
0x14e4   :  { %5896 = vmatpush3.msk.msra.mxu1 %vm2974_vm6, %v3671_v3 }
0x14e5   :  { %v3500_v54 = vrot.slane %v3499_v50, 4  ;;  %6234 = vmatprep.subr.bf16.mxu1 %v6410_v16 }
0x14e7   :  { %v3501_v55 = vadd.f32 %v3500_v54, %v3499_v50 }
0x14e9   :  { %v3502_v56 = vrot.slane %v3501_v55, 2 }
0x14eb   :  { %v3503_v57 = vadd.f32 %v3502_v56, %v3501_v55 }
0x14ed   :  { %v3504_v58 = vrot.slane %v3503_v57, 1 }
0x14ef   :  { %v3505_v59 = vadd.f32 %v3504_v58, %v3503_v57 }
0x14f1   :  { %v3506_v52 = vmul.f32 0.0625, %v3505_v59 }
0x14f3   :  { %v3507_v53 = vadd.f32 1e-05, %v3506_v52  ;;  %v3789_v52 = vld [vmem:[%s8318_s2 + $0x210] sm:$0xff] }
0x14f5   :  { %6378 = vrsqrt.f32 %v3507_v53  ;;  %v3790_v53 = vld [vmem:[%s8318_s2 + $0x218] sm:$0xff] }
0x14ff   :  { %v6379_v61 = vpop.eup %6378 }
0x1500   :  { %v3510_v62 = vmul.f32 %v6379_v61, %v3509_v60  ;;  %v6232_v60 = vpack.c.bf16 %v3790_v53, %v3789_v52  ;;  %v3791_v61 = vld [vmem:[%s8318_s2 + $0x220] sm:$0xf] }
0x1502   :  { %v3514_v7 = vrot.slane %v3510_v62, %v6996_v42  ;;  %v5388_v62 = vld [vmem:[%s8319_s1 + $0x26] ss:$0 sm:$0xff] }
0x1504   :  { %v3515_v0 = vmul.f32 %v3514_v7, %v3493_v40  ;;  %v3516_v6 = vmul.f32 %v3514_v7, %v3494_v41 }
0x1506   :  { %v3522_v11 = vadd.f32 %v5383_v63, %v3515_v0  ;;  %v3523_v31 = vadd.f32 %v5383_v63, %v3516_v6 }
0x1508   :  { %v3524_v34 = vmax.f32 %v3522_v11, 0.0  ;;  %v3525_v12 = vmax.f32 %v3523_v31, 0.0 }
0x150a   :  { %3526 = vst.msk [vmem:[#allocation12 + $0x1] sm:$0xff] %vm1018_vm9, %v3524_v34  ;;  %3527 = vst.msk [vmem:[#allocation12 + $0x11] sm:$0xff] %vm1018_vm9, %v3525_v12 }
0x1511   :  { %v3531_v13 = vld [vmem:[#allocation12 + $0x11] sm:$0xff]  ;;  %v3530_v1 = vld [vmem:[#allocation12 + $0x1] sm:$0xff] }
0x1512   :  { %3538 = vrot.lane.b32.xlu1 %v3531_v13, %s6409_s29  ;;  %3536 = vrot.lane.b32.xlu0 %v3530_v1, %s6409_s29  ;;  %v3533_v14 = vld [vmem:[#allocation12 + $0x12] sm:$0xff]  ;;  %v3532_v2 = vld [vmem:[#allocation12 + $0x2] sm:$0xff] }
0x1513   :  { %v3529_v8 = vld [vmem:[#allocation12 + $0x10] sm:$0xff]  ;;  %v3528_v19 = vld [vmem:[#allocation12] sm:$0xff] }
0x1516   :  { %3546 = vrot.lane.b32.xlu1 %v3533_v14, %s6412_s20  ;;  %3544 = vrot.lane.b32.xlu0 %v3532_v2, %s6412_s20 }
0x1584   :  { %v3539_v17 = vpop.permute.xlu1 %3538  ;;  %v3537_v23 = vpop.permute.xlu0 %3536 }
0x1585   :  { %v3551_v22 = vsel %vm1018_vm9, %v3529_v8, %v3539_v17  ;;  %v3550_v25 = vsel %vm1018_vm9, %v3528_v19, %v3537_v23 }
0x1588   :  { %v3547_v18 = vpop.permute.xlu1 %3546  ;;  %v3545_v27 = vpop.permute.xlu0 %3544 }
0x1589   :  { %v3553_v28 = vsel %vm2951_vm5, %v3551_v22, %v3547_v18  ;;  %v3552_v38 = vsel %vm2951_vm5, %v3550_v25, %v3545_v27  ;;  %v3775_v27 = vld [vmem:[%s8319_s1 + $0x27] sm:$0x1] }
0x158a   :  { %5888 = vmatprep.mubr.msk.f32.mxu0 %vm2967_vm10, %v3552_v38 }
0x158b   :  { %5889 = vmatmul.mubr.msk.f32.vlgmr.msra.gmra.mrb[38].mxu0 %vm2967_vm10, %v3553_v28 }
0x158c   :  { %5906 = vmatprep.mubr.msk.f32.mxu0 %vm6411_vm1, %v6404_v15  ;;  %6233 = vmatpush3.bf16.msra.mxu0 %v6232_v60 }
0x158d   :  { %5904 = vmatprep.subr.mxu0 %v6404_v15 }
0x1590   :  { %5905 = vmatpush3.msk.msra.mxu0 %vm2974_vm6, %v3791_v61 }
0x1591   :  { %6247 = vmatprep.subr.bf16.mxu0 %v6410_v16 }
0x165e   :  { %v5890_v48 = vpop.f32.mrb[38].mxu0 }
0x165f   :  { %v7724_v9 = vadd.f32 %v5890_v48, %v5384_v5  ;;  %v3642_v47 = vpop.f32.mrb[39].mxu0  ;;  %v3990_v48 = vld [vmem:[%s8318_s2 + $0x228] sm:$0xff] }
0x1660   :  { %v7726_v10 = vadd.f32 %v5384_v5, %v3642_v47  ;;  %v3991_v47 = vld [vmem:[%s8318_s2 + $0x230] sm:$0xff] }
0x1661   :  { %v3652_v49 = vand.u32 2147483647, %v7724_v9 }
0x1662   :  { %v3651_v30 = vand.u32 2147483647, %v7726_v10 }
0x1663   :  { %v3660_v32 = vsel %vm1018_vm9, %v3652_v49, 0.0  ;;  %v3992_v49 = vld [vmem:[%s8318_s2 + $0x238] sm:$0xff] }
0x1664   :  { %v3661_v35 = vrot.slane %v3660_v32, 4  ;;  %v3653_v37 = vsel %vm1018_vm9, %v3651_v30, 0.0  ;;  %v6235_v30 = vpack.c.bf16 %v3991_v47, %v3990_v48  ;;  %v5395_v48 = vld [vmem:[%s8319_s1 + $0x2b] ss:$0 sm:$0xff] }
0x1665   :  { %v3654_v39 = vrot.slane %v3653_v37, 4 }
0x1666   :  { %v3662_v40 = vadd.f32 %v3661_v35, %v3660_v32  ;;  %v3993_v32 = vld [vmem:[%s8318_s2 + $0x240] sm:$0xff] }
0x1667   :  { %v3655_v41 = vadd.f32 %v3654_v39, %v3653_v37  ;;  %v6238_v35 = vpack.c.bf16 %v3993_v32, %v3992_v49  ;;  %v5392_v37 = vld [vmem:[%s8319_s1 + $0x29] ss:$0 sm:$0xff]  ;;  %v3995_v32 = vld [vmem:[%s8318_s2 + $0x250] sm:$0xff] }
0x1668   :  { %v3663_v43 = vrot.slane %v3662_v40, 2 }
0x1669   :  { %v3656_v44 = vrot.slane %v3655_v41, 2 }
0x166a   :  { %v3664_v45 = vadd.f32 %v3663_v43, %v3662_v40 }
0x166b   :  { %v3657_v46 = vadd.f32 %v3656_v44, %v3655_v41 }
0x166c   :  { %v3665_v50 = vrot.slane %v3664_v45, 1 }
0x166d   :  { %v3658_v54 = vrot.slane %v3657_v46, 1 }
0x166e   :  { %v3666_v55 = vadd.f32 %v3665_v50, %v3664_v45 }
0x166f   :  { %v3659_v56 = vadd.f32 %v3658_v54, %v3657_v46 }
0x1670   :  { %v7732_v57 = vmul.f32 0.125, %v3666_v55 }
0x1671   :  { %v7734_v58 = vmul.f32 0.125, %v3659_v56 }
0x1673   :  { %v3679_v59 = vsel %vm1724_vm2, %v7732_v57, %v7734_v58 }
0x1674   :  { %5898 = vmatmul.mubr.msk.f32.vlgmr.msra.gmra.mrb[36].mxu1 %vm1018_vm9, %v3679_v59 }
0x1675   :  { %5925 = vmatprep.mubr.msk.f32.mxu1 %vm6411_vm1, %v6404_v15  ;;  %6236 = vmatpush3.bf16.msra.mxu1 %v6235_v30  ;;  %v3994_v30 = vld [vmem:[%s8318_s2 + $0x248] sm:$0xff] }
0x1676   :  { %6237 = vmatprep.subr.bf16.mxu1 %v6410_v16 }
0x1679   :  { %6239 = vmatpush3.bf16.msra.mxu1 %v6238_v35 }
0x167a   :  { %6240 = vmatprep.subr.bf16.mxu1 %v6410_v16 }
0x1747   :  { %v3751_v7 = vpop.f32.mrb[36].mxu1 }
0x1748   :  { %v3752_v63 = vadd.f32 %v5388_v62, %v3751_v7  ;;  %v5899_v0 = vpop.f32.mrb[37].mxu1 }
0x174a   :  { %v3755_v6 = vsel %vm3158_vm11, %v3752_v63, 0.0 }
0x174b   :  { %v3756_v4 = vrot.slane %v3755_v6, 4 }
0x174d   :  { %v3757_v21 = vadd.f32 %v3756_v4, %v3755_v6 }
0x174f   :  { %v3758_v11 = vrot.slane %v3757_v21, 2 }
0x1751   :  { %v3759_v31 = vadd.f32 %v3758_v11, %v3757_v21 }
0x1753   :  { %v3760_v33 = vrot.slane %v3759_v31, 1 }
0x1755   :  { %v3761_v34 = vadd.f32 %v3760_v33, %v3759_v31 }
0x1757   :  { %v3762_v12 = vmul.f32 0.5, %v3761_v34 }
0x1759   :  { %v3763_v13 = vsub.f32 %v3752_v63, %v3762_v12 }
0x175b   :  { %v3764_v1 = vmul.f32 %v3763_v13, %v3763_v13 }
0x175d   :  { %v3765_v14 = vsel %vm3158_vm11, %v3764_v1, 0.0 }
0x175e   :  { %v3766_v2 = vrot.slane %v3765_v14, 4 }
0x1760   :  { %v3767_v17 = vadd.f32 %v3766_v2, %v3765_v14 }
0x1762   :  { %v3768_v23 = vrot.slane %v3767_v17, 2 }
0x1764   :  { %v3769_v8 = vadd.f32 %v3768_v23, %v3767_v17 }
0x1766   :  { %v3770_v19 = vrot.slane %v3769_v8, 1 }
0x1768   :  { %v3771_v22 = vadd.f32 %v3770_v19, %v3769_v8 }
0x176a   :  { %v3772_v25 = vmul.f32 0.5, %v3771_v22 }
0x176c   :  { %v3773_v18 = vadd.f32 1e-05, %v3772_v25 }
0x176e   :  { %6380 = vrsqrt.f32 %v3773_v18 }
0x1778   :  { %v6381_v28 = vpop.eup %6380 }
0x1779   :  { %v3776_v38 = vmul.f32 %v6381_v28, %v3775_v27 }
0x177b   :  { %v3780_v36 = vrot.slane %v3776_v38, %v6996_v42 }
0x177d   :  { %v3781_v29 = vmul.f32 %v3780_v36, %v3763_v13 }
0x177f   :  { %v3787_v3 = vadd.f32 %v5391_v51, %v3781_v29  ;;  %v3940_v51 = vld [vmem:[%s8319_s1 + $0x2a] sm:$0x1] }
0x1781   :  { %v3788_v5 = vmax.f32 %v3787_v3, 0.0 }
0x1783   :  { %5907 = vmatmul.mubr.msk.f32.vlgmr.msra.gmra.mrb[40].mxu0 %vm1018_vm9, %v3788_v5 }
0x1784   :  { %5958 = vmatprep.mubr.msk.f32.mxu0 %vm6411_vm1, %v6404_v15 }
0x1856   :  { %v3869_v39 = vpop.f32.mrb[40].mxu0 }
0x1857   :  { %v3870_v40 = vadd.f32 %v5392_v37, %v3869_v39  ;;  %v5908_v41 = vpop.f32.mrb[41].mxu0  ;;  %v6241_v39 = vpack.c.bf16 %v3995_v32, %v3994_v30 }
0x1859   :  { %v3873_v43 = vmul.f32 0.5, %v3870_v40  ;;  %6242 = vmatpush3.bf16.msra.mxu1 %v6241_v39 }
0x185a   :  { %6243 = vmatprep.subr.bf16.mxu1 %v6410_v16 }
0x185b   :  { %6382 = vtanh.f32 %v3873_v43  ;;  %v3996_v43 = vld [vmem:[%s8318_s2 + $0x258] sm:$0xff] }
0x1865   :  { %v6383_v44 = vpop.eup %6382 }
0x1866   :  { %v3875_v45 = vadd.f32 1.0, %v6383_v44  ;;  %v3997_v44 = vld [vmem:[%s8318_s2 + $0x260] sm:$0xf] }
0x1868   :  { %v3876_v46 = vmul.f32 0.5, %v3875_v45  ;;  %v6244_v45 = vpack.c.bf16 %v3997_v44, %v3996_v43 }
0x186a   :  { %v3878_v50 = vrot.slane %v3876_v46, 1  ;;  %v3881_v54 = vmul.f32 %v3876_v46, %v7734_v58  ;;  %6246 = vmatpush3.bf16.msk.msra.mxu1 %vm7492_vm8, %v6244_v45 }
0x186b   :  { %6268 = vmatprep.subr.bf16.mxu1 %v6410_v16 }
0x186c   :  { %v3882_v55 = vmul.f32 %v3878_v50, %v7732_v57  ;;  %v3883_v56 = vsub.f32 0.0, %v3881_v54  ;;  %v3898_v61 = vrot.slane %v3881_v54, %v6996_v42 }
0x186e   :  { %v3884_v59 = vsub.f32 0.0, %v3882_v55  ;;  %v3888_v52 = vrot.slane %v3883_v56, %v6996_v42  ;;  %v3902_v7 = vrot.slane %v3882_v55, %v6996_v42 }
0x1870   :  { %v3892_v53 = vrot.slane %v3884_v59, %v6996_v42  ;;  %v3893_v60 = vmax.f32 %v3888_v52, %v7726_v10 }
0x1872   :  { %v3894_v62 = vmax.f32 %v3892_v53, %v7724_v9  ;;  %v3903_v63 = vmin.f32 %v3898_v61, %v3893_v60 }
0x1874   :  { %v3904_v0 = vmin.f32 %v3902_v7, %v3894_v62  ;;  %v3905_v58 = vsub.f32 %v7726_v10, %v3903_v63 }
0x1876   :  { %v3906_v57 = vsub.f32 %v7724_v9, %v3904_v0  ;;  %v3907_v6 = vadd.f32 %v3905_v58, %v7607_v24  ;;  %v4157_v58 = vld [vmem:[%s8318_s2 + $0x268] sm:$0xff] }
0x1878   :  { %v3908_v4 = vadd.f32 %v3906_v57, %v7610_v26  ;;  %3909 = vst.msk [vmem:[#allocation15] sm:$0xff] %vm1018_vm9, %v3907_v6  ;;  %v3914_v21 = vsel %vm1018_vm9, %v3907_v6, 0.0  ;;  %v4158_v57 = vld [vmem:[%s8318_s2 + $0x270] sm:$0xff] }
0x187a   :  { %3910 = vst.msk [vmem:[#allocation15 + $0x8] sm:$0xff] %vm1018_vm9, %v3908_v4  ;;  %v3915_v11 = vsel %vm1018_vm9, %v3908_v4, 0.0 }
0x187b   :  { %v3916_v31 = vadd.f32 %v3915_v11, %v3914_v21  ;;  %v4160_v21 = vld [vmem:[%s8318_s2 + $0x280] sm:$0xff] }
0x187d   :  { %v3917_v33 = vrot.slane %v3916_v31, 4 }
0x187f   :  { %v3918_v34 = vadd.f32 %v3917_v33, %v3916_v31  ;;  %v4161_v31 = vld [vmem:[%s8318_s2 + $0x288] sm:$0xff]  ;;  %v4162_v33 = vld [vmem:[%s8318_s2 + $0x290] sm:$0xff] }
0x1881   :  { %v3919_v12 = vrot.slane %v3918_v34, 2 }
0x1883   :  { %v3920_v13 = vadd.f32 %v3919_v12, %v3918_v34  ;;  %v6254_v34 = vpack.c.bf16 %v4162_v33, %v4161_v31  ;;  %v4163_v12 = vld [vmem:[%s8318_s2 + $0x298] sm:$0xff] }
0x1885   :  { %v3921_v10 = vrot.slane %v3920_v13, 1 }
0x1887   :  { %v3922_v1 = vadd.f32 %v3921_v10, %v3920_v13  ;;  %v4164_v13 = vld [vmem:[%s8318_s2 + $0x2a0] sm:$0xff] }
0x1888   :  { %v6257_v10 = vpack.c.bf16 %v4164_v13, %v4163_v12 }
0x1889   :  { %v3923_v9 = vmul.f32 0.0625, %v3922_v1  ;;  %v4165_v1 = vld [vmem:[%s8318_s2 + $0x2a8] sm:$0xff] }
0x188b   :  { %v3924_v14 = vsub.f32 %v3907_v6, %v3923_v9  ;;  %v3925_v24 = vsub.f32 %v3908_v4, %v3923_v9  ;;  %v4159_v6 = vld [vmem:[%s8318_s2 + $0x278] sm:$0xff]  ;;  %v6248_v4 = vpack.c.bf16 %v4158_v57, %v4157_v58  ;;  %v4166_v9 = vld [vmem:[%s8318_s2 + $0x2b0] sm:$0xff] }
0x188c   :  { %v6251_v11 = vpack.c.bf16 %v4160_v21, %v4159_v6  ;;  %v4171_v57 = vld [vmem:[%s8318_s2 + $0x2d8] sm:$0xff] }
0x188d   :  { %v3926_v2 = vmul.f32 %v3924_v14, %v3924_v14  ;;  %v3927_v26 = vmul.f32 %v3925_v24, %v3925_v24  ;;  %6249 = vmatpush3.bf16.msra.mxu0 %v6248_v4 }
0x188e   :  { %6250 = vmatprep.subr.bf16.mxu0 %v6410_v16 }
0x188f   :  { %v3928_v17 = vsel %vm1018_vm9, %v3926_v2, 0.0  ;;  %v3929_v23 = vsel %vm1018_vm9, %v3927_v26, 0.0  ;;  %v4168_v2 = vld [vmem:[%s8318_s2 + $0x2c0] sm:$0xff] }
0x1890   :  { %v3930_v8 = vadd.f32 %v3929_v23, %v3928_v17  ;;  %v5396_v17 = vld [vmem:[%s8319_s1 + $0x2c] ss:$0 sm:$0xff] }
0x1891   :  { %6252 = vmatpush3.bf16.msra.mxu0 %v6251_v11 }
0x1892   :  { %v3931_v19 = vrot.slane %v3930_v8, 4  ;;  %6253 = vmatprep.subr.bf16.mxu0 %v6410_v16 }
0x1894   :  { %v3932_v22 = vadd.f32 %v3931_v19, %v3930_v8 }
0x1895   :  { %6255 = vmatpush3.bf16.msra.mxu0 %v6254_v34 }
0x1896   :  { %v3933_v25 = vrot.slane %v3932_v22, 2  ;;  %6256 = vmatprep.subr.bf16.mxu0 %v6410_v16 }
0x1898   :  { %v3934_v18 = vadd.f32 %v3933_v25, %v3932_v22 }
0x1899   :  { %6258 = vmatpush3.bf16.msra.mxu0 %v6257_v10 }
0x189a   :  { %v3935_v27 = vrot.slane %v3934_v18, 1  ;;  %6259 = vmatprep.subr.bf16.mxu0 %v6410_v16 }
0x189c   :  { %v3936_v28 = vadd.f32 %v3935_v27, %v3934_v18 }
0x189e   :  { %v3937_v38 = vmul.f32 0.0625, %v3936_v28 }
0x18a0   :  { %v3938_v36 = vadd.f32 1e-05, %v3937_v38 }
0x18a2   :  { %6384 = vrsqrt.f32 %v3938_v36 }
0x18ac   :  { %v6385_v29 = vpop.eup %6384 }
0x18ad   :  { %v3941_v3 = vmul.f32 %v6385_v29, %v3940_v51 }
0x18af   :  { %v3945_v5 = vrot.slane %v3941_v3, %v6996_v42 }
0x18b1   :  { %v3946_v47 = vmul.f32 %v3945_v5, %v3924_v14  ;;  %v3947_v49 = vmul.f32 %v3945_v5, %v3925_v24  ;;  %v6260_v14 = vpack.c.bf16 %v4166_v9, %v4165_v1  ;;  %v4167_v24 = vld [vmem:[%s8318_s2 + $0x2b8] sm:$0xff] }
0x18b2   :  { %v6263_v26 = vpack.c.bf16 %v4168_v2, %v4167_v24 }
0x18b3   :  { %v3953_v35 = vadd.f32 %v5395_v48, %v3946_v47  ;;  %v3954_v37 = vadd.f32 %v5395_v48, %v3947_v49  ;;  %6261 = vmatpush3.bf16.msra.mxu0 %v6260_v14 }
0x18b4   :  { %6262 = vmatprep.subr.bf16.mxu0 %v6410_v16 }
0x18b5   :  { %v3955_v40 = vmax.f32 %v3953_v35, 0.0  ;;  %v3956_v41 = vmax.f32 %v3954_v37, 0.0 }
0x18b7   :  { %3957 = vst.msk [vmem:[#allocation13 + $0x1] sm:$0xff] %vm1018_vm9, %v3955_v40  ;;  %3958 = vst.msk [vmem:[#allocation13 + $0x11] sm:$0xff] %vm1018_vm9, %v3956_v41  ;;  %6264 = vmatpush3.bf16.msra.mxu0 %v6263_v26  ;;  %v4275_v26 = vld [vmem:[%s8318_s2 + $0x2e0] sm:$0xff] }
0x18b8   :  { %6265 = vmatprep.subr.bf16.mxu0 %v6410_v16 }
0x18be   :  { %v3965_v46 = vld [vmem:[#allocation13 + $0x11] ss:$2 sm:$0xf]  ;;  %v3963_v50 = vld [vmem:[#allocation13 + $0x1] ss:$2 sm:$0xf] }
0x18bf   :  { %3974 = vrot.lane.b32.xlu1 %v3965_v46, %s6409_s29  ;;  %3972 = vrot.lane.b32.xlu0 %v3963_v50, %s6409_s29  ;;  %v3969_v54 = vld [vmem:[#allocation13 + $0x12] ss:$2 sm:$0xf]  ;;  %v3967_v55 = vld [vmem:[#allocation13 + $0x2] ss:$2 sm:$0xf] }
0x18c0   :  { %v3961_v52 = vld [vmem:[#allocation13 + $0x10] ss:$2 sm:$0xf]  ;;  %v3959_v53 = vld [vmem:[#allocation13] ss:$2 sm:$0xf] }
0x18c3   :  { %3982 = vrot.lane.b32.xlu1 %v3969_v54, %s6412_s20  ;;  %3980 = vrot.lane.b32.xlu0 %v3967_v55, %s6412_s20  ;;  %v4111_v54 = vld [vmem:[%s8319_s1 + $0x2d] sm:$0x1] }
0x1931   :  { %v3975_v56 = vpop.permute.xlu1 %3974  ;;  %v3973_v59 = vpop.permute.xlu0 %3972 }
0x1932   :  { %v3987_v20 = vsel %vm1018_vm9, %v3961_v52, %v3975_v56  ;;  %v3986_v60 = vsel %vm1018_vm9, %v3959_v53, %v3973_v59  ;;  %v5399_v52 = vld [vmem:[%s8319_s1 + $0x2e] ss:$0 sm:$0xff] }
0x1935   :  { %v3983_v61 = vpop.permute.xlu1 %3982  ;;  %v3981_v62 = vpop.permute.xlu0 %3980 }
0x1936   :  { %v3989_v7 = vsel %vm2951_vm5, %v3987_v20, %v3983_v61  ;;  %v3988_v63 = vsel %vm2951_vm5, %v3986_v60, %v3981_v62  ;;  %v4169_v60 = vld [vmem:[%s8318_s2 + $0x2c8] sm:$0xff]  ;;  %v4170_v61 = vld [vmem:[%s8318_s2 + $0x2d0] sm:$0xff] }
0x1937   :  { %v4005_v0 = vcombine.low %v3988_v63, %v3989_v7  ;;  %v6266_v63 = vpack.c.bf16 %v4170_v61, %v4169_v60  ;;  %v5402_v60 = vld [vmem:[%s8319_s1 + $0x30] ss:$0 sm:$0xff] }
0x1939   :  { %5926 = vmatmul.mubr.msk.f32.vlgmr.msra.gmra.mrb[38].mxu1 %vm2967_vm10, %v4005_v0  ;;  %6267 = vmatpush3.bf16.msra.mxu0 %v6266_v63 }
0x193a   :  { %5971 = vmatprep.mubr.msk.f32.mxu1 %vm6411_vm1, %v6404_v15  ;;  %5956 = vmatprep.subr.mxu0 %v6404_v15 }
0x193d   :  { %5957 = vmatpush3.msra.mxu0 %v4171_v57 }
0x193e   :  { %6280 = vmatprep.subr.bf16.mxu0 %v6410_v16 }
0x1a0c   :  { %v4077_v23 = vpop.f32.mrb[38].mxu1 }
0x1a0d   :  { %v4078_v8 = vadd.f32 %v5396_v17, %v4077_v23  ;;  %v5927_v19 = vpop.f32.mrb[39].mxu1  ;;  %v4276_v17 = vld [vmem:[%s8318_s2 + $0x2e8] sm:$0xff]  ;;  %v4277_v23 = vld [vmem:[%s8318_s2 + $0x2f0] sm:$0xff] }
0x1a0e   :  { %v4278_v19 = vld [vmem:[%s8318_s2 + $0x2f8] sm:$0xff] }
0x1a0f   :  { %v4082_v22 = vcombine.high %v4078_v8, %v4078_v8  ;;  %v4085_v25 = vsel %vm4084_vm12, %v4078_v8, 0.0 }
0x1a11   :  { %v4086_v18 = vsel %vm4084_vm12, %v4082_v22, 0.0 }
0x1a12   :  { %v4087_v27 = vadd.f32 %v4086_v18, %v4085_v25  ;;  %v4279_v25 = vld [vmem:[%s8318_s2 + $0x300] sm:$0xff]  ;;  %v5400_v18 = vld [vmem:[%s8319_s1 + $0x2f] ss:$0 sm:$0xff] }
0x1a14   :  { %v4088_v28 = vrot.slane %v4087_v27, 4 }
0x1a16   :  { %v4089_v38 = vadd.f32 %v4088_v28, %v4087_v27 }
0x1a18   :  { %v4090_v36 = vrot.slane %v4089_v38, 2 }
0x1a1a   :  { %v4091_v51 = vadd.f32 %v4090_v36, %v4089_v38 }
0x1a1c   :  { %v4092_v29 = vrot.slane %v4091_v51, 1 }
0x1a1e   :  { %v4093_v3 = vadd.f32 %v4092_v29, %v4091_v51 }
0x1a20   :  { %v4094_v5 = vmul.f32 0.125, %v4093_v3 }
0x1a22   :  { %v4095_v48 = vsub.f32 %v4078_v8, %v4094_v5  ;;  %v4096_v47 = vsub.f32 %v4082_v22, %v4094_v5  ;;  %v6269_v8 = vpack.c.bf16 %v4276_v17, %v4275_v26  ;;  %v6272_v22 = vpack.c.bf16 %v4278_v19, %v4277_v23  ;;  %v4381_v26 = vld [vmem:[%s8319_s1 + $0x31] sm:$0x1]  ;;  %v5404_v19 = vld [vmem:[%s8319_s1 + $0x32] ss:$0 sm:$0xff] }
0x1a24   :  { %v4097_v49 = vmul.f32 %v4095_v48, %v4095_v48  ;;  %v4098_v30 = vmul.f32 %v4096_v47, %v4096_v47  ;;  %6270 = vmatpush3.bf16.msra.mxu1 %v6269_v8 }
0x1a25   :  { %6271 = vmatprep.subr.bf16.mxu1 %v6410_v16 }
0x1a26   :  { %v4099_v32 = vsel %vm4084_vm12, %v4097_v49, 0.0  ;;  %v4100_v35 = vsel %vm4084_vm12, %v4098_v30, 0.0 }
0x1a27   :  { %v4101_v37 = vadd.f32 %v4100_v35, %v4099_v32 }
0x1a28   :  { %6273 = vmatpush3.bf16.msra.mxu1 %v6272_v22 }
0x1a29   :  { %v4102_v39 = vrot.slane %v4101_v37, 4  ;;  %5969 = vmatprep.subr.mxu1 %v6404_v15 }
0x1a2b   :  { %v4103_v40 = vadd.f32 %v4102_v39, %v4101_v37 }
0x1a2c   :  { %5970 = vmatpush3.msra.mxu1 %v4279_v25 }
0x1a2d   :  { %v4104_v41 = vrot.slane %v4103_v40, 2  ;;  %6274 = vmatprep.subr.bf16.mxu1 %v6410_v16 }
0x1a2f   :  { %v4105_v43 = vadd.f32 %v4104_v41, %v4103_v40 }
0x1a31   :  { %v4106_v44 = vrot.slane %v4105_v43, 1 }
0x1a33   :  { %v4107_v45 = vadd.f32 %v4106_v44, %v4105_v43 }
0x1a35   :  { %v4108_v46 = vmul.f32 0.125, %v4107_v45 }
0x1a37   :  { %v4109_v50 = vadd.f32 1e-05, %v4108_v46 }
0x1a39   :  { %6386 = vrsqrt.f32 %v4109_v50 }
0x1a43   :  { %v6387_v55 = vpop.eup %6386 }
0x1a44   :  { %v4112_v56 = vmul.f32 %v6387_v55, %v4111_v54  ;;  %v4395_v54 = vld [vmem:[%s8318_s2 + $0x308] sm:$0xff]  ;;  %v4396_v55 = vld [vmem:[%s8318_s2 + $0x310] sm:$0xff] }
0x1a46   :  { %v4116_v59 = vrot.slane %v4112_v56, %v6996_v42  ;;  %v6275_v56 = vpack.c.bf16 %v4396_v55, %v4395_v54 }
0x1a48   :  { %v4117_v53 = vmul.f32 %v4116_v59, %v4095_v48  ;;  %v4118_v20 = vmul.f32 %v4116_v59, %v4096_v47  ;;  %v4397_v59 = vld [vmem:[%s8318_s2 + $0x318] sm:$0xff] }
0x1a4a   :  { %v4124_v62 = vadd.f32 %v5399_v52, %v4117_v53  ;;  %v4125_v7 = vadd.f32 %v5399_v52, %v4118_v20  ;;  %v4398_v52 = vld [vmem:[%s8318_s2 + $0x320] sm:$0xff]  ;;  %v4399_v20 = vld [vmem:[%s8318_s2 + $0x328] sm:$0xff] }
0x1a4b   :  { %v6278_v53 = vpack.c.bf16 %v4398_v52, %v4397_v59 }
0x1a4c   :  { %v4126_v0 = vmax.f32 %v4124_v62, 0.0  ;;  %v4127_v58 = vmax.f32 %v4125_v7, 0.0 }
0x1a4e   :  { %4128 = vst.msk [vmem:[#allocation14 + $0x1] sm:$0xf] %vm4084_vm12, %v4126_v0  ;;  %4129 = vst.msk [vmem:[#allocation14 + $0x9] sm:$0xf] %vm4084_vm12, %v4127_v58 }
0x1a55   :  { %v4133_v6 = vld [vmem:[#allocation14 + $0x9] sm:$0xf]  ;;  %v4132_v4 = vld [vmem:[#allocation14 + $0x1] sm:$0xf] }
0x1a56   :  { %4140 = vrot.lane.b32.xlu1 %v4133_v6, %s6412_s20  ;;  %4138 = vrot.lane.b32.xlu0 %v4132_v4, %s6412_s20  ;;  %v4135_v21 = vld [vmem:[#allocation14 + $0xa] sm:$0xf]  ;;  %v4134_v11 = vld [vmem:[#allocation14 + $0x2] sm:$0xf] }
0x1a57   :  { %v4131_v34 = vld [vmem:[#allocation14 + $0x8] sm:$0xf]  ;;  %v4130_v12 = vld [vmem:[#allocation14] sm:$0xf] }
0x1a5a   :  { %4148 = vrot.lane.b32.xlu1 %v4135_v21, %s6413_s6  ;;  %4146 = vrot.lane.b32.xlu0 %v4134_v11, %s6413_s6 }
0x1ac8   :  { %v4141_v31 = vpop.permute.xlu1 %4140  ;;  %v4139_v33 = vpop.permute.xlu0 %4138 }
0x1ac9   :  { %v4153_v13 = vsel %vm2951_vm5, %v4131_v34, %v4141_v31  ;;  %v4152_v10 = vsel %vm2951_vm5, %v4130_v12, %v4139_v33 }
0x1acc   :  { %v4149_v1 = vpop.permute.xlu1 %4148  ;;  %v4147_v9 = vpop.permute.xlu0 %4146 }
0x1acd   :  { %v4156_v14 = vsel %vm4154_vm13, %v4153_v13, %v4149_v1  ;;  %v4155_v24 = vsel %vm4154_vm13, %v4152_v10, %v4147_v9 }
0x1ace   :  { %v4179_v2 = vcombine.low %v4155_v24, %v4156_v14 }
0x1ad0   :  { %5959 = vmatmul.mubr.msk.f32.vlgmr.msra.gmra.mrb[42].mxu0 %vm4180_vm14, %v4179_v2 }
0x1ad1   :  { %6017 = vmatprep.mubr.msk.f32.mxu0 %vm6411_vm1, %v6404_v15 }
0x1ba3   :  { %v4249_v27 = vpop.f32.mrb[42].mxu0 }
0x1ba4   :  { %v7953_v28 = vadd.f32 %v5400_v18, %v4249_v27  ;;  %v5960_v38 = vpop.f32.mrb[43].mxu0  ;;  %v4587_v27 = vld [vmem:[%s8318_s2 + $0x330] sm:$0xff] }
0x1ba5   :  { %v4588_v38 = vld [vmem:[%s8318_s2 + $0x338] sm:$0xff] }
0x1ba6   :  { %v7957_v36 = vcombine.high %v7953_v28, %v7953_v28  ;;  %v4256_v51 = vand.u32 2147483647, %v7953_v28 }
0x1ba8   :  { %v4257_v29 = vand.u32 2147483647, %v7957_v36  ;;  %v4258_v3 = vsel %vm4084_vm12, %v4256_v51, 0.0  ;;  %v4589_v51 = vld [vmem:[%s8318_s2 + $0x340] sm:$0xff] }
0x1ba9   :  { %v4259_v5 = vrot.slane %v4258_v3, 4 }
0x1baa   :  { %v4265_v48 = vsel %vm4084_vm12, %v4257_v29, 0.0  ;;  %v6281_v29 = vpack.c.bf16 %v4588_v38, %v4587_v27 }
0x1bab   :  { %v4260_v47 = vadd.f32 %v4259_v5, %v4258_v3  ;;  %v4266_v49 = vrot.slane %v4265_v48, 4  ;;  %v4590_v3 = vld [vmem:[%s8318_s2 + $0x348] sm:$0xff] }
0x1bac   :  { %6282 = vmatpush3.bf16.msra.mxu0 %v6281_v29  ;;  %v6284_v5 = vpack.c.bf16 %v4590_v3, %v4589_v51 }
0x1bad   :  { %v4261_v30 = vrot.slane %v4260_v47, 2  ;;  %v4267_v32 = vadd.f32 %v4266_v49, %v4265_v48  ;;  %6283 = vmatprep.subr.bf16.mxu0 %v6410_v16  ;;  %v4591_v48 = vld [vmem:[%s8318_s2 + $0x350] sm:$0xff] }
0x1baf   :  { %v4262_v35 = vadd.f32 %v4261_v30, %v4260_v47  ;;  %v4268_v37 = vrot.slane %v4267_v32, 2  ;;  %v4592_v47 = vld [vmem:[%s8318_s2 + $0x358] sm:$0xff]  ;;  %v4593_v30 = vld [vmem:[%s8318_s2 + $0x360] sm:$0xff] }
0x1bb0   :  { %6285 = vmatpush3.bf16.msra.mxu0 %v6284_v5  ;;  %v6287_v49 = vpack.c.bf16 %v4592_v47, %v4591_v48 }
0x1bb1   :  { %v4263_v39 = vrot.slane %v4262_v35, 1  ;;  %v4269_v40 = vadd.f32 %v4268_v37, %v4267_v32  ;;  %6286 = vmatprep.subr.bf16.mxu0 %v6410_v16  ;;  %v4594_v32 = vld [vmem:[%s8318_s2 + $0x368] sm:$0xff]  ;;  %v4595_v37 = vld [vmem:[%s8318_s2 + $0x370] sm:$0xff] }
0x1bb3   :  { %v4264_v41 = vadd.f32 %v4263_v39, %v4262_v35  ;;  %v4270_v43 = vrot.slane %v4269_v40, 1  ;;  %v6290_v35 = vpack.c.bf16 %v4594_v32, %v4593_v30  ;;  %v4596_v39 = vld [vmem:[%s8318_s2 + $0x378] sm:$0xff] }
0x1bb4   :  { %6288 = vmatpush3.bf16.msra.mxu0 %v6287_v49 }
0x1bb5   :  { %v4271_v44 = vadd.f32 %v4270_v43, %v4269_v40  ;;  %v7963_v45 = vmul.f32 0.25, %v4264_v41  ;;  %6289 = vmatprep.subr.bf16.mxu0 %v6410_v16  ;;  %v6293_v40 = vpack.c.bf16 %v4596_v39, %v4595_v37  ;;  %v4597_v41 = vld [vmem:[%s8318_s2 + $0x380] sm:$0xff]  ;;  %v4598_v43 = vld [vmem:[%s8318_s2 + $0x388] sm:$0xff] }
0x1bb6   :  { %v6296_v54 = vpack.c.bf16 %v4598_v43, %v4597_v41  ;;  %v5407_v41 = vld [vmem:[%s8319_s1 + $0x35] ss:$0 sm:$0xff] }
0x1bb7   :  { %v7965_v46 = vmul.f32 0.25, %v4271_v44  ;;  %v5405_v44 = vld [vmem:[%s8319_s1 + $0x33] ss:$0 sm:$0xff] }
0x1bb8   :  { %6291 = vmatpush3.bf16.msra.mxu0 %v6290_v35  ;;  %v4542_v35 = vld [vmem:[%s8319_s1 + $0x34] sm:$0x1] }
0x1bb9   :  { %v4287_v50 = vsel %vm1724_vm2, %v7965_v46, %v7963_v45  ;;  %6292 = vmatprep.subr.bf16.mxu0 %v6410_v16 }
0x1bba   :  { %5972 = vmatmul.mubr.msk.f32.vlgmr.msra.gmra.mrb[40].mxu1 %vm2951_vm5, %v4287_v50 }
0x1bbb   :  { %5984 = vmatprep.mubr.msk.f32.mxu1 %vm6411_vm1, %v6404_v15  ;;  %6276 = vmatpush3.bf16.msra.mxu1 %v6275_v56 }
0x1bbc   :  { %6277 = vmatprep.subr.bf16.mxu1 %v6410_v16  ;;  %6294 = vmatpush3.bf16.msra.mxu0 %v6293_v40 }
0x1bbd   :  { %6295 = vmatprep.subr.bf16.mxu0 %v6410_v16 }
0x1bbf   :  { %6279 = vmatpush3.bf16.msra.mxu1 %v6278_v53 }
0x1bc0   :  { %5982 = vmatprep.subr.mxu1 %v6404_v15  ;;  %6297 = vmatpush3.bf16.msra.mxu0 %v6296_v54  ;;  %v4600_v54 = vld [vmem:[%s8318_s2 + $0x398] sm:$0xff] }
0x1bc1   :  { %6298 = vmatprep.subr.bf16.mxu0 %v6410_v16 }
0x1bc3   :  { %5983 = vmatpush3.msra.mxu1 %v4399_v20 }
0x1bc4   :  { %6301 = vmatprep.subr.bf16.mxu1 %v6410_v16 }
0x1c8d   :  { %v4356_v61 = vpop.f32.mrb[40].mxu1 }
0x1c8e   :  { %v4357_v62 = vadd.f32 %v5402_v60, %v4356_v61  ;;  %v5973_v7 = vpop.f32.mrb[41].mxu1 }
0x1c90   :  { %v4361_v63 = vsel %vm4360_vm15, %v4357_v62, 0.0 }
0x1c91   :  { %v4362_v0 = vrot.slane %v4361_v63, 4 }
0x1c93   :  { %v4363_v58 = vadd.f32 %v4362_v0, %v4361_v63 }
0x1c95   :  { %v4364_v57 = vrot.slane %v4363_v58, 2 }
0x1c97   :  { %v4365_v6 = vadd.f32 %v4364_v57, %v4363_v58 }
0x1c99   :  { %v4366_v4 = vrot.slane %v4365_v6, 1 }
0x1c9b   :  { %v4367_v21 = vadd.f32 %v4366_v4, %v4365_v6  ;;  %v3911_v4 = vld [vmem:[#allocation15] ss:$2 sm:$0xf] }
0x1c9d   :  { %v4368_v11 = vmul.f32 0.5, %v4367_v21 }
0x1c9f   :  { %v4369_v31 = vsub.f32 %v4357_v62, %v4368_v11 }
0x1ca1   :  { %v4370_v33 = vmul.f32 %v4369_v31, %v4369_v31 }
0x1ca3   :  { %v4371_v34 = vsel %vm4360_vm15, %v4370_v33, 0.0  ;;  %v3913_v33 = vld [vmem:[#allocation15 + $0x8] ss:$2 sm:$0xf] }
0x1ca4   :  { %v4372_v12 = vrot.slane %v4371_v34, 4 }
0x1ca6   :  { %v4373_v13 = vadd.f32 %v4372_v12, %v4371_v34  ;;  %v4512_v34 = vsel %vm1018_vm9, %v3911_v4, 0.0 }
0x1ca8   :  { %v4374_v10 = vrot.slane %v4373_v13, 2 }
0x1caa   :  { %v4375_v1 = vadd.f32 %v4374_v10, %v4373_v13  ;;  %v4513_v10 = vsel %vm1018_vm9, %v3913_v33, 0.0  ;;  %vm5269_vm9 = vcmask 1024  }
0x1cac   :  { %v4376_v9 = vrot.slane %v4375_v1, 1 }
0x1cae   :  { %v4377_v14 = vadd.f32 %v4376_v9, %v4375_v1 }
0x1cb0   :  { %v4378_v24 = vmul.f32 0.5, %v4377_v14 }
0x1cb2   :  { %v4379_v2 = vadd.f32 1e-05, %v4378_v24 }
0x1cb4   :  { %6388 = vrsqrt.f32 %v4379_v2 }
0x1cbe   :  { %v6389_v17 = vpop.eup %6388 }
0x1cbf   :  { %v4382_v23 = vmul.f32 %v6389_v17, %v4381_v26 }
0x1cc1   :  { %v4386_v8 = vrot.slane %v4382_v23, %v6996_v42 }
0x1cc3   :  { %v4387_v22 = vmul.f32 %v4386_v8, %v4369_v31 }
0x1cc5   :  { %v4393_v25 = vadd.f32 %v5404_v19, %v4387_v22 }
0x1cc7   :  { %v4394_v18 = vmax.f32 %v4393_v25, 0.0 }
0x1cc9   :  { %5985 = vmatmul.mubr.msk.f32.vlgmr.msra.gmra.mrb[42].mxu1 %vm2951_vm5, %v4394_v18 }
0x1cca   :  { %6050 = vmatprep.mubr.msk.f32.mxu1 %vm6411_vm1, %v6404_v15 }
0x1d9c   :  { %v4474_v50 = vpop.f32.mrb[42].mxu1 }
0x1d9d   :  { %v4475_v55 = vadd.f32 %v5405_v44, %v4474_v50  ;;  %v5986_v56 = vpop.f32.mrb[43].mxu1  ;;  %v4599_v50 = vld [vmem:[%s8318_s2 + $0x390] sm:$0xff] }
0x1d9f   :  { %v4478_v59 = vmul.f32 0.5, %v4475_v55 }
0x1da1   :  { %6390 = vtanh.f32 %v4478_v59  ;;  %v6299_v59 = vpack.c.bf16 %v4600_v54, %v4599_v50 }
0x1da3   :  { %6300 = vmatpush3.bf16.msra.mxu0 %v6299_v59 }
0x1da4   :  { %6015 = vmatprep.subr.mxu0 %v6404_v15 }
0x1dab   :  { %v6391_v52 = vpop.eup %6390 }
0x1dac   :  { %v4480_v53 = vadd.f32 1.0, %v6391_v52 }
0x1dae   :  { %v4481_v20 = vmul.f32 0.5, %v4480_v53 }
0x1db0   :  { %v4483_v60 = vrot.slane %v4481_v20, 1  ;;  %v4486_v61 = vmul.f32 %v4481_v20, %v7963_v45  ;;  %v4601_v20 = vld [vmem:[%s8318_s2 + $0x3a0] sm:$0xff] }
0x1db1   :  { %6016 = vmatpush3.msra.mxu0 %v4601_v20 }
0x1db2   :  { %v4487_v62 = vmul.f32 %v4483_v60, %v7965_v46  ;;  %v4488_v7 = vsub.f32 0.0, %v4486_v61  ;;  %v4503_v6 = vrot.slane %v4486_v61, %v6996_v42  ;;  %6322 = vmatprep.subr.bf16.mxu0 %v6410_v16 }
0x1db4   :  { %v4489_v63 = vsub.f32 0.0, %v4487_v62  ;;  %v4493_v0 = vrot.slane %v4488_v7, %v6996_v42  ;;  %v4507_v11 = vrot.slane %v4487_v62, %v6996_v42 }
0x1db6   :  { %v4497_v58 = vrot.slane %v4489_v63, %v6996_v42  ;;  %v4498_v57 = vmax.f32 %v4493_v0, %v7953_v28 }
0x1db8   :  { %v4499_v21 = vmax.f32 %v4497_v58, %v7957_v36  ;;  %v4508_v31 = vmin.f32 %v4503_v6, %v4498_v57 }
0x1dba   :  { %v4509_v45 = vmin.f32 %v4507_v11, %v4499_v21  ;;  %v4510_v46 = vsub.f32 %v7953_v28, %v4508_v31 }
0x1dbc   :  { %v4511_v12 = vsub.f32 %v7957_v36, %v4509_v45  ;;  %v8062_v13 = vadd.f32 %v4512_v34, %v4510_v46  ;;  %v4756_v46 = vld [vmem:[%s8318_s2 + $0x3a8] sm:$0xff]  ;;  %v4757_v34 = vld [vmem:[%s8318_s2 + $0x3b0] sm:$0xff] }
0x1dbe   :  { %v8065_v1 = vadd.f32 %v4513_v10, %v4511_v12  ;;  %v4516_v9 = vsel %vm4084_vm12, %v8062_v13, 0.0  ;;  %v4758_v12 = vld [vmem:[%s8318_s2 + $0x3b8] sm:$0xff]  ;;  %v6302_v10 = vpack.c.bf16 %v4757_v34, %v4756_v46 }
0x1dc0   :  { %v4517_v14 = vsel %vm4084_vm12, %v8065_v1, 0.0  ;;  %6303 = vmatpush3.bf16.msra.mxu1 %v6302_v10  ;;  %v4770_v10 = vld [vmem:[%s8318_s2 + $0x418] sm:$0xff] }
0x1dc1   :  { %v4518_v24 = vadd.f32 %v4517_v14, %v4516_v9  ;;  %v4759_v9 = vld [vmem:[%s8318_s2 + $0x3c0] sm:$0xff]  ;;  %6304 = vmatprep.subr.bf16.mxu1 %v6410_v16 }
0x1dc2   :  { %v6305_v14 = vpack.c.bf16 %v4759_v9, %v4758_v12 }
0x1dc3   :  { %v4519_v2 = vrot.slane %v4518_v24, 4 }
0x1dc4   :  { %6306 = vmatpush3.bf16.msra.mxu1 %v6305_v14 }
0x1dc5   :  { %v4520_v26 = vadd.f32 %v4519_v2, %v4518_v24  ;;  %v4760_v24 = vld [vmem:[%s8318_s2 + $0x3c8] sm:$0xff]  ;;  %v4761_v2 = vld [vmem:[%s8318_s2 + $0x3d0] sm:$0xff]  ;;  %6307 = vmatprep.subr.bf16.mxu1 %v6410_v16 }
0x1dc7   :  { %v4521_v28 = vrot.slane %v4520_v26, 2 }
0x1dc9   :  { %v4522_v17 = vadd.f32 %v4521_v28, %v4520_v26  ;;  %v6308_v26 = vpack.c.bf16 %v4761_v2, %v4760_v24  ;;  %v4762_v28 = vld [vmem:[%s8318_s2 + $0x3d8] sm:$0xff] }
0x1dcb   :  { %v4523_v23 = vrot.slane %v4522_v17, 1  ;;  %6309 = vmatpush3.bf16.msra.mxu1 %v6308_v26 }
0x1dcc   :  { %6310 = vmatprep.subr.bf16.mxu1 %v6410_v16 }
0x1dcd   :  { %v4524_v8 = vadd.f32 %v4523_v23, %v4522_v17  ;;  %v4763_v17 = vld [vmem:[%s8318_s2 + $0x3e0] sm:$0xff] }
0x1dce   :  { %v6311_v23 = vpack.c.bf16 %v4763_v17, %v4762_v28 }
0x1dcf   :  { %v4525_v36 = vmul.f32 0.125, %v4524_v8  ;;  %v4764_v8 = vld [vmem:[%s8318_s2 + $0x3e8] sm:$0xff] }
0x1dd0   :  { %6312 = vmatpush3.bf16.msra.mxu1 %v6311_v23 }
0x1dd1   :  { %v4526_v19 = vsub.f32 %v8062_v13, %v4525_v36  ;;  %v4527_v22 = vsub.f32 %v8065_v1, %v4525_v36  ;;  %v4765_v36 = vld [vmem:[%s8318_s2 + $0x3f0] sm:$0xff]  ;;  %6313 = vmatprep.subr.bf16.mxu1 %v6410_v16 }
0x1dd3   :  { %v4528_v25 = vmul.f32 %v4526_v19, %v4526_v19  ;;  %v4529_v18 = vmul.f32 %v4527_v22, %v4527_v22 }
0x1dd5   :  { %v4530_v27 = vsel %vm4084_vm12, %v4528_v25, 0.0  ;;  %v4531_v38 = vsel %vm4084_vm12, %v4529_v18, 0.0  ;;  %v4767_v25 = vld [vmem:[%s8318_s2 + $0x400] sm:$0xff] }
0x1dd6   :  { %v4532_v51 = vadd.f32 %v4531_v38, %v4530_v27  ;;  %v5408_v27 = vld [vmem:[%s8319_s1 + $0x36] ss:$0 sm:$0xff] }
0x1dd8   :  { %v4533_v29 = vrot.slane %v4532_v51, 4 }
0x1dda   :  { %v4534_v3 = vadd.f32 %v4533_v29, %v4532_v51 }
0x1ddc   :  { %v4535_v5 = vrot.slane %v4534_v3, 2 }
0x1dde   :  { %v4536_v48 = vadd.f32 %v4535_v5, %v4534_v3 }
0x1de0   :  { %v4537_v47 = vrot.slane %v4536_v48, 1 }
0x1de2   :  { %v4538_v49 = vadd.f32 %v4537_v47, %v4536_v48 }
0x1de4   :  { %v4539_v30 = vmul.f32 0.125, %v4538_v49 }
0x1de6   :  { %v4540_v32 = vadd.f32 1e-05, %v4539_v30 }
0x1de8   :  { %6392 = vrsqrt.f32 %v4540_v32 }
0x1df2   :  { %v6393_v37 = vpop.eup %6392 }
0x1df3   :  { %v4543_v39 = vmul.f32 %v6393_v37, %v4542_v35 }
0x1df5   :  { %v4547_v40 = vrot.slane %v4543_v39, %v6996_v42 }
0x1df7   :  { %v4548_v43 = vmul.f32 %v4547_v40, %v4526_v19  ;;  %v4549_v44 = vmul.f32 %v4547_v40, %v4527_v22  ;;  %v6314_v19 = vpack.c.bf16 %v4765_v36, %v4764_v8  ;;  %v4766_v22 = vld [vmem:[%s8318_s2 + $0x3f8] sm:$0xff] }
0x1df8   :  { %v6317_v18 = vpack.c.bf16 %v4767_v25, %v4766_v22 }
0x1df9   :  { %v4555_v55 = vadd.f32 %v5407_v41, %v4548_v43  ;;  %v4556_v56 = vadd.f32 %v5407_v41, %v4549_v44  ;;  %6315 = vmatpush3.bf16.msra.mxu1 %v6314_v19 }
0x1dfa   :  { %6316 = vmatprep.subr.bf16.mxu1 %v6410_v16 }
0x1dfb   :  { %v4557_v52 = vmax.f32 %v4555_v55, 0.0  ;;  %v4558_v53 = vmax.f32 %v4556_v56, 0.0 }
0x1dfd   :  { %4559 = vst.msk [vmem:[#allocation16 + $0x1] sm:$0xf] %vm4084_vm12, %v4557_v52  ;;  %4560 = vst.msk [vmem:[#allocation16 + $0x9] sm:$0xf] %vm4084_vm12, %v4558_v53  ;;  %6318 = vmatpush3.bf16.msra.mxu1 %v6317_v18 }
0x1dfe   :  { %6319 = vmatprep.subr.bf16.mxu1 %v6410_v16 }
0x1e04   :  { %v4564_v60 = vld [vmem:[#allocation16 + $0x9] sm:$0xf]  ;;  %v4563_v61 = vld [vmem:[#allocation16 + $0x1] sm:$0xf] }
0x1e05   :  { %4571 = vrot.lane.b32.xlu1 %v4564_v60, %s6412_s20  ;;  %4569 = vrot.lane.b32.xlu0 %v4563_v61, %s6412_s20  ;;  %v4566_v62 = vld [vmem:[#allocation16 + $0xa] sm:$0xf]  ;;  %v4565_v7 = vld [vmem:[#allocation16 + $0x2] sm:$0xf] }
0x1e06   :  { %v4562_v58 = vld [vmem:[#allocation16 + $0x8] sm:$0xf]  ;;  %v4561_v57 = vld [vmem:[#allocation16] sm:$0xf] }
0x1e09   :  { %4579 = vrot.lane.b32.xlu1 %v4566_v62, %s6413_s6  ;;  %4577 = vrot.lane.b32.xlu0 %v4565_v7, %s6413_s6 }
0x1e77   :  { %v4572_v63 = vpop.permute.xlu1 %4571  ;;  %v4570_v0 = vpop.permute.xlu0 %4569 }
0x1e78   :  { %v4584_v6 = vsel %vm2951_vm5, %v4562_v58, %v4572_v63  ;;  %v4583_v4 = vsel %vm2951_vm5, %v4561_v57, %v4570_v0  ;;  %v4711_v63 = vld [vmem:[%s8319_s1 + $0x37] sm:$0x1] }
0x1e7b   :  { %v4580_v21 = vpop.permute.xlu1 %4579  ;;  %v4578_v11 = vpop.permute.xlu0 %4577 }
0x1e7c   :  { %v4586_v31 = vsel %vm4154_vm13, %v4584_v6, %v4580_v21  ;;  %v4585_v33 = vsel %vm4154_vm13, %v4583_v4, %v4578_v11  ;;  %v5410_v6 = vld [vmem:[%s8319_s1 + $0x38] ss:$0 sm:$0xff]  ;;  %v4768_v11 = vld [vmem:[%s8318_s2 + $0x408] sm:$0xff] }
0x1e7d   :  { %v4609_v45 = vcombine.low %v4585_v33, %v4586_v31  ;;  %v4769_v31 = vld [vmem:[%s8318_s2 + $0x410] sm:$0xff] }
0x1e7e   :  { %v6320_v46 = vpack.c.bf16 %v4769_v31, %v4768_v11  ;;  %v4995_v31 = vld [vmem:[%s8318_s2 + $0x468] sm:$0xff] }
0x1e7f   :  { %6018 = vmatmul.mubr.msk.f32.vlgmr.msra.gmra.mrb[44].mxu0 %vm4180_vm14, %v4609_v45 }
0x1e80   :  { %6063 = vmatprep.mubr.msk.f32.mxu0 %vm6411_vm1, %v6404_v15  ;;  %6321 = vmatpush3.bf16.msra.mxu1 %v6320_v46 }
0x1e81   :  { %6048 = vmatprep.subr.mxu1 %v6404_v15 }
0x1e84   :  { %6049 = vmatpush3.msra.mxu1 %v4770_v10 }
0x1e85   :  { %6328 = vmatprep.subr.bf16.mxu1 %v6410_v16 }
0x1f52   :  { %v4678_v38 = vpop.f32.mrb[44].mxu0 }
0x1f53   :  { %v4679_v51 = vadd.f32 %v5408_v27, %v4678_v38  ;;  %v6019_v29 = vpop.f32.mrb[45].mxu0  ;;  %v4872_v38 = vld [vmem:[%s8318_s2 + $0x420] sm:$0xff] }
0x1f54   :  { %v4874_v29 = vld [vmem:[%s8318_s2 + $0x430] sm:$0xff] }
0x1f55   :  { %v4683_v3 = vcombine.high %v4679_v51, %v4679_v51  ;;  %v4685_v5 = vsel %vm4084_vm12, %v4679_v51, 0.0 }
0x1f57   :  { %v4686_v48 = vsel %vm4084_vm12, %v4683_v3, 0.0 }
0x1f58   :  { %v4687_v47 = vadd.f32 %v4686_v48, %v4685_v5  ;;  %v4875_v5 = vld [vmem:[%s8318_s2 + $0x438] sm:$0xff] }
0x1f59   :  { %v6326_v48 = vpack.c.bf16 %v4875_v5, %v4874_v29  ;;  %v4977_v29 = vld [vmem:[%s8319_s1 + $0x3b] sm:$0x1] }
0x1f5a   :  { %v4688_v49 = vrot.slane %v4687_v47, 4 }
0x1f5c   :  { %v4689_v30 = vadd.f32 %v4688_v49, %v4687_v47  ;;  %v4876_v47 = vld [vmem:[%s8318_s2 + $0x440] sm:$0xff]  ;;  %v5411_v49 = vld [vmem:[%s8319_s1 + $0x39] ss:$0 sm:$0xff] }
0x1f5e   :  { %v4690_v32 = vrot.slane %v4689_v30, 2 }
0x1f60   :  { %v4691_v35 = vadd.f32 %v4690_v32, %v4689_v30 }
0x1f62   :  { %v4692_v37 = vrot.slane %v4691_v35, 1 }
0x1f64   :  { %v4693_v39 = vadd.f32 %v4692_v37, %v4691_v35 }
0x1f66   :  { %v4694_v40 = vmul.f32 0.125, %v4693_v39 }
0x1f68   :  { %v4695_v41 = vsub.f32 %v4679_v51, %v4694_v40  ;;  %v4696_v43 = vsub.f32 %v4683_v3, %v4694_v40  ;;  %v4873_v51 = vld [vmem:[%s8318_s2 + $0x428] sm:$0xff] }
0x1f69   :  { %v6323_v3 = vpack.c.bf16 %v4873_v51, %v4872_v38 }
0x1f6a   :  { %v4697_v44 = vmul.f32 %v4695_v41, %v4695_v41  ;;  %v4698_v50 = vmul.f32 %v4696_v43, %v4696_v43 }
0x1f6b   :  { %6324 = vmatpush3.bf16.msra.mxu0 %v6323_v3 }
0x1f6c   :  { %v4699_v54 = vsel %vm4084_vm12, %v4697_v44, 0.0  ;;  %v4700_v55 = vsel %vm4084_vm12, %v4698_v50, 0.0  ;;  %6325 = vmatprep.subr.bf16.mxu0 %v6410_v16 }
0x1f6d   :  { %v4701_v56 = vadd.f32 %v4700_v55, %v4699_v54 }
0x1f6f   :  { %v4702_v59 = vrot.slane %v4701_v56, 4  ;;  %6327 = vmatpush3.bf16.msra.mxu0 %v6326_v48 }
0x1f70   :  { %6061 = vmatprep.subr.mxu0 %v6404_v15 }
0x1f71   :  { %v4703_v52 = vadd.f32 %v4702_v59, %v4701_v56 }
0x1f73   :  { %v4704_v53 = vrot.slane %v4703_v52, 2  ;;  %6062 = vmatpush3.msra.mxu0 %v4876_v47  ;;  %v5415_v47 = vld [vmem:[%s8319_s1 + $0x3c] ss:$0 sm:$0xff] }
0x1f74   :  { %6334 = vmatprep.subr.bf16.mxu0 %v6410_v16 }
0x1f75   :  { %v4705_v20 = vadd.f32 %v4704_v53, %v4703_v52 }
0x1f77   :  { %v4706_v60 = vrot.slane %v4705_v20, 1 }
0x1f79   :  { %v4707_v61 = vadd.f32 %v4706_v60, %v4705_v20 }
0x1f7b   :  { %v4708_v62 = vmul.f32 0.125, %v4707_v61 }
0x1f7d   :  { %v4709_v7 = vadd.f32 1e-05, %v4708_v62 }
0x1f7f   :  { %6394 = vrsqrt.f32 %v4709_v7 }
0x1f89   :  { %v6395_v0 = vpop.eup %6394 }
0x1f8a   :  { %v4712_v58 = vmul.f32 %v6395_v0, %v4711_v63 }
0x1f8c   :  { %v4716_v57 = vrot.slane %v4712_v58, %v6996_v42  ;;  %v4991_v58 = vld [vmem:[%s8318_s2 + $0x448] sm:$0xff] }
0x1f8e   :  { %v4717_v4 = vmul.f32 %v4716_v57, %v4695_v41  ;;  %v4718_v21 = vmul.f32 %v4716_v57, %v4696_v43  ;;  %v4992_v57 = vld [vmem:[%s8318_s2 + $0x450] sm:$0xff] }
0x1f90   :  { %v4724_v33 = vadd.f32 %v5410_v6, %v4717_v4  ;;  %v4725_v45 = vadd.f32 %v5410_v6, %v4718_v21  ;;  %v6329_v6 = vpack.c.bf16 %v4992_v57, %v4991_v58  ;;  %v4993_v4 = vld [vmem:[%s8318_s2 + $0x458] sm:$0xff]  ;;  %v4994_v21 = vld [vmem:[%s8318_s2 + $0x460] sm:$0xff] }
0x1f91   :  { %v6332_v11 = vpack.c.bf16 %v4994_v21, %v4993_v4 }
0x1f92   :  { %v4726_v34 = vmax.f32 %v4724_v33, 0.0  ;;  %v4727_v12 = vmax.f32 %v4725_v45, 0.0  ;;  %v5413_v33 = vld [vmem:[%s8319_s1 + $0x3a] ss:$0 sm:$0xff] }
0x1f94   :  { %4728 = vst.msk [vmem:[#allocation17 + $0x1] sm:$0xf] %vm4084_vm12, %v4726_v34  ;;  %4729 = vst.msk [vmem:[#allocation17 + $0x9] sm:$0xf] %vm4084_vm12, %v4727_v12 }
0x1f9b   :  { %v4733_v9 = vld [vmem:[#allocation17 + $0x9] sm:$0xf]  ;;  %v4732_v14 = vld [vmem:[#allocation17 + $0x1] sm:$0xf] }
0x1f9c   :  { %4740 = vrot.lane.b32.xlu1 %v4733_v9, %s6412_s20  ;;  %4738 = vrot.lane.b32.xlu0 %v4732_v14, %s6412_s20  ;;  %v4735_v24 = vld [vmem:[#allocation17 + $0xa] sm:$0xf]  ;;  %v4734_v2 = vld [vmem:[#allocation17 + $0x2] sm:$0xf] }
0x1f9d   :  { %v4731_v17 = vld [vmem:[#allocation17 + $0x8] sm:$0xf]  ;;  %v4730_v23 = vld [vmem:[#allocation17] sm:$0xf] }
0x1fa0   :  { %4748 = vrot.lane.b32.xlu1 %v4735_v24, %s6413_s6  ;;  %4746 = vrot.lane.b32.xlu0 %v4734_v2, %s6413_s6 }
0x200e   :  { %v4741_v26 = vpop.permute.xlu1 %4740  ;;  %v4739_v28 = vpop.permute.xlu0 %4738 }
0x200f   :  { %v4753_v8 = vsel %vm2951_vm5, %v4731_v17, %v4741_v26  ;;  %v4752_v36 = vsel %vm2951_vm5, %v4730_v23, %v4739_v28 }
0x2012   :  { %v4749_v19 = vpop.permute.xlu1 %4748  ;;  %v4747_v22 = vpop.permute.xlu0 %4746 }
0x2013   :  { %v4755_v25 = vsel %vm4154_vm13, %v4753_v8, %v4749_v19  ;;  %v4754_v18 = vsel %vm4154_vm13, %v4752_v36, %v4747_v22 }
0x2014   :  { %v4778_v27 = vcombine.low %v4754_v18, %v4755_v25 }
0x2016   :  { %6051 = vmatmul.mubr.msk.f32.vlgmr.msra.gmra.mrb[44].mxu1 %vm4180_vm14, %v4778_v27 }
0x2017   :  { %6076 = vmatprep.mubr.msk.f32.mxu1 %vm6411_vm1, %v6404_v15  ;;  %6330 = vmatpush3.bf16.msra.mxu1 %v6329_v6 }
0x2018   :  { %6331 = vmatprep.subr.bf16.mxu1 %v6410_v16 }
0x201b   :  { %6333 = vmatpush3.bf16.msra.mxu1 %v6332_v11 }
0x201c   :  { %6074 = vmatprep.subr.mxu1 %v6404_v15 }
0x201f   :  { %6075 = vmatpush3.msra.mxu1 %v4995_v31 }
0x20e9   :  { %v4847_v30 = vpop.f32.mrb[44].mxu1 }
0x20ea   :  { %v8207_v32 = vadd.f32 %v5411_v49, %v4847_v30  ;;  %v6052_v35 = vpop.f32.mrb[45].mxu1 }
0x20ec   :  { %v8211_v37 = vcombine.high %v8207_v32, %v8207_v32  ;;  %v4854_v39 = vand.u32 2147483647, %v8207_v32 }
0x20ee   :  { %v4855_v40 = vand.u32 2147483647, %v8211_v37  ;;  %v4856_v41 = vsel %vm4084_vm12, %v4854_v39, 0.0  ;;  %v5169_v39 = vld [vmem:[%s8318_s2 + $0x470] sm:$0xff] }
0x20ef   :  { %v4857_v43 = vrot.slane %v4856_v41, 4 }
0x20f0   :  { %v4863_v44 = vsel %vm4084_vm12, %v4855_v40, 0.0  ;;  %v5170_v40 = vld [vmem:[%s8318_s2 + $0x478] sm:$0xff] }
0x20f1   :  { %v4858_v50 = vadd.f32 %v4857_v43, %v4856_v41  ;;  %v4864_v54 = vrot.slane %v4863_v44, 4  ;;  %v5171_v41 = vld [vmem:[%s8318_s2 + $0x480] sm:$0xff]  ;;  %v6335_v43 = vpack.c.bf16 %v5170_v40, %v5169_v39 }
0x20f3   :  { %v4859_v55 = vrot.slane %v4858_v50, 2  ;;  %v4865_v56 = vadd.f32 %v4864_v54, %v4863_v44  ;;  %v5172_v44 = vld [vmem:[%s8318_s2 + $0x488] sm:$0xff]  ;;  %v5173_v54 = vld [vmem:[%s8318_s2 + $0x490] sm:$0xff] }
0x20f5   :  { %v4860_v59 = vadd.f32 %v4859_v55, %v4858_v50  ;;  %v4866_v52 = vrot.slane %v4865_v56, 2  ;;  %v6338_v50 = vpack.c.bf16 %v5172_v44, %v5171_v41  ;;  %v5416_v55 = vld [vmem:[%s8319_s1 + $0x3d] ss:$0 sm:$0xff] }
0x20f7   :  { %v4861_v53 = vrot.slane %v4860_v59, 1  ;;  %v4867_v20 = vadd.f32 %v4866_v52, %v4865_v56 }
0x20f9   :  { %v4862_v60 = vadd.f32 %v4861_v53, %v4860_v59  ;;  %v4868_v61 = vrot.slane %v4867_v20, 1 }
0x20fb   :  { %v4869_v62 = vadd.f32 %v4868_v61, %v4867_v20  ;;  %v8217_v7 = vmul.f32 0.25, %v4862_v60 }
0x20fd   :  { %v8219_v63 = vmul.f32 0.25, %v4869_v62 }
0x20ff   :  { %v4884_v0 = vsel %vm1724_vm2, %v8219_v63, %v8217_v7 }
0x2100   :  { %6064 = vmatmul.mubr.msk.f32.vlgmr.msra.gmra.mrb[46].mxu0 %vm2951_vm5, %v4884_v0 }
0x2101   :  { %6089 = vmatprep.mubr.msk.f32.mxu0 %vm6411_vm1, %v6404_v15  ;;  %6336 = vmatpush3.bf16.msra.mxu0 %v6335_v43 }
0x2102   :  { %6337 = vmatprep.subr.bf16.mxu0 %v6410_v16 }
0x2105   :  { %6339 = vmatpush3.bf16.msra.mxu0 %v6338_v50 }
0x2106   :  { %6087 = vmatprep.subr.mxu0 %v6404_v15 }
0x2109   :  { %6088 = vmatpush3.msra.mxu0 %v5173_v54 }
0x21d3   :  { %v4953_v45 = vpop.f32.mrb[46].mxu0 }
0x21d4   :  { %v4954_v46 = vadd.f32 %v5413_v33, %v4953_v45  ;;  %v6065_v34 = vpop.f32.mrb[47].mxu0 }
0x21d6   :  { %v4957_v12 = vsel %vm4360_vm15, %v4954_v46, 0.0 }
0x21d7   :  { %v4958_v10 = vrot.slane %v4957_v12, 4 }
0x21d9   :  { %v4959_v9 = vadd.f32 %v4958_v10, %v4957_v12 }
0x21db   :  { %v4960_v14 = vrot.slane %v4959_v9, 2 }
0x21dd   :  { %v4961_v24 = vadd.f32 %v4960_v14, %v4959_v9 }
0x21df   :  { %v4962_v2 = vrot.slane %v4961_v24, 1 }
0x21e1   :  { %v4963_v26 = vadd.f32 %v4962_v2, %v4961_v24 }
0x21e3   :  { %v4964_v28 = vmul.f32 0.5, %v4963_v26 }
0x21e5   :  { %v4965_v17 = vsub.f32 %v4954_v46, %v4964_v28 }
0x21e7   :  { %v4966_v23 = vmul.f32 %v4965_v17, %v4965_v17 }
0x21e9   :  { %v4967_v8 = vsel %vm4360_vm15, %v4966_v23, 0.0 }
0x21ea   :  { %v4968_v36 = vrot.slane %v4967_v8, 4 }
0x21ec   :  { %v4969_v19 = vadd.f32 %v4968_v36, %v4967_v8 }
0x21ee   :  { %v4970_v22 = vrot.slane %v4969_v19, 2 }
0x21f0   :  { %v4971_v25 = vadd.f32 %v4970_v22, %v4969_v19 }
0x21f2   :  { %v4972_v18 = vrot.slane %v4971_v25, 1 }
0x21f4   :  { %v4973_v27 = vadd.f32 %v4972_v18, %v4971_v25 }
0x21f6   :  { %v4974_v38 = vmul.f32 0.5, %v4973_v27 }
0x21f8   :  { %v4975_v51 = vadd.f32 1e-05, %v4974_v38 }
0x21fa   :  { %6396 = vrsqrt.f32 %v4975_v51 }
0x2204   :  { %v6397_v3 = vpop.eup %6396 }
0x2205   :  { %v4978_v5 = vmul.f32 %v6397_v3, %v4977_v29 }
0x2207   :  { %v4982_v48 = vrot.slane %v4978_v5, %v6996_v42  ;;  %v5136_v5 = vld [vmem:[%s8319_s1 + $0x3e] sm:$0x1] }
0x2209   :  { %v4983_v49 = vmul.f32 %v4982_v48, %v4965_v17 }
0x220b   :  { %v4989_v30 = vadd.f32 %v5415_v47, %v4983_v49 }
0x220d   :  { %v4990_v35 = vmax.f32 %v4989_v30, 0.0  ;;  %v5418_v30 = vld [vmem:[%s8319_s1 + $0x3f] ss:$0 sm:$0xff] }
0x220f   :  { %6077 = vmatmul.mubr.msk.f32.vlgmr.msra.gmra.mrb[46].mxu1 %vm2951_vm5, %v4990_v35 }
0x22e2   :  { %v5070_v56 = vpop.f32.mrb[46].mxu1 }
0x22e3   :  { %v5071_v59 = vadd.f32 %v5416_v55, %v5070_v56  ;;  %v6078_v52 = vpop.f32.mrb[47].mxu1 }
0x22e5   :  { %v5074_v53 = vmul.f32 0.5, %v5071_v59 }
0x22e7   :  { %6398 = vtanh.f32 %v5074_v53 }
0x22f1   :  { %v6399_v20 = vpop.eup %6398 }
0x22f2   :  { %v5076_v60 = vadd.f32 1.0, %v6399_v20 }
0x22f4   :  { %v5077_v16 = vmul.f32 0.5, %v5076_v60 }
0x22f6   :  { %v5079_v61 = vrot.slane %v5077_v16, 1  ;;  %v5082_v15 = vmul.f32 %v5077_v16, %v8217_v7 }
0x22f8   :  { %v5083_v62 = vmul.f32 %v5079_v61, %v8219_v63  ;;  %v5084_v0 = vsub.f32 0.0, %v5082_v15  ;;  %v5099_v21 = vrot.slane %v5082_v15, %v6996_v42 }
0x22fa   :  { %v5085_v58 = vsub.f32 0.0, %v5083_v62  ;;  %v5089_v57 = vrot.slane %v5084_v0, %v6996_v42  ;;  %v5103_v31 = vrot.slane %v5083_v62, %v6996_v42 }
0x22fc   :  { %v5093_v6 = vrot.slane %v5085_v58, %v6996_v42  ;;  %v5094_v4 = vmax.f32 %v5089_v57, %v8207_v32 }
0x22fe   :  { %v5095_v11 = vmax.f32 %v5093_v6, %v8211_v37  ;;  %v5104_v33 = vmin.f32 %v5099_v21, %v5094_v4  ;;  %v5419_v6 = vld [vmem:[%s8319_s1 + $0x40] ss:$0 sm:$0xff]  ;;  %v5421_v21 = vld [vmem:[%s8319_s1 + $0x41] ss:$0 sm:$0xff] }
0x2300   :  { %v5105_v45 = vmin.f32 %v5103_v31, %v5095_v11  ;;  %v5106_v7 = vsub.f32 %v8207_v32, %v5104_v33 }
0x2302   :  { %v5107_v63 = vsub.f32 %v8211_v37, %v5105_v45  ;;  %v5108_v46 = vadd.f32 %v5106_v7, %v8062_v13  ;;  %v5422_v7 = vld [vmem:[%s8319_s1 + $0x42] ss:$0 sm:$0xff] }
0x2304   :  { %v5109_v34 = vadd.f32 %v5107_v63, %v8065_v1  ;;  %v5110_v12 = vsel %vm4084_vm12, %v5108_v46, 0.0 }
0x2306   :  { %v5111_v10 = vsel %vm4084_vm12, %v5109_v34, 0.0 }
0x2307   :  { %v5112_v9 = vadd.f32 %v5111_v10, %v5110_v12 }
0x2309   :  { %v5113_v14 = vrot.slane %v5112_v9, 4 }
0x230b   :  { %v5114_v24 = vadd.f32 %v5113_v14, %v5112_v9 }
0x230d   :  { %v5115_v2 = vrot.slane %v5114_v24, 2 }
0x230f   :  { %v5116_v26 = vadd.f32 %v5115_v2, %v5114_v24 }
0x2311   :  { %v5117_v28 = vrot.slane %v5116_v26, 1 }
0x2313   :  { %v5118_v17 = vadd.f32 %v5117_v28, %v5116_v26 }
0x2315   :  { %v5119_v23 = vmul.f32 0.125, %v5118_v17 }
0x2317   :  { %v5120_v8 = vsub.f32 %v5108_v46, %v5119_v23  ;;  %v5121_v32 = vsub.f32 %v5109_v34, %v5119_v23 }
0x2319   :  { %v5122_v36 = vmul.f32 %v5120_v8, %v5120_v8  ;;  %v5123_v37 = vmul.f32 %v5121_v32, %v5121_v32 }
0x231b   :  { %v5124_v13 = vsel %vm4084_vm12, %v5122_v36, 0.0  ;;  %v5125_v1 = vsel %vm4084_vm12, %v5123_v37, 0.0 }
0x231c   :  { %v5126_v19 = vadd.f32 %v5125_v1, %v5124_v13 }
0x231e   :  { %v5127_v22 = vrot.slane %v5126_v19, 4 }
0x2320   :  { %v5128_v25 = vadd.f32 %v5127_v22, %v5126_v19 }
0x2322   :  { %v5129_v18 = vrot.slane %v5128_v25, 2 }
0x2324   :  { %v5130_v27 = vadd.f32 %v5129_v18, %v5128_v25 }
0x2326   :  { %v5131_v38 = vrot.slane %v5130_v27, 1 }
0x2328   :  { %v5132_v51 = vadd.f32 %v5131_v38, %v5130_v27 }
0x232a   :  { %v5133_v29 = vmul.f32 0.125, %v5132_v51 }
0x232c   :  { %v5134_v3 = vadd.f32 1e-05, %v5133_v29 }
0x232e   :  { %6400 = vrsqrt.f32 %v5134_v3 }
0x2338   :  { %v6401_v48 = vpop.eup %6400 }
0x2339   :  { %v5137_v47 = vmul.f32 %v6401_v48, %v5136_v5 }
0x233b   :  { %v5141_v49 = vrot.slane %v5137_v47, %v6996_v42 }
0x233d   :  { %v5142_v35 = vmul.f32 %v5141_v49, %v5120_v8  ;;  %v5143_v39 = vmul.f32 %v5141_v49, %v5121_v32 }
0x233f   :  { %v5149_v40 = vadd.f32 %v5418_v30, %v5142_v35  ;;  %v5150_v41 = vadd.f32 %v5418_v30, %v5143_v39 }
0x2341   :  { %v5151_v43 = vmax.f32 %v5149_v40, 0.0  ;;  %v5152_v44 = vmax.f32 %v5150_v41, 0.0 }
0x2343   :  { %v5153_v50 = vsel %vm4084_vm12, %v5151_v43, 0.0  ;;  %v5160_v54 = vsel %vm4084_vm12, %v5152_v44, 0.0 }
0x2344   :  { %v5154_v55 = vrot.slane %v5153_v50, 4  ;;  %v5161_v56 = vrot.slane %v5160_v54, 4 }
0x2346   :  { %v5155_v59 = vadd.f32 %v5154_v55, %v5153_v50  ;;  %v5162_v52 = vadd.f32 %v5161_v56, %v5160_v54 }
0x2348   :  { %v5156_v53 = vrot.slane %v5155_v59, 2  ;;  %v5163_v42 = vrot.slane %v5162_v52, 2 }
0x234a   :  { %v5157_v20 = vadd.f32 %v5156_v53, %v5155_v59  ;;  %v5164_v60 = vadd.f32 %v5163_v42, %v5162_v52 }
0x234c   :  { %v5158_v16 = vrot.slane %v5157_v20, 1  ;;  %v5165_v61 = vrot.slane %v5164_v60, 1 }
0x234e   :  { %v5159_v15 = vadd.f32 %v5158_v16, %v5157_v20  ;;  %v5166_v62 = vadd.f32 %v5165_v61, %v5164_v60 }
0x2350   :  { %v5167_v0 = vmul.f32 0.25, %v5159_v15  ;;  %v5168_v58 = vmul.f32 0.25, %v5166_v62 }
0x2352   :  { %v5181_v57 = vsel %vm1724_vm2, %v5168_v58, %v5167_v0 }
0x2353   :  { %6090 = vmatmul.mubr.msk.f32.vlgmr.msra.gmra.mrb[48].mxu0 %vm2951_vm5, %v5181_v57 }
0x2426   :  { %v5250_v4 = vpop.f32.mrb[48].mxu0 }
0x2427   :  { %v5251_v11 = vadd.f32 %v5419_v6, %v5250_v4  ;;  %v6091_v31 = vpop.f32.mrb[49].mxu0 }
0x2429   :  { %v5259_v33 = vmul.f32 %v5421_v21, %v5251_v11 }
0x242b   :  { %v5260_v45 = vsel %vm3158_vm11, %v5259_v33, 0.0 }
0x242c   :  { %5261 = vadd.xlane.f32.xlu0 %v5260_v45 }
0x24b9   :  { %v5262_v63 = vpop.xlane.xlu0 %5261 }
0x24ba   :  { %v5268_v46 = vadd.f32 %v5422_v7, %v5262_v63 }
0x24bc   :  { %5270 = vst.msk [vmem:[%s8320_s3] sm:$0x3] %vm5269_vm9, %v5268_v46 }

</bundles_post_ra>
